<compile_context>
chip_gen: v7x
topology: tpu7x:2x2x1
jax: 0.10.0
libtpu: 0.0.40
codegen_flags: <defaults>
</compile_context>

<pallas_src>
import functools
import math

import numpy as np
import jax
import jax.numpy as jnp
from jax import lax
from jax.experimental import pallas as pl
from jax.experimental.pallas import tpu as pltpu


# ---------------------------------------------------------------------------
# helpers
# ---------------------------------------------------------------------------
def _round_up(a, m):
    return ((a + m - 1) // m) * m


def _layout(dim):
    """(original->padded index map, padded dim) for a feature dimension."""
    if dim == 700:  # flattened attention output: 7 tokens x 100 -> 7 x 128
        j = np.arange(700)
        return (j // 100) * 128 + (j % 100), 7 * 128
    j = np.arange(dim)
    return j, max(128, _round_up(dim, 128))


def _qkv_headmajor_colmap():
    """Fused [q|k|v] output (600 cols) -> head-major padded layout (768 cols).

    col = head*96 + part*32 + d   with part: 0=q, 1=k, 2=v and d in 0..24 (of 32).
    """
    o = np.arange(600)
    part = o // 200
    j = o % 200
    return (j // 25) * 96 + part * 32 + (j % 25), 768


def _pad_w(w, rmap, r_p, cmap, c_p):
    wp = jnp.zeros((r_p, c_p), jnp.float32)
    return wp.at[np.asarray(rmap)[:, None], np.asarray(cmap)[None, :]].set(w)


def _pad_b(b, cmap, c_p):
    bp = jnp.zeros((1, c_p), jnp.float32)
    return bp.at[0, np.asarray(cmap)].set(b)


# ---------------------------------------------------------------------------
# Fused forward kernel (one grid step = one batch tile of bt examples)
# ---------------------------------------------------------------------------
def _fused_kernel(*refs, bt, n_mlp):
    (xh_ref, kr_ref,
     wceqkv_ref, bceqkv_ref, wkn_ref, bkn_ref, wo_ref, bo_ref) = refs[:8]
    mlp_refs = refs[8:8 + 2 * n_mlp]
    out_ref = refs[8 + 2 * n_mlp]
    qkv_ref, attn_ref = refs[8 + 2 * n_mlp + 1:]

    S, H, QKVH = 7, 8, 96            # tokens, heads, per-head q|k|v width
    R = S * bt                       # token-major rows: r = s*bt + b
    f32, bf16 = jnp.float32, jnp.bfloat16

    # --- fused (linear_CE o Wqkv) / Wqkv projections, stored head-major -----
    def store_headmajor(m, s):
        mb = m.astype(bf16)
        for h in range(H):
            qkv_ref[h, s * bt:(s + 1) * bt, :] = mb[:, h * QKVH:(h + 1) * QKVH]

    for s in range(3):               # CLS, e1, e2 :  x @ (Wce @ Wqkv) + b
        xs = xh_ref[:, 768 * s:768 * (s + 1)]
        m = jnp.dot(xs, wceqkv_ref[...], preferred_element_type=f32) + bceqkv_ref[...]
        store_headmajor(m, s)
    for t in range(4):               # 4 knowledge vectors :  k @ Wqkv + b
        ks = kr_ref[:, 256 * t:256 * (t + 1)]
        m = jnp.dot(ks, wkn_ref[...], preferred_element_type=f32) + bkn_ref[...]
        store_headmajor(m, 3 + t)

    # --- block-diagonal multi-head SDPA (rows of the same example attend) ---
    ri = lax.broadcasted_iota(jnp.int32, (R, 1), 0)
    ci = lax.broadcasted_iota(jnp.int32, (1, R), 1)
    same_example = (ri & (bt - 1)) == (ci & (bt - 1))    # bt is a power of two
    neg_big = jnp.float32(-1e30)

    attn_ref[...] = jnp.broadcast_to(bo_ref[...], (R, 128))     # init with bias

    def head_body(h, carry):
        qkv_h = qkv_ref[h]                           # (R, 96) bf16
        qh = qkv_h[:, 0:32]                          # softmax scale folded in
        kh = qkv_h[:, 32:64]
        vh = qkv_h[:, 64:96]
        s_hh = lax.dot_general(qh, kh, (((1,), (1,)), ((), ())),
                               preferred_element_type=f32)       # (R, R)
        # scores are small & bounded -> no per-row max pass; masked cols -> exp=0
        e = jnp.exp(jnp.where(same_example, s_hh, neg_big))
        p = e * pl.reciprocal(jnp.sum(e, axis=-1, keepdims=True), approx=True)
        ctx = jnp.dot(p.astype(bf16), vh, preferred_element_type=f32)   # (R, 32)
        attn_ref[...] += jnp.dot(ctx.astype(bf16), wo_ref[h],
                                 preferred_element_type=f32)            # (R, 128)
        return carry

    lax.fori_loop(0, H, head_body, 0)

    # --- TopMLP: the 7-token flatten is folded into layer 0's K-blocks -------
    w0, b0 = mlp_refs[0], mlp_refs[1]
    y = b0[...] + jnp.dot(attn_ref[0:bt, :].astype(bf16), w0[0:128, :],
                          preferred_element_type=f32)
    for s in range(1, S):
        y = y + jnp.dot(attn_ref[s * bt:(s + 1) * bt, :].astype(bf16),
                        w0[128 * s:128 * (s + 1), :],
                        preferred_element_type=f32)
    for li in range(1, n_mlp):       # residuals already folded into the weights
        w, b = mlp_refs[2 * li], mlp_refs[2 * li + 1]
        y = jnp.dot(y.astype(bf16), w[...], preferred_element_type=f32) + b[...]

    out_ref[...] = y


# ---------------------------------------------------------------------------
# Parameters (PyTorch-style init) + padding / fusion / remapping
# ---------------------------------------------------------------------------
def _linear_init(key, fan_in, fan_out):
    k1, k2 = jax.random.split(key)
    bound = 1.0 / math.sqrt(fan_in)
    w = jax.random.uniform(k1, (fan_in, fan_out), jnp.float32, -bound, bound)
    b = jax.random.uniform(k2, (fan_out,), jnp.float32, -bound, bound)
    return w, b


def init_params(key, hn_list):
    keys = jax.random.split(key, 6)
    params = {
        "ce": _linear_init(keys[0], 768, 200),   # linear_CE
        "wq": _linear_init(keys[1], 200, 200),   # SDPAttention projections
        "wk": _linear_init(keys[2], 200, 200),
        "wv": _linear_init(keys[3], 200, 200),
        "wo": _linear_init(keys[4], 200, 100),   # SDPAttention output proj
    }
    dims = [700] + list(hn_list) + [2]           # TopMLP([700] + hn_list + [2])
    mkeys = jax.random.split(keys[5], len(dims) - 1)
    params["mlp"] = [
        _linear_init(mkeys[i], din, dout)
        for i, (din, dout) in enumerate(zip(dims[:-1], dims[1:]))
    ]
    return params


def pad_params(params):
    """Pad/remap all weights once; fuse CE+QKV; fold scale & residual identities."""
    rep_map, rep_p = _layout(200)            # 200 -> 256 (contiguous)
    qkv_map, qkv_p = _qkv_headmajor_colmap() # fused qkv 600 -> 768, head-major
    in768_map, in768_p = _layout(768)

    scale = 1.0 / math.sqrt(25.0)
    wq, bq = params["wq"]
    wk, bk = params["wk"]
    wv, bv = params["wv"]
    wqkv = jnp.concatenate([wq * scale, wk, wv], axis=1)          # (200, 600)
    bqkv = jnp.concatenate([bq * scale, bk, bv], axis=0)          # (600,)

    # knowledge-token Q/K/V projection
    wkn_p = _pad_w(wqkv, rep_map, rep_p, qkv_map, qkv_p)          # (256, 768)
    bkn_p = _pad_b(bqkv, qkv_map, qkv_p)                          # (1, 768)

    # CLS/e1/e2 projection with linear_CE folded in: x@(Wce@Wqkv) + (bce@Wqkv+bqkv)
    wce, bce = params["ce"]
    wceqkv = wce @ wqkv                                           # (768, 600)
    bceqkv = bce @ wqkv + bqkv                                    # (600,)
    wceqkv_p = _pad_w(wceqkv, in768_map, in768_p, qkv_map, qkv_p) # (768, 768)
    bceqkv_p = _pad_b(bceqkv, qkv_map, qkv_p)

    # attention output projection, head-major (8, 32, 128)
    wo, bo = params["wo"]
    wo_hm = jnp.zeros((8, 32, 128), jnp.float32)
    wo_hm = wo_hm.at[:, :25, :100].set(wo.reshape(8, 25, 100))
    bo_p = _pad_b(bo, np.arange(100), 128)

    bf = lambda a: a.astype(jnp.bfloat16)
    flat = [bf(wceqkv_p), bceqkv_p, bf(wkn_p), bkn_p, bf(wo_hm), bo_p]

    # TopMLP: residual layers get the identity folded into the weight
    for w, b in params["mlp"]:
        din, dout = w.shape
        if din == dout:
            w = w + jnp.eye(din, dtype=jnp.float32)
        rmap, r_p = _layout(din)
        cmap, c_p = _layout(dout)
        flat += [bf(_pad_w(w, rmap, r_p, cmap, c_p)), _pad_b(b, cmap, c_p)]

    out_dim_p = _layout(params["mlp"][-1][0].shape[1])[1]
    return {"flat": flat, "n_mlp": len(params["mlp"]), "out_dim": out_dim_p}


# ---------------------------------------------------------------------------
# Forward wrapper: one pallas_call over batch tiles
# ---------------------------------------------------------------------------
def top_attn_forward(x, pparams):
    B = x.shape[0]
    assert x.shape[-1] == 3104

    # Fixed power-of-two batch tile (the in-kernel mask & bf16 sublane tiling
    # rely on it).  bt=16 keeps the attention waste small and gives the
    # "parallel" grid >=2 steps for B>=32 (v7x megacore).
    bt = 16
    b_pad = _round_up(B, bt)

    xb = x.astype(jnp.bfloat16)                 # bf16 inputs -> half the DMA
    if b_pad != B:
        xb = jnp.pad(xb, ((0, b_pad - B), (0, 0)))
    xh = xb[:, :2304]                                            # (Bp, 2304)
    kr = jnp.pad(xb[:, 2304:].reshape(b_pad, 4, 200),
                 ((0, 0), (0, 0), (0, 56))).reshape(b_pad, 1024)  # bf16 pad

    flat = pparams["flat"]
    n_mlp = pparams["n_mlp"]
    out_p = pparams["out_dim"]
    kernel = functools.partial(_fused_kernel, bt=bt, n_mlp=n_mlp)

    in_specs = [pl.BlockSpec((bt, 2304), lambda i: (i, 0)),
                pl.BlockSpec((bt, 1024), lambda i: (i, 0))]
    for a in flat:                              # VMEM-resident weights
        if a.ndim == 2:
            in_specs.append(pl.BlockSpec(a.shape, lambda i: (0, 0)))
        else:
            in_specs.append(pl.BlockSpec(a.shape, lambda i: (0, 0, 0)))

    out = pl.pallas_call(
        kernel,
        out_shape=jax.ShapeDtypeStruct((b_pad, out_p), jnp.float32),
        grid=(b_pad // bt,),
        in_specs=in_specs,
        out_specs=pl.BlockSpec((bt, out_p), lambda i: (i, 0)),
        scratch_shapes=[pltpu.VMEM((8, 7 * bt, 96), jnp.bfloat16),  # head-major Q|K|V
                        pltpu.VMEM((7 * bt, 128), jnp.float32)],    # attn-out accum
        compiler_params=pltpu.CompilerParams(
            dimension_semantics=("parallel",),
            vmem_limit_bytes=32 * 1024 * 1024),
    )(xh, kr, *flat)

    return out[:B, :2]


# ---------------------------------------------------------------------------
# Pure-JAX reference (original, un-padded weights)
# ---------------------------------------------------------------------------
def top_attn_reference(x, params):
    B = x.shape[0]
    x = x.astype(jnp.float32)
    h_cls, h_e1, h_e2 = x[:, :768], x[:, 768:1536], x[:, 1536:2304]
    dk_e1, dk_e2 = x[:, 2304:2504], x[:, 2504:2704]
    rk_e1, rk_e2 = x[:, 2704:2904], x[:, 2904:3104]

    wce, bce = params["ce"]
    lin = lambda t, w, b: t @ w + b
    rep = jnp.stack(
        [lin(h_cls, wce, bce), lin(h_e1, wce, bce), lin(h_e2, wce, bce),
         dk_e1, dk_e2, rk_e1, rk_e2], axis=1)                    # (B, 7, 200)

    S, D, H = 7, 200, 8
    Dh = D // H
    q = lin(rep, *params["wq"]).reshape(B, S, H, Dh).transpose(0, 2, 1, 3)
    k = lin(rep, *params["wk"]).reshape(B, S, H, Dh).transpose(0, 2, 1, 3)
    v = lin(rep, *params["wv"]).reshape(B, S, H, Dh).transpose(0, 2, 1, 3)
    scores = jnp.einsum("bhqd,bhkd->bhqk", q, k) / math.sqrt(Dh)
    p = jax.nn.softmax(scores, axis=-1)
    ctx = jnp.einsum("bhqk,bhkd->bhqd", p, v).transpose(0, 2, 1, 3).reshape(B, S, D)
    attn_out = lin(ctx, *params["wo"])                           # (B, 7, 100)

    h = attn_out.reshape(B, -1)                                  # (B, 700)
    for w, b in params["mlp"]:
        res = h if w.shape[0] == w.shape[1] else 0.0
        h = h @ w + b + res
    return h


# ---------------------------------------------------------------------------
if __name__ == "__main__":
    key = jax.random.PRNGKey(0)
    k_param, k_x = jax.random.split(key)

    # hn_list=[700] exercises both TopMLP branches (residual + plain).
    hn_list = [700]
    params = init_params(k_param, hn_list)
    pparams = pad_params(params)

    B = 2
    x = jax.random.normal(k_x, (B, 3104), dtype=jnp.float32)

    out = jax.block_until_ready(top_attn_forward(x, pparams))
    assert out.shape == (B, 2), out.shape

    ref = jax.block_until_ready(top_attn_reference(x, params))
    assert jnp.allclose(out, ref, rtol=2e-2, atol=2e-2), (out, ref)

    print("KERNEL_OK")
</pallas_src>

<mosaic_0001>
module attributes {stable_mosaic.version = 11 : i64} {
  func.func @_fused_kernel(%arg0: i32, %arg1: memref<16x2304xbf16, #tpu.memory_space<vmem>>, %arg2: memref<16x1024xbf16, #tpu.memory_space<vmem>>, %arg3: memref<768x768xbf16, #tpu.memory_space<vmem>>, %arg4: memref<1x768xf32, #tpu.memory_space<vmem>>, %arg5: memref<256x768xbf16, #tpu.memory_space<vmem>>, %arg6: memref<1x768xf32, #tpu.memory_space<vmem>>, %arg7: memref<8x32x128xbf16, #tpu.memory_space<vmem>>, %arg8: memref<1x128xf32, #tpu.memory_space<vmem>>, %arg9: memref<896x896xbf16, #tpu.memory_space<vmem>>, %arg10: memref<1x896xf32, #tpu.memory_space<vmem>>, %arg11: memref<896x128xbf16, #tpu.memory_space<vmem>>, %arg12: memref<1x128xf32, #tpu.memory_space<vmem>>, %arg13: memref<16x128xf32, #tpu.memory_space<vmem>>, %arg14: memref<8x112x96xbf16, #tpu.memory_space<vmem>>, %arg15: memref<112x128xf32, #tpu.memory_space<vmem>>) attributes {dimension_semantics = [#tpu.dimension_semantics<parallel>], iteration_bounds = array<i64: 1>, scalar_prefetch = 0 : i64, scratch_operands = 2 : i64, tpu.core_type = #tpu.core_type<tc>, window_params = [{transform_indices = @transform_0, window_bounds = array<i64: 16, 2304>}, {transform_indices = @transform_1, window_bounds = array<i64: 16, 1024>}, {pipeline_mode = #tpu.pipeline_mode<synchronous>, transform_indices = @transform_2, window_bounds = array<i64: 768, 768>}, {pipeline_mode = #tpu.pipeline_mode<synchronous>, transform_indices = @transform_3, window_bounds = array<i64: 1, 768>}, {pipeline_mode = #tpu.pipeline_mode<synchronous>, transform_indices = @transform_4, window_bounds = array<i64: 256, 768>}, {pipeline_mode = #tpu.pipeline_mode<synchronous>, transform_indices = @transform_5, window_bounds = array<i64: 1, 768>}, {pipeline_mode = #tpu.pipeline_mode<synchronous>, transform_indices = @transform_6, window_bounds = array<i64: 8, 32, 128>}, {pipeline_mode = #tpu.pipeline_mode<synchronous>, transform_indices = @transform_7, window_bounds = array<i64: 1, 128>}, {pipeline_mode = #tpu.pipeline_mode<synchronous>, transform_indices = @transform_8, window_bounds = array<i64: 896, 896>}, {pipeline_mode = #tpu.pipeline_mode<synchronous>, transform_indices = @transform_9, window_bounds = array<i64: 1, 896>}, {pipeline_mode = #tpu.pipeline_mode<synchronous>, transform_indices = @transform_10, window_bounds = array<i64: 896, 128>}, {pipeline_mode = #tpu.pipeline_mode<synchronous>, transform_indices = @transform_11, window_bounds = array<i64: 1, 128>}, {transform_indices = @transform_12, window_bounds = array<i64: 16, 128>}]} {
    %c0 = arith.constant 0 : index
    %c0_0 = arith.constant 0 : index
    %0 = vector.load %arg1[%c0, %c0_0] : memref<16x2304xbf16, #tpu.memory_space<vmem>>, vector<16x768xbf16>
    %c0_1 = arith.constant 0 : index
    %c0_2 = arith.constant 0 : index
    %1 = vector.load %arg3[%c0_1, %c0_2] : memref<768x768xbf16, #tpu.memory_space<vmem>>, vector<768x768xbf16>
    %cst = arith.constant dense<0.000000e+00> : vector<16x768xf32>
    %2 = tpu.matmul %0, %1, %cst {dimension_numbers = #tpu.dot_dimension_numbers<[1], [0], [0], [1], [0, 0, 1, 1], [], []>} : vector<16x768xbf16>, vector<768x768xbf16>, vector<16x768xf32> -> vector<16x768xf32>
    %c0_3 = arith.constant 0 : index
    %c0_4 = arith.constant 0 : index
    %3 = vector.load %arg4[%c0_3, %c0_4] : memref<1x768xf32, #tpu.memory_space<vmem>>, vector<1x768xf32>
    %4 = vector.broadcast %3 : vector<1x768xf32> to vector<16x768xf32>
    %5 = arith.addf %2, %4 : vector<16x768xf32>
    %6 = arith.truncf %5 : vector<16x768xf32> to vector<16x768xbf16>
    %7 = vector.extract_strided_slice %6 {offsets = [0, 0], sizes = [16, 96], strides = [1, 1]} : vector<16x768xbf16> to vector<16x96xbf16>
    %c0_5 = arith.constant 0 : index
    %c0_6 = arith.constant 0 : index
    %c0_7 = arith.constant 0 : index
    %8 = vector.load %arg14[%c0_5, %c0_6, %c0_7] : memref<8x112x96xbf16, #tpu.memory_space<vmem>>, vector<1x16x96xbf16>
    %9 = vector.shape_cast %8 : vector<1x16x96xbf16> to vector<16x96xbf16>
    %10 = vector.shape_cast %7 : vector<16x96xbf16> to vector<1x16x96xbf16>
    tpu.vector_store %arg14[%c0_5, %c0_6, %c0_7], %10 {strides = array<i32>} : memref<8x112x96xbf16, #tpu.memory_space<vmem>>, vector<1x16x96xbf16>,
    %11 = vector.extract_strided_slice %6 {offsets = [0, 96], sizes = [16, 96], strides = [1, 1]} : vector<16x768xbf16> to vector<16x96xbf16>
    %c1 = arith.constant 1 : index
    %c0_8 = arith.constant 0 : index
    %c0_9 = arith.constant 0 : index
    %12 = vector.load %arg14[%c1, %c0_8, %c0_9] : memref<8x112x96xbf16, #tpu.memory_space<vmem>>, vector<1x16x96xbf16>
    %13 = vector.shape_cast %12 : vector<1x16x96xbf16> to vector<16x96xbf16>
    %14 = vector.shape_cast %11 : vector<16x96xbf16> to vector<1x16x96xbf16>
    tpu.vector_store %arg14[%c1, %c0_8, %c0_9], %14 {strides = array<i32>} : memref<8x112x96xbf16, #tpu.memory_space<vmem>>, vector<1x16x96xbf16>,
    %15 = vector.extract_strided_slice %6 {offsets = [0, 192], sizes = [16, 96], strides = [1, 1]} : vector<16x768xbf16> to vector<16x96xbf16>
    %c2 = arith.constant 2 : index
    %c0_10 = arith.constant 0 : index
    %c0_11 = arith.constant 0 : index
    %16 = vector.load %arg14[%c2, %c0_10, %c0_11] : memref<8x112x96xbf16, #tpu.memory_space<vmem>>, vector<1x16x96xbf16>
    %17 = vector.shape_cast %16 : vector<1x16x96xbf16> to vector<16x96xbf16>
    %18 = vector.shape_cast %15 : vector<16x96xbf16> to vector<1x16x96xbf16>
    tpu.vector_store %arg14[%c2, %c0_10, %c0_11], %18 {strides = array<i32>} : memref<8x112x96xbf16, #tpu.memory_space<vmem>>, vector<1x16x96xbf16>,
    %19 = vector.extract_strided_slice %6 {offsets = [0, 288], sizes = [16, 96], strides = [1, 1]} : vector<16x768xbf16> to vector<16x96xbf16>
    %c3 = arith.constant 3 : index
    %c0_12 = arith.constant 0 : index
    %c0_13 = arith.constant 0 : index
    %20 = vector.load %arg14[%c3, %c0_12, %c0_13] : memref<8x112x96xbf16, #tpu.memory_space<vmem>>, vector<1x16x96xbf16>
    %21 = vector.shape_cast %20 : vector<1x16x96xbf16> to vector<16x96xbf16>
    %22 = vector.shape_cast %19 : vector<16x96xbf16> to vector<1x16x96xbf16>
    tpu.vector_store %arg14[%c3, %c0_12, %c0_13], %22 {strides = array<i32>} : memref<8x112x96xbf16, #tpu.memory_space<vmem>>, vector<1x16x96xbf16>,
    %23 = vector.extract_strided_slice %6 {offsets = [0, 384], sizes = [16, 96], strides = [1, 1]} : vector<16x768xbf16> to vector<16x96xbf16>
    %c4 = arith.constant 4 : index
    %c0_14 = arith.constant 0 : index
    %c0_15 = arith.constant 0 : index
    %24 = vector.load %arg14[%c4, %c0_14, %c0_15] : memref<8x112x96xbf16, #tpu.memory_space<vmem>>, vector<1x16x96xbf16>
    %25 = vector.shape_cast %24 : vector<1x16x96xbf16> to vector<16x96xbf16>
    %26 = vector.shape_cast %23 : vector<16x96xbf16> to vector<1x16x96xbf16>
    tpu.vector_store %arg14[%c4, %c0_14, %c0_15], %26 {strides = array<i32>} : memref<8x112x96xbf16, #tpu.memory_space<vmem>>, vector<1x16x96xbf16>,
    %27 = vector.extract_strided_slice %6 {offsets = [0, 480], sizes = [16, 96], strides = [1, 1]} : vector<16x768xbf16> to vector<16x96xbf16>
    %c5 = arith.constant 5 : index
    %c0_16 = arith.constant 0 : index
    %c0_17 = arith.constant 0 : index
    %28 = vector.load %arg14[%c5, %c0_16, %c0_17] : memref<8x112x96xbf16, #tpu.memory_space<vmem>>, vector<1x16x96xbf16>
    %29 = vector.shape_cast %28 : vector<1x16x96xbf16> to vector<16x96xbf16>
    %30 = vector.shape_cast %27 : vector<16x96xbf16> to vector<1x16x96xbf16>
    tpu.vector_store %arg14[%c5, %c0_16, %c0_17], %30 {strides = array<i32>} : memref<8x112x96xbf16, #tpu.memory_space<vmem>>, vector<1x16x96xbf16>,
    %31 = vector.extract_strided_slice %6 {offsets = [0, 576], sizes = [16, 96], strides = [1, 1]} : vector<16x768xbf16> to vector<16x96xbf16>
    %c6 = arith.constant 6 : index
    %c0_18 = arith.constant 0 : index
    %c0_19 = arith.constant 0 : index
    %32 = vector.load %arg14[%c6, %c0_18, %c0_19] : memref<8x112x96xbf16, #tpu.memory_space<vmem>>, vector<1x16x96xbf16>
    %33 = vector.shape_cast %32 : vector<1x16x96xbf16> to vector<16x96xbf16>
    %34 = vector.shape_cast %31 : vector<16x96xbf16> to vector<1x16x96xbf16>
    tpu.vector_store %arg14[%c6, %c0_18, %c0_19], %34 {strides = array<i32>} : memref<8x112x96xbf16, #tpu.memory_space<vmem>>, vector<1x16x96xbf16>,
    %35 = vector.extract_strided_slice %6 {offsets = [0, 672], sizes = [16, 96], strides = [1, 1]} : vector<16x768xbf16> to vector<16x96xbf16>
    %c7 = arith.constant 7 : index
    %c0_20 = arith.constant 0 : index
    %c0_21 = arith.constant 0 : index
    %36 = vector.load %arg14[%c7, %c0_20, %c0_21] : memref<8x112x96xbf16, #tpu.memory_space<vmem>>, vector<1x16x96xbf16>
    %37 = vector.shape_cast %36 : vector<1x16x96xbf16> to vector<16x96xbf16>
    %38 = vector.shape_cast %35 : vector<16x96xbf16> to vector<1x16x96xbf16>
    tpu.vector_store %arg14[%c7, %c0_20, %c0_21], %38 {strides = array<i32>} : memref<8x112x96xbf16, #tpu.memory_space<vmem>>, vector<1x16x96xbf16>,
    %c0_22 = arith.constant 0 : index
    %c768 = arith.constant 768 : index
    %39 = vector.load %arg1[%c0_22, %c768] : memref<16x2304xbf16, #tpu.memory_space<vmem>>, vector<16x768xbf16>
    %c0_23 = arith.constant 0 : index
    %c0_24 = arith.constant 0 : index
    %40 = vector.load %arg3[%c0_23, %c0_24] : memref<768x768xbf16, #tpu.memory_space<vmem>>, vector<768x768xbf16>
    %cst_25 = arith.constant dense<0.000000e+00> : vector<16x768xf32>
    %41 = tpu.matmul %39, %40, %cst_25 {dimension_numbers = #tpu.dot_dimension_numbers<[1], [0], [0], [1], [0, 0, 1, 1], [], []>} : vector<16x768xbf16>, vector<768x768xbf16>, vector<16x768xf32> -> vector<16x768xf32>
    %c0_26 = arith.constant 0 : index
    %c0_27 = arith.constant 0 : index
    %42 = vector.load %arg4[%c0_26, %c0_27] : memref<1x768xf32, #tpu.memory_space<vmem>>, vector<1x768xf32>
    %43 = vector.broadcast %42 : vector<1x768xf32> to vector<16x768xf32>
    %44 = arith.addf %41, %43 : vector<16x768xf32>
    %45 = arith.truncf %44 : vector<16x768xf32> to vector<16x768xbf16>
    %46 = vector.extract_strided_slice %45 {offsets = [0, 0], sizes = [16, 96], strides = [1, 1]} : vector<16x768xbf16> to vector<16x96xbf16>
    %c0_28 = arith.constant 0 : index
    %c16 = arith.constant 16 : index
    %c0_29 = arith.constant 0 : index
    %47 = vector.load %arg14[%c0_28, %c16, %c0_29] : memref<8x112x96xbf16, #tpu.memory_space<vmem>>, vector<1x16x96xbf16>
    %48 = vector.shape_cast %47 : vector<1x16x96xbf16> to vector<16x96xbf16>
    %49 = vector.shape_cast %46 : vector<16x96xbf16> to vector<1x16x96xbf16>
    tpu.vector_store %arg14[%c0_28, %c16, %c0_29], %49 {strides = array<i32>} : memref<8x112x96xbf16, #tpu.memory_space<vmem>>, vector<1x16x96xbf16>,
    %50 = vector.extract_strided_slice %45 {offsets = [0, 96], sizes = [16, 96], strides = [1, 1]} : vector<16x768xbf16> to vector<16x96xbf16>
    %c1_30 = arith.constant 1 : index
    %c16_31 = arith.constant 16 : index
    %c0_32 = arith.constant 0 : index
    %51 = vector.load %arg14[%c1_30, %c16_31, %c0_32] : memref<8x112x96xbf16, #tpu.memory_space<vmem>>, vector<1x16x96xbf16>
    %52 = vector.shape_cast %51 : vector<1x16x96xbf16> to vector<16x96xbf16>
    %53 = vector.shape_cast %50 : vector<16x96xbf16> to vector<1x16x96xbf16>
    tpu.vector_store %arg14[%c1_30, %c16_31, %c0_32], %53 {strides = array<i32>} : memref<8x112x96xbf16, #tpu.memory_space<vmem>>, vector<1x16x96xbf16>,
    %54 = vector.extract_strided_slice %45 {offsets = [0, 192], sizes = [16, 96], strides = [1, 1]} : vector<16x768xbf16> to vector<16x96xbf16>
    %c2_33 = arith.constant 2 : index
    %c16_34 = arith.constant 16 : index
    %c0_35 = arith.constant 0 : index
    %55 = vector.load %arg14[%c2_33, %c16_34, %c0_35] : memref<8x112x96xbf16, #tpu.memory_space<vmem>>, vector<1x16x96xbf16>
    %56 = vector.shape_cast %55 : vector<1x16x96xbf16> to vector<16x96xbf16>
    %57 = vector.shape_cast %54 : vector<16x96xbf16> to vector<1x16x96xbf16>
    tpu.vector_store %arg14[%c2_33, %c16_34, %c0_35], %57 {strides = array<i32>} : memref<8x112x96xbf16, #tpu.memory_space<vmem>>, vector<1x16x96xbf16>,
    %58 = vector.extract_strided_slice %45 {offsets = [0, 288], sizes = [16, 96], strides = [1, 1]} : vector<16x768xbf16> to vector<16x96xbf16>
    %c3_36 = arith.constant 3 : index
    %c16_37 = arith.constant 16 : index
    %c0_38 = arith.constant 0 : index
    %59 = vector.load %arg14[%c3_36, %c16_37, %c0_38] : memref<8x112x96xbf16, #tpu.memory_space<vmem>>, vector<1x16x96xbf16>
    %60 = vector.shape_cast %59 : vector<1x16x96xbf16> to vector<16x96xbf16>
    %61 = vector.shape_cast %58 : vector<16x96xbf16> to vector<1x16x96xbf16>
    tpu.vector_store %arg14[%c3_36, %c16_37, %c0_38], %61 {strides = array<i32>} : memref<8x112x96xbf16, #tpu.memory_space<vmem>>, vector<1x16x96xbf16>,
    %62 = vector.extract_strided_slice %45 {offsets = [0, 384], sizes = [16, 96], strides = [1, 1]} : vector<16x768xbf16> to vector<16x96xbf16>
    %c4_39 = arith.constant 4 : index
    %c16_40 = arith.constant 16 : index
    %c0_41 = arith.constant 0 : index
    %63 = vector.load %arg14[%c4_39, %c16_40, %c0_41] : memref<8x112x96xbf16, #tpu.memory_space<vmem>>, vector<1x16x96xbf16>
    %64 = vector.shape_cast %63 : vector<1x16x96xbf16> to vector<16x96xbf16>
    %65 = vector.shape_cast %62 : vector<16x96xbf16> to vector<1x16x96xbf16>
    tpu.vector_store %arg14[%c4_39, %c16_40, %c0_41], %65 {strides = array<i32>} : memref<8x112x96xbf16, #tpu.memory_space<vmem>>, vector<1x16x96xbf16>,
    %66 = vector.extract_strided_slice %45 {offsets = [0, 480], sizes = [16, 96], strides = [1, 1]} : vector<16x768xbf16> to vector<16x96xbf16>
    %c5_42 = arith.constant 5 : index
    %c16_43 = arith.constant 16 : index
    %c0_44 = arith.constant 0 : index
    %67 = vector.load %arg14[%c5_42, %c16_43, %c0_44] : memref<8x112x96xbf16, #tpu.memory_space<vmem>>, vector<1x16x96xbf16>
    %68 = vector.shape_cast %67 : vector<1x16x96xbf16> to vector<16x96xbf16>
    %69 = vector.shape_cast %66 : vector<16x96xbf16> to vector<1x16x96xbf16>
    tpu.vector_store %arg14[%c5_42, %c16_43, %c0_44], %69 {strides = array<i32>} : memref<8x112x96xbf16, #tpu.memory_space<vmem>>, vector<1x16x96xbf16>,
    %70 = vector.extract_strided_slice %45 {offsets = [0, 576], sizes = [16, 96], strides = [1, 1]} : vector<16x768xbf16> to vector<16x96xbf16>
    %c6_45 = arith.constant 6 : index
    %c16_46 = arith.constant 16 : index
    %c0_47 = arith.constant 0 : index
    %71 = vector.load %arg14[%c6_45, %c16_46, %c0_47] : memref<8x112x96xbf16, #tpu.memory_space<vmem>>, vector<1x16x96xbf16>
    %72 = vector.shape_cast %71 : vector<1x16x96xbf16> to vector<16x96xbf16>
    %73 = vector.shape_cast %70 : vector<16x96xbf16> to vector<1x16x96xbf16>
    tpu.vector_store %arg14[%c6_45, %c16_46, %c0_47], %73 {strides = array<i32>} : memref<8x112x96xbf16, #tpu.memory_space<vmem>>, vector<1x16x96xbf16>,
    %74 = vector.extract_strided_slice %45 {offsets = [0, 672], sizes = [16, 96], strides = [1, 1]} : vector<16x768xbf16> to vector<16x96xbf16>
    %c7_48 = arith.constant 7 : index
    %c16_49 = arith.constant 16 : index
    %c0_50 = arith.constant 0 : index
    %75 = vector.load %arg14[%c7_48, %c16_49, %c0_50] : memref<8x112x96xbf16, #tpu.memory_space<vmem>>, vector<1x16x96xbf16>
    %76 = vector.shape_cast %75 : vector<1x16x96xbf16> to vector<16x96xbf16>
    %77 = vector.shape_cast %74 : vector<16x96xbf16> to vector<1x16x96xbf16>
    tpu.vector_store %arg14[%c7_48, %c16_49, %c0_50], %77 {strides = array<i32>} : memref<8x112x96xbf16, #tpu.memory_space<vmem>>, vector<1x16x96xbf16>,
    %c0_51 = arith.constant 0 : index
    %c1536 = arith.constant 1536 : index
    %78 = vector.load %arg1[%c0_51, %c1536] : memref<16x2304xbf16, #tpu.memory_space<vmem>>, vector<16x768xbf16>
    %c0_52 = arith.constant 0 : index
    %c0_53 = arith.constant 0 : index
    %79 = vector.load %arg3[%c0_52, %c0_53] : memref<768x768xbf16, #tpu.memory_space<vmem>>, vector<768x768xbf16>
    %cst_54 = arith.constant dense<0.000000e+00> : vector<16x768xf32>
    %80 = tpu.matmul %78, %79, %cst_54 {dimension_numbers = #tpu.dot_dimension_numbers<[1], [0], [0], [1], [0, 0, 1, 1], [], []>} : vector<16x768xbf16>, vector<768x768xbf16>, vector<16x768xf32> -> vector<16x768xf32>
    %c0_55 = arith.constant 0 : index
    %c0_56 = arith.constant 0 : index
    %81 = vector.load %arg4[%c0_55, %c0_56] : memref<1x768xf32, #tpu.memory_space<vmem>>, vector<1x768xf32>
    %82 = vector.broadcast %81 : vector<1x768xf32> to vector<16x768xf32>
    %83 = arith.addf %80, %82 : vector<16x768xf32>
    %84 = arith.truncf %83 : vector<16x768xf32> to vector<16x768xbf16>
    %85 = vector.extract_strided_slice %84 {offsets = [0, 0], sizes = [16, 96], strides = [1, 1]} : vector<16x768xbf16> to vector<16x96xbf16>
    %c0_57 = arith.constant 0 : index
    %c32 = arith.constant 32 : index
    %c0_58 = arith.constant 0 : index
    %86 = vector.load %arg14[%c0_57, %c32, %c0_58] : memref<8x112x96xbf16, #tpu.memory_space<vmem>>, vector<1x16x96xbf16>
    %87 = vector.shape_cast %86 : vector<1x16x96xbf16> to vector<16x96xbf16>
    %88 = vector.shape_cast %85 : vector<16x96xbf16> to vector<1x16x96xbf16>
    tpu.vector_store %arg14[%c0_57, %c32, %c0_58], %88 {strides = array<i32>} : memref<8x112x96xbf16, #tpu.memory_space<vmem>>, vector<1x16x96xbf16>,
    %89 = vector.extract_strided_slice %84 {offsets = [0, 96], sizes = [16, 96], strides = [1, 1]} : vector<16x768xbf16> to vector<16x96xbf16>
    %c1_59 = arith.constant 1 : index
    %c32_60 = arith.constant 32 : index
    %c0_61 = arith.constant 0 : index
    %90 = vector.load %arg14[%c1_59, %c32_60, %c0_61] : memref<8x112x96xbf16, #tpu.memory_space<vmem>>, vector<1x16x96xbf16>
    %91 = vector.shape_cast %90 : vector<1x16x96xbf16> to vector<16x96xbf16>
    %92 = vector.shape_cast %89 : vector<16x96xbf16> to vector<1x16x96xbf16>
    tpu.vector_store %arg14[%c1_59, %c32_60, %c0_61], %92 {strides = array<i32>} : memref<8x112x96xbf16, #tpu.memory_space<vmem>>, vector<1x16x96xbf16>,
    %93 = vector.extract_strided_slice %84 {offsets = [0, 192], sizes = [16, 96], strides = [1, 1]} : vector<16x768xbf16> to vector<16x96xbf16>
    %c2_62 = arith.constant 2 : index
    %c32_63 = arith.constant 32 : index
    %c0_64 = arith.constant 0 : index
    %94 = vector.load %arg14[%c2_62, %c32_63, %c0_64] : memref<8x112x96xbf16, #tpu.memory_space<vmem>>, vector<1x16x96xbf16>
    %95 = vector.shape_cast %94 : vector<1x16x96xbf16> to vector<16x96xbf16>
    %96 = vector.shape_cast %93 : vector<16x96xbf16> to vector<1x16x96xbf16>
    tpu.vector_store %arg14[%c2_62, %c32_63, %c0_64], %96 {strides = array<i32>} : memref<8x112x96xbf16, #tpu.memory_space<vmem>>, vector<1x16x96xbf16>,
    %97 = vector.extract_strided_slice %84 {offsets = [0, 288], sizes = [16, 96], strides = [1, 1]} : vector<16x768xbf16> to vector<16x96xbf16>
    %c3_65 = arith.constant 3 : index
    %c32_66 = arith.constant 32 : index
    %c0_67 = arith.constant 0 : index
    %98 = vector.load %arg14[%c3_65, %c32_66, %c0_67] : memref<8x112x96xbf16, #tpu.memory_space<vmem>>, vector<1x16x96xbf16>
    %99 = vector.shape_cast %98 : vector<1x16x96xbf16> to vector<16x96xbf16>
    %100 = vector.shape_cast %97 : vector<16x96xbf16> to vector<1x16x96xbf16>
    tpu.vector_store %arg14[%c3_65, %c32_66, %c0_67], %100 {strides = array<i32>} : memref<8x112x96xbf16, #tpu.memory_space<vmem>>, vector<1x16x96xbf16>,
    %101 = vector.extract_strided_slice %84 {offsets = [0, 384], sizes = [16, 96], strides = [1, 1]} : vector<16x768xbf16> to vector<16x96xbf16>
    %c4_68 = arith.constant 4 : index
    %c32_69 = arith.constant 32 : index
    %c0_70 = arith.constant 0 : index
    %102 = vector.load %arg14[%c4_68, %c32_69, %c0_70] : memref<8x112x96xbf16, #tpu.memory_space<vmem>>, vector<1x16x96xbf16>
    %103 = vector.shape_cast %102 : vector<1x16x96xbf16> to vector<16x96xbf16>
    %104 = vector.shape_cast %101 : vector<16x96xbf16> to vector<1x16x96xbf16>
    tpu.vector_store %arg14[%c4_68, %c32_69, %c0_70], %104 {strides = array<i32>} : memref<8x112x96xbf16, #tpu.memory_space<vmem>>, vector<1x16x96xbf16>,
    %105 = vector.extract_strided_slice %84 {offsets = [0, 480], sizes = [16, 96], strides = [1, 1]} : vector<16x768xbf16> to vector<16x96xbf16>
    %c5_71 = arith.constant 5 : index
    %c32_72 = arith.constant 32 : index
    %c0_73 = arith.constant 0 : index
    %106 = vector.load %arg14[%c5_71, %c32_72, %c0_73] : memref<8x112x96xbf16, #tpu.memory_space<vmem>>, vector<1x16x96xbf16>
    %107 = vector.shape_cast %106 : vector<1x16x96xbf16> to vector<16x96xbf16>
    %108 = vector.shape_cast %105 : vector<16x96xbf16> to vector<1x16x96xbf16>
    tpu.vector_store %arg14[%c5_71, %c32_72, %c0_73], %108 {strides = array<i32>} : memref<8x112x96xbf16, #tpu.memory_space<vmem>>, vector<1x16x96xbf16>,
    %109 = vector.extract_strided_slice %84 {offsets = [0, 576], sizes = [16, 96], strides = [1, 1]} : vector<16x768xbf16> to vector<16x96xbf16>
    %c6_74 = arith.constant 6 : index
    %c32_75 = arith.constant 32 : index
    %c0_76 = arith.constant 0 : index
    %110 = vector.load %arg14[%c6_74, %c32_75, %c0_76] : memref<8x112x96xbf16, #tpu.memory_space<vmem>>, vector<1x16x96xbf16>
    %111 = vector.shape_cast %110 : vector<1x16x96xbf16> to vector<16x96xbf16>
    %112 = vector.shape_cast %109 : vector<16x96xbf16> to vector<1x16x96xbf16>
    tpu.vector_store %arg14[%c6_74, %c32_75, %c0_76], %112 {strides = array<i32>} : memref<8x112x96xbf16, #tpu.memory_space<vmem>>, vector<1x16x96xbf16>,
    %113 = vector.extract_strided_slice %84 {offsets = [0, 672], sizes = [16, 96], strides = [1, 1]} : vector<16x768xbf16> to vector<16x96xbf16>
    %c7_77 = arith.constant 7 : index
    %c32_78 = arith.constant 32 : index
    %c0_79 = arith.constant 0 : index
    %114 = vector.load %arg14[%c7_77, %c32_78, %c0_79] : memref<8x112x96xbf16, #tpu.memory_space<vmem>>, vector<1x16x96xbf16>
    %115 = vector.shape_cast %114 : vector<1x16x96xbf16> to vector<16x96xbf16>
    %116 = vector.shape_cast %113 : vector<16x96xbf16> to vector<1x16x96xbf16>
    tpu.vector_store %arg14[%c7_77, %c32_78, %c0_79], %116 {strides = array<i32>} : memref<8x112x96xbf16, #tpu.memory_space<vmem>>, vector<1x16x96xbf16>,
    %c0_80 = arith.constant 0 : index
    %c0_81 = arith.constant 0 : index
    %117 = vector.load %arg2[%c0_80, %c0_81] : memref<16x1024xbf16, #tpu.memory_space<vmem>>, vector<16x256xbf16>
    %c0_82 = arith.constant 0 : index
    %c0_83 = arith.constant 0 : index
    %118 = vector.load %arg5[%c0_82, %c0_83] : memref<256x768xbf16, #tpu.memory_space<vmem>>, vector<256x768xbf16>
    %cst_84 = arith.constant dense<0.000000e+00> : vector<16x768xf32>
    %119 = tpu.matmul %117, %118, %cst_84 {dimension_numbers = #tpu.dot_dimension_numbers<[1], [0], [0], [1], [0, 0, 1, 1], [], []>} : vector<16x256xbf16>, vector<256x768xbf16>, vector<16x768xf32> -> vector<16x768xf32>
    %c0_85 = arith.constant 0 : index
    %c0_86 = arith.constant 0 : index
    %120 = vector.load %arg6[%c0_85, %c0_86] : memref<1x768xf32, #tpu.memory_space<vmem>>, vector<1x768xf32>
    %121 = vector.broadcast %120 : vector<1x768xf32> to vector<16x768xf32>
    %122 = arith.addf %119, %121 : vector<16x768xf32>
    %123 = arith.truncf %122 : vector<16x768xf32> to vector<16x768xbf16>
    %124 = vector.extract_strided_slice %123 {offsets = [0, 0], sizes = [16, 96], strides = [1, 1]} : vector<16x768xbf16> to vector<16x96xbf16>
    %c0_87 = arith.constant 0 : index
    %c48 = arith.constant 48 : index
    %c0_88 = arith.constant 0 : index
    %125 = vector.load %arg14[%c0_87, %c48, %c0_88] : memref<8x112x96xbf16, #tpu.memory_space<vmem>>, vector<1x16x96xbf16>
    %126 = vector.shape_cast %125 : vector<1x16x96xbf16> to vector<16x96xbf16>
    %127 = vector.shape_cast %124 : vector<16x96xbf16> to vector<1x16x96xbf16>
    tpu.vector_store %arg14[%c0_87, %c48, %c0_88], %127 {strides = array<i32>} : memref<8x112x96xbf16, #tpu.memory_space<vmem>>, vector<1x16x96xbf16>,
    %128 = vector.extract_strided_slice %123 {offsets = [0, 96], sizes = [16, 96], strides = [1, 1]} : vector<16x768xbf16> to vector<16x96xbf16>
    %c1_89 = arith.constant 1 : index
    %c48_90 = arith.constant 48 : index
    %c0_91 = arith.constant 0 : index
    %129 = vector.load %arg14[%c1_89, %c48_90, %c0_91] : memref<8x112x96xbf16, #tpu.memory_space<vmem>>, vector<1x16x96xbf16>
    %130 = vector.shape_cast %129 : vector<1x16x96xbf16> to vector<16x96xbf16>
    %131 = vector.shape_cast %128 : vector<16x96xbf16> to vector<1x16x96xbf16>
    tpu.vector_store %arg14[%c1_89, %c48_90, %c0_91], %131 {strides = array<i32>} : memref<8x112x96xbf16, #tpu.memory_space<vmem>>, vector<1x16x96xbf16>,
    %132 = vector.extract_strided_slice %123 {offsets = [0, 192], sizes = [16, 96], strides = [1, 1]} : vector<16x768xbf16> to vector<16x96xbf16>
    %c2_92 = arith.constant 2 : index
    %c48_93 = arith.constant 48 : index
    %c0_94 = arith.constant 0 : index
    %133 = vector.load %arg14[%c2_92, %c48_93, %c0_94] : memref<8x112x96xbf16, #tpu.memory_space<vmem>>, vector<1x16x96xbf16>
    %134 = vector.shape_cast %133 : vector<1x16x96xbf16> to vector<16x96xbf16>
    %135 = vector.shape_cast %132 : vector<16x96xbf16> to vector<1x16x96xbf16>
    tpu.vector_store %arg14[%c2_92, %c48_93, %c0_94], %135 {strides = array<i32>} : memref<8x112x96xbf16, #tpu.memory_space<vmem>>, vector<1x16x96xbf16>,
    %136 = vector.extract_strided_slice %123 {offsets = [0, 288], sizes = [16, 96], strides = [1, 1]} : vector<16x768xbf16> to vector<16x96xbf16>
    %c3_95 = arith.constant 3 : index
    %c48_96 = arith.constant 48 : index
    %c0_97 = arith.constant 0 : index
    %137 = vector.load %arg14[%c3_95, %c48_96, %c0_97] : memref<8x112x96xbf16, #tpu.memory_space<vmem>>, vector<1x16x96xbf16>
    %138 = vector.shape_cast %137 : vector<1x16x96xbf16> to vector<16x96xbf16>
    %139 = vector.shape_cast %136 : vector<16x96xbf16> to vector<1x16x96xbf16>
    tpu.vector_store %arg14[%c3_95, %c48_96, %c0_97], %139 {strides = array<i32>} : memref<8x112x96xbf16, #tpu.memory_space<vmem>>, vector<1x16x96xbf16>,
    %140 = vector.extract_strided_slice %123 {offsets = [0, 384], sizes = [16, 96], strides = [1, 1]} : vector<16x768xbf16> to vector<16x96xbf16>
    %c4_98 = arith.constant 4 : index
    %c48_99 = arith.constant 48 : index
    %c0_100 = arith.constant 0 : index
    %141 = vector.load %arg14[%c4_98, %c48_99, %c0_100] : memref<8x112x96xbf16, #tpu.memory_space<vmem>>, vector<1x16x96xbf16>
    %142 = vector.shape_cast %141 : vector<1x16x96xbf16> to vector<16x96xbf16>
    %143 = vector.shape_cast %140 : vector<16x96xbf16> to vector<1x16x96xbf16>
    tpu.vector_store %arg14[%c4_98, %c48_99, %c0_100], %143 {strides = array<i32>} : memref<8x112x96xbf16, #tpu.memory_space<vmem>>, vector<1x16x96xbf16>,
    %144 = vector.extract_strided_slice %123 {offsets = [0, 480], sizes = [16, 96], strides = [1, 1]} : vector<16x768xbf16> to vector<16x96xbf16>
    %c5_101 = arith.constant 5 : index
    %c48_102 = arith.constant 48 : index
    %c0_103 = arith.constant 0 : index
    %145 = vector.load %arg14[%c5_101, %c48_102, %c0_103] : memref<8x112x96xbf16, #tpu.memory_space<vmem>>, vector<1x16x96xbf16>
    %146 = vector.shape_cast %145 : vector<1x16x96xbf16> to vector<16x96xbf16>
    %147 = vector.shape_cast %144 : vector<16x96xbf16> to vector<1x16x96xbf16>
    tpu.vector_store %arg14[%c5_101, %c48_102, %c0_103], %147 {strides = array<i32>} : memref<8x112x96xbf16, #tpu.memory_space<vmem>>, vector<1x16x96xbf16>,
    %148 = vector.extract_strided_slice %123 {offsets = [0, 576], sizes = [16, 96], strides = [1, 1]} : vector<16x768xbf16> to vector<16x96xbf16>
    %c6_104 = arith.constant 6 : index
    %c48_105 = arith.constant 48 : index
    %c0_106 = arith.constant 0 : index
    %149 = vector.load %arg14[%c6_104, %c48_105, %c0_106] : memref<8x112x96xbf16, #tpu.memory_space<vmem>>, vector<1x16x96xbf16>
    %150 = vector.shape_cast %149 : vector<1x16x96xbf16> to vector<16x96xbf16>
    %151 = vector.shape_cast %148 : vector<16x96xbf16> to vector<1x16x96xbf16>
    tpu.vector_store %arg14[%c6_104, %c48_105, %c0_106], %151 {strides = array<i32>} : memref<8x112x96xbf16, #tpu.memory_space<vmem>>, vector<1x16x96xbf16>,
    %152 = vector.extract_strided_slice %123 {offsets = [0, 672], sizes = [16, 96], strides = [1, 1]} : vector<16x768xbf16> to vector<16x96xbf16>
    %c7_107 = arith.constant 7 : index
    %c48_108 = arith.constant 48 : index
    %c0_109 = arith.constant 0 : index
    %153 = vector.load %arg14[%c7_107, %c48_108, %c0_109] : memref<8x112x96xbf16, #tpu.memory_space<vmem>>, vector<1x16x96xbf16>
    %154 = vector.shape_cast %153 : vector<1x16x96xbf16> to vector<16x96xbf16>
    %155 = vector.shape_cast %152 : vector<16x96xbf16> to vector<1x16x96xbf16>
    tpu.vector_store %arg14[%c7_107, %c48_108, %c0_109], %155 {strides = array<i32>} : memref<8x112x96xbf16, #tpu.memory_space<vmem>>, vector<1x16x96xbf16>,
    %c0_110 = arith.constant 0 : index
    %c256 = arith.constant 256 : index
    %156 = vector.load %arg2[%c0_110, %c256] : memref<16x1024xbf16, #tpu.memory_space<vmem>>, vector<16x256xbf16>
    %c0_111 = arith.constant 0 : index
    %c0_112 = arith.constant 0 : index
    %157 = vector.load %arg5[%c0_111, %c0_112] : memref<256x768xbf16, #tpu.memory_space<vmem>>, vector<256x768xbf16>
    %cst_113 = arith.constant dense<0.000000e+00> : vector<16x768xf32>
    %158 = tpu.matmul %156, %157, %cst_113 {dimension_numbers = #tpu.dot_dimension_numbers<[1], [0], [0], [1], [0, 0, 1, 1], [], []>} : vector<16x256xbf16>, vector<256x768xbf16>, vector<16x768xf32> -> vector<16x768xf32>
    %c0_114 = arith.constant 0 : index
    %c0_115 = arith.constant 0 : index
    %159 = vector.load %arg6[%c0_114, %c0_115] : memref<1x768xf32, #tpu.memory_space<vmem>>, vector<1x768xf32>
    %160 = vector.broadcast %159 : vector<1x768xf32> to vector<16x768xf32>
    %161 = arith.addf %158, %160 : vector<16x768xf32>
    %162 = arith.truncf %161 : vector<16x768xf32> to vector<16x768xbf16>
    %163 = vector.extract_strided_slice %162 {offsets = [0, 0], sizes = [16, 96], strides = [1, 1]} : vector<16x768xbf16> to vector<16x96xbf16>
    %c0_116 = arith.constant 0 : index
    %c64 = arith.constant 64 : index
    %c0_117 = arith.constant 0 : index
    %164 = vector.load %arg14[%c0_116, %c64, %c0_117] : memref<8x112x96xbf16, #tpu.memory_space<vmem>>, vector<1x16x96xbf16>
    %165 = vector.shape_cast %164 : vector<1x16x96xbf16> to vector<16x96xbf16>
    %166 = vector.shape_cast %163 : vector<16x96xbf16> to vector<1x16x96xbf16>
    tpu.vector_store %arg14[%c0_116, %c64, %c0_117], %166 {strides = array<i32>} : memref<8x112x96xbf16, #tpu.memory_space<vmem>>, vector<1x16x96xbf16>,
    %167 = vector.extract_strided_slice %162 {offsets = [0, 96], sizes = [16, 96], strides = [1, 1]} : vector<16x768xbf16> to vector<16x96xbf16>
    %c1_118 = arith.constant 1 : index
    %c64_119 = arith.constant 64 : index
    %c0_120 = arith.constant 0 : index
    %168 = vector.load %arg14[%c1_118, %c64_119, %c0_120] : memref<8x112x96xbf16, #tpu.memory_space<vmem>>, vector<1x16x96xbf16>
    %169 = vector.shape_cast %168 : vector<1x16x96xbf16> to vector<16x96xbf16>
    %170 = vector.shape_cast %167 : vector<16x96xbf16> to vector<1x16x96xbf16>
    tpu.vector_store %arg14[%c1_118, %c64_119, %c0_120], %170 {strides = array<i32>} : memref<8x112x96xbf16, #tpu.memory_space<vmem>>, vector<1x16x96xbf16>,
    %171 = vector.extract_strided_slice %162 {offsets = [0, 192], sizes = [16, 96], strides = [1, 1]} : vector<16x768xbf16> to vector<16x96xbf16>
    %c2_121 = arith.constant 2 : index
    %c64_122 = arith.constant 64 : index
    %c0_123 = arith.constant 0 : index
    %172 = vector.load %arg14[%c2_121, %c64_122, %c0_123] : memref<8x112x96xbf16, #tpu.memory_space<vmem>>, vector<1x16x96xbf16>
    %173 = vector.shape_cast %172 : vector<1x16x96xbf16> to vector<16x96xbf16>
    %174 = vector.shape_cast %171 : vector<16x96xbf16> to vector<1x16x96xbf16>
    tpu.vector_store %arg14[%c2_121, %c64_122, %c0_123], %174 {strides = array<i32>} : memref<8x112x96xbf16, #tpu.memory_space<vmem>>, vector<1x16x96xbf16>,
    %175 = vector.extract_strided_slice %162 {offsets = [0, 288], sizes = [16, 96], strides = [1, 1]} : vector<16x768xbf16> to vector<16x96xbf16>
    %c3_124 = arith.constant 3 : index
    %c64_125 = arith.constant 64 : index
    %c0_126 = arith.constant 0 : index
    %176 = vector.load %arg14[%c3_124, %c64_125, %c0_126] : memref<8x112x96xbf16, #tpu.memory_space<vmem>>, vector<1x16x96xbf16>
    %177 = vector.shape_cast %176 : vector<1x16x96xbf16> to vector<16x96xbf16>
    %178 = vector.shape_cast %175 : vector<16x96xbf16> to vector<1x16x96xbf16>
    tpu.vector_store %arg14[%c3_124, %c64_125, %c0_126], %178 {strides = array<i32>} : memref<8x112x96xbf16, #tpu.memory_space<vmem>>, vector<1x16x96xbf16>,
    %179 = vector.extract_strided_slice %162 {offsets = [0, 384], sizes = [16, 96], strides = [1, 1]} : vector<16x768xbf16> to vector<16x96xbf16>
    %c4_127 = arith.constant 4 : index
    %c64_128 = arith.constant 64 : index
    %c0_129 = arith.constant 0 : index
    %180 = vector.load %arg14[%c4_127, %c64_128, %c0_129] : memref<8x112x96xbf16, #tpu.memory_space<vmem>>, vector<1x16x96xbf16>
    %181 = vector.shape_cast %180 : vector<1x16x96xbf16> to vector<16x96xbf16>
    %182 = vector.shape_cast %179 : vector<16x96xbf16> to vector<1x16x96xbf16>
    tpu.vector_store %arg14[%c4_127, %c64_128, %c0_129], %182 {strides = array<i32>} : memref<8x112x96xbf16, #tpu.memory_space<vmem>>, vector<1x16x96xbf16>,
    %183 = vector.extract_strided_slice %162 {offsets = [0, 480], sizes = [16, 96], strides = [1, 1]} : vector<16x768xbf16> to vector<16x96xbf16>
    %c5_130 = arith.constant 5 : index
    %c64_131 = arith.constant 64 : index
    %c0_132 = arith.constant 0 : index
    %184 = vector.load %arg14[%c5_130, %c64_131, %c0_132] : memref<8x112x96xbf16, #tpu.memory_space<vmem>>, vector<1x16x96xbf16>
    %185 = vector.shape_cast %184 : vector<1x16x96xbf16> to vector<16x96xbf16>
    %186 = vector.shape_cast %183 : vector<16x96xbf16> to vector<1x16x96xbf16>
    tpu.vector_store %arg14[%c5_130, %c64_131, %c0_132], %186 {strides = array<i32>} : memref<8x112x96xbf16, #tpu.memory_space<vmem>>, vector<1x16x96xbf16>,
    %187 = vector.extract_strided_slice %162 {offsets = [0, 576], sizes = [16, 96], strides = [1, 1]} : vector<16x768xbf16> to vector<16x96xbf16>
    %c6_133 = arith.constant 6 : index
    %c64_134 = arith.constant 64 : index
    %c0_135 = arith.constant 0 : index
    %188 = vector.load %arg14[%c6_133, %c64_134, %c0_135] : memref<8x112x96xbf16, #tpu.memory_space<vmem>>, vector<1x16x96xbf16>
    %189 = vector.shape_cast %188 : vector<1x16x96xbf16> to vector<16x96xbf16>
    %190 = vector.shape_cast %187 : vector<16x96xbf16> to vector<1x16x96xbf16>
    tpu.vector_store %arg14[%c6_133, %c64_134, %c0_135], %190 {strides = array<i32>} : memref<8x112x96xbf16, #tpu.memory_space<vmem>>, vector<1x16x96xbf16>,
    %191 = vector.extract_strided_slice %162 {offsets = [0, 672], sizes = [16, 96], strides = [1, 1]} : vector<16x768xbf16> to vector<16x96xbf16>
    %c7_136 = arith.constant 7 : index
    %c64_137 = arith.constant 64 : index
    %c0_138 = arith.constant 0 : index
    %192 = vector.load %arg14[%c7_136, %c64_137, %c0_138] : memref<8x112x96xbf16, #tpu.memory_space<vmem>>, vector<1x16x96xbf16>
    %193 = vector.shape_cast %192 : vector<1x16x96xbf16> to vector<16x96xbf16>
    %194 = vector.shape_cast %191 : vector<16x96xbf16> to vector<1x16x96xbf16>
    tpu.vector_store %arg14[%c7_136, %c64_137, %c0_138], %194 {strides = array<i32>} : memref<8x112x96xbf16, #tpu.memory_space<vmem>>, vector<1x16x96xbf16>,
    %c0_139 = arith.constant 0 : index
    %c512 = arith.constant 512 : index
    %195 = vector.load %arg2[%c0_139, %c512] : memref<16x1024xbf16, #tpu.memory_space<vmem>>, vector<16x256xbf16>
    %c0_140 = arith.constant 0 : index
    %c0_141 = arith.constant 0 : index
    %196 = vector.load %arg5[%c0_140, %c0_141] : memref<256x768xbf16, #tpu.memory_space<vmem>>, vector<256x768xbf16>
    %cst_142 = arith.constant dense<0.000000e+00> : vector<16x768xf32>
    %197 = tpu.matmul %195, %196, %cst_142 {dimension_numbers = #tpu.dot_dimension_numbers<[1], [0], [0], [1], [0, 0, 1, 1], [], []>} : vector<16x256xbf16>, vector<256x768xbf16>, vector<16x768xf32> -> vector<16x768xf32>
    %c0_143 = arith.constant 0 : index
    %c0_144 = arith.constant 0 : index
    %198 = vector.load %arg6[%c0_143, %c0_144] : memref<1x768xf32, #tpu.memory_space<vmem>>, vector<1x768xf32>
    %199 = vector.broadcast %198 : vector<1x768xf32> to vector<16x768xf32>
    %200 = arith.addf %197, %199 : vector<16x768xf32>
    %201 = arith.truncf %200 : vector<16x768xf32> to vector<16x768xbf16>
    %202 = vector.extract_strided_slice %201 {offsets = [0, 0], sizes = [16, 96], strides = [1, 1]} : vector<16x768xbf16> to vector<16x96xbf16>
    %c0_145 = arith.constant 0 : index
    %c80 = arith.constant 80 : index
    %c0_146 = arith.constant 0 : index
    %203 = vector.load %arg14[%c0_145, %c80, %c0_146] : memref<8x112x96xbf16, #tpu.memory_space<vmem>>, vector<1x16x96xbf16>
    %204 = vector.shape_cast %203 : vector<1x16x96xbf16> to vector<16x96xbf16>
    %205 = vector.shape_cast %202 : vector<16x96xbf16> to vector<1x16x96xbf16>
    tpu.vector_store %arg14[%c0_145, %c80, %c0_146], %205 {strides = array<i32>} : memref<8x112x96xbf16, #tpu.memory_space<vmem>>, vector<1x16x96xbf16>,
    %206 = vector.extract_strided_slice %201 {offsets = [0, 96], sizes = [16, 96], strides = [1, 1]} : vector<16x768xbf16> to vector<16x96xbf16>
    %c1_147 = arith.constant 1 : index
    %c80_148 = arith.constant 80 : index
    %c0_149 = arith.constant 0 : index
    %207 = vector.load %arg14[%c1_147, %c80_148, %c0_149] : memref<8x112x96xbf16, #tpu.memory_space<vmem>>, vector<1x16x96xbf16>
    %208 = vector.shape_cast %207 : vector<1x16x96xbf16> to vector<16x96xbf16>
    %209 = vector.shape_cast %206 : vector<16x96xbf16> to vector<1x16x96xbf16>
    tpu.vector_store %arg14[%c1_147, %c80_148, %c0_149], %209 {strides = array<i32>} : memref<8x112x96xbf16, #tpu.memory_space<vmem>>, vector<1x16x96xbf16>,
    %210 = vector.extract_strided_slice %201 {offsets = [0, 192], sizes = [16, 96], strides = [1, 1]} : vector<16x768xbf16> to vector<16x96xbf16>
    %c2_150 = arith.constant 2 : index
    %c80_151 = arith.constant 80 : index
    %c0_152 = arith.constant 0 : index
    %211 = vector.load %arg14[%c2_150, %c80_151, %c0_152] : memref<8x112x96xbf16, #tpu.memory_space<vmem>>, vector<1x16x96xbf16>
    %212 = vector.shape_cast %211 : vector<1x16x96xbf16> to vector<16x96xbf16>
    %213 = vector.shape_cast %210 : vector<16x96xbf16> to vector<1x16x96xbf16>
    tpu.vector_store %arg14[%c2_150, %c80_151, %c0_152], %213 {strides = array<i32>} : memref<8x112x96xbf16, #tpu.memory_space<vmem>>, vector<1x16x96xbf16>,
    %214 = vector.extract_strided_slice %201 {offsets = [0, 288], sizes = [16, 96], strides = [1, 1]} : vector<16x768xbf16> to vector<16x96xbf16>
    %c3_153 = arith.constant 3 : index
    %c80_154 = arith.constant 80 : index
    %c0_155 = arith.constant 0 : index
    %215 = vector.load %arg14[%c3_153, %c80_154, %c0_155] : memref<8x112x96xbf16, #tpu.memory_space<vmem>>, vector<1x16x96xbf16>
    %216 = vector.shape_cast %215 : vector<1x16x96xbf16> to vector<16x96xbf16>
    %217 = vector.shape_cast %214 : vector<16x96xbf16> to vector<1x16x96xbf16>
    tpu.vector_store %arg14[%c3_153, %c80_154, %c0_155], %217 {strides = array<i32>} : memref<8x112x96xbf16, #tpu.memory_space<vmem>>, vector<1x16x96xbf16>,
    %218 = vector.extract_strided_slice %201 {offsets = [0, 384], sizes = [16, 96], strides = [1, 1]} : vector<16x768xbf16> to vector<16x96xbf16>
    %c4_156 = arith.constant 4 : index
    %c80_157 = arith.constant 80 : index
    %c0_158 = arith.constant 0 : index
    %219 = vector.load %arg14[%c4_156, %c80_157, %c0_158] : memref<8x112x96xbf16, #tpu.memory_space<vmem>>, vector<1x16x96xbf16>
    %220 = vector.shape_cast %219 : vector<1x16x96xbf16> to vector<16x96xbf16>
    %221 = vector.shape_cast %218 : vector<16x96xbf16> to vector<1x16x96xbf16>
    tpu.vector_store %arg14[%c4_156, %c80_157, %c0_158], %221 {strides = array<i32>} : memref<8x112x96xbf16, #tpu.memory_space<vmem>>, vector<1x16x96xbf16>,
    %222 = vector.extract_strided_slice %201 {offsets = [0, 480], sizes = [16, 96], strides = [1, 1]} : vector<16x768xbf16> to vector<16x96xbf16>
    %c5_159 = arith.constant 5 : index
    %c80_160 = arith.constant 80 : index
    %c0_161 = arith.constant 0 : index
    %223 = vector.load %arg14[%c5_159, %c80_160, %c0_161] : memref<8x112x96xbf16, #tpu.memory_space<vmem>>, vector<1x16x96xbf16>
    %224 = vector.shape_cast %223 : vector<1x16x96xbf16> to vector<16x96xbf16>
    %225 = vector.shape_cast %222 : vector<16x96xbf16> to vector<1x16x96xbf16>
    tpu.vector_store %arg14[%c5_159, %c80_160, %c0_161], %225 {strides = array<i32>} : memref<8x112x96xbf16, #tpu.memory_space<vmem>>, vector<1x16x96xbf16>,
    %226 = vector.extract_strided_slice %201 {offsets = [0, 576], sizes = [16, 96], strides = [1, 1]} : vector<16x768xbf16> to vector<16x96xbf16>
    %c6_162 = arith.constant 6 : index
    %c80_163 = arith.constant 80 : index
    %c0_164 = arith.constant 0 : index
    %227 = vector.load %arg14[%c6_162, %c80_163, %c0_164] : memref<8x112x96xbf16, #tpu.memory_space<vmem>>, vector<1x16x96xbf16>
    %228 = vector.shape_cast %227 : vector<1x16x96xbf16> to vector<16x96xbf16>
    %229 = vector.shape_cast %226 : vector<16x96xbf16> to vector<1x16x96xbf16>
    tpu.vector_store %arg14[%c6_162, %c80_163, %c0_164], %229 {strides = array<i32>} : memref<8x112x96xbf16, #tpu.memory_space<vmem>>, vector<1x16x96xbf16>,
    %230 = vector.extract_strided_slice %201 {offsets = [0, 672], sizes = [16, 96], strides = [1, 1]} : vector<16x768xbf16> to vector<16x96xbf16>
    %c7_165 = arith.constant 7 : index
    %c80_166 = arith.constant 80 : index
    %c0_167 = arith.constant 0 : index
    %231 = vector.load %arg14[%c7_165, %c80_166, %c0_167] : memref<8x112x96xbf16, #tpu.memory_space<vmem>>, vector<1x16x96xbf16>
    %232 = vector.shape_cast %231 : vector<1x16x96xbf16> to vector<16x96xbf16>
    %233 = vector.shape_cast %230 : vector<16x96xbf16> to vector<1x16x96xbf16>
    tpu.vector_store %arg14[%c7_165, %c80_166, %c0_167], %233 {strides = array<i32>} : memref<8x112x96xbf16, #tpu.memory_space<vmem>>, vector<1x16x96xbf16>,
    %c0_168 = arith.constant 0 : index
    %c768_169 = arith.constant 768 : index
    %234 = vector.load %arg2[%c0_168, %c768_169] : memref<16x1024xbf16, #tpu.memory_space<vmem>>, vector<16x256xbf16>
    %c0_170 = arith.constant 0 : index
    %c0_171 = arith.constant 0 : index
    %235 = vector.load %arg5[%c0_170, %c0_171] : memref<256x768xbf16, #tpu.memory_space<vmem>>, vector<256x768xbf16>
    %cst_172 = arith.constant dense<0.000000e+00> : vector<16x768xf32>
    %236 = tpu.matmul %234, %235, %cst_172 {dimension_numbers = #tpu.dot_dimension_numbers<[1], [0], [0], [1], [0, 0, 1, 1], [], []>} : vector<16x256xbf16>, vector<256x768xbf16>, vector<16x768xf32> -> vector<16x768xf32>
    %c0_173 = arith.constant 0 : index
    %c0_174 = arith.constant 0 : index
    %237 = vector.load %arg6[%c0_173, %c0_174] : memref<1x768xf32, #tpu.memory_space<vmem>>, vector<1x768xf32>
    %238 = vector.broadcast %237 : vector<1x768xf32> to vector<16x768xf32>
    %239 = arith.addf %236, %238 : vector<16x768xf32>
    %240 = arith.truncf %239 : vector<16x768xf32> to vector<16x768xbf16>
    %241 = vector.extract_strided_slice %240 {offsets = [0, 0], sizes = [16, 96], strides = [1, 1]} : vector<16x768xbf16> to vector<16x96xbf16>
    %c0_175 = arith.constant 0 : index
    %c96 = arith.constant 96 : index
    %c0_176 = arith.constant 0 : index
    %242 = vector.load %arg14[%c0_175, %c96, %c0_176] : memref<8x112x96xbf16, #tpu.memory_space<vmem>>, vector<1x16x96xbf16>
    %243 = vector.shape_cast %242 : vector<1x16x96xbf16> to vector<16x96xbf16>
    %244 = vector.shape_cast %241 : vector<16x96xbf16> to vector<1x16x96xbf16>
    tpu.vector_store %arg14[%c0_175, %c96, %c0_176], %244 {strides = array<i32>} : memref<8x112x96xbf16, #tpu.memory_space<vmem>>, vector<1x16x96xbf16>,
    %245 = vector.extract_strided_slice %240 {offsets = [0, 96], sizes = [16, 96], strides = [1, 1]} : vector<16x768xbf16> to vector<16x96xbf16>
    %c1_177 = arith.constant 1 : index
    %c96_178 = arith.constant 96 : index
    %c0_179 = arith.constant 0 : index
    %246 = vector.load %arg14[%c1_177, %c96_178, %c0_179] : memref<8x112x96xbf16, #tpu.memory_space<vmem>>, vector<1x16x96xbf16>
    %247 = vector.shape_cast %246 : vector<1x16x96xbf16> to vector<16x96xbf16>
    %248 = vector.shape_cast %245 : vector<16x96xbf16> to vector<1x16x96xbf16>
    tpu.vector_store %arg14[%c1_177, %c96_178, %c0_179], %248 {strides = array<i32>} : memref<8x112x96xbf16, #tpu.memory_space<vmem>>, vector<1x16x96xbf16>,
    %249 = vector.extract_strided_slice %240 {offsets = [0, 192], sizes = [16, 96], strides = [1, 1]} : vector<16x768xbf16> to vector<16x96xbf16>
    %c2_180 = arith.constant 2 : index
    %c96_181 = arith.constant 96 : index
    %c0_182 = arith.constant 0 : index
    %250 = vector.load %arg14[%c2_180, %c96_181, %c0_182] : memref<8x112x96xbf16, #tpu.memory_space<vmem>>, vector<1x16x96xbf16>
    %251 = vector.shape_cast %250 : vector<1x16x96xbf16> to vector<16x96xbf16>
    %252 = vector.shape_cast %249 : vector<16x96xbf16> to vector<1x16x96xbf16>
    tpu.vector_store %arg14[%c2_180, %c96_181, %c0_182], %252 {strides = array<i32>} : memref<8x112x96xbf16, #tpu.memory_space<vmem>>, vector<1x16x96xbf16>,
    %253 = vector.extract_strided_slice %240 {offsets = [0, 288], sizes = [16, 96], strides = [1, 1]} : vector<16x768xbf16> to vector<16x96xbf16>
    %c3_183 = arith.constant 3 : index
    %c96_184 = arith.constant 96 : index
    %c0_185 = arith.constant 0 : index
    %254 = vector.load %arg14[%c3_183, %c96_184, %c0_185] : memref<8x112x96xbf16, #tpu.memory_space<vmem>>, vector<1x16x96xbf16>
    %255 = vector.shape_cast %254 : vector<1x16x96xbf16> to vector<16x96xbf16>
    %256 = vector.shape_cast %253 : vector<16x96xbf16> to vector<1x16x96xbf16>
    tpu.vector_store %arg14[%c3_183, %c96_184, %c0_185], %256 {strides = array<i32>} : memref<8x112x96xbf16, #tpu.memory_space<vmem>>, vector<1x16x96xbf16>,
    %257 = vector.extract_strided_slice %240 {offsets = [0, 384], sizes = [16, 96], strides = [1, 1]} : vector<16x768xbf16> to vector<16x96xbf16>
    %c4_186 = arith.constant 4 : index
    %c96_187 = arith.constant 96 : index
    %c0_188 = arith.constant 0 : index
    %258 = vector.load %arg14[%c4_186, %c96_187, %c0_188] : memref<8x112x96xbf16, #tpu.memory_space<vmem>>, vector<1x16x96xbf16>
    %259 = vector.shape_cast %258 : vector<1x16x96xbf16> to vector<16x96xbf16>
    %260 = vector.shape_cast %257 : vector<16x96xbf16> to vector<1x16x96xbf16>
    tpu.vector_store %arg14[%c4_186, %c96_187, %c0_188], %260 {strides = array<i32>} : memref<8x112x96xbf16, #tpu.memory_space<vmem>>, vector<1x16x96xbf16>,
    %261 = vector.extract_strided_slice %240 {offsets = [0, 480], sizes = [16, 96], strides = [1, 1]} : vector<16x768xbf16> to vector<16x96xbf16>
    %c5_189 = arith.constant 5 : index
    %c96_190 = arith.constant 96 : index
    %c0_191 = arith.constant 0 : index
    %262 = vector.load %arg14[%c5_189, %c96_190, %c0_191] : memref<8x112x96xbf16, #tpu.memory_space<vmem>>, vector<1x16x96xbf16>
    %263 = vector.shape_cast %262 : vector<1x16x96xbf16> to vector<16x96xbf16>
    %264 = vector.shape_cast %261 : vector<16x96xbf16> to vector<1x16x96xbf16>
    tpu.vector_store %arg14[%c5_189, %c96_190, %c0_191], %264 {strides = array<i32>} : memref<8x112x96xbf16, #tpu.memory_space<vmem>>, vector<1x16x96xbf16>,
    %265 = vector.extract_strided_slice %240 {offsets = [0, 576], sizes = [16, 96], strides = [1, 1]} : vector<16x768xbf16> to vector<16x96xbf16>
    %c6_192 = arith.constant 6 : index
    %c96_193 = arith.constant 96 : index
    %c0_194 = arith.constant 0 : index
    %266 = vector.load %arg14[%c6_192, %c96_193, %c0_194] : memref<8x112x96xbf16, #tpu.memory_space<vmem>>, vector<1x16x96xbf16>
    %267 = vector.shape_cast %266 : vector<1x16x96xbf16> to vector<16x96xbf16>
    %268 = vector.shape_cast %265 : vector<16x96xbf16> to vector<1x16x96xbf16>
    tpu.vector_store %arg14[%c6_192, %c96_193, %c0_194], %268 {strides = array<i32>} : memref<8x112x96xbf16, #tpu.memory_space<vmem>>, vector<1x16x96xbf16>,
    %269 = vector.extract_strided_slice %240 {offsets = [0, 672], sizes = [16, 96], strides = [1, 1]} : vector<16x768xbf16> to vector<16x96xbf16>
    %c7_195 = arith.constant 7 : index
    %c96_196 = arith.constant 96 : index
    %c0_197 = arith.constant 0 : index
    %270 = vector.load %arg14[%c7_195, %c96_196, %c0_197] : memref<8x112x96xbf16, #tpu.memory_space<vmem>>, vector<1x16x96xbf16>
    %271 = vector.shape_cast %270 : vector<1x16x96xbf16> to vector<16x96xbf16>
    %272 = vector.shape_cast %269 : vector<16x96xbf16> to vector<1x16x96xbf16>
    tpu.vector_store %arg14[%c7_195, %c96_196, %c0_197], %272 {strides = array<i32>} : memref<8x112x96xbf16, #tpu.memory_space<vmem>>, vector<1x16x96xbf16>,
    %273 = tpu.iota {dimensions = array<i32: 0>} : vector<112x1xi32>
    %274 = tpu.iota {dimensions = array<i32: 1>} : vector<1x112xi32>
    %c15_i32 = arith.constant 15 : i32
    %275 = vector.broadcast %c15_i32 : i32 to vector<112x1xi32>
    %276 = arith.andi %273, %275 : vector<112x1xi32>
    %c15_i32_198 = arith.constant 15 : i32
    %277 = vector.broadcast %c15_i32_198 : i32 to vector<1x112xi32>
    %278 = arith.andi %274, %277 : vector<1x112xi32>
    %279 = vector.broadcast %276 : vector<112x1xi32> to vector<112x112xi32>
    %280 = vector.broadcast %278 : vector<1x112xi32> to vector<112x112xi32>
    %281 = arith.cmpi eq, %279, %280 : vector<112x112xi32>
    %c0_199 = arith.constant 0 : index
    %c0_200 = arith.constant 0 : index
    %282 = vector.load %arg8[%c0_199, %c0_200] : memref<1x128xf32, #tpu.memory_space<vmem>>, vector<1x128xf32>
    %283 = vector.shape_cast %282 : vector<1x128xf32> to vector<1x128xf32>
    %284 = vector.broadcast %283 : vector<1x128xf32> to vector<112x128xf32>
    %c0_201 = arith.constant 0 : index
    %c0_202 = arith.constant 0 : index
    %285 = vector.load %arg15[%c0_201, %c0_202] : memref<112x128xf32, #tpu.memory_space<vmem>>, vector<112x128xf32>
    tpu.vector_store %arg15[%c0_201, %c0_202], %284 {strides = array<i32>} : memref<112x128xf32, #tpu.memory_space<vmem>>, vector<112x128xf32>,
    %cst_203 = arith.constant -1.000000e+30 : f32
    %c0_i32 = arith.constant 0 : i32
    %c8_i32 = arith.constant 8 : i32
    %286 = arith.addi %c0_i32, %c8_i32 : i32
    %c1_i32 = arith.constant 1 : i32
    scf.for %arg16 = %c0_i32 to %286 step %c1_i32  : i32 {
      %331 = arith.index_cast %arg16 : i32 to index
      %c0_246 = arith.constant 0 : index
      %c0_247 = arith.constant 0 : index
      %332 = vector.load %arg14[%331, %c0_246, %c0_247] : memref<8x112x96xbf16, #tpu.memory_space<vmem>>, vector<1x112x96xbf16>
      %333 = vector.shape_cast %332 : vector<1x112x96xbf16> to vector<112x96xbf16>
      %334 = vector.extract_strided_slice %333 {offsets = [0, 0], sizes = [112, 32], strides = [1, 1]} : vector<112x96xbf16> to vector<112x32xbf16>
      %335 = vector.extract_strided_slice %333 {offsets = [0, 32], sizes = [112, 32], strides = [1, 1]} : vector<112x96xbf16> to vector<112x32xbf16>
      %336 = vector.extract_strided_slice %333 {offsets = [0, 64], sizes = [112, 32], strides = [1, 1]} : vector<112x96xbf16> to vector<112x32xbf16>
      %cst_248 = arith.constant dense<0.000000e+00> : vector<112x112xf32>
      %337 = tpu.matmul %334, %335, %cst_248 {dimension_numbers = #tpu.dot_dimension_numbers<[1], [1], [0], [0], [0, 0, 1, 0], [], []>} : vector<112x32xbf16>, vector<112x32xbf16>, vector<112x112xf32> -> vector<112x112xf32>
      %338 = vector.broadcast %cst_203 : f32 to vector<112x112xf32>
      %339 = arith.select %281, %337, %338 : vector<112x112xi1>, vector<112x112xf32>
      %340 = math.exp %339 : vector<112x112xf32>
      %cst_249 = arith.constant dense<0.000000e+00> : vector<112xf32>
      %341 = vector.multi_reduction <add>, %340, %cst_249 [1] : vector<112x112xf32> to vector<112xf32>
      %342 = vector.shape_cast %341 : vector<112xf32> to vector<112x1xf32>
      %343 = tpu.reciprocal %342 {approx = true} : vector<112x1xf32> -> vector<112x1xf32>
      %344 = vector.broadcast %343 : vector<112x1xf32> to vector<112x112xf32>
      %345 = arith.mulf %340, %344 : vector<112x112xf32>
      %346 = arith.truncf %345 : vector<112x112xf32> to vector<112x112xbf16>
      %cst_250 = arith.constant dense<0.000000e+00> : vector<112x32xf32>
      %347 = tpu.matmul %346, %336, %cst_250 {dimension_numbers = #tpu.dot_dimension_numbers<[1], [0], [0], [1], [0, 0, 1, 1], [], []>} : vector<112x112xbf16>, vector<112x32xbf16>, vector<112x32xf32> -> vector<112x32xf32>
      %c0_251 = arith.constant 0 : index
      %c0_252 = arith.constant 0 : index
      %348 = vector.load %arg15[%c0_251, %c0_252] : memref<112x128xf32, #tpu.memory_space<vmem>>, vector<112x128xf32>
      %349 = arith.truncf %347 : vector<112x32xf32> to vector<112x32xbf16>
      %350 = arith.index_cast %arg16 : i32 to index
      %c0_253 = arith.constant 0 : index
      %c0_254 = arith.constant 0 : index
      %351 = vector.load %arg7[%350, %c0_253, %c0_254] : memref<8x32x128xbf16, #tpu.memory_space<vmem>>, vector<1x32x128xbf16>
      %352 = vector.shape_cast %351 : vector<1x32x128xbf16> to vector<32x128xbf16>
      %cst_255 = arith.constant dense<0.000000e+00> : vector<112x128xf32>
      %353 = tpu.matmul %349, %352, %cst_255 {dimension_numbers = #tpu.dot_dimension_numbers<[1], [0], [0], [1], [0, 0, 1, 1], [], []>} : vector<112x32xbf16>, vector<32x128xbf16>, vector<112x128xf32> -> vector<112x128xf32>
      %354 = arith.addf %348, %353 : vector<112x128xf32>
      %c0_256 = arith.constant 0 : index
      %c0_257 = arith.constant 0 : index
      %355 = vector.load %arg15[%c0_256, %c0_257] : memref<112x128xf32, #tpu.memory_space<vmem>>, vector<112x128xf32>
      tpu.vector_store %arg15[%c0_256, %c0_257], %354 {strides = array<i32>} : memref<112x128xf32, #tpu.memory_space<vmem>>, vector<112x128xf32>,
    }
    %c8_i32_204 = arith.constant 8 : i32
    %c0_205 = arith.constant 0 : index
    %c0_206 = arith.constant 0 : index
    %287 = vector.load %arg10[%c0_205, %c0_206] : memref<1x896xf32, #tpu.memory_space<vmem>>, vector<1x896xf32>
    %c0_207 = arith.constant 0 : index
    %c0_208 = arith.constant 0 : index
    %288 = vector.load %arg15[%c0_207, %c0_208] : memref<112x128xf32, #tpu.memory_space<vmem>>, vector<16x128xf32>
    %289 = arith.truncf %288 : vector<16x128xf32> to vector<16x128xbf16>
    %c0_209 = arith.constant 0 : index
    %c0_210 = arith.constant 0 : index
    %290 = vector.load %arg9[%c0_209, %c0_210] : memref<896x896xbf16, #tpu.memory_space<vmem>>, vector<128x896xbf16>
    %cst_211 = arith.constant dense<0.000000e+00> : vector<16x896xf32>
    %291 = tpu.matmul %289, %290, %cst_211 {dimension_numbers = #tpu.dot_dimension_numbers<[1], [0], [0], [1], [0, 0, 1, 1], [], []>} : vector<16x128xbf16>, vector<128x896xbf16>, vector<16x896xf32> -> vector<16x896xf32>
    %292 = vector.broadcast %287 : vector<1x896xf32> to vector<16x896xf32>
    %293 = arith.addf %292, %291 : vector<16x896xf32>
    %c16_212 = arith.constant 16 : index
    %c0_213 = arith.constant 0 : index
    %294 = vector.load %arg15[%c16_212, %c0_213] : memref<112x128xf32, #tpu.memory_space<vmem>>, vector<16x128xf32>
    %295 = arith.truncf %294 : vector<16x128xf32> to vector<16x128xbf16>
    %c128 = arith.constant 128 : index
    %c0_214 = arith.constant 0 : index
    %296 = vector.load %arg9[%c128, %c0_214] : memref<896x896xbf16, #tpu.memory_space<vmem>>, vector<128x896xbf16>
    %cst_215 = arith.constant dense<0.000000e+00> : vector<16x896xf32>
    %297 = tpu.matmul %295, %296, %cst_215 {dimension_numbers = #tpu.dot_dimension_numbers<[1], [0], [0], [1], [0, 0, 1, 1], [], []>} : vector<16x128xbf16>, vector<128x896xbf16>, vector<16x896xf32> -> vector<16x896xf32>
    %298 = arith.addf %293, %297 : vector<16x896xf32>
    %c32_216 = arith.constant 32 : index
    %c0_217 = arith.constant 0 : index
    %299 = vector.load %arg15[%c32_216, %c0_217] : memref<112x128xf32, #tpu.memory_space<vmem>>, vector<16x128xf32>
    %300 = arith.truncf %299 : vector<16x128xf32> to vector<16x128xbf16>
    %c256_218 = arith.constant 256 : index
    %c0_219 = arith.constant 0 : index
    %301 = vector.load %arg9[%c256_218, %c0_219] : memref<896x896xbf16, #tpu.memory_space<vmem>>, vector<128x896xbf16>
    %cst_220 = arith.constant dense<0.000000e+00> : vector<16x896xf32>
    %302 = tpu.matmul %300, %301, %cst_220 {dimension_numbers = #tpu.dot_dimension_numbers<[1], [0], [0], [1], [0, 0, 1, 1], [], []>} : vector<16x128xbf16>, vector<128x896xbf16>, vector<16x896xf32> -> vector<16x896xf32>
    %303 = arith.addf %298, %302 : vector<16x896xf32>
    %c48_221 = arith.constant 48 : index
    %c0_222 = arith.constant 0 : index
    %304 = vector.load %arg15[%c48_221, %c0_222] : memref<112x128xf32, #tpu.memory_space<vmem>>, vector<16x128xf32>
    %305 = arith.truncf %304 : vector<16x128xf32> to vector<16x128xbf16>
    %c384 = arith.constant 384 : index
    %c0_223 = arith.constant 0 : index
    %306 = vector.load %arg9[%c384, %c0_223] : memref<896x896xbf16, #tpu.memory_space<vmem>>, vector<128x896xbf16>
    %cst_224 = arith.constant dense<0.000000e+00> : vector<16x896xf32>
    %307 = tpu.matmul %305, %306, %cst_224 {dimension_numbers = #tpu.dot_dimension_numbers<[1], [0], [0], [1], [0, 0, 1, 1], [], []>} : vector<16x128xbf16>, vector<128x896xbf16>, vector<16x896xf32> -> vector<16x896xf32>
    %308 = arith.addf %303, %307 : vector<16x896xf32>
    %c64_225 = arith.constant 64 : index
    %c0_226 = arith.constant 0 : index
    %309 = vector.load %arg15[%c64_225, %c0_226] : memref<112x128xf32, #tpu.memory_space<vmem>>, vector<16x128xf32>
    %310 = arith.truncf %309 : vector<16x128xf32> to vector<16x128xbf16>
    %c512_227 = arith.constant 512 : index
    %c0_228 = arith.constant 0 : index
    %311 = vector.load %arg9[%c512_227, %c0_228] : memref<896x896xbf16, #tpu.memory_space<vmem>>, vector<128x896xbf16>
    %cst_229 = arith.constant dense<0.000000e+00> : vector<16x896xf32>
    %312 = tpu.matmul %310, %311, %cst_229 {dimension_numbers = #tpu.dot_dimension_numbers<[1], [0], [0], [1], [0, 0, 1, 1], [], []>} : vector<16x128xbf16>, vector<128x896xbf16>, vector<16x896xf32> -> vector<16x896xf32>
    %313 = arith.addf %308, %312 : vector<16x896xf32>
    %c80_230 = arith.constant 80 : index
    %c0_231 = arith.constant 0 : index
    %314 = vector.load %arg15[%c80_230, %c0_231] : memref<112x128xf32, #tpu.memory_space<vmem>>, vector<16x128xf32>
    %315 = arith.truncf %314 : vector<16x128xf32> to vector<16x128xbf16>
    %c640 = arith.constant 640 : index
    %c0_232 = arith.constant 0 : index
    %316 = vector.load %arg9[%c640, %c0_232] : memref<896x896xbf16, #tpu.memory_space<vmem>>, vector<128x896xbf16>
    %cst_233 = arith.constant dense<0.000000e+00> : vector<16x896xf32>
    %317 = tpu.matmul %315, %316, %cst_233 {dimension_numbers = #tpu.dot_dimension_numbers<[1], [0], [0], [1], [0, 0, 1, 1], [], []>} : vector<16x128xbf16>, vector<128x896xbf16>, vector<16x896xf32> -> vector<16x896xf32>
    %318 = arith.addf %313, %317 : vector<16x896xf32>
    %c96_234 = arith.constant 96 : index
    %c0_235 = arith.constant 0 : index
    %319 = vector.load %arg15[%c96_234, %c0_235] : memref<112x128xf32, #tpu.memory_space<vmem>>, vector<16x128xf32>
    %320 = arith.truncf %319 : vector<16x128xf32> to vector<16x128xbf16>
    %c768_236 = arith.constant 768 : index
    %c0_237 = arith.constant 0 : index
    %321 = vector.load %arg9[%c768_236, %c0_237] : memref<896x896xbf16, #tpu.memory_space<vmem>>, vector<128x896xbf16>
    %cst_238 = arith.constant dense<0.000000e+00> : vector<16x896xf32>
    %322 = tpu.matmul %320, %321, %cst_238 {dimension_numbers = #tpu.dot_dimension_numbers<[1], [0], [0], [1], [0, 0, 1, 1], [], []>} : vector<16x128xbf16>, vector<128x896xbf16>, vector<16x896xf32> -> vector<16x896xf32>
    %323 = arith.addf %318, %322 : vector<16x896xf32>
    %324 = arith.truncf %323 : vector<16x896xf32> to vector<16x896xbf16>
    %c0_239 = arith.constant 0 : index
    %c0_240 = arith.constant 0 : index
    %325 = vector.load %arg11[%c0_239, %c0_240] : memref<896x128xbf16, #tpu.memory_space<vmem>>, vector<896x128xbf16>
    %cst_241 = arith.constant dense<0.000000e+00> : vector<16x128xf32>
    %326 = tpu.matmul %324, %325, %cst_241 {dimension_numbers = #tpu.dot_dimension_numbers<[1], [0], [0], [1], [0, 0, 1, 1], [], []>} : vector<16x896xbf16>, vector<896x128xbf16>, vector<16x128xf32> -> vector<16x128xf32>
    %c0_242 = arith.constant 0 : index
    %c0_243 = arith.constant 0 : index
    %327 = vector.load %arg12[%c0_242, %c0_243] : memref<1x128xf32, #tpu.memory_space<vmem>>, vector<1x128xf32>
    %328 = vector.broadcast %327 : vector<1x128xf32> to vector<16x128xf32>
    %329 = arith.addf %326, %328 : vector<16x128xf32>
    %c0_244 = arith.constant 0 : index
    %c0_245 = arith.constant 0 : index
    %330 = vector.load %arg13[%c0_244, %c0_245] : memref<16x128xf32, #tpu.memory_space<vmem>>, vector<16x128xf32>
    tpu.vector_store %arg13[%c0_244, %c0_245], %329 {strides = array<i32>} : memref<16x128xf32, #tpu.memory_space<vmem>>, vector<16x128xf32>,
    return
  }
  func.func @transform_0(%arg0: i32) -> (i32, i32) {
    %c0_i32 = arith.constant 0 : i32
    %c0_i32_0 = arith.constant 0 : i32
    return %arg0, %c0_i32 : i32, i32
  }
  func.func @transform_1(%arg0: i32) -> (i32, i32) {
    %c0_i32 = arith.constant 0 : i32
    %c0_i32_0 = arith.constant 0 : i32
    return %arg0, %c0_i32 : i32, i32
  }
  func.func @transform_2(%arg0: i32) -> (i32, i32) {
    %c0_i32 = arith.constant 0 : i32
    %c0_i32_0 = arith.constant 0 : i32
    %c0_i32_1 = arith.constant 0 : i32
    return %c0_i32, %c0_i32_0 : i32, i32
  }
  func.func @transform_3(%arg0: i32) -> (i32, i32) {
    %c0_i32 = arith.constant 0 : i32
    %c0_i32_0 = arith.constant 0 : i32
    %c0_i32_1 = arith.constant 0 : i32
    return %c0_i32, %c0_i32_0 : i32, i32
  }
  func.func @transform_4(%arg0: i32) -> (i32, i32) {
    %c0_i32 = arith.constant 0 : i32
    %c0_i32_0 = arith.constant 0 : i32
    %c0_i32_1 = arith.constant 0 : i32
    return %c0_i32, %c0_i32_0 : i32, i32
  }
  func.func @transform_5(%arg0: i32) -> (i32, i32) {
    %c0_i32 = arith.constant 0 : i32
    %c0_i32_0 = arith.constant 0 : i32
    %c0_i32_1 = arith.constant 0 : i32
    return %c0_i32, %c0_i32_0 : i32, i32
  }
  func.func @transform_6(%arg0: i32) -> (i32, i32, i32) {
    %c0_i32 = arith.constant 0 : i32
    %c0_i32_0 = arith.constant 0 : i32
    %c0_i32_1 = arith.constant 0 : i32
    %c0_i32_2 = arith.constant 0 : i32
    return %c0_i32, %c0_i32_0, %c0_i32_1 : i32, i32, i32
  }
  func.func @transform_7(%arg0: i32) -> (i32, i32) {
    %c0_i32 = arith.constant 0 : i32
    %c0_i32_0 = arith.constant 0 : i32
    %c0_i32_1 = arith.constant 0 : i32
    return %c0_i32, %c0_i32_0 : i32, i32
  }
  func.func @transform_8(%arg0: i32) -> (i32, i32) {
    %c0_i32 = arith.constant 0 : i32
    %c0_i32_0 = arith.constant 0 : i32
    %c0_i32_1 = arith.constant 0 : i32
    return %c0_i32, %c0_i32_0 : i32, i32
  }
  func.func @transform_9(%arg0: i32) -> (i32, i32) {
    %c0_i32 = arith.constant 0 : i32
    %c0_i32_0 = arith.constant 0 : i32
    %c0_i32_1 = arith.constant 0 : i32
    return %c0_i32, %c0_i32_0 : i32, i32
  }
  func.func @transform_10(%arg0: i32) -> (i32, i32) {
    %c0_i32 = arith.constant 0 : i32
    %c0_i32_0 = arith.constant 0 : i32
    %c0_i32_1 = arith.constant 0 : i32
    return %c0_i32, %c0_i32_0 : i32, i32
  }
  func.func @transform_11(%arg0: i32) -> (i32, i32) {
    %c0_i32 = arith.constant 0 : i32
    %c0_i32_0 = arith.constant 0 : i32
    %c0_i32_1 = arith.constant 0 : i32
    return %c0_i32, %c0_i32_0 : i32, i32
  }
  func.func @transform_12(%arg0: i32) -> (i32, i32) {
    %c0_i32 = arith.constant 0 : i32
    %c0_i32_0 = arith.constant 0 : i32
    return %arg0, %c0_i32 : i32, i32
  }
}

</mosaic_0001>

<bundles_post_ra>
// kernel: tpu_custom_call.1
= control target key start
LH: loop header
LB: loop body
LE: loop exit
PB: predicated region body
PF: predicated region fallthrough
CT: control target
= control target key end

     0   :  { %17 = vsyncpa [#allocation5], 0  ;;  %s22062_s0 = inlined_call_operand.hbm [shape: bf16[16,2304], index: 0, kind: input, shape index: {}]   ;;  %s22063_s1 = inlined_call_operand.hbm [shape: bf16[16,1024], index: 1, kind: input, shape index: {}]   ;;  %s22064_s2 = inlined_call_operand.hbm [shape: bf16[768,768], index: 2, kind: input, shape index: {}]   ;;  %s22065_s3 = inlined_call_operand.hbm [shape: f32[1,768], index: 3, kind: input, shape index: {}]   ;;  %s22066_s4 = inlined_call_operand.hbm [shape: bf16[256,768], index: 4, kind: input, shape index: {}]   ;;  %s22067_s5 = inlined_call_operand.hbm [shape: f32[1,768], index: 5, kind: input, shape index: {}]   ;;  %s22068_s6 = inlined_call_operand.hbm [shape: bf16[8,32,128], index: 6, kind: input, shape index: {}]   ;;  %s22069_s7 = inlined_call_operand.hbm [shape: f32[1,128], index: 7, kind: input, shape index: {}]   ;;  %s22070_s8 = inlined_call_operand.hbm [shape: bf16[896,896], index: 8, kind: input, shape index: {}]   ;;  %s22071_s9 = inlined_call_operand.hbm [shape: f32[1,896], index: 9, kind: input, shape index: {}]   ;;  %s22072_s10 = inlined_call_operand.hbm [shape: bf16[896,128], index: 10, kind: input, shape index: {}]   ;;  %s22073_s11 = inlined_call_operand.hbm [shape: f32[1,128], index: 11, kind: input, shape index: {}]   ;;  %s22074_s12 = inlined_call_operand.hbm [shape: f32[16,128], index: 12, kind: output, shape index: {}]  }
   0x1   :  { %18 = vsyncpa [#allocation8], 0 }
   0x2   :  { %19 = vsyncpa [#allocation11], 0 }
   0x3   :  { %20 = vsyncpa [#allocation14], 0 }
   0x4   :  { %21 = vsyncpa [#allocation17], 0 }
   0x5   :  { %22 = vsyncpa [#allocation20], 0 }
   0x6   :  { %23 = vsyncpa [#allocation23], 0 }
   0x7   :  { %24 = vsyncpa [#allocation6], 0  ;;  %s20370_s21 = smov [#allocation7]   ;;  %s20060_s25 = scalar_lea.hbm %s22063_s1, 1024 }
   0x8   :  { %s42_s22 = sshll.u32 %s20370_s21, 4  ;;  %p20061_p0 = scmp.ne.s32.totalorder %s22063_s1, %s20060_s25  ;;  %s43_s22 = int_to_ptr.vmem [resolvable:$true] %s42_s22 }
   0x9   :  { %p20064_p1 = scmp.lt.u32.totalorder %s20060_s25, %s22063_s1 }
   0xb   :  { %p20066_p2 = pnand %p20064_p1, %p20061_p0 }
   0xd   :  { %20069 = shalt.err (!%p20066_p2)
}
   0xe   :  { %s20070_s30 = scalar_lea.vmem %s43_s22, 1024  ;;  %p20075_p4 = scmp.lt.s32.totalorder %s43_s22, %s43_s22 }
   0xf   :  { %p20071_p3 = scmp.ne.s32.totalorder %s43_s22, %s20070_s30  ;;  %p20076_p5 = scmp.lt.s32.totalorder %s20070_s30, %s20070_s30 }
  0x11   :  { %p20077_p6 = por %p20076_p5, %p20075_p4 }
  0x13   :  { %p20078_p7 = pnand %p20077_p6, %p20071_p3 }
  0x15   :  { %20081 = shalt.err (!%p20078_p7)
}
  0x16   :  { %s20371_s13 = smov 512   ;;  %s20372_s14 = smov 32  }
  0x17   :  { %48 = dma.hbm_to_vmem [thread:$0]  %s22063_s1, 1024, %s43_s22, [#allocation8], %s20371_s13, %s20371_s13, %s20372_s14  }
  0x18   :  { %s20373_s17 = smov [#allocation10]   ;;  %s20374_s19 = smov [#allocation13]  }
  0x19   :  { %s67_s18 = sshll.u32 %s20373_s17, 4  ;;  %s89_s20 = sshll.u32 %s20374_s19, 4  ;;  %s68_s18 = int_to_ptr.vmem [resolvable:$true] %s67_s18  ;;  %s90_s20 = int_to_ptr.vmem [resolvable:$true] %s89_s20 }
  0x1a   :  { %s20082_s24 = scalar_lea.hbm %s22065_s3, 96 }
  0x1b   :  { %p20083_p8 = scmp.ne.s32.totalorder %s22065_s3, %s20082_s24  ;;  %p20086_p9 = scmp.lt.u32.totalorder %s20082_s24, %s22065_s3 }
  0x1d   :  { %p20088_p10 = pnand %p20086_p9, %p20083_p8 }
  0x1f   :  { %20091 = shalt.err (!%p20088_p10)
}
  0x20   :  { %s20092_s1 = scalar_lea.vmem %s68_s18, 96  ;;  %p20097_p12 = scmp.lt.s32.totalorder %s68_s18, %s68_s18 }
  0x21   :  { %p20093_p11 = scmp.ne.s32.totalorder %s68_s18, %s20092_s1  ;;  %p20098_p13 = scmp.lt.s32.totalorder %s20092_s1, %s20092_s1 }
  0x23   :  { %p20099_p0 = por %p20098_p13, %p20097_p12 }
  0x25   :  { %p20100_p1 = pnand %p20099_p0, %p20093_p11 }
  0x27   :  { %20103 = shalt.err (!%p20100_p1)
}
  0x28   :  { %70 = dma.hbm_to_vmem [thread:$0]  %s22065_s3, 96, %s68_s18, [#allocation11]  }
  0x29   :  { %s20104_s15 = scalar_lea.hbm %s22067_s5, 96 }
  0x2a   :  { %p20105_p2 = scmp.ne.s32.totalorder %s22067_s5, %s20104_s15  ;;  %p20108_p3 = scmp.lt.u32.totalorder %s20104_s15, %s22067_s5 }
  0x2c   :  { %p20110_p4 = pnand %p20108_p3, %p20105_p2 }
  0x2e   :  { %20113 = shalt.err (!%p20110_p4)
}
  0x2f   :  { %s20114_s23 = scalar_lea.vmem %s90_s20, 96  ;;  %p20119_p6 = scmp.lt.s32.totalorder %s90_s20, %s90_s20 }
  0x30   :  { %p20115_p5 = scmp.ne.s32.totalorder %s90_s20, %s20114_s23  ;;  %p20120_p7 = scmp.lt.s32.totalorder %s20114_s23, %s20114_s23 }
  0x32   :  { %p20121_p8 = por %p20120_p7, %p20119_p6 }
  0x34   :  { %p20122_p9 = pnand %p20121_p8, %p20115_p5 }
  0x36   :  { %20125 = shalt.err (!%p20122_p9)
}
  0x37   :  { %92 = dma.hbm_to_vmem [thread:$0]  %s22067_s5, 96, %s90_s20, [#allocation14]  }
  0x38   :  { %s20375_s24 = smov [#allocation16]   ;;  %s20376_s26 = smov [#allocation19]  }
  0x39   :  { %s111_s25 = sshll.u32 %s20375_s24, 4  ;;  %s133_s27 = sshll.u32 %s20376_s26, 4  ;;  %s112_s25 = int_to_ptr.vmem [resolvable:$true] %s111_s25  ;;  %s134_s27 = int_to_ptr.vmem [resolvable:$true] %s133_s27 }
  0x3a   :  { %s20126_s22 = scalar_lea.hbm %s22069_s7, 16 }
  0x3b   :  { %p20127_p10 = scmp.ne.s32.totalorder %s22069_s7, %s20126_s22  ;;  %p20130_p11 = scmp.lt.u32.totalorder %s20126_s22, %s22069_s7 }
  0x3d   :  { %p20132_p12 = pnand %p20130_p11, %p20127_p10 }
  0x3f   :  { %20135 = shalt.err (!%p20132_p12)
}
  0x40   :  { %s20136_s5 = scalar_lea.vmem %s112_s25, 16  ;;  %s20140_s20 = scalar_lea.vmem %s112_s25, 32 }
  0x41   :  { %p20137_p13 = scmp.ne.s32.totalorder %s112_s25, %s20136_s5  ;;  %p20141_p0 = scmp.lt.s32.totalorder %s112_s25, %s112_s25 }
  0x42   :  { %p20142_p1 = scmp.lt.s32.totalorder %s20140_s20, %s20136_s5 }
  0x44   :  { %p20143_p2 = por %p20142_p1, %p20141_p0 }
  0x46   :  { %p20144_p3 = pnand %p20143_p2, %p20137_p13 }
  0x48   :  { %20147 = shalt.err (!%p20144_p3)
}
  0x49   :  { %114 = dma.hbm_to_vmem [thread:$0]  %s22069_s7, 16, %s112_s25, [#allocation17]  }
  0x4a   :  { %s20148_s23 = scalar_lea.hbm %s22071_s9, 112 }
  0x4b   :  { %p20149_p4 = scmp.ne.s32.totalorder %s22071_s9, %s20148_s23  ;;  %p20152_p5 = scmp.lt.u32.totalorder %s20148_s23, %s22071_s9 }
  0x4d   :  { %p20154_p6 = pnand %p20152_p5, %p20149_p4 }
  0x4f   :  { %20157 = shalt.err (!%p20154_p6)
}
  0x50   :  { %s20158_s28 = scalar_lea.vmem %s134_s27, 112  ;;  %s20162_s1 = scalar_lea.vmem %s134_s27, 128 }
  0x51   :  { %p20159_p7 = scmp.ne.s32.totalorder %s134_s27, %s20158_s28  ;;  %p20163_p8 = scmp.lt.s32.totalorder %s134_s27, %s134_s27 }
  0x52   :  { %p20164_p9 = scmp.lt.s32.totalorder %s20162_s1, %s20158_s28 }
  0x54   :  { %p20165_p10 = por %p20164_p9, %p20163_p8 }
  0x56   :  { %p20166_p11 = pnand %p20165_p10, %p20159_p7 }
  0x58   :  { %20169 = shalt.err (!%p20166_p11)
}
  0x59   :  { %136 = dma.hbm_to_vmem [thread:$0]  %s22071_s9, 112, %s134_s27, [#allocation20]  }
  0x5a   :  { %s20377_s22 = smov [#allocation4]   ;;  %s20170_s15 = scalar_lea.hbm %s22062_s0, 2304 }
  0x5b   :  { %s30_s29 = sshll.u32 %s20377_s22, 4  ;;  %p20171_p12 = scmp.ne.s32.totalorder %s22062_s0, %s20170_s15  ;;  %s31_s29 = int_to_ptr.vmem [resolvable:$true] %s30_s29 }
  0x5c   :  { %p20174_p13 = scmp.lt.u32.totalorder %s20170_s15, %s22062_s0 }
  0x5e   :  { %p20176_p0 = pnand %p20174_p13, %p20171_p12 }
  0x60   :  { %20179 = shalt.err (!%p20176_p0)
}
  0x61   :  { %s20180_s19 = scalar_lea.vmem %s31_s29, 2304  ;;  %p20185_p2 = scmp.lt.s32.totalorder %s31_s29, %s31_s29 }
  0x62   :  { %p20181_p1 = scmp.ne.s32.totalorder %s31_s29, %s20180_s19  ;;  %p20186_p3 = scmp.lt.s32.totalorder %s20180_s19, %s20180_s19 }
  0x64   :  { %p20187_p4 = por %p20186_p3, %p20185_p2 }
  0x66   :  { %p20188_p5 = pnand %p20187_p4, %p20181_p1 }
  0x68   :  { %20191 = shalt.err (!%p20188_p5)
}
  0x69   :  { %s20378_s9 = smov 1152   ;;  %s20379_s27 = smov 72  }
  0x6a   :  { %36 = dma.hbm_to_vmem [thread:$0]  %s22062_s0, 2304, %s31_s29, [#allocation5], %s20378_s9, %s20378_s9, %s20379_s27  }
  0x6b   :  { %s20380_s3 = smov [#allocation9]   ;;  %s20192_s28 = scalar_lea.hbm %s22064_s2, 36864 }
  0x6c   :  { %s54_s18 = sshll.u32 %s20380_s3, 4  ;;  %p20193_p6 = scmp.ne.s32.totalorder %s22064_s2, %s20192_s28  ;;  %s55_s18 = int_to_ptr.vmem [resolvable:$true] %s54_s18 }
  0x6d   :  { %p20196_p7 = scmp.lt.u32.totalorder %s20192_s28, %s22064_s2 }
  0x6f   :  { %p20198_p8 = pnand %p20196_p7, %p20193_p6 }
  0x71   :  { %20201 = shalt.err (!%p20198_p8)
}
  0x72   :  { %s20202_s30 = scalar_lea.vmem %s55_s18, 36864  ;;  %p20207_p10 = scmp.lt.s32.totalorder %s55_s18, %s55_s18 }
  0x73   :  { %p20203_p9 = scmp.ne.s32.totalorder %s55_s18, %s20202_s30  ;;  %p20208_p11 = scmp.lt.s32.totalorder %s20202_s30, %s20202_s30 }
  0x75   :  { %p20209_p12 = por %p20208_p11, %p20207_p10 }
  0x77   :  { %p20210_p13 = pnand %p20209_p12, %p20203_p9 }
  0x79   :  { %20213 = shalt.err (!%p20210_p13)
}
  0x7a   :  { %s20381_s0 = smov 384   ;;  %s20382_s29 = smov 24  }
  0x7b   :  { %60 = dma.hbm_to_vmem [thread:$0]  %s22064_s2, 36864, %s55_s18, [#allocation8], %s20381_s0, %s20381_s0, %s20382_s29  }
  0x7c   :  { %s20383_s5 = smov [#allocation12]   ;;  %s20384_s16 = smov [#allocation15]  }
  0x7d   :  { %s76_s20 = sshll.u32 %s20383_s5, 4  ;;  %s98_s17 = sshll.u32 %s20384_s16, 4  ;;  %s77_s20 = int_to_ptr.vmem [resolvable:$true] %s76_s20  ;;  %s99_s17 = int_to_ptr.vmem [resolvable:$true] %s98_s17 }
  0x7e   :  { %s20214_s27 = scalar_lea.hbm %s22066_s4, 12288 }
  0x7f   :  { %p20215_p0 = scmp.ne.s32.totalorder %s22066_s4, %s20214_s27  ;;  %p20218_p1 = scmp.lt.u32.totalorder %s20214_s27, %s22066_s4 }
  0x81   :  { %p20220_p2 = pnand %p20218_p1, %p20215_p0 }
  0x83   :  { %20223 = shalt.err (!%p20220_p2)
}
  0x84   :  { %s20224_s2 = scalar_lea.vmem %s77_s20, 12288  ;;  %p20229_p4 = scmp.lt.s32.totalorder %s77_s20, %s77_s20 }
  0x85   :  { %p20225_p3 = scmp.ne.s32.totalorder %s77_s20, %s20224_s2  ;;  %p20230_p5 = scmp.lt.s32.totalorder %s20224_s2, %s20224_s2 }
  0x87   :  { %p20231_p6 = por %p20230_p5, %p20229_p4 }
  0x89   :  { %p20232_p7 = pnand %p20231_p6, %p20225_p3 }
  0x8b   :  { %20235 = shalt.err (!%p20232_p7)
}
  0x8c   :  { %82 = dma.hbm_to_vmem [thread:$0]  %s22066_s4, 12288, %s77_s20, [#allocation11], %s20381_s0, %s20381_s0, %s20382_s29  }
  0x8d   :  { %s20236_s7 = scalar_lea.hbm %s22068_s6, 2048 }
  0x8e   :  { %p20237_p8 = scmp.ne.s32.totalorder %s22068_s6, %s20236_s7  ;;  %p20240_p9 = scmp.lt.u32.totalorder %s20236_s7, %s22068_s6 }
  0x90   :  { %p20242_p10 = pnand %p20240_p9, %p20237_p8 }
  0x92   :  { %20245 = shalt.err (!%p20242_p10)
}
  0x93   :  { %s20246_s15 = scalar_lea.vmem %s99_s17, 2048  ;;  %p20251_p12 = scmp.lt.s32.totalorder %s99_s17, %s99_s17 }
  0x94   :  { %p20247_p11 = scmp.ne.s32.totalorder %s99_s17, %s20246_s15  ;;  %p20252_p13 = scmp.lt.s32.totalorder %s20246_s15, %s20246_s15 }
  0x96   :  { %p20253_p0 = por %p20252_p13, %p20251_p12 }
  0x98   :  { %p20254_p1 = pnand %p20253_p0, %p20247_p11 }
  0x9a   :  { %20257 = shalt.err (!%p20254_p1)
}
  0x9b   :  { %s20385_s4 = smov 64   ;;  %s20386_s0 = smov 4  }
  0x9c   :  { %104 = dma.hbm_to_vmem [thread:$0]  %s22068_s6, 2048, %s99_s17, [#allocation14], %s20385_s4, %s20385_s4, %s20386_s0  }
  0x9d   :  { %s20387_s20 = smov [#allocation18]   ;;  %s20258_s27 = scalar_lea.hbm %s22070_s8, 50176 }
  0x9e   :  { %s120_s16 = sshll.u32 %s20387_s20, 4  ;;  %p20259_p2 = scmp.ne.s32.totalorder %s22070_s8, %s20258_s27  ;;  %s121_s16 = int_to_ptr.vmem [resolvable:$true] %s120_s16 }
  0x9f   :  { %p20262_p3 = scmp.lt.u32.totalorder %s20258_s27, %s22070_s8 }
  0xa1   :  { %p20264_p4 = pnand %p20262_p3, %p20259_p2 }
  0xa3   :  { %20267 = shalt.err (!%p20264_p4)
}
  0xa4   :  { %s20268_s2 = scalar_lea.vmem %s121_s16, 50176  ;;  %p20273_p6 = scmp.lt.s32.totalorder %s121_s16, %s121_s16 }
  0xa5   :  { %p20269_p5 = scmp.ne.s32.totalorder %s121_s16, %s20268_s2  ;;  %p20274_p7 = scmp.lt.s32.totalorder %s20268_s2, %s20268_s2 }
  0xa7   :  { %p20275_p8 = por %p20274_p7, %p20273_p6 }
  0xa9   :  { %p20276_p9 = pnand %p20275_p8, %p20269_p5 }
  0xab   :  { %20279 = shalt.err (!%p20276_p9)
}
  0xac   :  { %s20388_s6 = smov 448   ;;  %s20389_s17 = smov 28  }
  0xad   :  { %126 = dma.hbm_to_vmem [thread:$0]  %s22070_s8, 50176, %s121_s16, [#allocation17], %s20388_s6, %s20388_s6, %s20389_s17  }
  0xae   :  { %s20390_s28 = smov [#allocation21]   ;;  %s20391_s7 = smov [#allocation22]  }
  0xaf   :  { %s142_s1 = sshll.u32 %s20390_s28, 4  ;;  %s155_s25 = sshll.u32 %s20391_s7, 4  ;;  %s143_s1 = int_to_ptr.vmem [resolvable:$true] %s142_s1  ;;  %s156_s25 = int_to_ptr.vmem [resolvable:$true] %s155_s25 }
  0xb0   :  { %s20280_s13 = scalar_lea.hbm %s22072_s10, 7168 }
  0xb1   :  { %p20281_p10 = scmp.ne.s32.totalorder %s22072_s10, %s20280_s13  ;;  %p20284_p11 = scmp.lt.u32.totalorder %s20280_s13, %s22072_s10 }
  0xb3   :  { %p20286_p12 = pnand %p20284_p11, %p20281_p10 }
  0xb5   :  { %20289 = shalt.err (!%p20286_p12)
}
  0xb6   :  { %s20290_s8 = scalar_lea.vmem %s143_s1, 7168  ;;  %p20295_p0 = scmp.lt.s32.totalorder %s143_s1, %s143_s1 }
  0xb7   :  { %p20291_p13 = scmp.ne.s32.totalorder %s143_s1, %s20290_s8  ;;  %p20296_p1 = scmp.lt.s32.totalorder %s20290_s8, %s20290_s8 }
  0xb9   :  { %p20297_p2 = por %p20296_p1, %p20295_p0 }
  0xbb   :  { %p20298_p3 = pnand %p20297_p2, %p20291_p13 }
  0xbd   :  { %20301 = shalt.err (!%p20298_p3)
}
  0xbe   :  { %148 = dma.hbm_to_vmem [thread:$0]  %s22072_s10, 7168, %s143_s1, [#allocation20], %s20385_s4, %s20385_s4, %s20386_s0  }
  0xbf   :  { %s20302_s21 = scalar_lea.hbm %s22073_s11, 16 }
  0xc0   :  { %p20303_p4 = scmp.ne.s32.totalorder %s22073_s11, %s20302_s21  ;;  %p20306_p5 = scmp.lt.u32.totalorder %s20302_s21, %s22073_s11 }
  0xc2   :  { %p20308_p6 = pnand %p20306_p5, %p20303_p4 }
  0xc4   :  { %20311 = shalt.err (!%p20308_p6)
}
  0xc5   :  { %s20312_s6 = scalar_lea.vmem %s156_s25, 16  ;;  %s20316_s17 = scalar_lea.vmem %s156_s25, 32 }
  0xc6   :  { %p20313_p7 = scmp.ne.s32.totalorder %s156_s25, %s20312_s6  ;;  %p20317_p8 = scmp.lt.s32.totalorder %s156_s25, %s156_s25 }
  0xc7   :  { %p20318_p9 = scmp.lt.s32.totalorder %s20316_s17, %s20312_s6 }
  0xc9   :  { %p20319_p10 = por %p20318_p9, %p20317_p8 }
  0xcb   :  { %p20320_p11 = pnand %p20319_p10, %p20313_p7 }
  0xcd   :  { %20323 = shalt.err (!%p20320_p11)
}
  0xce   :  { %158 = dma.hbm_to_vmem [thread:$0]  %s22073_s11, 16, %s156_s25, [#allocation23]  }
  0xcf   :  { %20350 = dma.done.wait [#allocation5], 2304  }
  0xd0   :  { %20351 = vsyncadd [#allocation5], 4294964992 }
  0xd1   :  { %20352 = dma.done.wait [#allocation8], 37888  }
  0xd2   :  { %20353 = vsyncadd [#allocation8], 4294929408 }
  0xd3   :  { %20354 = dma.done.wait [#allocation11], 12384  }
  0xd4   :  { %20355 = vsyncadd [#allocation11], 4294954912 }
  0xd5   :  { %20356 = dma.done.wait [#allocation14], 2144  }
  0xd6   :  { %20357 = vsyncadd [#allocation14], 4294965152 }
  0xd7   :  { %20358 = dma.done.wait [#allocation17], 50192  }
  0xd8   :  { %20359 = vsyncadd [#allocation17], 4294917104 }
  0xd9   :  { %20360 = dma.done.wait [#allocation20], 7280  }
  0xda   :  { %20361 = vsyncadd [#allocation20], 4294960016 }
  0xdb   :  { %20362 = dma.done.wait [#allocation23], 16  }
  0xdc   :  { %20363 = vsyncadd [#allocation23], 4294967280  ;;  %v16510_v0 = vld [vmem:[#allocation16] ss:$0 sm:$0xff]  ;;  %v17712_v1 = vld [vmem:[#allocation9 + $0x4] ss:$24 sps:$4 sm:$0xff]  }
  0xdd   :  { %10154 = vst [vmem:[#allocation3] sm:$0xff] %v16510_v0  ;;  %10155 = vst [vmem:[#allocation3 + $0x8] sm:$0xff] %v16510_v0  ;;  %v17714_v2 = vld [vmem:[#allocation9 + $0xc] ss:$24 sps:$4 sm:$0xff]   ;;  %v17716_v3 = vld [vmem:[#allocation9] ss:$24 sps:$4 sm:$0xff]   ;;  %1992 = vmatprep.subr.bf16.mxu0 %v17712_v1 }
  0xde   :  { %10156 = vst [vmem:[#allocation3 + $0x10] sm:$0xff] %v16510_v0  ;;  %10157 = vst [vmem:[#allocation3 + $0x18] sm:$0xff] %v16510_v0  ;;  %v17717_v4 = vld [vmem:[#allocation9 + $0x8] ss:$24 sps:$4 sm:$0xff]   ;;  %v17718_v5 = vld [vmem:[#allocation9 + $0x34] ss:$24 sps:$4 sm:$0xff]   ;;  %2121 = vmatprep.subr.bf16.mxu1 %v17714_v2  ;;  %1993 = vmatpush1.bf16.msra.mxu0 %v17716_v3 }
  0xdf   :  { %10158 = vst [vmem:[#allocation3 + $0x20] sm:$0xff] %v16510_v0  ;;  %10159 = vst [vmem:[#allocation3 + $0x28] sm:$0xff] %v16510_v0  ;;  %v17720_v6 = vld [vmem:[#allocation9 + $0x3c] ss:$24 sps:$4 sm:$0xff]   ;;  %2122 = vmatpush1.bf16.msra.mxu1 %v17717_v4  ;;  %1994 = vmatprep.subr.bf16.mxu0 %v17718_v5  ;;  %v17722_v7 = vld [vmem:[#allocation9 + $0x30] ss:$24 sps:$4 sm:$0xff]  }
  0xe0   :  { %10160 = vst [vmem:[#allocation3 + $0x30] sm:$0xff] %v16510_v0  ;;  %10161 = vst [vmem:[#allocation3 + $0x38] sm:$0xff] %v16510_v0  ;;  %v17723_v8 = vld [vmem:[#allocation9 + $0x38] ss:$24 sps:$4 sm:$0xff]   ;;  %2123 = vmatprep.subr.bf16.mxu1 %v17720_v6  ;;  %v17724_v9 = vld [vmem:[#allocation9 + $0x64] ss:$24 sps:$4 sm:$0xff]  }
  0xe1   :  { %10162 = vst [vmem:[#allocation3 + $0x40] sm:$0xff] %v16510_v0  ;;  %10163 = vst [vmem:[#allocation3 + $0x48] sm:$0xff] %v16510_v0  ;;  %v17726_v10 = vld [vmem:[#allocation9 + $0x6c] ss:$24 sps:$4 sm:$0xff]   ;;  %v17728_v11 = vld [vmem:[#allocation9 + $0x60] ss:$24 sps:$4 sm:$0xff]  }
  0xe2   :  { %10164 = vst [vmem:[#allocation3 + $0x50] sm:$0xff] %v16510_v0  ;;  %10165 = vst [vmem:[#allocation3 + $0x58] sm:$0xff] %v16510_v0  ;;  %1995 = vmatpush1.bf16.msra.mxu0 %v17722_v7  ;;  %v17729_v12 = vld [vmem:[#allocation9 + $0x68] ss:$24 sps:$4 sm:$0xff]   ;;  %v17730_v13 = vld [vmem:[#allocation9 + $0x94] ss:$24 sps:$4 sm:$0xff]  }
  0xe3   :  { %10166 = vst [vmem:[#allocation3 + $0x60] sm:$0xff] %v16510_v0  ;;  %10167 = vst [vmem:[#allocation3 + $0x68] sm:$0xff] %v16510_v0  ;;  %2124 = vmatpush1.bf16.msra.mxu1 %v17723_v8  ;;  %1996 = vmatprep.subr.bf16.mxu0 %v17724_v9  ;;  %v17732_v14 = vld [vmem:[#allocation9 + $0x9c] ss:$24 sps:$4 sm:$0xff]   ;;  %v17734_v15 = vld [vmem:[#allocation9 + $0x90] ss:$24 sps:$4 sm:$0xff]  }
  0xe4   :  { %2125 = vmatprep.subr.bf16.mxu1 %v17726_v10  ;;  %v17735_v16 = vld [vmem:[#allocation9 + $0x98] ss:$24 sps:$4 sm:$0xff]   ;;  %v17736_v17 = vld [vmem:[#allocation9 + $0xc4] ss:$24 sps:$4 sm:$0xff]   ;;  %v17741_v20 = vld [vmem:[#allocation9 + $0xc8] ss:$24 sps:$4 sm:$0xff]  }
  0xe5   :  { %v17738_v18 = vld [vmem:[#allocation9 + $0xcc] ss:$24 sps:$4 sm:$0xff]   ;;  %v17740_v19 = vld [vmem:[#allocation9 + $0xc0] ss:$24 sps:$4 sm:$0xff]   ;;  %v17744_v22 = vld [vmem:[#allocation9 + $0xfc] ss:$24 sps:$4 sm:$0xff]  }
  0xe6   :  { %1997 = vmatpush1.bf16.msra.mxu0 %v17728_v11  ;;  %v17742_v21 = vld [vmem:[#allocation9 + $0xf4] ss:$24 sps:$4 sm:$0xff]   ;;  %v17746_v23 = vld [vmem:[#allocation9 + $0xf0] ss:$24 sps:$4 sm:$0xff]   ;;  %v17748_v25 = vld [vmem:[#allocation9 + $0x124] ss:$24 sps:$4 sm:$0xff]  }
  0xe7   :  { %2126 = vmatpush1.bf16.msra.mxu1 %v17729_v12  ;;  %1998 = vmatprep.subr.bf16.mxu0 %v17730_v13  ;;  %v17747_v24 = vld [vmem:[#allocation9 + $0xf8] ss:$24 sps:$4 sm:$0xff]   ;;  %v17750_v26 = vld [vmem:[#allocation9 + $0x12c] ss:$24 sps:$4 sm:$0xff]   ;;  %v17753_v28 = vld [vmem:[#allocation9 + $0x128] ss:$24 sps:$4 sm:$0xff]  }
  0xe8   :  { %2127 = vmatprep.subr.bf16.mxu1 %v17732_v14  ;;  %v17752_v27 = vld [vmem:[#allocation9 + $0x120] ss:$24 sps:$4 sm:$0xff]   ;;  %v17754_v29 = vld [vmem:[#allocation9 + $0x154] ss:$24 sps:$4 sm:$0xff]   ;;  %v17758_v31 = vld [vmem:[#allocation9 + $0x150] ss:$24 sps:$4 sm:$0xff]  }
  0xe9   :  { %v17756_v30 = vld [vmem:[#allocation9 + $0x15c] ss:$24 sps:$4 sm:$0xff]   ;;  %v17759_v32 = vld [vmem:[#allocation9 + $0x158] ss:$24 sps:$4 sm:$0xff]   ;;  %v17762_v34 = vld [vmem:[#allocation9 + $0x18c] ss:$24 sps:$4 sm:$0xff]  }
  0xea   :  { %1999 = vmatpush1.bf16.msra.mxu0 %v17734_v15  ;;  %v17760_v33 = vld [vmem:[#allocation9 + $0x184] ss:$24 sps:$4 sm:$0xff]   ;;  %v17764_v35 = vld [vmem:[#allocation9 + $0x180] ss:$24 sps:$4 sm:$0xff]   ;;  %v17766_v37 = vld [vmem:[#allocation9 + $0x1b4] ss:$24 sps:$4 sm:$0xff]  }
  0xeb   :  { %2128 = vmatpush1.bf16.msra.mxu1 %v17735_v16  ;;  %2000 = vmatprep.subr.bf16.mxu0 %v17736_v17  ;;  %v17765_v36 = vld [vmem:[#allocation9 + $0x188] ss:$24 sps:$4 sm:$0xff]   ;;  %v17768_v38 = vld [vmem:[#allocation9 + $0x1bc] ss:$24 sps:$4 sm:$0xff]   ;;  %v17771_v40 = vld [vmem:[#allocation9 + $0x1b8] ss:$24 sps:$4 sm:$0xff]  }
  0xec   :  { %2129 = vmatprep.subr.bf16.mxu1 %v17738_v18  ;;  %v17770_v39 = vld [vmem:[#allocation9 + $0x1b0] ss:$24 sps:$4 sm:$0xff]   ;;  %v17772_v41 = vld [vmem:[#allocation9 + $0x1e4] ss:$24 sps:$4 sm:$0xff]   ;;  %v17776_v43 = vld [vmem:[#allocation9 + $0x1e0] ss:$24 sps:$4 sm:$0xff]  }
  0xed   :  { %v17774_v42 = vld [vmem:[#allocation9 + $0x1ec] ss:$24 sps:$4 sm:$0xff]   ;;  %v17777_v44 = vld [vmem:[#allocation9 + $0x1e8] ss:$24 sps:$4 sm:$0xff]   ;;  %v17780_v46 = vld [vmem:[#allocation9 + $0x21c] ss:$24 sps:$4 sm:$0xff]  }
  0xee   :  { %2001 = vmatpush1.bf16.msra.mxu0 %v17740_v19  ;;  %v17778_v45 = vld [vmem:[#allocation9 + $0x214] ss:$24 sps:$4 sm:$0xff]   ;;  %v17782_v47 = vld [vmem:[#allocation9 + $0x210] ss:$24 sps:$4 sm:$0xff]   ;;  %v17784_v50 = vld [vmem:[#allocation9 + $0x244] ss:$24 sps:$4 sm:$0xff]  }
  0xef   :  { %2130 = vmatpush1.bf16.msra.mxu1 %v17741_v20  ;;  %2002 = vmatprep.subr.bf16.mxu0 %v17742_v21  ;;  %v17808_v48 = vld [vmem:[#allocation4 + $0x4] ss:$72 sps:$4 sm:$0xff]   ;;  %v17783_v49 = vld [vmem:[#allocation9 + $0x218] ss:$24 sps:$4 sm:$0xff]   ;;  %v17786_v51 = vld [vmem:[#allocation9 + $0x24c] ss:$24 sps:$4 sm:$0xff]  }
  0xf0   :  { %2131 = vmatprep.subr.bf16.mxu1 %v17744_v22  ;;  %2024 = vmatprep.mubr.bf16.mxu0 %v17808_v48  ;;  %v17788_v52 = vld [vmem:[#allocation9 + $0x240] ss:$24 sps:$4 sm:$0xff]   ;;  %v17790_v54 = vld [vmem:[#allocation9 + $0x274] ss:$24 sps:$4 sm:$0xff]   ;;  %v17794_v56 = vld [vmem:[#allocation9 + $0x270] ss:$24 sps:$4 sm:$0xff]  }
  0xf1   :  { %2153 = vmatprep.mubr.bf16.mxu1 %v17808_v48  ;;  %v17789_v53 = vld [vmem:[#allocation9 + $0x248] ss:$24 sps:$4 sm:$0xff]   ;;  %v17792_v55 = vld [vmem:[#allocation9 + $0x27c] ss:$24 sps:$4 sm:$0xff]   ;;  %v17795_v57 = vld [vmem:[#allocation9 + $0x278] ss:$24 sps:$4 sm:$0xff]  }
  0xf2   :  { %2003 = vmatpush1.bf16.msra.mxu0 %v17746_v23  ;;  %v17796_v58 = vld [vmem:[#allocation9 + $0x2a4] ss:$24 sps:$4 sm:$0xff]   ;;  %v17800_v60 = vld [vmem:[#allocation9 + $0x2a0] ss:$24 sps:$4 sm:$0xff]   ;;  %v17802_v62 = vld [vmem:[#allocation9 + $0x2d4] ss:$24 sps:$4 sm:$0xff]  }
  0xf3   :  { %2132 = vmatpush1.bf16.msra.mxu1 %v17747_v24  ;;  %2004 = vmatprep.subr.bf16.mxu0 %v17748_v25  ;;  %v17798_v59 = vld [vmem:[#allocation9 + $0x2ac] ss:$24 sps:$4 sm:$0xff]   ;;  %v17801_v61 = vld [vmem:[#allocation9 + $0x2a8] ss:$24 sps:$4 sm:$0xff]   ;;  %v17804_v63 = vld [vmem:[#allocation9 + $0x2dc] ss:$24 sps:$4 sm:$0xff]  }
  0xf4   :  { %2133 = vmatprep.subr.bf16.mxu1 %v17750_v26  ;;  %v17806_v0 = vld [vmem:[#allocation9 + $0x2d0] ss:$24 sps:$4 sm:$0xff]   ;;  %v17812_v2 = vld [vmem:[#allocation9 + $0x304] ss:$24 sps:$4 sm:$0xff]   ;;  %v17810_v5 = vld [vmem:[#allocation9 + $0x300] ss:$24 sps:$4 sm:$0xff]  }
  0xf5   :  { %v17807_v1 = vld [vmem:[#allocation9 + $0x2d8] ss:$24 sps:$4 sm:$0xff]   ;;  %v17815_v3 = vld [vmem:[#allocation9 + $0x30c] ss:$24 sps:$4 sm:$0xff]   ;;  %v17813_v6 = vld [vmem:[#allocation9 + $0x308] ss:$24 sps:$4 sm:$0xff]  }
  0xf6   :  { %2005 = vmatpush1.bf16.msra.mxu0 %v17752_v27  ;;  %v17816_v4 = vld [vmem:[#allocation4] ss:$72 sps:$4 sm:$0xff]   ;;  %v17819_v7 = vld [vmem:[#allocation9 + $0x334] ss:$24 sps:$4 sm:$0xff]   ;;  %v17825_v11 = vld [vmem:[#allocation9 + $0x364] ss:$24 sps:$4 sm:$0xff]  }
  0xf7   :  { %2134 = vmatpush1.bf16.msra.mxu1 %v17753_v28  ;;  %2006 = vmatprep.subr.bf16.mxu0 %v17754_v29  ;;  %v17822_v8 = vld [vmem:[#allocation9 + $0x33c] ss:$24 sps:$4 sm:$0xff]   ;;  %v17817_v9 = vld [vmem:[#allocation9 + $0x330] ss:$24 sps:$4 sm:$0xff]   ;;  %v17828_v12 = vld [vmem:[#allocation9 + $0x36c] ss:$24 sps:$4 sm:$0xff]  }
  0xf8   :  { %2135 = vmatprep.subr.bf16.mxu1 %v17756_v30  ;;  %v17820_v10 = vld [vmem:[#allocation9 + $0x338] ss:$24 sps:$4 sm:$0xff]   ;;  %v17826_v14 = vld [vmem:[#allocation9 + $0x368] ss:$24 sps:$4 sm:$0xff]   ;;  %v17831_v15 = vld [vmem:[#allocation9 + $0x394] ss:$24 sps:$4 sm:$0xff]  }
  0xf9   :  { %v17823_v13 = vld [vmem:[#allocation9 + $0x360] ss:$24 sps:$4 sm:$0xff]   ;;  %v17834_v16 = vld [vmem:[#allocation9 + $0x39c] ss:$24 sps:$4 sm:$0xff]   ;;  %v17829_v17 = vld [vmem:[#allocation9 + $0x390] ss:$24 sps:$4 sm:$0xff]  }
  0xfa   :  { %2007 = vmatpush1.bf16.msra.mxu0 %v17758_v31  ;;  %v17832_v18 = vld [vmem:[#allocation9 + $0x398] ss:$24 sps:$4 sm:$0xff]   ;;  %v17837_v19 = vld [vmem:[#allocation9 + $0x3c4] ss:$24 sps:$4 sm:$0xff]   ;;  %v17838_v22 = vld [vmem:[#allocation9 + $0x3c8] ss:$24 sps:$4 sm:$0xff]  }
  0xfb   :  { %2136 = vmatpush1.bf16.msra.mxu1 %v17759_v32  ;;  %2008 = vmatprep.subr.bf16.mxu0 %v17760_v33  ;;  %v17840_v20 = vld [vmem:[#allocation9 + $0x3cc] ss:$24 sps:$4 sm:$0xff]   ;;  %v17835_v21 = vld [vmem:[#allocation9 + $0x3c0] ss:$24 sps:$4 sm:$0xff]   ;;  %v17846_v24 = vld [vmem:[#allocation9 + $0x3fc] ss:$24 sps:$4 sm:$0xff]  }
  0xfc   :  { %2137 = vmatprep.subr.bf16.mxu1 %v17762_v34  ;;  %v17843_v23 = vld [vmem:[#allocation9 + $0x3f4] ss:$24 sps:$4 sm:$0xff]   ;;  %v17841_v25 = vld [vmem:[#allocation9 + $0x3f0] ss:$24 sps:$4 sm:$0xff]   ;;  %v17849_v27 = vld [vmem:[#allocation9 + $0x424] ss:$24 sps:$4 sm:$0xff]  }
  0xfd   :  { %v17844_v26 = vld [vmem:[#allocation9 + $0x3f8] ss:$24 sps:$4 sm:$0xff]   ;;  %v17852_v28 = vld [vmem:[#allocation9 + $0x42c] ss:$24 sps:$4 sm:$0xff]   ;;  %v17850_v31 = vld [vmem:[#allocation9 + $0x428] ss:$24 sps:$4 sm:$0xff]  }
  0xfe   :  { %2009 = vmatpush1.bf16.msra.mxu0 %v17764_v35  ;;  %v17847_v29 = vld [vmem:[#allocation9 + $0x420] ss:$24 sps:$4 sm:$0xff]   ;;  %v17909_v30 = vld [vmem:[#allocation4 + $0xc] ss:$72 sps:$4 sm:$0xff]   ;;  %v17855_v32 = vld [vmem:[#allocation9 + $0x454] ss:$24 sps:$4 sm:$0xff]  }
  0xff   :  { %2138 = vmatpush1.bf16.msra.mxu1 %v17765_v36  ;;  %2010 = vmatprep.subr.bf16.mxu0 %v17766_v37  ;;  %v17858_v33 = vld [vmem:[#allocation9 + $0x45c] ss:$24 sps:$4 sm:$0xff]   ;;  %v17853_v34 = vld [vmem:[#allocation9 + $0x450] ss:$24 sps:$4 sm:$0xff]   ;;  %v17864_v37 = vld [vmem:[#allocation9 + $0x48c] ss:$24 sps:$4 sm:$0xff]  }
 0x100   :  { %2139 = vmatprep.subr.bf16.mxu1 %v17768_v38  ;;  %v17856_v35 = vld [vmem:[#allocation9 + $0x458] ss:$24 sps:$4 sm:$0xff]   ;;  %v17861_v36 = vld [vmem:[#allocation9 + $0x484] ss:$24 sps:$4 sm:$0xff]   ;;  %v17879_v48 = vld [vmem:[#allocation9 + $0x514] ss:$24 sps:$4 sm:$0xff]  }
 0x101   :  { %v17859_v38 = vld [vmem:[#allocation9 + $0x480] ss:$24 sps:$4 sm:$0xff]   ;;  %vm2385_vm14 = vcmask 785408   ;;  %s20392_s11 = smov 96   ;;  %vm2403_vm15 = vcmask 523264  }
 0x102   :  { %2011 = vmatpush1.bf16.msra.mxu0 %v17770_v39  ;;  %v17862_v39 = vld [vmem:[#allocation9 + $0x488] ss:$24 sps:$4 sm:$0xff]  }
 0x103   :  { %2140 = vmatpush1.bf16.msra.mxu1 %v17771_v40  ;;  %2012 = vmatprep.subr.bf16.mxu0 %v17772_v41  ;;  %v17867_v40 = vld [vmem:[#allocation9 + $0x4b4] ss:$24 sps:$4 sm:$0xff]  }
 0x104   :  { %2141 = vmatprep.subr.bf16.mxu1 %v17774_v42  ;;  %v17870_v41 = vld [vmem:[#allocation9 + $0x4bc] ss:$24 sps:$4 sm:$0xff]   ;;  %v17865_v42 = vld [vmem:[#allocation9 + $0x4b0] ss:$24 sps:$4 sm:$0xff]  }
 0x106   :  { %2013 = vmatpush1.bf16.msra.mxu0 %v17776_v43  ;;  %v17868_v43 = vld [vmem:[#allocation9 + $0x4b8] ss:$24 sps:$4 sm:$0xff]  }
 0x107   :  { %2142 = vmatpush1.bf16.msra.mxu1 %v17777_v44  ;;  %2014 = vmatprep.subr.bf16.mxu0 %v17778_v45  ;;  %v17873_v44 = vld [vmem:[#allocation9 + $0x4e4] ss:$24 sps:$4 sm:$0xff]  }
 0x108   :  { %2143 = vmatprep.subr.bf16.mxu1 %v17780_v46  ;;  %v17876_v45 = vld [vmem:[#allocation9 + $0x4ec] ss:$24 sps:$4 sm:$0xff]   ;;  %v17871_v46 = vld [vmem:[#allocation9 + $0x4e0] ss:$24 sps:$4 sm:$0xff]  }
 0x10a   :  { %2015 = vmatpush1.bf16.msra.mxu0 %v17782_v47  ;;  %v17874_v47 = vld [vmem:[#allocation9 + $0x4e8] ss:$24 sps:$4 sm:$0xff]  }
 0x10b   :  { %2144 = vmatpush1.bf16.msra.mxu1 %v17783_v49  ;;  %2016 = vmatprep.subr.bf16.mxu0 %v17784_v50  ;;  %v17882_v49 = vld [vmem:[#allocation9 + $0x51c] ss:$24 sps:$4 sm:$0xff]   ;;  %v17877_v50 = vld [vmem:[#allocation9 + $0x510] ss:$24 sps:$4 sm:$0xff]  }
 0x10c   :  { %2145 = vmatprep.subr.bf16.mxu1 %v17786_v51  ;;  %v17880_v51 = vld [vmem:[#allocation9 + $0x518] ss:$24 sps:$4 sm:$0xff]  }
 0x10e   :  { %2017 = vmatpush1.bf16.msra.mxu0 %v17788_v52  ;;  %v17885_v52 = vld [vmem:[#allocation9 + $0x544] ss:$24 sps:$4 sm:$0xff]  }
 0x10f   :  { %2146 = vmatpush1.bf16.msra.mxu1 %v17789_v53  ;;  %2018 = vmatprep.subr.bf16.mxu0 %v17790_v54  ;;  %v17888_v53 = vld [vmem:[#allocation9 + $0x54c] ss:$24 sps:$4 sm:$0xff]   ;;  %v17883_v54 = vld [vmem:[#allocation9 + $0x540] ss:$24 sps:$4 sm:$0xff]  }
 0x110   :  { %2147 = vmatprep.subr.bf16.mxu1 %v17792_v55  ;;  %v17886_v55 = vld [vmem:[#allocation9 + $0x548] ss:$24 sps:$4 sm:$0xff]  }
 0x112   :  { %2019 = vmatpush1.bf16.msra.mxu0 %v17794_v56  ;;  %v17891_v56 = vld [vmem:[#allocation9 + $0x574] ss:$24 sps:$4 sm:$0xff]  }
 0x113   :  { %2148 = vmatpush1.bf16.msra.mxu1 %v17795_v57  ;;  %2020 = vmatprep.subr.bf16.mxu0 %v17796_v58  ;;  %v17894_v57 = vld [vmem:[#allocation9 + $0x57c] ss:$24 sps:$4 sm:$0xff]   ;;  %v17889_v58 = vld [vmem:[#allocation9 + $0x570] ss:$24 sps:$4 sm:$0xff]  }
 0x114   :  { %2149 = vmatprep.subr.bf16.mxu1 %v17798_v59  ;;  %v17892_v59 = vld [vmem:[#allocation9 + $0x578] ss:$24 sps:$4 sm:$0xff]  }
 0x116   :  { %2021 = vmatpush1.bf16.msra.mxu0 %v17800_v60  ;;  %v17897_v60 = vld [vmem:[#allocation9 + $0x5a4] ss:$24 sps:$4 sm:$0xff]  }
 0x117   :  { %2150 = vmatpush1.bf16.msra.mxu1 %v17801_v61  ;;  %2022 = vmatprep.subr.bf16.mxu0 %v17802_v62  ;;  %v17900_v61 = vld [vmem:[#allocation9 + $0x5ac] ss:$24 sps:$4 sm:$0xff]   ;;  %v17895_v62 = vld [vmem:[#allocation9 + $0x5a0] ss:$24 sps:$4 sm:$0xff]  }
 0x118   :  { %2151 = vmatprep.subr.bf16.mxu1 %v17804_v63  ;;  %v17898_v63 = vld [vmem:[#allocation9 + $0x5a8] ss:$24 sps:$4 sm:$0xff]  }
 0x11a   :  { %2023 = vmatpush1.bf16.msra.mxu0 %v17806_v0  ;;  %v17903_v0 = vld [vmem:[#allocation9 + $0x5d4] ss:$24 sps:$4 sm:$0xff]  }
 0x11b   :  { %2152 = vmatpush1.bf16.msra.mxu1 %v17807_v1  ;;  %2035 = vmatprep.subr.bf16.mxu0 %v17812_v2  ;;  %v17906_v1 = vld [vmem:[#allocation9 + $0x5dc] ss:$24 sps:$4 sm:$0xff]   ;;  %v17901_v2 = vld [vmem:[#allocation9 + $0x5d0] ss:$24 sps:$4 sm:$0xff]  }
 0x11c   :  { %2164 = vmatprep.subr.bf16.mxu1 %v17815_v3  ;;  %v17904_v3 = vld [vmem:[#allocation9 + $0x5d8] ss:$24 sps:$4 sm:$0xff]  }
 0x11d   :  { %2025 = vmatmul.mubr.bf16.vlgmr.msra.gmra.mrb[0].mxu0 %v17816_v4 }
 0x11e   :  { %2036 = vmatpush1.bf16.msra.mxu0 %v17810_v5  ;;  %2154 = vmatmul.mubr.bf16.vlgmr.msra.gmra.mrb[0].mxu1 %v17816_v4  ;;  %v17912_v4 = vld [vmem:[#allocation9 + $0x604] ss:$24 sps:$4 sm:$0xff]  }
 0x11f   :  { %2165 = vmatpush1.bf16.msra.mxu1 %v17813_v6  ;;  %2037 = vmatprep.subr.bf16.mxu0 %v17819_v7  ;;  %v17915_v5 = vld [vmem:[#allocation9 + $0x60c] ss:$24 sps:$4 sm:$0xff]   ;;  %v17907_v6 = vld [vmem:[#allocation4 + $0x8] ss:$72 sps:$4 sm:$0xff]  }
 0x120   :  { %2166 = vmatprep.subr.bf16.mxu1 %v17822_v8  ;;  %2067 = vmatprep.mubr.bf16.mxu0 %v17909_v30  ;;  %v17910_v7 = vld [vmem:[#allocation9 + $0x600] ss:$24 sps:$4 sm:$0xff]  }
 0x121   :  { %2196 = vmatprep.mubr.bf16.mxu1 %v17909_v30  ;;  %v17913_v8 = vld [vmem:[#allocation9 + $0x608] ss:$24 sps:$4 sm:$0xff]   ;;  %v17948_v30 = vld [vmem:[#allocation9 + $0x724] ss:$24 sps:$4 sm:$0xff]  }
 0x122   :  { %2038 = vmatpush1.bf16.msra.mxu0 %v17817_v9  ;;  %v17918_v9 = vld [vmem:[#allocation9 + $0x634] ss:$24 sps:$4 sm:$0xff]  }
 0x123   :  { %2167 = vmatpush1.bf16.msra.mxu1 %v17820_v10  ;;  %2039 = vmatprep.subr.bf16.mxu0 %v17825_v11  ;;  %v17921_v10 = vld [vmem:[#allocation9 + $0x63c] ss:$24 sps:$4 sm:$0xff]   ;;  %v17916_v11 = vld [vmem:[#allocation9 + $0x630] ss:$24 sps:$4 sm:$0xff]  }
 0x124   :  { %2168 = vmatprep.subr.bf16.mxu1 %v17828_v12  ;;  %v18008_v12 = vld [vmem:[#allocation4 + $0x14] ss:$72 sps:$4 sm:$0xff]  }
 0x126   :  { %2040 = vmatpush1.bf16.msra.mxu0 %v17823_v13  ;;  %v17919_v13 = vld [vmem:[#allocation9 + $0x638] ss:$24 sps:$4 sm:$0xff]  }
 0x127   :  { %2169 = vmatpush1.bf16.msra.mxu1 %v17826_v14  ;;  %2041 = vmatprep.subr.bf16.mxu0 %v17831_v15  ;;  %v17924_v14 = vld [vmem:[#allocation9 + $0x664] ss:$24 sps:$4 sm:$0xff]  }
 0x128   :  { %2170 = vmatprep.subr.bf16.mxu1 %v17834_v16  ;;  %v17927_v15 = vld [vmem:[#allocation9 + $0x66c] ss:$24 sps:$4 sm:$0xff]   ;;  %v17922_v16 = vld [vmem:[#allocation9 + $0x660] ss:$24 sps:$4 sm:$0xff]  }
 0x12a   :  { %2042 = vmatpush1.bf16.msra.mxu0 %v17829_v17  ;;  %v17925_v17 = vld [vmem:[#allocation9 + $0x668] ss:$24 sps:$4 sm:$0xff]  }
 0x12b   :  { %2171 = vmatpush1.bf16.msra.mxu1 %v17832_v18  ;;  %2043 = vmatprep.subr.bf16.mxu0 %v17837_v19  ;;  %v17930_v18 = vld [vmem:[#allocation9 + $0x694] ss:$24 sps:$4 sm:$0xff]  }
 0x12c   :  { %2172 = vmatprep.subr.bf16.mxu1 %v17840_v20  ;;  %v17933_v19 = vld [vmem:[#allocation9 + $0x69c] ss:$24 sps:$4 sm:$0xff]   ;;  %v17928_v20 = vld [vmem:[#allocation9 + $0x690] ss:$24 sps:$4 sm:$0xff]  }
 0x12e   :  { %2044 = vmatpush1.bf16.msra.mxu0 %v17835_v21  ;;  %v17931_v21 = vld [vmem:[#allocation9 + $0x698] ss:$24 sps:$4 sm:$0xff]  }
 0x12f   :  { %2173 = vmatpush1.bf16.msra.mxu1 %v17838_v22  ;;  %2045 = vmatprep.subr.bf16.mxu0 %v17843_v23  ;;  %v17936_v22 = vld [vmem:[#allocation9 + $0x6c4] ss:$24 sps:$4 sm:$0xff]  }
 0x130   :  { %2174 = vmatprep.subr.bf16.mxu1 %v17846_v24  ;;  %v17939_v23 = vld [vmem:[#allocation9 + $0x6cc] ss:$24 sps:$4 sm:$0xff]   ;;  %v17934_v24 = vld [vmem:[#allocation9 + $0x6c0] ss:$24 sps:$4 sm:$0xff]  }
 0x132   :  { %2046 = vmatpush1.bf16.msra.mxu0 %v17841_v25  ;;  %v17937_v25 = vld [vmem:[#allocation9 + $0x6c8] ss:$24 sps:$4 sm:$0xff]  }
 0x133   :  { %2175 = vmatpush1.bf16.msra.mxu1 %v17844_v26  ;;  %2047 = vmatprep.subr.bf16.mxu0 %v17849_v27  ;;  %v17942_v26 = vld [vmem:[#allocation9 + $0x6f4] ss:$24 sps:$4 sm:$0xff]  }
 0x134   :  { %2176 = vmatprep.subr.bf16.mxu1 %v17852_v28  ;;  %v17945_v27 = vld [vmem:[#allocation9 + $0x6fc] ss:$24 sps:$4 sm:$0xff]   ;;  %v17940_v28 = vld [vmem:[#allocation9 + $0x6f0] ss:$24 sps:$4 sm:$0xff]  }
 0x136   :  { %2048 = vmatpush1.bf16.msra.mxu0 %v17847_v29  ;;  %v17943_v29 = vld [vmem:[#allocation9 + $0x6f8] ss:$24 sps:$4 sm:$0xff]  }
 0x137   :  { %2177 = vmatpush1.bf16.msra.mxu1 %v17850_v31  ;;  %2049 = vmatprep.subr.bf16.mxu0 %v17855_v32  ;;  %v17951_v31 = vld [vmem:[#allocation9 + $0x72c] ss:$24 sps:$4 sm:$0xff]   ;;  %v17946_v32 = vld [vmem:[#allocation9 + $0x720] ss:$24 sps:$4 sm:$0xff]  }
 0x138   :  { %2178 = vmatprep.subr.bf16.mxu1 %v17858_v33  ;;  %v17949_v33 = vld [vmem:[#allocation9 + $0x728] ss:$24 sps:$4 sm:$0xff]  }
 0x13a   :  { %2050 = vmatpush1.bf16.msra.mxu0 %v17853_v34  ;;  %v17954_v34 = vld [vmem:[#allocation9 + $0x754] ss:$24 sps:$4 sm:$0xff]  }
 0x13b   :  { %2179 = vmatpush1.bf16.msra.mxu1 %v17856_v35  ;;  %2051 = vmatprep.subr.bf16.mxu0 %v17861_v36  ;;  %v17957_v35 = vld [vmem:[#allocation9 + $0x75c] ss:$24 sps:$4 sm:$0xff]   ;;  %v17952_v36 = vld [vmem:[#allocation9 + $0x750] ss:$24 sps:$4 sm:$0xff]  }
 0x13c   :  { %2180 = vmatprep.subr.bf16.mxu1 %v17864_v37  ;;  %v17955_v37 = vld [vmem:[#allocation9 + $0x758] ss:$24 sps:$4 sm:$0xff]  }
 0x13e   :  { %2052 = vmatpush1.bf16.msra.mxu0 %v17859_v38  ;;  %v17960_v38 = vld [vmem:[#allocation9 + $0x784] ss:$24 sps:$4 sm:$0xff]  }
 0x13f   :  { %2181 = vmatpush1.bf16.msra.mxu1 %v17862_v39  ;;  %2053 = vmatprep.subr.bf16.mxu0 %v17867_v40  ;;  %v17963_v39 = vld [vmem:[#allocation9 + $0x78c] ss:$24 sps:$4 sm:$0xff]   ;;  %v17958_v40 = vld [vmem:[#allocation9 + $0x780] ss:$24 sps:$4 sm:$0xff]  }
 0x140   :  { %2182 = vmatprep.subr.bf16.mxu1 %v17870_v41  ;;  %v17961_v41 = vld [vmem:[#allocation9 + $0x788] ss:$24 sps:$4 sm:$0xff]  }
 0x142   :  { %2054 = vmatpush1.bf16.msra.mxu0 %v17865_v42  ;;  %v17966_v42 = vld [vmem:[#allocation9 + $0x7b4] ss:$24 sps:$4 sm:$0xff]  }
 0x143   :  { %2183 = vmatpush1.bf16.msra.mxu1 %v17868_v43  ;;  %2055 = vmatprep.subr.bf16.mxu0 %v17873_v44  ;;  %v17969_v43 = vld [vmem:[#allocation9 + $0x7bc] ss:$24 sps:$4 sm:$0xff]   ;;  %v17964_v44 = vld [vmem:[#allocation9 + $0x7b0] ss:$24 sps:$4 sm:$0xff]  }
 0x144   :  { %2184 = vmatprep.subr.bf16.mxu1 %v17876_v45  ;;  %v17967_v45 = vld [vmem:[#allocation9 + $0x7b8] ss:$24 sps:$4 sm:$0xff]  }
 0x146   :  { %2056 = vmatpush1.bf16.msra.mxu0 %v17871_v46  ;;  %v17972_v46 = vld [vmem:[#allocation9 + $0x7e4] ss:$24 sps:$4 sm:$0xff]  }
 0x147   :  { %2185 = vmatpush1.bf16.msra.mxu1 %v17874_v47  ;;  %2057 = vmatprep.subr.bf16.mxu0 %v17879_v48  ;;  %v17975_v47 = vld [vmem:[#allocation9 + $0x7ec] ss:$24 sps:$4 sm:$0xff]   ;;  %v17970_v48 = vld [vmem:[#allocation9 + $0x7e0] ss:$24 sps:$4 sm:$0xff]  }
 0x148   :  { %2186 = vmatprep.subr.bf16.mxu1 %v17882_v49  ;;  %v17973_v49 = vld [vmem:[#allocation9 + $0x7e8] ss:$24 sps:$4 sm:$0xff]  }
 0x14a   :  { %2058 = vmatpush1.bf16.msra.mxu0 %v17877_v50  ;;  %v17978_v50 = vld [vmem:[#allocation9 + $0x814] ss:$24 sps:$4 sm:$0xff]  }
 0x14b   :  { %2187 = vmatpush1.bf16.msra.mxu1 %v17880_v51  ;;  %2059 = vmatprep.subr.bf16.mxu0 %v17885_v52  ;;  %v17981_v51 = vld [vmem:[#allocation9 + $0x81c] ss:$24 sps:$4 sm:$0xff]   ;;  %v17976_v52 = vld [vmem:[#allocation9 + $0x810] ss:$24 sps:$4 sm:$0xff]  }
 0x14c   :  { %2188 = vmatprep.subr.bf16.mxu1 %v17888_v53  ;;  %v17979_v53 = vld [vmem:[#allocation9 + $0x818] ss:$24 sps:$4 sm:$0xff]  }
 0x14e   :  { %2060 = vmatpush1.bf16.msra.mxu0 %v17883_v54  ;;  %v17984_v54 = vld [vmem:[#allocation9 + $0x844] ss:$24 sps:$4 sm:$0xff]  }
 0x14f   :  { %2189 = vmatpush1.bf16.msra.mxu1 %v17886_v55  ;;  %2061 = vmatprep.subr.bf16.mxu0 %v17891_v56  ;;  %v17987_v55 = vld [vmem:[#allocation9 + $0x84c] ss:$24 sps:$4 sm:$0xff]   ;;  %v17982_v56 = vld [vmem:[#allocation9 + $0x840] ss:$24 sps:$4 sm:$0xff]  }
 0x150   :  { %2190 = vmatprep.subr.bf16.mxu1 %v17894_v57  ;;  %v17985_v57 = vld [vmem:[#allocation9 + $0x848] ss:$24 sps:$4 sm:$0xff]  }
 0x152   :  { %2062 = vmatpush1.bf16.msra.mxu0 %v17889_v58  ;;  %v17990_v58 = vld [vmem:[#allocation9 + $0x874] ss:$24 sps:$4 sm:$0xff]  }
 0x153   :  { %2191 = vmatpush1.bf16.msra.mxu1 %v17892_v59  ;;  %2063 = vmatprep.subr.bf16.mxu0 %v17897_v60  ;;  %v17993_v59 = vld [vmem:[#allocation9 + $0x87c] ss:$24 sps:$4 sm:$0xff]   ;;  %v17988_v60 = vld [vmem:[#allocation9 + $0x870] ss:$24 sps:$4 sm:$0xff]  }
 0x154   :  { %2192 = vmatprep.subr.bf16.mxu1 %v17900_v61  ;;  %v17991_v61 = vld [vmem:[#allocation9 + $0x878] ss:$24 sps:$4 sm:$0xff]  }
 0x156   :  { %2064 = vmatpush1.bf16.msra.mxu0 %v17895_v62  ;;  %v17996_v62 = vld [vmem:[#allocation9 + $0x8a4] ss:$24 sps:$4 sm:$0xff]  }
 0x157   :  { %2193 = vmatpush1.bf16.msra.mxu1 %v17898_v63  ;;  %2065 = vmatprep.subr.bf16.mxu0 %v17903_v0  ;;  %v17999_v63 = vld [vmem:[#allocation9 + $0x8ac] ss:$24 sps:$4 sm:$0xff]   ;;  %v17994_v0 = vld [vmem:[#allocation9 + $0x8a0] ss:$24 sps:$4 sm:$0xff]  }
 0x158   :  { %2194 = vmatprep.subr.bf16.mxu1 %v17906_v1  ;;  %v17997_v1 = vld [vmem:[#allocation9 + $0x8a8] ss:$24 sps:$4 sm:$0xff]  }
 0x15a   :  { %2066 = vmatpush1.bf16.msra.mxu0 %v17901_v2  ;;  %v18002_v2 = vld [vmem:[#allocation9 + $0x8d4] ss:$24 sps:$4 sm:$0xff]  }
 0x15b   :  { %2195 = vmatpush1.bf16.msra.mxu1 %v17904_v3  ;;  %2078 = vmatprep.subr.bf16.mxu0 %v17912_v4  ;;  %v18005_v3 = vld [vmem:[#allocation9 + $0x8dc] ss:$24 sps:$4 sm:$0xff]   ;;  %v18000_v4 = vld [vmem:[#allocation9 + $0x8d0] ss:$24 sps:$4 sm:$0xff]  }
 0x15c   :  { %2207 = vmatprep.subr.bf16.mxu1 %v17915_v5  ;;  %v18003_v5 = vld [vmem:[#allocation9 + $0x8d8] ss:$24 sps:$4 sm:$0xff]  }
 0x15d   :  { %2068 = vmatmul.mubr.bf16.vlgmr.msra.gmra.mrb[0].mxu0 %v17907_v6 }
 0x15e   :  { %2079 = vmatpush1.bf16.msra.mxu0 %v17910_v7  ;;  %2197 = vmatmul.mubr.bf16.vlgmr.msra.gmra.mrb[0].mxu1 %v17907_v6  ;;  %v18011_v6 = vld [vmem:[#allocation9 + $0x14] ss:$24 sps:$4 sm:$0xff]   ;;  %v18014_v7 = vld [vmem:[#allocation9 + $0x4] ss:$24 sps:$4 sm:$0xff]  }
 0x15f   :  { %2208 = vmatpush1.bf16.msra.mxu1 %v17913_v8  ;;  %2080 = vmatprep.subr.bf16.mxu0 %v17918_v9  ;;  %v18006_v8 = vld [vmem:[#allocation4 + $0x10] ss:$72 sps:$4 sm:$0xff]  }
 0x160   :  { %2209 = vmatprep.subr.bf16.mxu1 %v17921_v10  ;;  %2110 = vmatprep.mubr.bf16.mxu0 %v18008_v12  ;;  %v18009_v9 = vld [vmem:[#allocation9 + $0x10] ss:$24 sps:$4 sm:$0xff]   ;;  %v18012_v10 = vld [vmem:[#allocation9] ss:$24 sps:$4 sm:$0xff]  }
 0x161   :  { %2239 = vmatprep.mubr.bf16.mxu1 %v18008_v12  ;;  %v18020_v12 = vld [vmem:[#allocation9 + $0x34] ss:$24 sps:$4 sm:$0xff]  }
 0x162   :  { %2081 = vmatpush1.bf16.msra.mxu0 %v17916_v11  ;;  %v18017_v11 = vld [vmem:[#allocation9 + $0x44] ss:$24 sps:$4 sm:$0xff]  }
 0x163   :  { %2210 = vmatpush1.bf16.msra.mxu1 %v17919_v13  ;;  %2082 = vmatprep.subr.bf16.mxu0 %v17924_v14  ;;  %v18110_v13 = vld [vmem:[#allocation4 + $0x1c] ss:$72 sps:$4 sm:$0xff]   ;;  %v18015_v14 = vld [vmem:[#allocation9 + $0x40] ss:$24 sps:$4 sm:$0xff]  }
 0x164   :  { %2211 = vmatprep.subr.bf16.mxu1 %v17927_v15  ;;  %v18018_v15 = vld [vmem:[#allocation9 + $0x30] ss:$24 sps:$4 sm:$0xff]  }
 0x166   :  { %2083 = vmatpush1.bf16.msra.mxu0 %v17922_v16  ;;  %v18023_v16 = vld [vmem:[#allocation9 + $0x74] ss:$24 sps:$4 sm:$0xff]  }
 0x167   :  { %2212 = vmatpush1.bf16.msra.mxu1 %v17925_v17  ;;  %2084 = vmatprep.subr.bf16.mxu0 %v17930_v18  ;;  %v18026_v17 = vld [vmem:[#allocation9 + $0x64] ss:$24 sps:$4 sm:$0xff]  }
 0x168   :  { %2213 = vmatprep.subr.bf16.mxu1 %v17933_v19  ;;  %v19371_v18 = vld [vmem:[#allocation4 + $0x4] ss:$72 sps:$4 sm:$0xff]   ;;  %v18021_v19 = vld [vmem:[#allocation9 + $0x70] ss:$24 sps:$4 sm:$0xff]  }
 0x16a   :  { %2085 = vmatpush1.bf16.msra.mxu0 %v17928_v20  ;;  %v18024_v20 = vld [vmem:[#allocation9 + $0x60] ss:$24 sps:$4 sm:$0xff]  }
 0x16b   :  { %2214 = vmatpush1.bf16.msra.mxu1 %v17931_v21  ;;  %2086 = vmatprep.subr.bf16.mxu0 %v17936_v22  ;;  %v18029_v21 = vld [vmem:[#allocation9 + $0xa4] ss:$24 sps:$4 sm:$0xff]   ;;  %v18032_v22 = vld [vmem:[#allocation9 + $0x94] ss:$24 sps:$4 sm:$0xff]  }
 0x16c   :  { %2215 = vmatprep.subr.bf16.mxu1 %v17939_v23  ;;  %v18027_v23 = vld [vmem:[#allocation9 + $0xa0] ss:$24 sps:$4 sm:$0xff]  }
 0x16e   :  { %2087 = vmatpush1.bf16.msra.mxu0 %v17934_v24  ;;  %v18030_v24 = vld [vmem:[#allocation9 + $0x90] ss:$24 sps:$4 sm:$0xff]  }
 0x16f   :  { %2216 = vmatpush1.bf16.msra.mxu1 %v17937_v25  ;;  %2088 = vmatprep.subr.bf16.mxu0 %v17942_v26  ;;  %v18035_v25 = vld [vmem:[#allocation9 + $0xd4] ss:$24 sps:$4 sm:$0xff]   ;;  %v18038_v26 = vld [vmem:[#allocation9 + $0xc4] ss:$24 sps:$4 sm:$0xff]  }
 0x170   :  { %2217 = vmatprep.subr.bf16.mxu1 %v17945_v27  ;;  %v18033_v27 = vld [vmem:[#allocation9 + $0xd0] ss:$24 sps:$4 sm:$0xff]  }
 0x172   :  { %2089 = vmatpush1.bf16.msra.mxu0 %v17940_v28  ;;  %v18036_v28 = vld [vmem:[#allocation9 + $0xc0] ss:$24 sps:$4 sm:$0xff]  }
 0x173   :  { %2218 = vmatpush1.bf16.msra.mxu1 %v17943_v29  ;;  %2090 = vmatprep.subr.bf16.mxu0 %v17948_v30  ;;  %v18041_v29 = vld [vmem:[#allocation9 + $0x104] ss:$24 sps:$4 sm:$0xff]   ;;  %v18044_v30 = vld [vmem:[#allocation9 + $0xf4] ss:$24 sps:$4 sm:$0xff]  }
 0x174   :  { %2219 = vmatprep.subr.bf16.mxu1 %v17951_v31  ;;  %v18039_v31 = vld [vmem:[#allocation9 + $0x100] ss:$24 sps:$4 sm:$0xff]  }
 0x176   :  { %2091 = vmatpush1.bf16.msra.mxu0 %v17946_v32  ;;  %v18042_v32 = vld [vmem:[#allocation9 + $0xf0] ss:$24 sps:$4 sm:$0xff]  }
 0x177   :  { %2220 = vmatpush1.bf16.msra.mxu1 %v17949_v33  ;;  %2092 = vmatprep.subr.bf16.mxu0 %v17954_v34  ;;  %v18047_v33 = vld [vmem:[#allocation9 + $0x134] ss:$24 sps:$4 sm:$0xff]   ;;  %v18050_v34 = vld [vmem:[#allocation9 + $0x124] ss:$24 sps:$4 sm:$0xff]  }
 0x178   :  { %2221 = vmatprep.subr.bf16.mxu1 %v17957_v35  ;;  %v18045_v35 = vld [vmem:[#allocation9 + $0x130] ss:$24 sps:$4 sm:$0xff]  }
 0x17a   :  { %2093 = vmatpush1.bf16.msra.mxu0 %v17952_v36  ;;  %v18048_v36 = vld [vmem:[#allocation9 + $0x120] ss:$24 sps:$4 sm:$0xff]  }
 0x17b   :  { %2222 = vmatpush1.bf16.msra.mxu1 %v17955_v37  ;;  %2094 = vmatprep.subr.bf16.mxu0 %v17960_v38  ;;  %v18053_v37 = vld [vmem:[#allocation9 + $0x164] ss:$24 sps:$4 sm:$0xff]   ;;  %v18056_v38 = vld [vmem:[#allocation9 + $0x154] ss:$24 sps:$4 sm:$0xff]  }
 0x17c   :  { %2223 = vmatprep.subr.bf16.mxu1 %v17963_v39  ;;  %v18051_v39 = vld [vmem:[#allocation9 + $0x160] ss:$24 sps:$4 sm:$0xff]  }
 0x17e   :  { %2095 = vmatpush1.bf16.msra.mxu0 %v17958_v40  ;;  %v18054_v40 = vld [vmem:[#allocation9 + $0x150] ss:$24 sps:$4 sm:$0xff]  }
 0x17f   :  { %2224 = vmatpush1.bf16.msra.mxu1 %v17961_v41  ;;  %2096 = vmatprep.subr.bf16.mxu0 %v17966_v42  ;;  %v18059_v41 = vld [vmem:[#allocation9 + $0x194] ss:$24 sps:$4 sm:$0xff]   ;;  %v18062_v42 = vld [vmem:[#allocation9 + $0x184] ss:$24 sps:$4 sm:$0xff]  }
 0x180   :  { %2225 = vmatprep.subr.bf16.mxu1 %v17969_v43  ;;  %v18057_v43 = vld [vmem:[#allocation9 + $0x190] ss:$24 sps:$4 sm:$0xff]  }
 0x182   :  { %2097 = vmatpush1.bf16.msra.mxu0 %v17964_v44  ;;  %v18060_v44 = vld [vmem:[#allocation9 + $0x180] ss:$24 sps:$4 sm:$0xff]  }
 0x183   :  { %2226 = vmatpush1.bf16.msra.mxu1 %v17967_v45  ;;  %2098 = vmatprep.subr.bf16.mxu0 %v17972_v46  ;;  %v18065_v45 = vld [vmem:[#allocation9 + $0x1c4] ss:$24 sps:$4 sm:$0xff]   ;;  %v18068_v46 = vld [vmem:[#allocation9 + $0x1b4] ss:$24 sps:$4 sm:$0xff]  }
 0x184   :  { %2227 = vmatprep.subr.bf16.mxu1 %v17975_v47  ;;  %v18063_v47 = vld [vmem:[#allocation9 + $0x1c0] ss:$24 sps:$4 sm:$0xff]  }
 0x186   :  { %2099 = vmatpush1.bf16.msra.mxu0 %v17970_v48  ;;  %v18066_v48 = vld [vmem:[#allocation9 + $0x1b0] ss:$24 sps:$4 sm:$0xff]  }
 0x187   :  { %2228 = vmatpush1.bf16.msra.mxu1 %v17973_v49  ;;  %2100 = vmatprep.subr.bf16.mxu0 %v17978_v50  ;;  %v18071_v49 = vld [vmem:[#allocation9 + $0x1f4] ss:$24 sps:$4 sm:$0xff]   ;;  %v18074_v50 = vld [vmem:[#allocation9 + $0x1e4] ss:$24 sps:$4 sm:$0xff]  }
 0x188   :  { %2229 = vmatprep.subr.bf16.mxu1 %v17981_v51  ;;  %v18069_v51 = vld [vmem:[#allocation9 + $0x1f0] ss:$24 sps:$4 sm:$0xff]  }
 0x18a   :  { %2101 = vmatpush1.bf16.msra.mxu0 %v17976_v52  ;;  %v18072_v52 = vld [vmem:[#allocation9 + $0x1e0] ss:$24 sps:$4 sm:$0xff]  }
 0x18b   :  { %2230 = vmatpush1.bf16.msra.mxu1 %v17979_v53  ;;  %2102 = vmatprep.subr.bf16.mxu0 %v17984_v54  ;;  %v18077_v53 = vld [vmem:[#allocation9 + $0x224] ss:$24 sps:$4 sm:$0xff]   ;;  %v18080_v54 = vld [vmem:[#allocation9 + $0x214] ss:$24 sps:$4 sm:$0xff]  }
 0x18c   :  { %2231 = vmatprep.subr.bf16.mxu1 %v17987_v55  ;;  %v18075_v55 = vld [vmem:[#allocation9 + $0x220] ss:$24 sps:$4 sm:$0xff]  }
 0x18e   :  { %2103 = vmatpush1.bf16.msra.mxu0 %v17982_v56  ;;  %v18078_v56 = vld [vmem:[#allocation9 + $0x210] ss:$24 sps:$4 sm:$0xff]  }
 0x18f   :  { %2232 = vmatpush1.bf16.msra.mxu1 %v17985_v57  ;;  %2104 = vmatprep.subr.bf16.mxu0 %v17990_v58  ;;  %v18083_v57 = vld [vmem:[#allocation9 + $0x254] ss:$24 sps:$4 sm:$0xff]   ;;  %v18086_v58 = vld [vmem:[#allocation9 + $0x244] ss:$24 sps:$4 sm:$0xff]  }
 0x190   :  { %2233 = vmatprep.subr.bf16.mxu1 %v17993_v59  ;;  %v18081_v59 = vld [vmem:[#allocation9 + $0x250] ss:$24 sps:$4 sm:$0xff]  }
 0x192   :  { %2105 = vmatpush1.bf16.msra.mxu0 %v17988_v60  ;;  %v18084_v60 = vld [vmem:[#allocation9 + $0x240] ss:$24 sps:$4 sm:$0xff]  }
 0x193   :  { %2234 = vmatpush1.bf16.msra.mxu1 %v17991_v61  ;;  %2106 = vmatprep.subr.bf16.mxu0 %v17996_v62  ;;  %v18089_v61 = vld [vmem:[#allocation9 + $0x284] ss:$24 sps:$4 sm:$0xff]   ;;  %v18092_v62 = vld [vmem:[#allocation9 + $0x274] ss:$24 sps:$4 sm:$0xff]  }
 0x194   :  { %2235 = vmatprep.subr.bf16.mxu1 %v17999_v63  ;;  %v18087_v63 = vld [vmem:[#allocation9 + $0x280] ss:$24 sps:$4 sm:$0xff]  }
 0x196   :  { %2107 = vmatpush1.bf16.msra.mxu0 %v17994_v0  ;;  %v18090_v0 = vld [vmem:[#allocation9 + $0x270] ss:$24 sps:$4 sm:$0xff]  }
 0x197   :  { %2236 = vmatpush1.bf16.msra.mxu1 %v17997_v1  ;;  %2108 = vmatprep.subr.bf16.mxu0 %v18002_v2  ;;  %v18095_v1 = vld [vmem:[#allocation9 + $0x2b4] ss:$24 sps:$4 sm:$0xff]   ;;  %v18098_v2 = vld [vmem:[#allocation9 + $0x2a4] ss:$24 sps:$4 sm:$0xff]  }
 0x198   :  { %2237 = vmatprep.subr.bf16.mxu1 %v18005_v3  ;;  %v18093_v3 = vld [vmem:[#allocation9 + $0x2b0] ss:$24 sps:$4 sm:$0xff]  }
 0x19a   :  { %2109 = vmatpush1.bf16.msra.mxu0 %v18000_v4  ;;  %v18096_v4 = vld [vmem:[#allocation9 + $0x2a0] ss:$24 sps:$4 sm:$0xff]  }
 0x19b   :  { %2238 = vmatpush1.bf16.msra.mxu1 %v18003_v5  ;;  %2250 = vmatprep.subr.bf16.mxu0 %v18011_v6  ;;  %v18101_v5 = vld [vmem:[#allocation9 + $0x2e4] ss:$24 sps:$4 sm:$0xff]   ;;  %v18104_v6 = vld [vmem:[#allocation9 + $0x2d4] ss:$24 sps:$4 sm:$0xff]  }
 0x19c   :  { %4235 = vmatprep.subr.bf16.mxu1 %v18014_v7  ;;  %v18099_v7 = vld [vmem:[#allocation9 + $0x2e0] ss:$24 sps:$4 sm:$0xff]  }
 0x19d   :  { %2111 = vmatmul.mubr.bf16.vlgmr.msra.gmra.mrb[0].mxu0 %v18006_v8 }
 0x19e   :  { %2240 = vmatmul.mubr.bf16.vlgmr.msra.gmra.mrb[0].mxu1 %v18006_v8  ;;  %2251 = vmatpush1.bf16.msra.mxu0 %v18009_v9  ;;  %v18102_v8 = vld [vmem:[#allocation9 + $0x2d0] ss:$24 sps:$4 sm:$0xff]   ;;  %v18107_v9 = vld [vmem:[#allocation9 + $0x314] ss:$24 sps:$4 sm:$0xff]  }
 0x19f   :  { %4236 = vmatpush1.bf16.msra.mxu1 %v18012_v10  ;;  %2252 = vmatprep.subr.bf16.mxu0 %v18017_v11  ;;  %v18113_v10 = vld [vmem:[#allocation9 + $0x304] ss:$24 sps:$4 sm:$0xff]   ;;  %v18105_v11 = vld [vmem:[#allocation9 + $0x310] ss:$24 sps:$4 sm:$0xff]  }
 0x1a0   :  { %4237 = vmatprep.subr.bf16.mxu1 %v18020_v12  ;;  %2282 = vmatprep.mubr.bf16.mxu0 %v19371_v18  ;;  %v18108_v12 = vld [vmem:[#allocation4 + $0x18] ss:$72 sps:$4 sm:$0xff]   ;;  %v18114_v18 = vld [vmem:[#allocation9 + $0x340] ss:$24 sps:$4 sm:$0xff]  }
 0x1a1   :  { %4267 = vmatprep.mubr.bf16.mxu1 %v18110_v13  ;;  %v18111_v13 = vld [vmem:[#allocation9 + $0x300] ss:$24 sps:$4 sm:$0xff]  }
 0x1a2   :  { %2253 = vmatpush1.bf16.msra.mxu0 %v18015_v14  ;;  %v18116_v14 = vld [vmem:[#allocation9 + $0x344] ss:$24 sps:$4 sm:$0xff]  }
 0x1a3   :  { %4238 = vmatpush1.bf16.msra.mxu1 %v18018_v15  ;;  %2254 = vmatprep.subr.bf16.mxu0 %v18023_v16  ;;  %v18119_v15 = vld [vmem:[#allocation9 + $0x334] ss:$24 sps:$4 sm:$0xff]   ;;  %v19372_v16 = vld [vmem:[#allocation4] ss:$72 sps:$4 sm:$0xff]  }
 0x1a4   :  { %4239 = vmatprep.subr.bf16.mxu1 %v18026_v17  ;;  %v18209_v17 = vld [vmem:[#allocation4 + $0x24] ss:$72 sps:$4 sm:$0xff]  }
 0x1a6   :  { %2255 = vmatpush1.bf16.msra.mxu0 %v18021_v19  ;;  %v18117_v19 = vld [vmem:[#allocation9 + $0x330] ss:$24 sps:$4 sm:$0xff]  }
 0x1a7   :  { %4240 = vmatpush1.bf16.msra.mxu1 %v18024_v20  ;;  %2256 = vmatprep.subr.bf16.mxu0 %v18029_v21  ;;  %v18122_v20 = vld [vmem:[#allocation9 + $0x374] ss:$24 sps:$4 sm:$0xff]   ;;  %v18125_v21 = vld [vmem:[#allocation9 + $0x364] ss:$24 sps:$4 sm:$0xff]  }
 0x1a8   :  { %4241 = vmatprep.subr.bf16.mxu1 %v18032_v22  ;;  %v19373_v22 = vld [vmem:[#allocation4 + $0xc] ss:$72 sps:$4 sm:$0xff]  }
 0x1aa   :  { %2257 = vmatpush1.bf16.msra.mxu0 %v18027_v23  ;;  %v18120_v23 = vld [vmem:[#allocation9 + $0x370] ss:$24 sps:$4 sm:$0xff]  }
 0x1ab   :  { %4242 = vmatpush1.bf16.msra.mxu1 %v18030_v24  ;;  %2258 = vmatprep.subr.bf16.mxu0 %v18035_v25  ;;  %v18123_v24 = vld [vmem:[#allocation9 + $0x360] ss:$24 sps:$4 sm:$0xff]   ;;  %v18128_v25 = vld [vmem:[#allocation9 + $0x3a4] ss:$24 sps:$4 sm:$0xff]  }
 0x1ac   :  { %4243 = vmatprep.subr.bf16.mxu1 %v18038_v26  ;;  %v18131_v26 = vld [vmem:[#allocation9 + $0x394] ss:$24 sps:$4 sm:$0xff]  }
 0x1ae   :  { %2259 = vmatpush1.bf16.msra.mxu0 %v18033_v27  ;;  %v18126_v27 = vld [vmem:[#allocation9 + $0x3a0] ss:$24 sps:$4 sm:$0xff]  }
 0x1af   :  { %4244 = vmatpush1.bf16.msra.mxu1 %v18036_v28  ;;  %2260 = vmatprep.subr.bf16.mxu0 %v18041_v29  ;;  %v18129_v28 = vld [vmem:[#allocation9 + $0x390] ss:$24 sps:$4 sm:$0xff]   ;;  %v18134_v29 = vld [vmem:[#allocation9 + $0x3d4] ss:$24 sps:$4 sm:$0xff]  }
 0x1b0   :  { %4245 = vmatprep.subr.bf16.mxu1 %v18044_v30  ;;  %v18137_v30 = vld [vmem:[#allocation9 + $0x3c4] ss:$24 sps:$4 sm:$0xff]  }
 0x1b2   :  { %2261 = vmatpush1.bf16.msra.mxu0 %v18039_v31  ;;  %v18132_v31 = vld [vmem:[#allocation9 + $0x3d0] ss:$24 sps:$4 sm:$0xff]  }
 0x1b3   :  { %4246 = vmatpush1.bf16.msra.mxu1 %v18042_v32  ;;  %2262 = vmatprep.subr.bf16.mxu0 %v18047_v33  ;;  %v18135_v32 = vld [vmem:[#allocation9 + $0x3c0] ss:$24 sps:$4 sm:$0xff]   ;;  %v18140_v33 = vld [vmem:[#allocation9 + $0x404] ss:$24 sps:$4 sm:$0xff]  }
 0x1b4   :  { %4247 = vmatprep.subr.bf16.mxu1 %v18050_v34  ;;  %v18143_v34 = vld [vmem:[#allocation9 + $0x3f4] ss:$24 sps:$4 sm:$0xff]  }
 0x1b6   :  { %2263 = vmatpush1.bf16.msra.mxu0 %v18045_v35  ;;  %v492_v35 = vlaneseq }
 0x1b7   :  { %4248 = vmatpush1.bf16.msra.mxu1 %v18048_v36  ;;  %2264 = vmatprep.subr.bf16.mxu0 %v18053_v37  ;;  %v18138_v36 = vld [vmem:[#allocation9 + $0x400] ss:$24 sps:$4 sm:$0xff]   ;;  %v18141_v37 = vld [vmem:[#allocation9 + $0x3f0] ss:$24 sps:$4 sm:$0xff]  }
 0x1b8   :  { %4249 = vmatprep.subr.bf16.mxu1 %v18056_v38  ;;  %v18146_v38 = vld [vmem:[#allocation9 + $0x434] ss:$24 sps:$4 sm:$0xff]  }
 0x1ba   :  { %2265 = vmatpush1.bf16.msra.mxu0 %v18051_v39  ;;  %v18149_v39 = vld [vmem:[#allocation9 + $0x424] ss:$24 sps:$4 sm:$0xff]  }
 0x1bb   :  { %4250 = vmatpush1.bf16.msra.mxu1 %v18054_v40  ;;  %2266 = vmatprep.subr.bf16.mxu0 %v18059_v41  ;;  %v20619_v40 = vshrl.u32 %v492_v35, 7  ;;  %v18144_v41 = vld [vmem:[#allocation9 + $0x430] ss:$24 sps:$4 sm:$0xff]  }
 0x1bc   :  { %4251 = vmatprep.subr.bf16.mxu1 %v18062_v42  ;;  %v18147_v42 = vld [vmem:[#allocation9 + $0x420] ss:$24 sps:$4 sm:$0xff]  }
 0x1bd   :  { %22156 = vst [vmem:[#allocation33_spill] sm:$0xff] %v20619_v40 }
 0x1be   :  { %2267 = vmatpush1.bf16.msra.mxu0 %v18057_v43  ;;  %v10103_v43 = vadd.s32 8, %v20619_v40 }
 0x1bf   :  { %4252 = vmatpush1.bf16.msra.mxu1 %v18060_v44  ;;  %2268 = vmatprep.subr.bf16.mxu0 %v18065_v45  ;;  %v10104_v44 = vadd.s32 16, %v20619_v40  ;;  %v10105_v45 = vadd.s32 24, %v20619_v40 }
 0x1c0   :  { %4253 = vmatprep.subr.bf16.mxu1 %v18068_v46  ;;  %v18152_v46 = vld [vmem:[#allocation9 + $0x464] ss:$24 sps:$4 sm:$0xff]  }
 0x1c2   :  { %2269 = vmatpush1.bf16.msra.mxu0 %v18063_v47  ;;  %v10106_v47 = vadd.s32 32, %v20619_v40 }
 0x1c3   :  { %4254 = vmatpush1.bf16.msra.mxu1 %v18066_v48  ;;  %2270 = vmatprep.subr.bf16.mxu0 %v18071_v49  ;;  %v10107_v48 = vadd.s32 40, %v20619_v40  ;;  %v10108_v49 = vadd.s32 48, %v20619_v40 }
 0x1c4   :  { %4255 = vmatprep.subr.bf16.mxu1 %v18074_v50  ;;  %v10109_v50 = vadd.s32 56, %v20619_v40 }
 0x1c6   :  { %2271 = vmatpush1.bf16.msra.mxu0 %v18069_v51  ;;  %v18150_v51 = vld [vmem:[#allocation9 + $0x460] ss:$24 sps:$4 sm:$0xff]  }
 0x1c7   :  { %4256 = vmatpush1.bf16.msra.mxu1 %v18072_v52  ;;  %2272 = vmatprep.subr.bf16.mxu0 %v18077_v53  ;;  %v18155_v52 = vld [vmem:[#allocation9 + $0x454] ss:$24 sps:$4 sm:$0xff]   ;;  %v10110_v53 = vadd.s32 64, %v20619_v40 }
 0x1c8   :  { %4257 = vmatprep.subr.bf16.mxu1 %v18080_v54  ;;  %v10111_v54 = vadd.s32 72, %v20619_v40 }
 0x1ca   :  { %2273 = vmatpush1.bf16.msra.mxu0 %v18075_v55  ;;  %v10112_v55 = vadd.s32 80, %v20619_v40 }
 0x1cb   :  { %4258 = vmatpush1.bf16.msra.mxu1 %v18078_v56  ;;  %2274 = vmatprep.subr.bf16.mxu0 %v18083_v57  ;;  %v10117_v56 = vand.u32 127, %v492_v35  ;;  %v18153_v57 = vld [vmem:[#allocation9 + $0x450] ss:$24 sps:$4 sm:$0xff]   ;;  %v18173_v35 = vld [vmem:[#allocation9 + $0x4e4] ss:$24 sps:$4 sm:$0xff]  }
 0x1cc   :  { %4259 = vmatprep.subr.bf16.mxu1 %v18086_v58  ;;  %v10113_v58 = vadd.s32 88, %v20619_v40 }
 0x1ce   :  { %2275 = vmatpush1.bf16.msra.mxu0 %v18081_v59  ;;  %v10114_v59 = vadd.s32 96, %v20619_v40 }
 0x1cf   :  { %4260 = vmatpush1.bf16.msra.mxu1 %v18084_v60  ;;  %2276 = vmatprep.subr.bf16.mxu0 %v18089_v61  ;;  %v10115_v60 = vadd.s32 104, %v20619_v40  ;;  %v18158_v61 = vld [vmem:[#allocation9 + $0x494] ss:$24 sps:$4 sm:$0xff]  }
 0x1d0   :  { %4261 = vmatprep.subr.bf16.mxu1 %v18092_v62  ;;  %v10118_v62 = vand.u32 15, %v20619_v40 }
 0x1d2   :  { %2277 = vmatpush1.bf16.msra.mxu0 %v18087_v63  ;;  %v10119_v63 = vand.u32 15, %v10103_v43  ;;  %v18182_v43 = vld [vmem:[#allocation9 + $0x554] ss:$24 sps:$4 sm:$0xff]  }
 0x1d3   :  { %4262 = vmatpush1.bf16.msra.mxu1 %v18090_v0  ;;  %2278 = vmatprep.subr.bf16.mxu0 %v18095_v1  ;;  %v10120_v0 = vand.u32 15, %v10104_v44  ;;  %v10121_v1 = vand.u32 15, %v10105_v45  ;;  %v18180_v44 = vld [vmem:[#allocation9 + $0x550] ss:$24 sps:$4 sm:$0xff]   ;;  %v18185_v45 = vld [vmem:[#allocation9 + $0x544] ss:$24 sps:$4 sm:$0xff]  }
 0x1d4   :  { %4263 = vmatprep.subr.bf16.mxu1 %v18098_v2  ;;  %v18161_v2 = vld [vmem:[#allocation9 + $0x484] ss:$24 sps:$4 sm:$0xff]  }
 0x1d6   :  { %2279 = vmatpush1.bf16.msra.mxu0 %v18093_v3  ;;  %v10122_v3 = vand.u32 15, %v10106_v47  ;;  %v18188_v47 = vld [vmem:[#allocation9 + $0x584] ss:$24 sps:$4 sm:$0xff]  }
 0x1d7   :  { %4264 = vmatpush1.bf16.msra.mxu1 %v18096_v4  ;;  %2280 = vmatprep.subr.bf16.mxu0 %v18101_v5  ;;  %v10123_v4 = vand.u32 15, %v10107_v48  ;;  %v10124_v5 = vand.u32 15, %v10108_v49  ;;  %v18186_v48 = vld [vmem:[#allocation9 + $0x580] ss:$24 sps:$4 sm:$0xff]   ;;  %v18191_v49 = vld [vmem:[#allocation9 + $0x574] ss:$24 sps:$4 sm:$0xff]  }
 0x1d8   :  { %4265 = vmatprep.subr.bf16.mxu1 %v18104_v6  ;;  %v10125_v6 = vand.u32 15, %v10109_v50  ;;  %v18189_v50 = vld [vmem:[#allocation9 + $0x570] ss:$24 sps:$4 sm:$0xff]  }
 0x1da   :  { %2281 = vmatpush1.bf16.msra.mxu0 %v18099_v7  ;;  %v10126_v7 = vand.u32 15, %v10110_v53  ;;  %v18197_v53 = vld [vmem:[#allocation9 + $0x5a4] ss:$24 sps:$4 sm:$0xff]  }
 0x1db   :  { %4266 = vmatpush1.bf16.msra.mxu1 %v18102_v8  ;;  %2293 = vmatprep.subr.bf16.mxu0 %v18107_v9  ;;  %v10127_v8 = vand.u32 15, %v10111_v54  ;;  %v10128_v9 = vand.u32 15, %v10112_v55  ;;  %v18195_v54 = vld [vmem:[#allocation9 + $0x5a0] ss:$24 sps:$4 sm:$0xff]   ;;  %v18200_v55 = vld [vmem:[#allocation9 + $0x5e4] ss:$24 sps:$4 sm:$0xff]  }
 0x1dc   :  { %4278 = vmatprep.subr.bf16.mxu1 %v18113_v10  ;;  %v10132_v10 = vand.u32 15, %v10117_v56  ;;  %v18198_v56 = vld [vmem:[#allocation9 + $0x5e0] ss:$24 sps:$4 sm:$0xff]  }
 0x1dd   :  { %2283 = vmatmul.mubr.bf16.vlgmr.msra.gmra.mrb[4].mxu0 %v19372_v16  ;;  %v22160_v16 = vmov 0 }
 0x1de   :  { %2294 = vmatpush1.bf16.msra.mxu0 %v18105_v11  ;;  %4268 = vmatmul.mubr.bf16.vlgmr.msra.gmra.mrb[4].mxu1 %v18108_v12  ;;  %v10129_v11 = vand.u32 15, %v10113_v58  ;;  %v10130_v12 = vand.u32 15, %v10114_v59  ;;  %vm20635_vm0 = vcmp.eq.s32.totalorder %v10118_v62, %v10132_v10  ;;  %vm20639_vm1 = vcmp.eq.s32.totalorder %v10119_v63, %v10132_v10  ;;  %v18201_v58 = vld [vmem:[#allocation9 + $0x5d0] ss:$24 sps:$4 sm:$0xff]   ;;  %v18206_v59 = vld [vmem:[#allocation9 + $0x614] ss:$24 sps:$4 sm:$0xff]  }
 0x1df   :  { %4279 = vmatpush1.bf16.msra.mxu1 %v18111_v13  ;;  %2295 = vmatprep.subr.bf16.mxu0 %v18116_v14  ;;  %v10131_v13 = vand.u32 15, %v10115_v60  ;;  %v18156_v14 = vld [vmem:[#allocation9 + $0x490] ss:$24 sps:$4 sm:$0xff]   ;;  %v22161_v16 = vsel %vm20639_vm1, 4294967295, %v22160_v16  ;;  %vm20643_vm2 = vcmp.eq.s32.totalorder %v10120_v0, %v10132_v10  ;;  %vm20647_vm3 = vcmp.eq.s32.totalorder %v10121_v1, %v10132_v10  ;;  %v18212_v62 = vld [vmem:[#allocation9 + $0x604] ss:$24 sps:$4 sm:$0xff]  }
 0x1e0   :  { %4280 = vmatprep.subr.bf16.mxu1 %v18119_v15  ;;  %2325 = vmatprep.mubr.bf16.mxu0 %v19373_v22  ;;  %v22157_v15 = vmov 0  ;;  %22162 = vst [vmem:[#allocation35_spill] sm:$0xff] %v22161_v16  ;;  %vm20651_vm4 = vcmp.eq.s32.totalorder %v10122_v3, %v10132_v10  ;;  %vm20655_vm5 = vcmp.eq.s32.totalorder %v10123_v4, %v10132_v10  ;;  %v22172_v22 = vmov 0  ;;  %v18204_v60 = vld [vmem:[#allocation9 + $0x610] ss:$24 sps:$4 sm:$0xff]  }
 0x1e1   :  { %4310 = vmatprep.mubr.bf16.mxu1 %v18209_v17  ;;  %v22158_v15 = vsel %vm20635_vm0, 4294967295, %v22157_v15  ;;  %v22163_v17 = vmov 0  ;;  %v22173_v22 = vsel %vm20655_vm5, 4294967295, %v22172_v22  ;;  %vm20659_vm6 = vcmp.eq.s32.totalorder %v10124_v5, %v10132_v10  ;;  %v18210_v63 = vld [vmem:[#allocation9 + $0x600] ss:$24 sps:$4 sm:$0xff]  }
 0x1e2   :  { %2296 = vmatpush1.bf16.msra.mxu0 %v18114_v18  ;;  %22159 = vst [vmem:[#allocation34_spill] sm:$0xff] %v22158_v15  ;;  %v22164_v17 = vsel %vm20643_vm2, 4294967295, %v22163_v17  ;;  %v22166_v18 = vmov 0  ;;  %22174 = vst [vmem:[#allocation39_spill] sm:$0xff] %v22173_v22  ;;  %vm20663_vm7 = vcmp.eq.s32.totalorder %v10125_v6, %v10132_v10  ;;  %vm20667_vm8 = vcmp.eq.s32.totalorder %v10126_v7, %v10132_v10  ;;  %v18215_v0 = vld [vmem:[#allocation9 + $0x644] ss:$24 sps:$4 sm:$0xff]  }
 0x1e3   :  { %4281 = vmatpush1.bf16.msra.mxu1 %v18117_v19  ;;  %2297 = vmatprep.subr.bf16.mxu0 %v18122_v20  ;;  %22165 = vst [vmem:[#allocation36_spill] sm:$0xff] %v22164_v17  ;;  %v22167_v18 = vsel %vm20647_vm3, 4294967295, %v22166_v18  ;;  %v18159_v19 = vld [vmem:[#allocation9 + $0x480] ss:$24 sps:$4 sm:$0xff]   ;;  %v18164_v20 = vld [vmem:[#allocation9 + $0x4c4] ss:$24 sps:$4 sm:$0xff]   ;;  %vm20671_vm9 = vcmp.eq.s32.totalorder %v10127_v8, %v10132_v10  ;;  %vm20675_vm10 = vcmp.eq.s32.totalorder %v10128_v9, %v10132_v10 }
 0x1e4   :  { %4282 = vmatprep.subr.bf16.mxu1 %v18125_v21  ;;  %22168 = vst [vmem:[#allocation37_spill] sm:$0xff] %v22167_v18  ;;  %v22169_v21 = vmov 0  ;;  %vm20679_vm11 = vcmp.eq.s32.totalorder %v10129_v11, %v10132_v10  ;;  %vm20683_vm12 = vcmp.eq.s32.totalorder %v10130_v12, %v10132_v10  ;;  %vm20687_vm13 = vcmp.eq.s32.totalorder %v10131_v13, %v10132_v10  ;;  %v18218_v1 = vld [vmem:[#allocation9 + $0x634] ss:$24 sps:$4 sm:$0xff]   ;;  %v18305_v3 = vld [vmem:[#allocation4 + $0x2c] ss:$72 sps:$4 sm:$0xff]  }
 0x1e5   :  { %v22170_v21 = vsel %vm20651_vm4, 4294967295, %v22169_v21  ;;  %v19374_v4 = vld [vmem:[#allocation4 + $0x8] ss:$72 sps:$4 sm:$0xff]   ;;  %v18216_v5 = vld [vmem:[#allocation9 + $0x630] ss:$24 sps:$4 sm:$0xff]  }
 0x1e6   :  { %2298 = vmatpush1.bf16.msra.mxu0 %v18120_v23  ;;  %22171 = vst [vmem:[#allocation38_spill] sm:$0xff] %v22170_v21  ;;  %v22175_v23 = vmov 0  ;;  %v18221_v6 = vld [vmem:[#allocation9 + $0x674] ss:$24 sps:$4 sm:$0xff]   ;;  %v18219_v7 = vld [vmem:[#allocation9 + $0x670] ss:$24 sps:$4 sm:$0xff]  }
 0x1e7   :  { %4283 = vmatpush1.bf16.msra.mxu1 %v18123_v24  ;;  %2299 = vmatprep.subr.bf16.mxu0 %v18128_v25  ;;  %v22176_v23 = vsel %vm20659_vm6, 4294967295, %v22175_v23  ;;  %v18167_v24 = vld [vmem:[#allocation9 + $0x4b4] ss:$24 sps:$4 sm:$0xff]   ;;  %v22178_v25 = vmov 0  ;;  %v18224_v8 = vld [vmem:[#allocation9 + $0x664] ss:$24 sps:$4 sm:$0xff]  }
 0x1e8   :  { %4284 = vmatprep.subr.bf16.mxu1 %v18131_v26  ;;  %22177 = vst [vmem:[#allocation40_spill] sm:$0xff] %v22176_v23  ;;  %v22179_v25 = vsel %vm20663_vm7, 4294967295, %v22178_v25  ;;  %v22181_v26 = vmov 0  ;;  %v19375_v9 = vld [vmem:[#allocation4 + $0x14] ss:$72 sps:$4 sm:$0xff]  }
 0x1e9   :  { %22180 = vst [vmem:[#allocation41_spill] sm:$0xff] %v22179_v25  ;;  %v22182_v26 = vsel %vm20667_vm8, 4294967295, %v22181_v26  ;;  %v18222_v10 = vld [vmem:[#allocation9 + $0x660] ss:$24 sps:$4 sm:$0xff]   ;;  %v18227_v11 = vld [vmem:[#allocation9 + $0x6a4] ss:$24 sps:$4 sm:$0xff]  }
 0x1ea   :  { %2300 = vmatpush1.bf16.msra.mxu0 %v18126_v27  ;;  %22183 = vst [vmem:[#allocation42_spill] sm:$0xff] %v22182_v26  ;;  %v22184_v27 = vmov 0  ;;  %v18225_v12 = vld [vmem:[#allocation9 + $0x6a0] ss:$24 sps:$4 sm:$0xff]   ;;  %v18230_v13 = vld [vmem:[#allocation9 + $0x694] ss:$24 sps:$4 sm:$0xff]  }
 0x1eb   :  { %4285 = vmatpush1.bf16.msra.mxu1 %v18129_v28  ;;  %2301 = vmatprep.subr.bf16.mxu0 %v18134_v29  ;;  %v22185_v27 = vsel %vm20671_vm9, 4294967295, %v22184_v27  ;;  %v22187_v28 = vmov 0  ;;  %v18162_v29 = vld [vmem:[#allocation9 + $0x4c0] ss:$24 sps:$4 sm:$0xff]   ;;  %v19107_v25 = vld [vmem:[#allocation9 + $0x6d0] ss:$24 sps:$4 sm:$0xff]  }
 0x1ec   :  { %4286 = vmatprep.subr.bf16.mxu1 %v18137_v30  ;;  %22186 = vst [vmem:[#allocation43_spill] sm:$0xff] %v22185_v27  ;;  %v22188_v28 = vsel %vm20675_vm10, 4294967295, %v22187_v28  ;;  %v22190_v30 = vmov 0  ;;  %v19101_v27 = vld [vmem:[#allocation9 + $0x6a0] ss:$24 sps:$4 sm:$0xff]  }
 0x1ed   :  { %22189 = vst [vmem:[#allocation44_spill] sm:$0xff] %v22188_v28  ;;  %v22191_v30 = vsel %vm20679_vm11, 4294967295, %v22190_v30  ;;  %v20926_v22 = vld [vmem:[#allocation12 + $0x104] ss:$24 sps:$4 sm:$0xff]  }
 0x1ee   :  { %2302 = vmatpush1.bf16.msra.mxu0 %v18132_v31  ;;  %22192 = vst [vmem:[#allocation45_spill] sm:$0xff] %v22191_v30  ;;  %v22193_v31 = vmov 0  ;;  %v19103_v30 = vld [vmem:[#allocation9 + $0x6a4] ss:$24 sps:$4 sm:$0xff]   ;;  %22207 = vst [vmem:[#allocation56_spill] sm:$0xff] %v20926_v22 }
 0x1ef   :  { %4287 = vmatpush1.bf16.msra.mxu1 %v18135_v32  ;;  %2303 = vmatprep.subr.bf16.mxu0 %v18140_v33  ;;  %v22194_v31 = vsel %vm20683_vm12, 4294967295, %v22193_v31  ;;  %v22196_v32 = vmov 0  ;;  %v18165_v33 = vld [vmem:[#allocation9 + $0x4b0] ss:$24 sps:$4 sm:$0xff]   ;;  %v19127_v15 = vld [vmem:[#allocation9 + $0x764] ss:$24 sps:$4 sm:$0xff]  }
 0x1f0   :  { %4288 = vmatprep.subr.bf16.mxu1 %v18143_v34  ;;  %22195 = vst [vmem:[#allocation46_spill] sm:$0xff] %v22194_v31  ;;  %v22197_v32 = vsel %vm20687_vm13, 4294967295, %v22196_v32  ;;  %v18170_v34 = vld [vmem:[#allocation9 + $0x4f4] ss:$24 sps:$4 sm:$0xff]   ;;  %vm22155_vm13 = vcmask 261120  }
 0x1f1   :  { %22198 = vst [vmem:[#allocation47_spill] sm:$0xff] %v22197_v32  ;;  %v19091_v32 = vld [vmem:[#allocation9 + $0x644] ss:$24 sps:$4 sm:$0xff]   ;;  %v19097_v31 = vld [vmem:[#allocation9 + $0x674] ss:$24 sps:$4 sm:$0xff]  }
 0x1f2   :  { %2304 = vmatpush1.bf16.msra.mxu0 %v18138_v36  ;;  %v18168_v36 = vld [vmem:[#allocation9 + $0x4f0] ss:$24 sps:$4 sm:$0xff]  }
 0x1f3   :  { %4289 = vmatpush1.bf16.msra.mxu1 %v18141_v37  ;;  %2305 = vmatprep.subr.bf16.mxu0 %v18146_v38  ;;  %v18171_v37 = vld [vmem:[#allocation9 + $0x4e0] ss:$24 sps:$4 sm:$0xff]   ;;  %v18176_v38 = vld [vmem:[#allocation9 + $0x524] ss:$24 sps:$4 sm:$0xff]   ;;  %v19119_v16 = vld [vmem:[#allocation9 + $0x730] ss:$24 sps:$4 sm:$0xff]  }
 0x1f4   :  { %4290 = vmatprep.subr.bf16.mxu1 %v18149_v39  ;;  %v18174_v39 = vld [vmem:[#allocation9 + $0x520] ss:$24 sps:$4 sm:$0xff]  }
 0x1f6   :  { %2306 = vmatpush1.bf16.msra.mxu0 %v18144_v41  ;;  %v18179_v41 = vld [vmem:[#allocation9 + $0x514] ss:$24 sps:$4 sm:$0xff]  }
 0x1f7   :  { %4291 = vmatpush1.bf16.msra.mxu1 %v18147_v42  ;;  %2307 = vmatprep.subr.bf16.mxu0 %v18152_v46  ;;  %v18177_v42 = vld [vmem:[#allocation9 + $0x510] ss:$24 sps:$4 sm:$0xff]   ;;  %v18183_v46 = vld [vmem:[#allocation9 + $0x540] ss:$24 sps:$4 sm:$0xff]  }
 0x1f8   :  { %4292 = vmatprep.subr.bf16.mxu1 %v18155_v52  ;;  %v18192_v52 = vld [vmem:[#allocation9 + $0x5b0] ss:$24 sps:$4 sm:$0xff]  }
 0x1fa   :  { %2308 = vmatpush1.bf16.msra.mxu0 %v18150_v51  ;;  %v18194_v51 = vld [vmem:[#allocation9 + $0x5b4] ss:$24 sps:$4 sm:$0xff]  }
 0x1fb   :  { %4293 = vmatpush1.bf16.msra.mxu1 %v18153_v57  ;;  %2309 = vmatprep.subr.bf16.mxu0 %v18158_v61  ;;  %v18203_v57 = vld [vmem:[#allocation9 + $0x5d4] ss:$24 sps:$4 sm:$0xff]   ;;  %v18207_v61 = vld [vmem:[#allocation4 + $0x20] ss:$72 sps:$4 sm:$0xff]  }
 0x1fc   :  { %4294 = vmatprep.subr.bf16.mxu1 %v18161_v2  ;;  %v18213_v2 = vld [vmem:[#allocation9 + $0x640] ss:$24 sps:$4 sm:$0xff]  }
 0x1fe   :  { %2310 = vmatpush1.bf16.msra.mxu0 %v18156_v14  ;;  %v18228_v14 = vld [vmem:[#allocation9 + $0x690] ss:$24 sps:$4 sm:$0xff]  }
 0x1ff   :  { %4295 = vmatpush1.bf16.msra.mxu1 %v18159_v19  ;;  %2311 = vmatprep.subr.bf16.mxu0 %v18164_v20  ;;  %v18233_v19 = vld [vmem:[#allocation9 + $0x6d4] ss:$24 sps:$4 sm:$0xff]   ;;  %v18231_v20 = vld [vmem:[#allocation9 + $0x6d0] ss:$24 sps:$4 sm:$0xff]  }
 0x200   :  { %4296 = vmatprep.subr.bf16.mxu1 %v18167_v24  ;;  %v18236_v24 = vld [vmem:[#allocation9 + $0x6c4] ss:$24 sps:$4 sm:$0xff]  }
 0x202   :  { %2312 = vmatpush1.bf16.msra.mxu0 %v18162_v29  ;;  %v18234_v29 = vld [vmem:[#allocation9 + $0x6c0] ss:$24 sps:$4 sm:$0xff]  }
 0x203   :  { %4297 = vmatpush1.bf16.msra.mxu1 %v18165_v33  ;;  %2313 = vmatprep.subr.bf16.mxu0 %v18170_v34  ;;  %v18239_v33 = vld [vmem:[#allocation9 + $0x704] ss:$24 sps:$4 sm:$0xff]   ;;  %v18237_v34 = vld [vmem:[#allocation9 + $0x700] ss:$24 sps:$4 sm:$0xff]  }
 0x204   :  { %4298 = vmatprep.subr.bf16.mxu1 %v18173_v35  ;;  %v18242_v35 = vld [vmem:[#allocation9 + $0x6f4] ss:$24 sps:$4 sm:$0xff]  }
 0x206   :  { %2314 = vmatpush1.bf16.msra.mxu0 %v18168_v36  ;;  %v18240_v36 = vld [vmem:[#allocation9 + $0x6f0] ss:$24 sps:$4 sm:$0xff]  }
 0x207   :  { %4299 = vmatpush1.bf16.msra.mxu1 %v18171_v37  ;;  %2315 = vmatprep.subr.bf16.mxu0 %v18176_v38  ;;  %v18245_v37 = vld [vmem:[#allocation9 + $0x734] ss:$24 sps:$4 sm:$0xff]   ;;  %v18243_v38 = vld [vmem:[#allocation9 + $0x730] ss:$24 sps:$4 sm:$0xff]  }
 0x208   :  { %4300 = vmatprep.subr.bf16.mxu1 %v18179_v41  ;;  %v18246_v41 = vld [vmem:[#allocation9 + $0x720] ss:$24 sps:$4 sm:$0xff]  }
 0x20a   :  { %2316 = vmatpush1.bf16.msra.mxu0 %v18174_v39  ;;  %v18248_v39 = vld [vmem:[#allocation9 + $0x724] ss:$24 sps:$4 sm:$0xff]  }
 0x20b   :  { %4301 = vmatpush1.bf16.msra.mxu1 %v18177_v42  ;;  %2317 = vmatprep.subr.bf16.mxu0 %v18182_v43  ;;  %v18251_v42 = vld [vmem:[#allocation9 + $0x764] ss:$24 sps:$4 sm:$0xff]   ;;  %v18249_v43 = vld [vmem:[#allocation9 + $0x760] ss:$24 sps:$4 sm:$0xff]  }
 0x20c   :  { %4302 = vmatprep.subr.bf16.mxu1 %v18185_v45  ;;  %v18252_v45 = vld [vmem:[#allocation9 + $0x750] ss:$24 sps:$4 sm:$0xff]  }
 0x20e   :  { %2318 = vmatpush1.bf16.msra.mxu0 %v18180_v44  ;;  %v18254_v44 = vld [vmem:[#allocation9 + $0x754] ss:$24 sps:$4 sm:$0xff]  }
 0x20f   :  { %4303 = vmatpush1.bf16.msra.mxu1 %v18183_v46  ;;  %2319 = vmatprep.subr.bf16.mxu0 %v18188_v47  ;;  %v18257_v46 = vld [vmem:[#allocation9 + $0x794] ss:$24 sps:$4 sm:$0xff]   ;;  %v18255_v47 = vld [vmem:[#allocation9 + $0x790] ss:$24 sps:$4 sm:$0xff]  }
 0x210   :  { %4304 = vmatprep.subr.bf16.mxu1 %v18191_v49  ;;  %v18258_v49 = vld [vmem:[#allocation9 + $0x780] ss:$24 sps:$4 sm:$0xff]  }
 0x212   :  { %2320 = vmatpush1.bf16.msra.mxu0 %v18186_v48  ;;  %v18260_v48 = vld [vmem:[#allocation9 + $0x784] ss:$24 sps:$4 sm:$0xff]  }
 0x213   :  { %4305 = vmatpush1.bf16.msra.mxu1 %v18189_v50  ;;  %2321 = vmatprep.subr.bf16.mxu0 %v18194_v51  ;;  %v18263_v50 = vld [vmem:[#allocation9 + $0x7c4] ss:$24 sps:$4 sm:$0xff]   ;;  %v18261_v51 = vld [vmem:[#allocation9 + $0x7c0] ss:$24 sps:$4 sm:$0xff]  }
 0x214   :  { %4306 = vmatprep.subr.bf16.mxu1 %v18197_v53  ;;  %v18264_v53 = vld [vmem:[#allocation9 + $0x7b0] ss:$24 sps:$4 sm:$0xff]  }
 0x216   :  { %2322 = vmatpush1.bf16.msra.mxu0 %v18192_v52  ;;  %v18266_v52 = vld [vmem:[#allocation9 + $0x7b4] ss:$24 sps:$4 sm:$0xff]  }
 0x217   :  { %4307 = vmatpush1.bf16.msra.mxu1 %v18195_v54  ;;  %2323 = vmatprep.subr.bf16.mxu0 %v18200_v55  ;;  %v18269_v54 = vld [vmem:[#allocation9 + $0x7f4] ss:$24 sps:$4 sm:$0xff]   ;;  %v18267_v55 = vld [vmem:[#allocation9 + $0x7f0] ss:$24 sps:$4 sm:$0xff]  }
 0x218   :  { %4308 = vmatprep.subr.bf16.mxu1 %v18203_v57  ;;  %v18270_v57 = vld [vmem:[#allocation9 + $0x7e0] ss:$24 sps:$4 sm:$0xff]  }
 0x21a   :  { %2324 = vmatpush1.bf16.msra.mxu0 %v18198_v56  ;;  %v18272_v56 = vld [vmem:[#allocation9 + $0x7e4] ss:$24 sps:$4 sm:$0xff]  }
 0x21b   :  { %4309 = vmatpush1.bf16.msra.mxu1 %v18201_v58  ;;  %2336 = vmatprep.subr.bf16.mxu0 %v18206_v59  ;;  %v18275_v58 = vld [vmem:[#allocation9 + $0x824] ss:$24 sps:$4 sm:$0xff]   ;;  %v18273_v59 = vld [vmem:[#allocation9 + $0x820] ss:$24 sps:$4 sm:$0xff]  }
 0x21c   :  { %4321 = vmatprep.subr.bf16.mxu1 %v18212_v62  ;;  %v18281_v62 = vld [vmem:[#allocation9 + $0x854] ss:$24 sps:$4 sm:$0xff]  }
 0x21d   :  { %2326 = vmatmul.mubr.bf16.vlgmr.msra.gmra.mrb[4].mxu0 %v19374_v4  ;;  %v18290_v4 = vld [vmem:[#allocation9 + $0x874] ss:$24 sps:$4 sm:$0xff]  }
 0x21e   :  { %2337 = vmatpush1.bf16.msra.mxu0 %v18204_v60  ;;  %4311 = vmatmul.mubr.bf16.vlgmr.msra.gmra.mrb[4].mxu1 %v18207_v61  ;;  %v18278_v60 = vld [vmem:[#allocation9 + $0x814] ss:$24 sps:$4 sm:$0xff]   ;;  %v18276_v61 = vld [vmem:[#allocation9 + $0x810] ss:$24 sps:$4 sm:$0xff]  }
 0x21f   :  { %4322 = vmatpush1.bf16.msra.mxu1 %v18210_v63  ;;  %2338 = vmatprep.subr.bf16.mxu0 %v18215_v0  ;;  %v18279_v63 = vld [vmem:[#allocation9 + $0x850] ss:$24 sps:$4 sm:$0xff]   ;;  %v18284_v0 = vld [vmem:[#allocation9 + $0x844] ss:$24 sps:$4 sm:$0xff]  }
 0x220   :  { %4323 = vmatprep.subr.bf16.mxu1 %v18218_v1  ;;  %2368 = vmatprep.mubr.bf16.mxu0 %v19375_v9  ;;  %v18282_v1 = vld [vmem:[#allocation9 + $0x840] ss:$24 sps:$4 sm:$0xff]  }
 0x221   :  { %4353 = vmatprep.mubr.bf16.mxu1 %v18305_v3  ;;  %v18285_v3 = vld [vmem:[#allocation9 + $0x880] ss:$24 sps:$4 sm:$0xff]  }
 0x222   :  { %2339 = vmatpush1.bf16.msra.mxu0 %v18213_v2  ;;  %v18287_v2 = vld [vmem:[#allocation9 + $0x884] ss:$24 sps:$4 sm:$0xff]   ;;  %v18294_v9 = vld [vmem:[#allocation9 + $0x8a0] ss:$24 sps:$4 sm:$0xff]  }
 0x223   :  { %4324 = vmatpush1.bf16.msra.mxu1 %v18216_v5  ;;  %2340 = vmatprep.subr.bf16.mxu0 %v18221_v6  ;;  %v18288_v5 = vld [vmem:[#allocation9 + $0x870] ss:$24 sps:$4 sm:$0xff]   ;;  %v18293_v6 = vld [vmem:[#allocation9 + $0x8b4] ss:$24 sps:$4 sm:$0xff]  }
 0x224   :  { %4325 = vmatprep.subr.bf16.mxu1 %v18224_v8  ;;  %v18296_v8 = vld [vmem:[#allocation9 + $0x8a4] ss:$24 sps:$4 sm:$0xff]  }
 0x226   :  { %2341 = vmatpush1.bf16.msra.mxu0 %v18219_v7  ;;  %v18291_v7 = vld [vmem:[#allocation9 + $0x8b0] ss:$24 sps:$4 sm:$0xff]  }
 0x227   :  { %4326 = vmatpush1.bf16.msra.mxu1 %v18222_v10  ;;  %2342 = vmatprep.subr.bf16.mxu0 %v18227_v11  ;;  %v18299_v10 = vld [vmem:[#allocation9 + $0x8e4] ss:$24 sps:$4 sm:$0xff]   ;;  %v18297_v11 = vld [vmem:[#allocation9 + $0x8e0] ss:$24 sps:$4 sm:$0xff]  }
 0x228   :  { %4327 = vmatprep.subr.bf16.mxu1 %v18230_v13  ;;  %v18300_v13 = vld [vmem:[#allocation9 + $0x8d0] ss:$24 sps:$4 sm:$0xff]  }
 0x22a   :  { %2343 = vmatpush1.bf16.msra.mxu0 %v18225_v12  ;;  %v18302_v12 = vld [vmem:[#allocation9 + $0x8d4] ss:$24 sps:$4 sm:$0xff]  }
 0x22b   :  { %4328 = vmatpush1.bf16.msra.mxu1 %v18228_v14  ;;  %2344 = vmatprep.subr.bf16.mxu0 %v18233_v19  ;;  %v18308_v14 = vld [vmem:[#allocation9 + $0xc] ss:$24 sps:$4 sm:$0xff]   ;;  %v18303_v19 = vld [vmem:[#allocation4 + $0x28] ss:$72 sps:$4 sm:$0xff]  }
 0x22c   :  { %4329 = vmatprep.subr.bf16.mxu1 %v18236_v24  ;;  %v18311_v24 = vld [vmem:[#allocation9 + $0x14] ss:$24 sps:$4 sm:$0xff]  }
 0x22e   :  { %2345 = vmatpush1.bf16.msra.mxu0 %v18231_v20  ;;  %v18306_v20 = vld [vmem:[#allocation9 + $0x8] ss:$24 sps:$4 sm:$0xff]  }
 0x22f   :  { %4330 = vmatpush1.bf16.msra.mxu1 %v18234_v29  ;;  %2346 = vmatprep.subr.bf16.mxu0 %v18239_v33  ;;  %v18309_v29 = vld [vmem:[#allocation9 + $0x10] ss:$24 sps:$4 sm:$0xff]   ;;  %v18314_v33 = vld [vmem:[#allocation9 + $0x3c] ss:$24 sps:$4 sm:$0xff]  }
 0x230   :  { %4331 = vmatprep.subr.bf16.mxu1 %v18242_v35  ;;  %v18317_v35 = vld [vmem:[#allocation9 + $0x44] ss:$24 sps:$4 sm:$0xff]  }
 0x232   :  { %2347 = vmatpush1.bf16.msra.mxu0 %v18237_v34  ;;  %v18312_v34 = vld [vmem:[#allocation9 + $0x38] ss:$24 sps:$4 sm:$0xff]  }
 0x233   :  { %4332 = vmatpush1.bf16.msra.mxu1 %v18240_v36  ;;  %2348 = vmatprep.subr.bf16.mxu0 %v18245_v37  ;;  %v19376_v36 = vld [vmem:[#allocation4 + $0x10] ss:$72 sps:$4 sm:$0xff]  }
 0x234   :  { %4333 = vmatprep.subr.bf16.mxu1 %v18248_v39  ;;  %v18315_v37 = vld [vmem:[#allocation9 + $0x40] ss:$24 sps:$4 sm:$0xff]  }
 0x235   :  { %v18318_v39 = vld [vmem:[#allocation9 + $0x68] ss:$24 sps:$4 sm:$0xff]  }
 0x236   :  { %2349 = vmatpush1.bf16.msra.mxu0 %v18243_v38  ;;  %v18320_v38 = vld [vmem:[#allocation9 + $0x6c] ss:$24 sps:$4 sm:$0xff]  }
 0x237   :  { %4334 = vmatpush1.bf16.msra.mxu1 %v18246_v41  ;;  %2350 = vmatprep.subr.bf16.mxu0 %v18251_v42  ;;  %v18323_v41 = vld [vmem:[#allocation9 + $0x74] ss:$24 sps:$4 sm:$0xff]  }
 0x238   :  { %4335 = vmatprep.subr.bf16.mxu1 %v18254_v44  ;;  %v19377_v42 = vld [vmem:[#allocation4 + $0x1c] ss:$72 sps:$4 sm:$0xff]  }
 0x239   :  { %v18326_v44 = vld [vmem:[#allocation9 + $0x9c] ss:$24 sps:$4 sm:$0xff]  }
 0x23a   :  { %2351 = vmatpush1.bf16.msra.mxu0 %v18249_v43  ;;  %v18321_v43 = vld [vmem:[#allocation9 + $0x70] ss:$24 sps:$4 sm:$0xff]  }
 0x23b   :  { %4336 = vmatpush1.bf16.msra.mxu1 %v18252_v45  ;;  %2352 = vmatprep.subr.bf16.mxu0 %v18257_v46  ;;  %v18324_v45 = vld [vmem:[#allocation9 + $0x98] ss:$24 sps:$4 sm:$0xff]   ;;  %v18329_v46 = vld [vmem:[#allocation9 + $0xa4] ss:$24 sps:$4 sm:$0xff]  }
 0x23c   :  { %4337 = vmatprep.subr.bf16.mxu1 %v18260_v48  ;;  %v18332_v48 = vld [vmem:[#allocation9 + $0xcc] ss:$24 sps:$4 sm:$0xff]  }
 0x23e   :  { %2353 = vmatpush1.bf16.msra.mxu0 %v18255_v47  ;;  %v18327_v47 = vld [vmem:[#allocation9 + $0xa0] ss:$24 sps:$4 sm:$0xff]  }
 0x23f   :  { %4338 = vmatpush1.bf16.msra.mxu1 %v18258_v49  ;;  %2354 = vmatprep.subr.bf16.mxu0 %v18263_v50  ;;  %v18335_v49 = vld [vmem:[#allocation9 + $0xd4] ss:$24 sps:$4 sm:$0xff]   ;;  %v18330_v50 = vld [vmem:[#allocation9 + $0xc8] ss:$24 sps:$4 sm:$0xff]  }
 0x240   :  { %4339 = vmatprep.subr.bf16.mxu1 %v18266_v52  ;;  %v18333_v52 = vld [vmem:[#allocation9 + $0xd0] ss:$24 sps:$4 sm:$0xff]  }
 0x242   :  { %2355 = vmatpush1.bf16.msra.mxu0 %v18261_v51  ;;  %v20692_v51 = vsub.s32 0, %v20619_v40 }
 0x243   :  { %4340 = vmatpush1.bf16.msra.mxu1 %v18264_v53  ;;  %2356 = vmatprep.subr.bf16.mxu0 %v18269_v54  ;;  %v490_v53 = vld [vmem:[#allocation10] sm:$0x3f]  ;;  %v18338_v54 = vld [vmem:[#allocation9 + $0xfc] ss:$24 sps:$4 sm:$0xff]  }
 0x244   :  { %4341 = vmatprep.subr.bf16.mxu1 %v18272_v56  ;;  %22199 = vst [vmem:[#allocation48_spill] sm:$0xff] %v20692_v51  ;;  %v20698_v56 = vsub.s32 1, %v20619_v40 }
 0x246   :  { %2357 = vmatpush1.bf16.msra.mxu0 %v18267_v55  ;;  %v20695_v55 = vsub.s32 2, %v20619_v40  ;;  %22201 = vst [vmem:[#allocation50_spill] sm:$0xff] %v20698_v56 }
 0x247   :  { %4342 = vmatpush1.bf16.msra.mxu1 %v18270_v57  ;;  %2358 = vmatprep.subr.bf16.mxu0 %v18275_v58  ;;  %v18336_v57 = vld [vmem:[#allocation9 + $0xf8] ss:$24 sps:$4 sm:$0xff]   ;;  %v18341_v58 = vld [vmem:[#allocation9 + $0x104] ss:$24 sps:$4 sm:$0xff]  }
 0x248   :  { %4343 = vmatprep.subr.bf16.mxu1 %v18278_v60  ;;  %22200 = vst [vmem:[#allocation49_spill] sm:$0xff] %v20695_v55  ;;  %v18339_v60 = vld [vmem:[#allocation9 + $0x100] ss:$24 sps:$4 sm:$0xff]  }
 0x24a   :  { %2359 = vmatpush1.bf16.msra.mxu0 %v18273_v59  ;;  %v20701_v59 = vsub.s32 3, %v20619_v40 }
 0x24b   :  { %4344 = vmatpush1.bf16.msra.mxu1 %v18276_v61  ;;  %2360 = vmatprep.subr.bf16.mxu0 %v18281_v62  ;;  %v18344_v61 = vld [vmem:[#allocation9 + $0x12c] ss:$24 sps:$4 sm:$0xff]   ;;  %v495_v62 = vrot.slane %v490_v53, %v20692_v51 }
 0x24c   :  { %4345 = vmatprep.subr.bf16.mxu1 %v18284_v0  ;;  %22202 = vst [vmem:[#allocation51_spill] sm:$0xff] %v20701_v59  ;;  %v503_v0 = vrot.slane %v490_v53, %v20695_v55 }
 0x24e   :  { %2361 = vmatpush1.bf16.msra.mxu0 %v18279_v63 }
 0x24f   :  { %4346 = vmatpush1.bf16.msra.mxu1 %v18282_v1  ;;  %2362 = vmatprep.subr.bf16.mxu0 %v18287_v2  ;;  %v499_v1 = vrot.slane %v490_v53, %v20698_v56  ;;  %v18347_v2 = vld [vmem:[#allocation9 + $0x134] ss:$24 sps:$4 sm:$0xff]  }
 0x250   :  { %4347 = vmatprep.subr.bf16.mxu1 %v18290_v4 }
 0x252   :  { %2363 = vmatpush1.bf16.msra.mxu0 %v18285_v3 }
 0x253   :  { %4348 = vmatpush1.bf16.msra.mxu1 %v18288_v5  ;;  %2364 = vmatprep.subr.bf16.mxu0 %v18293_v6  ;;  %v507_v5 = vrot.slane %v490_v53, %v20701_v59  ;;  %v18342_v6 = vld [vmem:[#allocation9 + $0x128] ss:$24 sps:$4 sm:$0xff]   ;;  %v18368_v53 = vld [vmem:[#allocation9 + $0x1ec] ss:$24 sps:$4 sm:$0xff]  }
 0x254   :  { %4349 = vmatprep.subr.bf16.mxu1 %v18296_v8 }
 0x256   :  { %2365 = vmatpush1.bf16.msra.mxu0 %v18291_v7 }
 0x257   :  { %4350 = vmatpush1.bf16.msra.mxu1 %v18294_v9  ;;  %2366 = vmatprep.subr.bf16.mxu0 %v18299_v10 }
 0x258   :  { %4351 = vmatprep.subr.bf16.mxu1 %v18302_v12 }
 0x25a   :  { %2367 = vmatpush1.bf16.msra.mxu0 %v18297_v11 }
 0x25b   :  { %4352 = vmatpush1.bf16.msra.mxu1 %v18300_v13  ;;  %4364 = vmatprep.subr.bf16.mxu0 %v18308_v14  ;;  %v18345_v13 = vld [vmem:[#allocation9 + $0x130] ss:$24 sps:$4 sm:$0xff]  }
 0x25c   :  { %4493 = vmatprep.subr.bf16.mxu1 %v18311_v24 }
 0x25d   :  { %2369 = vmatmul.mubr.bf16.vlgmr.msra.gmra.mrb[4].mxu0 %v19376_v36 }
 0x25e   :  { %4354 = vmatmul.mubr.bf16.vlgmr.msra.gmra.mrb[4].mxu1 %v18303_v19  ;;  %4365 = vmatpush1.bf16.msra.mxu0 %v18306_v20 }
 0x25f   :  { %4494 = vmatpush1.bf16.msra.mxu1 %v18309_v29  ;;  %4366 = vmatprep.subr.bf16.mxu0 %v18314_v33  ;;  %v18348_v33 = vld [vmem:[#allocation9 + $0x158] ss:$24 sps:$4 sm:$0xff]  }
 0x260   :  { %4495 = vmatprep.subr.bf16.mxu1 %v18317_v35  ;;  %4396 = vmatprep.mubr.bf16.mxu0 %v19377_v42  ;;  %v18353_v35 = vld [vmem:[#allocation9 + $0x164] ss:$24 sps:$4 sm:$0xff]  }
 0x261   :  { %4525 = vmatprep.mubr.bf16.mxu1 %v19377_v42  ;;  %v18351_v42 = vld [vmem:[#allocation9 + $0x160] ss:$24 sps:$4 sm:$0xff]  }
 0x262   :  { %4367 = vmatpush1.bf16.msra.mxu0 %v18312_v34  ;;  %v18350_v34 = vld [vmem:[#allocation9 + $0x15c] ss:$24 sps:$4 sm:$0xff]  }
 0x263   :  { %4496 = vmatpush1.bf16.msra.mxu1 %v18315_v37  ;;  %4368 = vmatprep.subr.bf16.mxu0 %v18320_v38 }
 0x264   :  { %4497 = vmatprep.subr.bf16.mxu1 %v18323_v41 }
 0x266   :  { %4369 = vmatpush1.bf16.msra.mxu0 %v18318_v39 }
 0x267   :  { %4498 = vmatpush1.bf16.msra.mxu1 %v18321_v43  ;;  %4370 = vmatprep.subr.bf16.mxu0 %v18326_v44  ;;  %v18356_v43 = vld [vmem:[#allocation9 + $0x18c] ss:$24 sps:$4 sm:$0xff]  }
 0x268   :  { %4499 = vmatprep.subr.bf16.mxu1 %v18329_v46  ;;  %v18359_v46 = vld [vmem:[#allocation9 + $0x194] ss:$24 sps:$4 sm:$0xff]  }
 0x26a   :  { %4371 = vmatpush1.bf16.msra.mxu0 %v18324_v45  ;;  %v18354_v45 = vld [vmem:[#allocation9 + $0x188] ss:$24 sps:$4 sm:$0xff]  }
 0x26b   :  { %4500 = vmatpush1.bf16.msra.mxu1 %v18327_v47  ;;  %4372 = vmatprep.subr.bf16.mxu0 %v18332_v48  ;;  %v18357_v47 = vld [vmem:[#allocation9 + $0x190] ss:$24 sps:$4 sm:$0xff]   ;;  %v18362_v48 = vld [vmem:[#allocation9 + $0x1bc] ss:$24 sps:$4 sm:$0xff]  }
 0x26c   :  { %4501 = vmatprep.subr.bf16.mxu1 %v18335_v49  ;;  %v18360_v49 = vld [vmem:[#allocation9 + $0x1b8] ss:$24 sps:$4 sm:$0xff]  }
 0x26e   :  { %4373 = vmatpush1.bf16.msra.mxu0 %v18330_v50  ;;  %v18365_v50 = vld [vmem:[#allocation9 + $0x1c4] ss:$24 sps:$4 sm:$0xff]  }
 0x26f   :  { %4502 = vmatpush1.bf16.msra.mxu1 %v18333_v52  ;;  %4374 = vmatprep.subr.bf16.mxu0 %v18338_v54  ;;  %v18363_v52 = vld [vmem:[#allocation9 + $0x1c0] ss:$24 sps:$4 sm:$0xff]  }
 0x270   :  { %v2112_v63 = vpop.f32.mrb[0].mxu0  ;;  %4503 = vmatprep.subr.bf16.mxu1 %v18341_v58  ;;  %v18366_v54 = vld [vmem:[#allocation9 + $0x1e8] ss:$24 sps:$4 sm:$0xff]  }
 0x271   :  { %v2241_v3 = vpop.f32.mrb[0].mxu1  ;;  %v2114_v4 = vpop.f32.mrb[1].mxu0  ;;  %v17439_v9 = vadd.f32 %v2112_v63, %v495_v62  ;;  %v18369_v58 = vld [vmem:[#allocation9 + $0x1f0] ss:$24 sps:$4 sm:$0xff]   ;;  %v18375_v63 = vld [vmem:[#allocation9 + $0x220] ss:$24 sps:$4 sm:$0xff]  }
 0x272   :  { %v2243_v7 = vpop.f32.mrb[1].mxu1  ;;  %v2116_v8 = vpop.f32.mrb[2].mxu0  ;;  %4375 = vmatpush1.bf16.msra.mxu0 %v18336_v57  ;;  %v17443_v14 = vadd.f32 %v2241_v3, %v503_v0  ;;  %v17440_v19 = vadd.f32 %v2114_v4, %v499_v1  ;;  %v18371_v57 = vld [vmem:[#allocation9 + $0x1f4] ss:$24 sps:$4 sm:$0xff]   ;;  %v18381_v3 = vld [vmem:[#allocation9 + $0x250] ss:$24 sps:$4 sm:$0xff]  }
 0x273   :  { %v17441_v10 = vadd.f32 %v2116_v8, %v495_v62  ;;  %v2245_v11 = vpop.f32.mrb[2].mxu1  ;;  %4504 = vmatpush1.bf16.msra.mxu1 %v18339_v60  ;;  %v2118_v12 = vpop.f32.mrb[3].mxu0  ;;  %4376 = vmatprep.subr.bf16.mxu0 %v18344_v61  ;;  %v17444_v36 = vadd.f32 %v2243_v7, %v507_v5  ;;  %v18374_v60 = vld [vmem:[#allocation9 + $0x21c] ss:$24 sps:$4 sm:$0xff]   ;;  %v18372_v61 = vld [vmem:[#allocation9 + $0x218] ss:$24 sps:$4 sm:$0xff]  }
 0x274   :  { %v17445_v20 = vadd.f32 %v2245_v11, %v503_v0  ;;  %v17442_v24 = vadd.f32 %v2118_v12, %v499_v1  ;;  %v2247_v29 = vpop.f32.mrb[3].mxu1  ;;  %4505 = vmatprep.subr.bf16.mxu1 %v18347_v2  ;;  %v18377_v62 = vld [vmem:[#allocation9 + $0x224] ss:$24 sps:$4 sm:$0xff]   ;;  %v18378_v1 = vld [vmem:[#allocation9 + $0x248] ss:$24 sps:$4 sm:$0xff]  }
 0x275   :  { %v17446_v37 = vadd.f32 %v2247_v29, %v507_v5  ;;  %v2379_v38 = vpack.c.bf16 %v17441_v10, %v17439_v9  ;;  %v18380_v0 = vld [vmem:[#allocation9 + $0x24c] ss:$24 sps:$4 sm:$0xff]   ;;  %v18386_v4 = vld [vmem:[#allocation9 + $0x27c] ss:$24 sps:$4 sm:$0xff]   ;;  %v18384_v5 = vld [vmem:[#allocation9 + $0x278] ss:$24 sps:$4 sm:$0xff]  }
 0x276   :  { %4377 = vmatpush1.bf16.msra.mxu0 %v18342_v6  ;;  %v2381_v39 = vpack.c.bf16 %v17445_v20, %v17443_v14  ;;  %v2380_v41 = vpack.c.bf16 %v17442_v24, %v17440_v19  ;;  %v18383_v2 = vld [vmem:[#allocation9 + $0x254] ss:$24 sps:$4 sm:$0xff]   ;;  %v18389_v6 = vld [vmem:[#allocation9 + $0x284] ss:$24 sps:$4 sm:$0xff]   ;;  %v18387_v7 = vld [vmem:[#allocation9 + $0x280] ss:$24 sps:$4 sm:$0xff]  }
 0x277   :  { %4506 = vmatpush1.bf16.msra.mxu1 %v18345_v13  ;;  %2389 = vrot.lane.b32.xlu0 %v2379_v38, %s20372_s14  ;;  %2386 = vst.msk [vmem:[#allocation2] sm:$0xff] %vm2385_vm14, %v2379_v38  ;;  %v2382_v44 = vpack.c.bf16 %v17446_v37, %v17444_v36  ;;  %v18392_v8 = vld [vmem:[#allocation9 + $0x2ac] ss:$24 sps:$4 sm:$0xff]   ;;  %v18390_v9 = vld [vmem:[#allocation9 + $0x2a8] ss:$24 sps:$4 sm:$0xff]  }
 0x278   :  { %2401 = vrot.lane.b32.xlu1 %v2381_v39, %s20385_s4  ;;  %4378 = vmatprep.subr.bf16.mxu0 %v18350_v34  ;;  %v18395_v10 = vld [vmem:[#allocation9 + $0x2b4] ss:$24 sps:$4 sm:$0xff]   ;;  %v18393_v11 = vld [vmem:[#allocation9 + $0x2b0] ss:$24 sps:$4 sm:$0xff]   ;;  %v18401_v14 = vld [vmem:[#allocation9 + $0x2e4] ss:$24 sps:$4 sm:$0xff]  }
 0x279   :  { %4507 = vmatprep.subr.bf16.mxu1 %v18353_v35  ;;  %2414 = vst.msk [vmem:[#allocation2 + $0xe0] sm:$0xff] %vm2385_vm14, %v2382_v44  ;;  %v18398_v12 = vld [vmem:[#allocation9 + $0x2dc] ss:$24 sps:$4 sm:$0xff]   ;;  %v18396_v13 = vld [vmem:[#allocation9 + $0x2d8] ss:$24 sps:$4 sm:$0xff]  }
 0x27a   :  { %4379 = vmatpush1.bf16.msra.mxu0 %v18348_v33  ;;  %v18399_v19 = vld [vmem:[#allocation9 + $0x2e0] ss:$24 sps:$4 sm:$0xff]   ;;  %v18404_v20 = vld [vmem:[#allocation9 + $0x30c] ss:$24 sps:$4 sm:$0xff]   ;;  %v18405_v33 = vld [vmem:[#allocation9 + $0x310] ss:$24 sps:$4 sm:$0xff]  }
 0x27b   :  { %4508 = vmatpush1.bf16.msra.mxu1 %v18351_v42  ;;  %2408 = vrot.lane.b32.xlu0 %v2381_v39, %s20392_s11  ;;  %v18402_v24 = vld [vmem:[#allocation9 + $0x308] ss:$24 sps:$4 sm:$0xff]   ;;  %v18407_v29 = vld [vmem:[#allocation9 + $0x314] ss:$24 sps:$4 sm:$0xff]   ;;  %v18413_v35 = vld [vmem:[#allocation9 + $0x344] ss:$24 sps:$4 sm:$0xff]  }
 0x27c   :  { %2399 = vrot.lane.b32.xlu1 %v2380_v41, %s20385_s4  ;;  %4380 = vmatprep.subr.bf16.mxu0 %v18356_v43  ;;  %v18410_v34 = vld [vmem:[#allocation9 + $0x33c] ss:$24 sps:$4 sm:$0xff]   ;;  %v19378_v36 = vld [vmem:[#allocation4 + $0x18] ss:$72 sps:$4 sm:$0xff]   ;;  %v18411_v38 = vld [vmem:[#allocation9 + $0x340] ss:$24 sps:$4 sm:$0xff]  }
 0x27d   :  { %4509 = vmatprep.subr.bf16.mxu1 %v18359_v46  ;;  %v18408_v37 = vld [vmem:[#allocation9 + $0x338] ss:$24 sps:$4 sm:$0xff]   ;;  %v18416_v39 = vld [vmem:[#allocation9 + $0x36c] ss:$24 sps:$4 sm:$0xff]   ;;  %v19379_v43 = vld [vmem:[#allocation4 + $0x24] ss:$72 sps:$4 sm:$0xff]  }
 0x27e   :  { %4381 = vmatpush1.bf16.msra.mxu0 %v18354_v45  ;;  %v18419_v42 = vld [vmem:[#allocation9 + $0x374] ss:$24 sps:$4 sm:$0xff]   ;;  %v18420_v46 = vld [vmem:[#allocation9 + $0x398] ss:$24 sps:$4 sm:$0xff]  }
 0x27f   :  { %4510 = vmatpush1.bf16.msra.mxu1 %v18357_v47  ;;  %2391 = vrot.lane.b32.xlu0 %v2380_v41, %s20372_s14  ;;  %v18414_v41 = vld [vmem:[#allocation9 + $0x368] ss:$24 sps:$4 sm:$0xff]   ;;  %v18422_v45 = vld [vmem:[#allocation9 + $0x39c] ss:$24 sps:$4 sm:$0xff]  }
 0x280   :  { %2417 = vrot.lane.b32.xlu1 %v2382_v44, %s20372_s14  ;;  %4382 = vmatprep.subr.bf16.mxu0 %v18362_v48  ;;  %v18417_v44 = vld [vmem:[#allocation9 + $0x370] ss:$24 sps:$4 sm:$0xff]   ;;  %v18425_v47 = vld [vmem:[#allocation9 + $0x3a4] ss:$24 sps:$4 sm:$0xff]   ;;  %v18423_v48 = vld [vmem:[#allocation9 + $0x3a0] ss:$24 sps:$4 sm:$0xff]  }
 0x281   :  { %4511 = vmatprep.subr.bf16.mxu1 %v18365_v50  ;;  %v18426_v50 = vld [vmem:[#allocation9 + $0x3c8] ss:$24 sps:$4 sm:$0xff]  }
 0x282   :  { %4383 = vmatpush1.bf16.msra.mxu0 %v18360_v49  ;;  %v18428_v49 = vld [vmem:[#allocation9 + $0x3cc] ss:$24 sps:$4 sm:$0xff]  }
 0x283   :  { %4512 = vmatpush1.bf16.msra.mxu1 %v18363_v52  ;;  %4384 = vmatprep.subr.bf16.mxu0 %v18368_v53  ;;  %v18431_v52 = vld [vmem:[#allocation9 + $0x3d4] ss:$24 sps:$4 sm:$0xff]   ;;  %v18429_v53 = vld [vmem:[#allocation9 + $0x3d0] ss:$24 sps:$4 sm:$0xff]  }
 0x284   :  { %4513 = vmatprep.subr.bf16.mxu1 %v18371_v57  ;;  %v18432_v57 = vld [vmem:[#allocation9 + $0x3f8] ss:$24 sps:$4 sm:$0xff]  }
 0x286   :  { %4385 = vmatpush1.bf16.msra.mxu0 %v18366_v54  ;;  %v18434_v54 = vld [vmem:[#allocation9 + $0x3fc] ss:$24 sps:$4 sm:$0xff]  }
 0x287   :  { %4514 = vmatpush1.bf16.msra.mxu1 %v18369_v58  ;;  %4386 = vmatprep.subr.bf16.mxu0 %v18374_v60  ;;  %v18437_v58 = vld [vmem:[#allocation9 + $0x404] ss:$24 sps:$4 sm:$0xff]   ;;  %v18435_v60 = vld [vmem:[#allocation9 + $0x400] ss:$24 sps:$4 sm:$0xff]  }
 0x288   :  { %4515 = vmatprep.subr.bf16.mxu1 %v18377_v62  ;;  %v18438_v62 = vld [vmem:[#allocation9 + $0x428] ss:$24 sps:$4 sm:$0xff]  }
 0x28a   :  { %4387 = vmatpush1.bf16.msra.mxu0 %v18372_v61  ;;  %v18440_v61 = vld [vmem:[#allocation9 + $0x42c] ss:$24 sps:$4 sm:$0xff]  }
 0x28b   :  { %4516 = vmatpush1.bf16.msra.mxu1 %v18375_v63  ;;  %4388 = vmatprep.subr.bf16.mxu0 %v18380_v0  ;;  %v18443_v63 = vld [vmem:[#allocation9 + $0x434] ss:$24 sps:$4 sm:$0xff]   ;;  %v18441_v0 = vld [vmem:[#allocation9 + $0x430] ss:$24 sps:$4 sm:$0xff]  }
 0x28c   :  { %4517 = vmatprep.subr.bf16.mxu1 %v18383_v2  ;;  %v18444_v2 = vld [vmem:[#allocation9 + $0x458] ss:$24 sps:$4 sm:$0xff]  }
 0x28e   :  { %4389 = vmatpush1.bf16.msra.mxu0 %v18378_v1  ;;  %v18446_v1 = vld [vmem:[#allocation9 + $0x45c] ss:$24 sps:$4 sm:$0xff]  }
 0x28f   :  { %4518 = vmatpush1.bf16.msra.mxu1 %v18381_v3  ;;  %4390 = vmatprep.subr.bf16.mxu0 %v18386_v4  ;;  %v18449_v3 = vld [vmem:[#allocation9 + $0x464] ss:$24 sps:$4 sm:$0xff]   ;;  %v18447_v4 = vld [vmem:[#allocation9 + $0x460] ss:$24 sps:$4 sm:$0xff]  }
 0x290   :  { %4519 = vmatprep.subr.bf16.mxu1 %v18389_v6  ;;  %v18450_v6 = vld [vmem:[#allocation9 + $0x488] ss:$24 sps:$4 sm:$0xff]  }
 0x292   :  { %4391 = vmatpush1.bf16.msra.mxu0 %v18384_v5  ;;  %v18452_v5 = vld [vmem:[#allocation9 + $0x48c] ss:$24 sps:$4 sm:$0xff]  }
 0x293   :  { %4520 = vmatpush1.bf16.msra.mxu1 %v18387_v7  ;;  %4392 = vmatprep.subr.bf16.mxu0 %v18392_v8  ;;  %v18455_v7 = vld [vmem:[#allocation9 + $0x494] ss:$24 sps:$4 sm:$0xff]   ;;  %v18453_v8 = vld [vmem:[#allocation9 + $0x490] ss:$24 sps:$4 sm:$0xff]  }
 0x294   :  { %4521 = vmatprep.subr.bf16.mxu1 %v18395_v10  ;;  %v18456_v10 = vld [vmem:[#allocation9 + $0x4b8] ss:$24 sps:$4 sm:$0xff]  }
 0x296   :  { %4393 = vmatpush1.bf16.msra.mxu0 %v18390_v9  ;;  %v18458_v9 = vld [vmem:[#allocation9 + $0x4bc] ss:$24 sps:$4 sm:$0xff]  }
 0x297   :  { %4522 = vmatpush1.bf16.msra.mxu1 %v18393_v11  ;;  %4394 = vmatprep.subr.bf16.mxu0 %v18398_v12  ;;  %v18461_v11 = vld [vmem:[#allocation9 + $0x4c4] ss:$24 sps:$4 sm:$0xff]   ;;  %v18459_v12 = vld [vmem:[#allocation9 + $0x4c0] ss:$24 sps:$4 sm:$0xff]  }
 0x298   :  { %4523 = vmatprep.subr.bf16.mxu1 %v18401_v14  ;;  %v18462_v14 = vld [vmem:[#allocation9 + $0x4e8] ss:$24 sps:$4 sm:$0xff]  }
 0x29a   :  { %4395 = vmatpush1.bf16.msra.mxu0 %v18396_v13  ;;  %v18464_v13 = vld [vmem:[#allocation9 + $0x4ec] ss:$24 sps:$4 sm:$0xff]  }
 0x29b   :  { %4524 = vmatpush1.bf16.msra.mxu1 %v18399_v19  ;;  %4407 = vmatprep.subr.bf16.mxu0 %v18404_v20  ;;  %v18467_v19 = vld [vmem:[#allocation9 + $0x4f4] ss:$24 sps:$4 sm:$0xff]   ;;  %v18465_v20 = vld [vmem:[#allocation9 + $0x4f0] ss:$24 sps:$4 sm:$0xff]  }
 0x29c   :  { %4536 = vmatprep.subr.bf16.mxu1 %v18407_v29  ;;  %v18473_v29 = vld [vmem:[#allocation9 + $0x524] ss:$24 sps:$4 sm:$0xff]  }
 0x29d   :  { %4397 = vmatmul.mubr.bf16.vlgmr.msra.gmra.mrb[8].mxu0 %v19378_v36 }
 0x29e   :  { %4408 = vmatpush1.bf16.msra.mxu0 %v18402_v24  ;;  %4526 = vmatmul.mubr.bf16.vlgmr.msra.gmra.mrb[8].mxu1 %v19378_v36  ;;  %v18470_v24 = vld [vmem:[#allocation9 + $0x51c] ss:$24 sps:$4 sm:$0xff]   ;;  %v18474_v36 = vld [vmem:[#allocation9 + $0x548] ss:$24 sps:$4 sm:$0xff]  }
 0x29f   :  { %4537 = vmatpush1.bf16.msra.mxu1 %v18405_v33  ;;  %4409 = vmatprep.subr.bf16.mxu0 %v18410_v34  ;;  %v18468_v33 = vld [vmem:[#allocation9 + $0x518] ss:$24 sps:$4 sm:$0xff]  }
 0x2a0   :  { %4538 = vmatprep.subr.bf16.mxu1 %v18413_v35  ;;  %4439 = vmatprep.mubr.bf16.mxu0 %v19379_v43  ;;  %v18471_v34 = vld [vmem:[#allocation9 + $0x520] ss:$24 sps:$4 sm:$0xff]   ;;  %v18476_v35 = vld [vmem:[#allocation9 + $0x54c] ss:$24 sps:$4 sm:$0xff]  }
 0x2a1   :  { %4568 = vmatprep.mubr.bf16.mxu1 %v19379_v43  ;;  %v18483_v43 = vld [vmem:[#allocation9 + $0x580] ss:$24 sps:$4 sm:$0xff]  }
 0x2a2   :  { %4410 = vmatpush1.bf16.msra.mxu0 %v18408_v37  ;;  %v18479_v37 = vld [vmem:[#allocation9 + $0x554] ss:$24 sps:$4 sm:$0xff]  }
 0x2a3   :  { %4539 = vmatpush1.bf16.msra.mxu1 %v18411_v38  ;;  %4411 = vmatprep.subr.bf16.mxu0 %v18416_v39  ;;  %v18477_v38 = vld [vmem:[#allocation9 + $0x550] ss:$24 sps:$4 sm:$0xff]   ;;  %v18482_v39 = vld [vmem:[#allocation9 + $0x57c] ss:$24 sps:$4 sm:$0xff]  }
 0x2a4   :  { %4540 = vmatprep.subr.bf16.mxu1 %v18419_v42  ;;  %v18485_v42 = vld [vmem:[#allocation9 + $0x584] ss:$24 sps:$4 sm:$0xff]  }
 0x2a6   :  { %4412 = vmatpush1.bf16.msra.mxu0 %v18414_v41  ;;  %v18480_v41 = vld [vmem:[#allocation9 + $0x578] ss:$24 sps:$4 sm:$0xff]  }
 0x2a7   :  { %4541 = vmatpush1.bf16.msra.mxu1 %v18417_v44  ;;  %4413 = vmatprep.subr.bf16.mxu0 %v18422_v45  ;;  %v18488_v44 = vld [vmem:[#allocation9 + $0x5ac] ss:$24 sps:$4 sm:$0xff]   ;;  %v18486_v45 = vld [vmem:[#allocation9 + $0x5a8] ss:$24 sps:$4 sm:$0xff]  }
 0x2a8   :  { %4542 = vmatprep.subr.bf16.mxu1 %v18425_v47  ;;  %v18489_v47 = vld [vmem:[#allocation9 + $0x5b0] ss:$24 sps:$4 sm:$0xff]  }
 0x2aa   :  { %4414 = vmatpush1.bf16.msra.mxu0 %v18420_v46  ;;  %v18491_v46 = vld [vmem:[#allocation9 + $0x5b4] ss:$24 sps:$4 sm:$0xff]  }
 0x2ab   :  { %4543 = vmatpush1.bf16.msra.mxu1 %v18423_v48  ;;  %4415 = vmatprep.subr.bf16.mxu0 %v18428_v49  ;;  %v18494_v48 = vld [vmem:[#allocation9 + $0x5dc] ss:$24 sps:$4 sm:$0xff]   ;;  %v18492_v49 = vld [vmem:[#allocation9 + $0x5d8] ss:$24 sps:$4 sm:$0xff]  }
 0x2ac   :  { %4544 = vmatprep.subr.bf16.mxu1 %v18431_v52  ;;  %v18495_v52 = vld [vmem:[#allocation9 + $0x5e0] ss:$24 sps:$4 sm:$0xff]  }
 0x2ae   :  { %4416 = vmatpush1.bf16.msra.mxu0 %v18426_v50  ;;  %v18497_v50 = vld [vmem:[#allocation9 + $0x5e4] ss:$24 sps:$4 sm:$0xff]  }
 0x2af   :  { %4545 = vmatpush1.bf16.msra.mxu1 %v18429_v53  ;;  %4417 = vmatprep.subr.bf16.mxu0 %v18434_v54  ;;  %v18500_v53 = vld [vmem:[#allocation9 + $0x60c] ss:$24 sps:$4 sm:$0xff]   ;;  %v18498_v54 = vld [vmem:[#allocation9 + $0x608] ss:$24 sps:$4 sm:$0xff]  }
 0x2b0   :  { %4546 = vmatprep.subr.bf16.mxu1 %v18437_v58  ;;  %v18501_v58 = vld [vmem:[#allocation9 + $0x610] ss:$24 sps:$4 sm:$0xff]  }
 0x2b2   :  { %4418 = vmatpush1.bf16.msra.mxu0 %v18432_v57  ;;  %v18503_v57 = vld [vmem:[#allocation9 + $0x614] ss:$24 sps:$4 sm:$0xff]  }
 0x2b3   :  { %4547 = vmatpush1.bf16.msra.mxu1 %v18435_v60  ;;  %4419 = vmatprep.subr.bf16.mxu0 %v18440_v61  ;;  %v18506_v60 = vld [vmem:[#allocation9 + $0x63c] ss:$24 sps:$4 sm:$0xff]   ;;  %v18504_v61 = vld [vmem:[#allocation9 + $0x638] ss:$24 sps:$4 sm:$0xff]  }
 0x2b4   :  { %4548 = vmatprep.subr.bf16.mxu1 %v18443_v63  ;;  %v19380_v63 = vld [vmem:[#allocation4 + $0x20] ss:$72 sps:$4 sm:$0xff]  }
 0x2b6   :  { %4420 = vmatpush1.bf16.msra.mxu0 %v18438_v62  ;;  %v18509_v62 = vld [vmem:[#allocation9 + $0x644] ss:$24 sps:$4 sm:$0xff]  }
 0x2b7   :  { %4549 = vmatpush1.bf16.msra.mxu1 %v18441_v0  ;;  %4421 = vmatprep.subr.bf16.mxu0 %v18446_v1  ;;  %v18507_v0 = vld [vmem:[#allocation9 + $0x640] ss:$24 sps:$4 sm:$0xff]   ;;  %v18512_v1 = vld [vmem:[#allocation9 + $0x66c] ss:$24 sps:$4 sm:$0xff]  }
 0x2b8   :  { %4550 = vmatprep.subr.bf16.mxu1 %v18449_v3  ;;  %v18515_v3 = vld [vmem:[#allocation9 + $0x674] ss:$24 sps:$4 sm:$0xff]  }
 0x2ba   :  { %4422 = vmatpush1.bf16.msra.mxu0 %v18444_v2  ;;  %v18510_v2 = vld [vmem:[#allocation9 + $0x668] ss:$24 sps:$4 sm:$0xff]  }
 0x2bb   :  { %4551 = vmatpush1.bf16.msra.mxu1 %v18447_v4  ;;  %4423 = vmatprep.subr.bf16.mxu0 %v18452_v5  ;;  %v19381_v4 = vld [vmem:[#allocation4 + $0x2c] ss:$72 sps:$4 sm:$0xff]   ;;  %v18513_v5 = vld [vmem:[#allocation9 + $0x670] ss:$24 sps:$4 sm:$0xff]  }
 0x2bc   :  { %4552 = vmatprep.subr.bf16.mxu1 %v18455_v7  ;;  %v18521_v7 = vld [vmem:[#allocation9 + $0x69c] ss:$24 sps:$4 sm:$0xff]  }
 0x2be   :  { %4424 = vmatpush1.bf16.msra.mxu0 %v18450_v6  ;;  %v18518_v6 = vld [vmem:[#allocation9 + $0x6a4] ss:$24 sps:$4 sm:$0xff]  }
 0x2bf   :  { %4553 = vmatpush1.bf16.msra.mxu1 %v18453_v8  ;;  %4425 = vmatprep.subr.bf16.mxu0 %v18458_v9  ;;  %v18519_v8 = vld [vmem:[#allocation9 + $0x698] ss:$24 sps:$4 sm:$0xff]  }
 0x2c0   :  { %4554 = vmatprep.subr.bf16.mxu1 %v18461_v11  ;;  %v18516_v9 = vld [vmem:[#allocation9 + $0x6a0] ss:$24 sps:$4 sm:$0xff]  }
 0x2c1   :  { %v18522_v11 = vld [vmem:[#allocation9 + $0x6c8] ss:$24 sps:$4 sm:$0xff]  }
 0x2c2   :  { %4426 = vmatpush1.bf16.msra.mxu0 %v18456_v10  ;;  %v18524_v10 = vld [vmem:[#allocation9 + $0x6cc] ss:$24 sps:$4 sm:$0xff]  }
 0x2c3   :  { %4555 = vmatpush1.bf16.msra.mxu1 %v18459_v12  ;;  %4427 = vmatprep.subr.bf16.mxu0 %v18464_v13  ;;  %v18527_v12 = vld [vmem:[#allocation9 + $0x6d4] ss:$24 sps:$4 sm:$0xff]  }
 0x2c4   :  { %4556 = vmatprep.subr.bf16.mxu1 %v18467_v19  ;;  %v18525_v19 = vld [vmem:[#allocation9 + $0x6d0] ss:$24 sps:$4 sm:$0xff]  }
 0x2c6   :  { %4428 = vmatpush1.bf16.msra.mxu0 %v18462_v14 }
 0x2c7   :  { %4557 = vmatpush1.bf16.msra.mxu1 %v18465_v20  ;;  %4429 = vmatprep.subr.bf16.mxu0 %v18470_v24  ;;  %v18530_v20 = vld [vmem:[#allocation9 + $0x6fc] ss:$24 sps:$4 sm:$0xff]   ;;  %v18528_v24 = vld [vmem:[#allocation9 + $0x6f8] ss:$24 sps:$4 sm:$0xff]  }
 0x2c8   :  { %4558 = vmatprep.subr.bf16.mxu1 %v18473_v29  ;;  %v18533_v29 = vld [vmem:[#allocation9 + $0x704] ss:$24 sps:$4 sm:$0xff]  }
 0x2ca   :  { %4430 = vmatpush1.bf16.msra.mxu0 %v18468_v33 }
 0x2cb   :  { %4559 = vmatpush1.bf16.msra.mxu1 %v18471_v34  ;;  %4431 = vmatprep.subr.bf16.mxu0 %v18476_v35 }
 0x2cc   :  { %4560 = vmatprep.subr.bf16.mxu1 %v18479_v37  ;;  %v18536_v37 = vld [vmem:[#allocation9 + $0x72c] ss:$24 sps:$4 sm:$0xff]  }
 0x2ce   :  { %4432 = vmatpush1.bf16.msra.mxu0 %v18474_v36  ;;  %v18531_v36 = vld [vmem:[#allocation9 + $0x700] ss:$24 sps:$4 sm:$0xff]  }
 0x2cf   :  { %4561 = vmatpush1.bf16.msra.mxu1 %v18477_v38  ;;  %4433 = vmatprep.subr.bf16.mxu0 %v18482_v39  ;;  %v18534_v38 = vld [vmem:[#allocation9 + $0x728] ss:$24 sps:$4 sm:$0xff]   ;;  %v18539_v39 = vld [vmem:[#allocation9 + $0x734] ss:$24 sps:$4 sm:$0xff]  }
 0x2d0   :  { %4562 = vmatprep.subr.bf16.mxu1 %v18485_v42 }
 0x2d2   :  { %4434 = vmatpush1.bf16.msra.mxu0 %v18480_v41 }
 0x2d3   :  { %4563 = vmatpush1.bf16.msra.mxu1 %v18483_v43  ;;  %4435 = vmatprep.subr.bf16.mxu0 %v18488_v44  ;;  %v18537_v43 = vld [vmem:[#allocation9 + $0x730] ss:$24 sps:$4 sm:$0xff]   ;;  %v18542_v44 = vld [vmem:[#allocation9 + $0x75c] ss:$24 sps:$4 sm:$0xff]  }
 0x2d4   :  { %4564 = vmatprep.subr.bf16.mxu1 %v18491_v46  ;;  %v18545_v46 = vld [vmem:[#allocation9 + $0x764] ss:$24 sps:$4 sm:$0xff]  }
 0x2d6   :  { %4436 = vmatpush1.bf16.msra.mxu0 %v18486_v45  ;;  %v18540_v45 = vld [vmem:[#allocation9 + $0x758] ss:$24 sps:$4 sm:$0xff]  }
 0x2d7   :  { %4565 = vmatpush1.bf16.msra.mxu1 %v18489_v47  ;;  %4437 = vmatprep.subr.bf16.mxu0 %v18494_v48  ;;  %v18543_v47 = vld [vmem:[#allocation9 + $0x760] ss:$24 sps:$4 sm:$0xff]   ;;  %v18548_v48 = vld [vmem:[#allocation9 + $0x78c] ss:$24 sps:$4 sm:$0xff]  }
 0x2d8   :  { %4566 = vmatprep.subr.bf16.mxu1 %v18497_v50  ;;  %v18551_v50 = vld [vmem:[#allocation9 + $0x794] ss:$24 sps:$4 sm:$0xff]  }
 0x2da   :  { %4438 = vmatpush1.bf16.msra.mxu0 %v18492_v49  ;;  %v18546_v49 = vld [vmem:[#allocation9 + $0x788] ss:$24 sps:$4 sm:$0xff]  }
 0x2db   :  { %4567 = vmatpush1.bf16.msra.mxu1 %v18495_v52  ;;  %4450 = vmatprep.subr.bf16.mxu0 %v18500_v53  ;;  %v18549_v52 = vld [vmem:[#allocation9 + $0x790] ss:$24 sps:$4 sm:$0xff]   ;;  %v18554_v53 = vld [vmem:[#allocation9 + $0x7bc] ss:$24 sps:$4 sm:$0xff]  }
 0x2dc   :  { %4579 = vmatprep.subr.bf16.mxu1 %v18503_v57  ;;  %v18557_v57 = vld [vmem:[#allocation9 + $0x7c4] ss:$24 sps:$4 sm:$0xff]  }
 0x2dd   :  { %4440 = vmatmul.mubr.bf16.vlgmr.msra.gmra.mrb[8].mxu0 %v19380_v63 }
 0x2de   :  { %4451 = vmatpush1.bf16.msra.mxu0 %v18498_v54  ;;  %4569 = vmatmul.mubr.bf16.vlgmr.msra.gmra.mrb[8].mxu1 %v19380_v63  ;;  %v18552_v54 = vld [vmem:[#allocation9 + $0x7b8] ss:$24 sps:$4 sm:$0xff]  }
 0x2df   :  { %4580 = vmatpush1.bf16.msra.mxu1 %v18501_v58  ;;  %4452 = vmatprep.subr.bf16.mxu0 %v18506_v60  ;;  %v18555_v58 = vld [vmem:[#allocation9 + $0x7c0] ss:$24 sps:$4 sm:$0xff]   ;;  %v18560_v60 = vld [vmem:[#allocation9 + $0x7ec] ss:$24 sps:$4 sm:$0xff]   ;;  %v18561_v63 = vld [vmem:[#allocation9 + $0x7f0] ss:$24 sps:$4 sm:$0xff]  }
 0x2e0   :  { %4581 = vmatprep.subr.bf16.mxu1 %v18509_v62  ;;  %4482 = vmatprep.mubr.bf16.mxu0 %v19381_v4  ;;  %v18563_v62 = vld [vmem:[#allocation9 + $0x7f4] ss:$24 sps:$4 sm:$0xff]  }
 0x2e1   :  { %4611 = vmatprep.mubr.bf16.mxu1 %v19381_v4  ;;  %v18572_v4 = vld [vmem:[#allocation9 + $0x84c] ss:$24 sps:$4 sm:$0xff]  }
 0x2e2   :  { %4453 = vmatpush1.bf16.msra.mxu0 %v18504_v61  ;;  %v18558_v61 = vld [vmem:[#allocation9 + $0x7e8] ss:$24 sps:$4 sm:$0xff]  }
 0x2e3   :  { %4582 = vmatpush1.bf16.msra.mxu1 %v18507_v0  ;;  %4454 = vmatprep.subr.bf16.mxu0 %v18512_v1  ;;  %v18566_v0 = vld [vmem:[#allocation9 + $0x81c] ss:$24 sps:$4 sm:$0xff]   ;;  %v18564_v1 = vld [vmem:[#allocation9 + $0x818] ss:$24 sps:$4 sm:$0xff]  }
 0x2e4   :  { %4583 = vmatprep.subr.bf16.mxu1 %v18515_v3  ;;  %v18567_v3 = vld [vmem:[#allocation9 + $0x820] ss:$24 sps:$4 sm:$0xff]  }
 0x2e6   :  { %4455 = vmatpush1.bf16.msra.mxu0 %v18510_v2  ;;  %v18569_v2 = vld [vmem:[#allocation9 + $0x824] ss:$24 sps:$4 sm:$0xff]  }
 0x2e7   :  { %4584 = vmatpush1.bf16.msra.mxu1 %v18513_v5  ;;  %4456 = vmatprep.subr.bf16.mxu0 %v18521_v7  ;;  %v18570_v5 = vld [vmem:[#allocation9 + $0x848] ss:$24 sps:$4 sm:$0xff]  }
 0x2e8   :  { %4585 = vmatprep.subr.bf16.mxu1 %v18518_v6  ;;  %v18575_v6 = vld [vmem:[#allocation9 + $0x854] ss:$24 sps:$4 sm:$0xff]   ;;  %v18573_v7 = vld [vmem:[#allocation9 + $0x850] ss:$24 sps:$4 sm:$0xff]  }
 0x2e9   :  { %v2390_v13 = vpop.permute.xlu0 %2389 }
 0x2ea   :  { %v2402_v14 = vpop.permute.xlu1 %2401  ;;  %4457 = vmatpush1.bf16.msra.mxu0 %v18519_v8  ;;  %v18578_v8 = vld [vmem:[#allocation9 + $0x87c] ss:$24 sps:$4 sm:$0xff]  }
 0x2eb   :  { %4586 = vmatpush1.bf16.msra.mxu1 %v18516_v9  ;;  %4458 = vmatprep.subr.bf16.mxu0 %v18524_v10  ;;  %v18576_v9 = vld [vmem:[#allocation9 + $0x878] ss:$24 sps:$4 sm:$0xff]   ;;  %v18581_v10 = vld [vmem:[#allocation9 + $0x884] ss:$24 sps:$4 sm:$0xff]  }
 0x2ec   :  { %4587 = vmatprep.subr.bf16.mxu1 %v18527_v12  ;;  %v18584_v12 = vld [vmem:[#allocation9 + $0x8ac] ss:$24 sps:$4 sm:$0xff]  }
 0x2ed   :  { %v2409_v33 = vpop.permute.xlu0 %2408 }
 0x2ee   :  { %v2400_v34 = vpop.permute.xlu1 %2399  ;;  %2412 = vst.msk [vmem:[#allocation2 + $0xa8] sm:$0xff] %vm2385_vm14, %v2409_v33  ;;  %4459 = vmatpush1.bf16.msra.mxu0 %v18522_v11  ;;  %v18579_v11 = vld [vmem:[#allocation9 + $0x880] ss:$24 sps:$4 sm:$0xff]  }
 0x2ef   :  { %v2404_v35 = vsel %vm2403_vm15, %v2400_v34, %v2402_v14  ;;  %4588 = vmatpush1.bf16.msra.mxu1 %v18525_v19  ;;  %4460 = vmatprep.subr.bf16.mxu0 %v18530_v20  ;;  %v18587_v14 = vld [vmem:[#allocation9 + $0x8b4] ss:$24 sps:$4 sm:$0xff]   ;;  %v18585_v19 = vld [vmem:[#allocation9 + $0x8b0] ss:$24 sps:$4 sm:$0xff]   ;;  %v18591_v33 = vld [vmem:[#allocation9 + $0x8e0] ss:$24 sps:$4 sm:$0xff]  }
 0x2f0   :  { %2407 = vst.msk [vmem:[#allocation2 + $0x70] sm:$0xff] %vm2385_vm14, %v2404_v35  ;;  %4589 = vmatprep.subr.bf16.mxu1 %v18533_v29  ;;  %v18590_v20 = vld [vmem:[#allocation9 + $0x8dc] ss:$24 sps:$4 sm:$0xff]   ;;  %v18599_v35 = vld [vmem:[#allocation9 + $0xc] ss:$24 sps:$4 sm:$0xff]  }
 0x2f1   :  { %v2392_v41 = vpop.permute.xlu0 %2391  ;;  %v18593_v29 = vld [vmem:[#allocation9 + $0x8e4] ss:$24 sps:$4 sm:$0xff]  }
 0x2f2   :  { %v2394_v42 = vsel %vm22155_vm13, %v2390_v13, %v2392_v41  ;;  %4461 = vmatpush1.bf16.msra.mxu0 %v18528_v24  ;;  %v18582_v13 = vld [vmem:[#allocation9 + $0x8a8] ss:$24 sps:$4 sm:$0xff]   ;;  %v18588_v24 = vld [vmem:[#allocation9 + $0x8d8] ss:$24 sps:$4 sm:$0xff]   ;;  %v18596_v34 = vld [vmem:[#allocation9 + $0x4] ss:$24 sps:$4 sm:$0xff]  }
 0x2f3   :  { %2397 = vst.msk [vmem:[#allocation2 + $0x38] sm:$0xff] %vm2385_vm14, %v2394_v42  ;;  %4590 = vmatpush1.bf16.msra.mxu1 %v18531_v36  ;;  %4462 = vmatprep.subr.bf16.mxu0 %v18536_v37  ;;  %v18594_v36 = vld [vmem:[#allocation9] ss:$24 sps:$4 sm:$0xff]   ;;  %v18605_v41 = vld [vmem:[#allocation9 + $0x3c] ss:$24 sps:$4 sm:$0xff]  }
 0x2f4   :  { %4591 = vmatprep.subr.bf16.mxu1 %v18539_v39  ;;  %v18597_v37 = vld [vmem:[#allocation9 + $0x8] ss:$24 sps:$4 sm:$0xff]   ;;  %v18692_v42 = vld [vmem:[#allocation4 + $0x34] ss:$72 sps:$4 sm:$0xff]  }
 0x2f5   :  { %v18600_v39 = vld [vmem:[#allocation9 + $0x30] ss:$24 sps:$4 sm:$0xff]  }
 0x2f6   :  { %4463 = vmatpush1.bf16.msra.mxu0 %v18534_v38  ;;  %v18602_v38 = vld [vmem:[#allocation9 + $0x34] ss:$24 sps:$4 sm:$0xff]  }
 0x2f7   :  { %4592 = vmatpush1.bf16.msra.mxu1 %v18537_v43  ;;  %4464 = vmatprep.subr.bf16.mxu0 %v18542_v44  ;;  %v19382_v43 = vld [vmem:[#allocation4 + $0x28] ss:$72 sps:$4 sm:$0xff]  }
 0x2f8   :  { %4593 = vmatprep.subr.bf16.mxu1 %v18545_v46  ;;  %v18603_v44 = vld [vmem:[#allocation9 + $0x38] ss:$24 sps:$4 sm:$0xff]  }
 0x2f9   :  { %v18606_v46 = vld [vmem:[#allocation9 + $0x60] ss:$24 sps:$4 sm:$0xff]  }
 0x2fa   :  { %4465 = vmatpush1.bf16.msra.mxu0 %v18540_v45  ;;  %v18608_v45 = vld [vmem:[#allocation9 + $0x64] ss:$24 sps:$4 sm:$0xff]  }
 0x2fb   :  { %4594 = vmatpush1.bf16.msra.mxu1 %v18543_v47  ;;  %4466 = vmatprep.subr.bf16.mxu0 %v18548_v48  ;;  %v18611_v47 = vld [vmem:[#allocation9 + $0x6c] ss:$24 sps:$4 sm:$0xff]   ;;  %v18609_v48 = vld [vmem:[#allocation9 + $0x68] ss:$24 sps:$4 sm:$0xff]  }
 0x2fc   :  { %4595 = vmatprep.subr.bf16.mxu1 %v18551_v50  ;;  %v18612_v50 = vld [vmem:[#allocation9 + $0x90] ss:$24 sps:$4 sm:$0xff]  }
 0x2fe   :  { %4467 = vmatpush1.bf16.msra.mxu0 %v18546_v49  ;;  %v18614_v49 = vld [vmem:[#allocation9 + $0x94] ss:$24 sps:$4 sm:$0xff]  }
 0x2ff   :  { %4596 = vmatpush1.bf16.msra.mxu1 %v18549_v52  ;;  %4468 = vmatprep.subr.bf16.mxu0 %v18554_v53  ;;  %v18617_v52 = vld [vmem:[#allocation9 + $0x9c] ss:$24 sps:$4 sm:$0xff]   ;;  %v18615_v53 = vld [vmem:[#allocation9 + $0x98] ss:$24 sps:$4 sm:$0xff]  }
 0x300   :  { %4597 = vmatprep.subr.bf16.mxu1 %v18557_v57  ;;  %v18618_v57 = vld [vmem:[#allocation9 + $0xc0] ss:$24 sps:$4 sm:$0xff]  }
 0x302   :  { %4469 = vmatpush1.bf16.msra.mxu0 %v18552_v54  ;;  %v18620_v54 = vld [vmem:[#allocation9 + $0xc4] ss:$24 sps:$4 sm:$0xff]  }
 0x303   :  { %4598 = vmatpush1.bf16.msra.mxu1 %v18555_v58  ;;  %4470 = vmatprep.subr.bf16.mxu0 %v18560_v60  ;;  %v18623_v58 = vld [vmem:[#allocation9 + $0xcc] ss:$24 sps:$4 sm:$0xff]   ;;  %v18621_v60 = vld [vmem:[#allocation9 + $0xc8] ss:$24 sps:$4 sm:$0xff]  }
 0x304   :  { %4599 = vmatprep.subr.bf16.mxu1 %v18563_v62  ;;  %v20721_v62 = vsub.s32 4, %v20619_v40 }
 0x306   :  { %4471 = vmatpush1.bf16.msra.mxu0 %v18558_v61  ;;  %v18626_v61 = vld [vmem:[#allocation9 + $0xf4] ss:$24 sps:$4 sm:$0xff]   ;;  %22203 = vst [vmem:[#allocation52_spill] sm:$0xff] %v20721_v62 }
 0x307   :  { %4600 = vmatpush1.bf16.msra.mxu1 %v18561_v63  ;;  %4472 = vmatprep.subr.bf16.mxu0 %v18566_v0  ;;  %v2733_v63 = vld [vmem:[#allocation10] sm:$0x3f]  ;;  %v20724_v0 = vsub.s32 5, %v20619_v40  ;;  %v20892_v40 = vld [vmem:[#allocation12 + $0x10] ss:$24 sps:$4 sm:$0xff]  }
 0x308   :  { %4601 = vmatprep.subr.bf16.mxu1 %v18569_v2  ;;  %v18624_v2 = vld [vmem:[#allocation9 + $0xf0] ss:$24 sps:$4 sm:$0xff]  }
 0x309   :  { %22204 = vst [vmem:[#allocation53_spill] sm:$0xff] %v20724_v0 }
 0x30a   :  { %4473 = vmatpush1.bf16.msra.mxu0 %v18564_v1  ;;  %v18629_v1 = vld [vmem:[#allocation9 + $0xfc] ss:$24 sps:$4 sm:$0xff]  }
 0x30b   :  { %4602 = vmatpush1.bf16.msra.mxu1 %v18567_v3  ;;  %4474 = vmatprep.subr.bf16.mxu0 %v18572_v4  ;;  %v19383_v3 = vld [vmem:[#allocation10] sm:$0x3f] }
 0x30c   :  { %4603 = vmatprep.subr.bf16.mxu1 %v18575_v6  ;;  %v511_v4 = vrot.slane %v19383_v3, %v20721_v62  ;;  %v18632_v6 = vld [vmem:[#allocation9 + $0x124] ss:$24 sps:$4 sm:$0xff]  }
 0x30e   :  { %4475 = vmatpush1.bf16.msra.mxu0 %v18570_v5  ;;  %v18627_v5 = vld [vmem:[#allocation9 + $0xf8] ss:$24 sps:$4 sm:$0xff]  }
 0x30f   :  { %4604 = vmatpush1.bf16.msra.mxu1 %v18573_v7  ;;  %4476 = vmatprep.subr.bf16.mxu0 %v18578_v8  ;;  %v18635_v7 = vld [vmem:[#allocation9 + $0x12c] ss:$24 sps:$4 sm:$0xff]  }
 0x310   :  { %4605 = vmatprep.subr.bf16.mxu1 %v18581_v10  ;;  %v515_v10 = vrot.slane %v19383_v3, %v20724_v0  ;;  %v18654_v3 = vld [vmem:[#allocation9 + $0x1e0] ss:$24 sps:$4 sm:$0xff]  }
 0x312   :  { %4477 = vmatpush1.bf16.msra.mxu0 %v18576_v9  ;;  %v2738_v9 = vrot.slane %v2733_v63, %v20692_v51 }
 0x313   :  { %4606 = vmatpush1.bf16.msra.mxu1 %v18579_v11  ;;  %4478 = vmatprep.subr.bf16.mxu0 %v18584_v12  ;;  %v18630_v11 = vld [vmem:[#allocation9 + $0x120] ss:$24 sps:$4 sm:$0xff]  }
 0x314   :  { %4607 = vmatprep.subr.bf16.mxu1 %v18587_v14  ;;  %v2742_v14 = vrot.slane %v2733_v63, %v20698_v56  ;;  %v18653_v63 = vld [vmem:[#allocation9 + $0x1bc] ss:$24 sps:$4 sm:$0xff]  }
 0x316   :  { %4479 = vmatpush1.bf16.msra.mxu0 %v18582_v13 }
 0x317   :  { %4608 = vmatpush1.bf16.msra.mxu1 %v18585_v19  ;;  %4480 = vmatprep.subr.bf16.mxu0 %v18590_v20  ;;  %v18633_v19 = vld [vmem:[#allocation9 + $0x128] ss:$24 sps:$4 sm:$0xff]  }
 0x318   :  { %4609 = vmatprep.subr.bf16.mxu1 %v18593_v29 }
 0x31a   :  { %4481 = vmatpush1.bf16.msra.mxu0 %v18588_v24 }
 0x31b   :  { %4610 = vmatpush1.bf16.msra.mxu1 %v18591_v33  ;;  %6468 = vmatprep.subr.bf16.mxu0 %v18596_v34 }
 0x31c   :  { %6597 = vmatprep.subr.bf16.mxu1 %v18599_v35 }
 0x31d   :  { %4483 = vmatmul.mubr.bf16.vlgmr.msra.gmra.mrb[8].mxu0 %v19382_v43 }
 0x31e   :  { %4612 = vmatmul.mubr.bf16.vlgmr.msra.gmra.mrb[8].mxu1 %v19382_v43  ;;  %6469 = vmatpush1.bf16.msra.mxu0 %v18594_v36 }
 0x31f   :  { %6598 = vmatpush1.bf16.msra.mxu1 %v18597_v37  ;;  %6470 = vmatprep.subr.bf16.mxu0 %v18602_v38 }
 0x320   :  { %6599 = vmatprep.subr.bf16.mxu1 %v18605_v41  ;;  %6500 = vmatprep.mubr.bf16.mxu0 %v18692_v42 }
 0x321   :  { %6629 = vmatprep.mubr.bf16.mxu1 %v18692_v42  ;;  %v18638_v42 = vld [vmem:[#allocation9 + $0x154] ss:$24 sps:$4 sm:$0xff]  }
 0x322   :  { %6471 = vmatpush1.bf16.msra.mxu0 %v18600_v39 }
 0x323   :  { %6600 = vmatpush1.bf16.msra.mxu1 %v18603_v44  ;;  %6472 = vmatprep.subr.bf16.mxu0 %v18608_v45 }
 0x324   :  { %6601 = vmatprep.subr.bf16.mxu1 %v18611_v47  ;;  %v18641_v47 = vld [vmem:[#allocation9 + $0x15c] ss:$24 sps:$4 sm:$0xff]  }
 0x326   :  { %6473 = vmatpush1.bf16.msra.mxu0 %v18606_v46  ;;  %v18636_v46 = vld [vmem:[#allocation9 + $0x150] ss:$24 sps:$4 sm:$0xff]  }
 0x327   :  { %6602 = vmatpush1.bf16.msra.mxu1 %v18609_v48  ;;  %6474 = vmatprep.subr.bf16.mxu0 %v18614_v49 }
 0x328   :  { %6603 = vmatprep.subr.bf16.mxu1 %v18617_v52  ;;  %v18644_v52 = vld [vmem:[#allocation9 + $0x184] ss:$24 sps:$4 sm:$0xff]  }
 0x32a   :  { %6475 = vmatpush1.bf16.msra.mxu0 %v18612_v50  ;;  %v18639_v50 = vld [vmem:[#allocation9 + $0x158] ss:$24 sps:$4 sm:$0xff]  }
 0x32b   :  { %6604 = vmatpush1.bf16.msra.mxu1 %v18615_v53  ;;  %6476 = vmatprep.subr.bf16.mxu0 %v18620_v54  ;;  %v18642_v54 = vld [vmem:[#allocation9 + $0x180] ss:$24 sps:$4 sm:$0xff]  }
 0x32c   :  { %6605 = vmatprep.subr.bf16.mxu1 %v18623_v58  ;;  %v18645_v58 = vld [vmem:[#allocation9 + $0x188] ss:$24 sps:$4 sm:$0xff]  }
 0x32e   :  { %6477 = vmatpush1.bf16.msra.mxu0 %v18618_v57  ;;  %v18647_v57 = vld [vmem:[#allocation9 + $0x18c] ss:$24 sps:$4 sm:$0xff]  }
 0x32f   :  { %6606 = vmatpush1.bf16.msra.mxu1 %v18621_v60  ;;  %6478 = vmatprep.subr.bf16.mxu0 %v18626_v61  ;;  %v18650_v60 = vld [vmem:[#allocation9 + $0x1b4] ss:$24 sps:$4 sm:$0xff]   ;;  %v18648_v61 = vld [vmem:[#allocation9 + $0x1b0] ss:$24 sps:$4 sm:$0xff]  }
 0x330   :  { %v2370_v8 = vpop.f32.mrb[4].mxu0  ;;  %6607 = vmatprep.subr.bf16.mxu1 %v18629_v1  ;;  %v18651_v1 = vld [vmem:[#allocation9 + $0x1b8] ss:$24 sps:$4 sm:$0xff]  }
 0x331   :  { %v4355_v12 = vpop.f32.mrb[4].mxu1  ;;  %v2372_v13 = vpop.f32.mrb[5].mxu0  ;;  %v17447_v29 = vadd.f32 %v2370_v8, %v511_v4  ;;  %v18665_v8 = vld [vmem:[#allocation9 + $0x21c] ss:$24 sps:$4 sm:$0xff]  }
 0x332   :  { %v4357_v20 = vpop.f32.mrb[5].mxu1  ;;  %v2374_v24 = vpop.f32.mrb[6].mxu0  ;;  %6479 = vmatpush1.bf16.msra.mxu0 %v18624_v2  ;;  %v17451_v36 = vadd.f32 %v4355_v12, %v2738_v9  ;;  %v17448_v37 = vadd.f32 %v2372_v13, %v515_v10  ;;  %v18656_v2 = vld [vmem:[#allocation9 + $0x1e4] ss:$24 sps:$4 sm:$0xff]   ;;  %v18669_v13 = vld [vmem:[#allocation9 + $0x248] ss:$24 sps:$4 sm:$0xff]  }
 0x333   :  { %v17449_v33 = vadd.f32 %v2374_v24, %v511_v4  ;;  %v4359_v34 = vpop.f32.mrb[6].mxu1  ;;  %6608 = vmatpush1.bf16.msra.mxu1 %v18627_v5  ;;  %v2376_v35 = vpop.f32.mrb[7].mxu0  ;;  %6480 = vmatprep.subr.bf16.mxu0 %v18632_v6  ;;  %v17452_v43 = vadd.f32 %v4357_v20, %v2742_v14  ;;  %v18659_v4 = vld [vmem:[#allocation9 + $0x1ec] ss:$24 sps:$4 sm:$0xff]   ;;  %v18657_v5 = vld [vmem:[#allocation9 + $0x1e8] ss:$24 sps:$4 sm:$0xff]  }
 0x334   :  { %v17453_v38 = vadd.f32 %v4359_v34, %v2738_v9  ;;  %v17450_v39 = vadd.f32 %v2376_v35, %v515_v10  ;;  %v4361_v41 = vpop.f32.mrb[7].mxu1  ;;  %6609 = vmatprep.subr.bf16.mxu1 %v18635_v7  ;;  %v18662_v6 = vld [vmem:[#allocation9 + $0x214] ss:$24 sps:$4 sm:$0xff]   ;;  %v18660_v7 = vld [vmem:[#allocation9 + $0x210] ss:$24 sps:$4 sm:$0xff]  }
 0x335   :  { %v17454_v44 = vadd.f32 %v4361_v41, %v2742_v14  ;;  %v2383_v45 = vpack.c.bf16 %v17449_v33, %v17447_v29  ;;  %v18663_v9 = vld [vmem:[#allocation9 + $0x218] ss:$24 sps:$4 sm:$0xff]   ;;  %v18668_v10 = vld [vmem:[#allocation9 + $0x244] ss:$24 sps:$4 sm:$0xff]   ;;  %v18674_v14 = vld [vmem:[#allocation9 + $0x274] ss:$24 sps:$4 sm:$0xff]  }
 0x336   :  { %v2384_v48 = vpack.c.bf16 %v17450_v39, %v17448_v37  ;;  %6481 = vmatpush1.bf16.msra.mxu0 %v18630_v11  ;;  %v4622_v49 = vpack.c.bf16 %v17453_v38, %v17451_v36  ;;  %v18666_v11 = vld [vmem:[#allocation9 + $0x240] ss:$24 sps:$4 sm:$0xff]   ;;  %v18671_v12 = vld [vmem:[#allocation9 + $0x24c] ss:$24 sps:$4 sm:$0xff]   ;;  %v18677_v20 = vld [vmem:[#allocation9 + $0x27c] ss:$24 sps:$4 sm:$0xff]  }
 0x337   :  { %6610 = vmatpush1.bf16.msra.mxu1 %v18633_v19  ;;  %2426 = vrot.lane.b32.xlu1 %v2383_v45, %s20385_s4  ;;  %v4623_v53 = vpack.c.bf16 %v17454_v44, %v17452_v43  ;;  %v18672_v19 = vld [vmem:[#allocation9 + $0x270] ss:$24 sps:$4 sm:$0xff]   ;;  %v18680_v29 = vld [vmem:[#allocation9 + $0x2a4] ss:$24 sps:$4 sm:$0xff]   ;;  %v18678_v33 = vld [vmem:[#allocation9 + $0x2a0] ss:$24 sps:$4 sm:$0xff]  }
 0x338   :  { %2419 = vrot.lane.b32.xlu0 %v2383_v45, %s20372_s14  ;;  %6482 = vmatprep.subr.bf16.mxu0 %v18638_v42  ;;  %4628 = vst.msk [vmem:[#allocation2 + $0x8] sm:$0xff] %vm2385_vm14, %v4622_v49  ;;  %v18675_v24 = vld [vmem:[#allocation9 + $0x278] ss:$24 sps:$4 sm:$0xff]   ;;  %v18683_v34 = vld [vmem:[#allocation9 + $0x2ac] ss:$24 sps:$4 sm:$0xff]  }
 0x339   :  { %6611 = vmatprep.subr.bf16.mxu1 %v18641_v47  ;;  %v18681_v35 = vld [vmem:[#allocation9 + $0x2a8] ss:$24 sps:$4 sm:$0xff]   ;;  %v18686_v36 = vld [vmem:[#allocation9 + $0x2d4] ss:$24 sps:$4 sm:$0xff]   ;;  %v18687_v39 = vld [vmem:[#allocation9 + $0x2d8] ss:$24 sps:$4 sm:$0xff]  }
 0x33a   :  { %6483 = vmatpush1.bf16.msra.mxu0 %v18636_v46  ;;  %v18689_v37 = vld [vmem:[#allocation9 + $0x2dc] ss:$24 sps:$4 sm:$0xff]   ;;  %v18684_v38 = vld [vmem:[#allocation9 + $0x2d0] ss:$24 sps:$4 sm:$0xff]   ;;  %v18698_v42 = vld [vmem:[#allocation9 + $0x30c] ss:$24 sps:$4 sm:$0xff]  }
 0x33b   :  { %6612 = vmatpush1.bf16.msra.mxu1 %v18639_v50  ;;  %2434 = vrot.lane.b32.xlu1 %v2384_v48, %s20392_s11  ;;  %v18695_v41 = vld [vmem:[#allocation9 + $0x304] ss:$24 sps:$4 sm:$0xff]   ;;  %v20738_v43 = vld [vmem:[#allocation4 + $0x30] ss:$72 sps:$4 sm:$0xff]   ;;  %v18701_v46 = vld [vmem:[#allocation9 + $0x334] ss:$24 sps:$4 sm:$0xff]  }
 0x33c   :  { %4631 = vrot.lane.b32.xlu0 %v4622_v49, %s20372_s14  ;;  %6484 = vmatprep.subr.bf16.mxu0 %v18644_v52  ;;  %v18693_v44 = vld [vmem:[#allocation9 + $0x300] ss:$24 sps:$4 sm:$0xff]   ;;  %v18704_v47 = vld [vmem:[#allocation9 + $0x33c] ss:$24 sps:$4 sm:$0xff]   ;;  %v18699_v49 = vld [vmem:[#allocation9 + $0x330] ss:$24 sps:$4 sm:$0xff]  }
 0x33d   :  { %6613 = vmatprep.subr.bf16.mxu1 %v18647_v57  ;;  %v18696_v45 = vld [vmem:[#allocation9 + $0x308] ss:$24 sps:$4 sm:$0xff]   ;;  %v18702_v50 = vld [vmem:[#allocation9 + $0x338] ss:$24 sps:$4 sm:$0xff]   ;;  %v18707_v52 = vld [vmem:[#allocation9 + $0x364] ss:$24 sps:$4 sm:$0xff]  }
 0x33e   :  { %6485 = vmatpush1.bf16.msra.mxu0 %v18642_v54  ;;  %v18705_v54 = vld [vmem:[#allocation9 + $0x360] ss:$24 sps:$4 sm:$0xff]  }
 0x33f   :  { %6614 = vmatpush1.bf16.msra.mxu1 %v18645_v58  ;;  %4633 = vrot.lane.b32.xlu1 %v4623_v53, %s20372_s14  ;;  %v18708_v57 = vld [vmem:[#allocation9 + $0x368] ss:$24 sps:$4 sm:$0xff]   ;;  %v18713_v58 = vld [vmem:[#allocation9 + $0x394] ss:$24 sps:$4 sm:$0xff]  }
 0x340   :  { %2428 = vrot.lane.b32.xlu0 %v2384_v48, %s20385_s4  ;;  %6486 = vmatprep.subr.bf16.mxu0 %v18650_v60  ;;  %v20740_v48 = vld [vmem:[#allocation4 + $0x3c] ss:$72 sps:$4 sm:$0xff]  }
 0x341   :  { %6615 = vmatprep.subr.bf16.mxu1 %v18653_v63  ;;  %v18716_v60 = vld [vmem:[#allocation9 + $0x39c] ss:$24 sps:$4 sm:$0xff]   ;;  %v18714_v63 = vld [vmem:[#allocation9 + $0x398] ss:$24 sps:$4 sm:$0xff]  }
 0x342   :  { %6487 = vmatpush1.bf16.msra.mxu0 %v18648_v61  ;;  %v18711_v61 = vld [vmem:[#allocation9 + $0x390] ss:$24 sps:$4 sm:$0xff]  }
 0x343   :  { %6616 = vmatpush1.bf16.msra.mxu1 %v18651_v1  ;;  %6488 = vmatprep.subr.bf16.mxu0 %v18656_v2  ;;  %v18719_v1 = vld [vmem:[#allocation9 + $0x3c4] ss:$24 sps:$4 sm:$0xff]  }
 0x344   :  { %4639 = vrot.lane.b32.xlu0 %v4623_v53, %s20385_s4  ;;  %6617 = vmatprep.subr.bf16.mxu1 %v18659_v4  ;;  %v18710_v53 = vld [vmem:[#allocation9 + $0x36c] ss:$24 sps:$4 sm:$0xff]   ;;  %v18720_v4 = vld [vmem:[#allocation9 + $0x3c8] ss:$24 sps:$4 sm:$0xff]  }
 0x345   :  { %v18722_v2 = vld [vmem:[#allocation9 + $0x3cc] ss:$24 sps:$4 sm:$0xff]  }
 0x346   :  { %6489 = vmatpush1.bf16.msra.mxu0 %v18654_v3  ;;  %v18717_v3 = vld [vmem:[#allocation9 + $0x3c0] ss:$24 sps:$4 sm:$0xff]  }
 0x347   :  { %6618 = vmatpush1.bf16.msra.mxu1 %v18657_v5  ;;  %6490 = vmatprep.subr.bf16.mxu0 %v18662_v6  ;;  %v18725_v5 = vld [vmem:[#allocation9 + $0x3f4] ss:$24 sps:$4 sm:$0xff]  }
 0x348   :  { %6619 = vmatprep.subr.bf16.mxu1 %v18665_v8  ;;  %v18728_v6 = vld [vmem:[#allocation9 + $0x3fc] ss:$24 sps:$4 sm:$0xff]   ;;  %v18726_v8 = vld [vmem:[#allocation9 + $0x3f8] ss:$24 sps:$4 sm:$0xff]  }
 0x34a   :  { %6491 = vmatpush1.bf16.msra.mxu0 %v18660_v7  ;;  %v18723_v7 = vld [vmem:[#allocation9 + $0x3f0] ss:$24 sps:$4 sm:$0xff]  }
 0x34b   :  { %6620 = vmatpush1.bf16.msra.mxu1 %v18663_v9  ;;  %6492 = vmatprep.subr.bf16.mxu0 %v18668_v10  ;;  %v18731_v9 = vld [vmem:[#allocation9 + $0x424] ss:$24 sps:$4 sm:$0xff]  }
 0x34c   :  { %6621 = vmatprep.subr.bf16.mxu1 %v18671_v12  ;;  %v18734_v10 = vld [vmem:[#allocation9 + $0x42c] ss:$24 sps:$4 sm:$0xff]   ;;  %v18732_v12 = vld [vmem:[#allocation9 + $0x428] ss:$24 sps:$4 sm:$0xff]  }
 0x34e   :  { %6493 = vmatpush1.bf16.msra.mxu0 %v18666_v11  ;;  %v18729_v11 = vld [vmem:[#allocation9 + $0x420] ss:$24 sps:$4 sm:$0xff]  }
 0x34f   :  { %6622 = vmatpush1.bf16.msra.mxu1 %v18669_v13  ;;  %6494 = vmatprep.subr.bf16.mxu0 %v18674_v14  ;;  %v18737_v13 = vld [vmem:[#allocation9 + $0x454] ss:$24 sps:$4 sm:$0xff]  }
 0x350   :  { %6623 = vmatprep.subr.bf16.mxu1 %v18677_v20  ;;  %v18740_v14 = vld [vmem:[#allocation9 + $0x45c] ss:$24 sps:$4 sm:$0xff]   ;;  %v18738_v20 = vld [vmem:[#allocation9 + $0x458] ss:$24 sps:$4 sm:$0xff]  }
 0x352   :  { %6495 = vmatpush1.bf16.msra.mxu0 %v18672_v19  ;;  %v18735_v19 = vld [vmem:[#allocation9 + $0x450] ss:$24 sps:$4 sm:$0xff]  }
 0x353   :  { %6624 = vmatpush1.bf16.msra.mxu1 %v18675_v24  ;;  %6496 = vmatprep.subr.bf16.mxu0 %v18680_v29  ;;  %v18743_v24 = vld [vmem:[#allocation9 + $0x484] ss:$24 sps:$4 sm:$0xff]  }
 0x354   :  { %6625 = vmatprep.subr.bf16.mxu1 %v18683_v34  ;;  %v18746_v29 = vld [vmem:[#allocation9 + $0x48c] ss:$24 sps:$4 sm:$0xff]   ;;  %v18744_v34 = vld [vmem:[#allocation9 + $0x488] ss:$24 sps:$4 sm:$0xff]  }
 0x356   :  { %6497 = vmatpush1.bf16.msra.mxu0 %v18678_v33  ;;  %v18741_v33 = vld [vmem:[#allocation9 + $0x480] ss:$24 sps:$4 sm:$0xff]  }
 0x357   :  { %6626 = vmatpush1.bf16.msra.mxu1 %v18681_v35  ;;  %6498 = vmatprep.subr.bf16.mxu0 %v18686_v36  ;;  %v18749_v35 = vld [vmem:[#allocation9 + $0x4b4] ss:$24 sps:$4 sm:$0xff]  }
 0x358   :  { %6627 = vmatprep.subr.bf16.mxu1 %v18689_v37  ;;  %v18752_v36 = vld [vmem:[#allocation9 + $0x4bc] ss:$24 sps:$4 sm:$0xff]   ;;  %v18747_v37 = vld [vmem:[#allocation9 + $0x4b0] ss:$24 sps:$4 sm:$0xff]  }
 0x35a   :  { %6499 = vmatpush1.bf16.msra.mxu0 %v18684_v38  ;;  %v18750_v38 = vld [vmem:[#allocation9 + $0x4b8] ss:$24 sps:$4 sm:$0xff]  }
 0x35b   :  { %6628 = vmatpush1.bf16.msra.mxu1 %v18687_v39  ;;  %6511 = vmatprep.subr.bf16.mxu0 %v18695_v41  ;;  %v18755_v39 = vld [vmem:[#allocation9 + $0x4e4] ss:$24 sps:$4 sm:$0xff]  }
 0x35c   :  { %6640 = vmatprep.subr.bf16.mxu1 %v18698_v42  ;;  %v18758_v41 = vld [vmem:[#allocation9 + $0x4ec] ss:$24 sps:$4 sm:$0xff]   ;;  %v18753_v42 = vld [vmem:[#allocation9 + $0x4e0] ss:$24 sps:$4 sm:$0xff]  }
 0x35d   :  { %6501 = vmatmul.mubr.bf16.vlgmr.msra.gmra.mrb[12].mxu0 %v20738_v43 }
 0x35e   :  { %6512 = vmatpush1.bf16.msra.mxu0 %v18693_v44  ;;  %6630 = vmatmul.mubr.bf16.vlgmr.msra.gmra.mrb[12].mxu1 %v20738_v43  ;;  %v18756_v44 = vld [vmem:[#allocation9 + $0x4e8] ss:$24 sps:$4 sm:$0xff]  }
 0x35f   :  { %6641 = vmatpush1.bf16.msra.mxu1 %v18696_v45  ;;  %6513 = vmatprep.subr.bf16.mxu0 %v18701_v46  ;;  %v18761_v45 = vld [vmem:[#allocation9 + $0x514] ss:$24 sps:$4 sm:$0xff]  }
 0x360   :  { %6642 = vmatprep.subr.bf16.mxu1 %v18704_v47  ;;  %6543 = vmatprep.mubr.bf16.mxu0 %v20740_v48  ;;  %v18764_v46 = vld [vmem:[#allocation9 + $0x51c] ss:$24 sps:$4 sm:$0xff]   ;;  %v18759_v47 = vld [vmem:[#allocation9 + $0x510] ss:$24 sps:$4 sm:$0xff]  }
 0x361   :  { %6672 = vmatprep.mubr.bf16.mxu1 %v20740_v48 }
 0x362   :  { %6514 = vmatpush1.bf16.msra.mxu0 %v18699_v49  ;;  %v18762_v49 = vld [vmem:[#allocation9 + $0x518] ss:$24 sps:$4 sm:$0xff]  }
 0x363   :  { %6643 = vmatpush1.bf16.msra.mxu1 %v18702_v50  ;;  %6515 = vmatprep.subr.bf16.mxu0 %v18707_v52  ;;  %v18767_v50 = vld [vmem:[#allocation9 + $0x544] ss:$24 sps:$4 sm:$0xff]  }
 0x364   :  { %6644 = vmatprep.subr.bf16.mxu1 %v18710_v53  ;;  %v18770_v52 = vld [vmem:[#allocation9 + $0x54c] ss:$24 sps:$4 sm:$0xff]   ;;  %v18765_v53 = vld [vmem:[#allocation9 + $0x540] ss:$24 sps:$4 sm:$0xff]  }
 0x366   :  { %6516 = vmatpush1.bf16.msra.mxu0 %v18705_v54  ;;  %v18768_v54 = vld [vmem:[#allocation9 + $0x548] ss:$24 sps:$4 sm:$0xff]  }
 0x367   :  { %6645 = vmatpush1.bf16.msra.mxu1 %v18708_v57  ;;  %6517 = vmatprep.subr.bf16.mxu0 %v18713_v58  ;;  %v18773_v57 = vld [vmem:[#allocation9 + $0x574] ss:$24 sps:$4 sm:$0xff]  }
 0x368   :  { %6646 = vmatprep.subr.bf16.mxu1 %v18716_v60  ;;  %v18776_v58 = vld [vmem:[#allocation9 + $0x57c] ss:$24 sps:$4 sm:$0xff]   ;;  %v18771_v60 = vld [vmem:[#allocation9 + $0x570] ss:$24 sps:$4 sm:$0xff]  }
 0x36a   :  { %6518 = vmatpush1.bf16.msra.mxu0 %v18711_v61  ;;  %v18774_v61 = vld [vmem:[#allocation9 + $0x578] ss:$24 sps:$4 sm:$0xff]  }
 0x36b   :  { %6647 = vmatpush1.bf16.msra.mxu1 %v18714_v63  ;;  %6519 = vmatprep.subr.bf16.mxu0 %v18719_v1  ;;  %v18779_v63 = vld [vmem:[#allocation9 + $0x5a4] ss:$24 sps:$4 sm:$0xff]  }
 0x36c   :  { %6648 = vmatprep.subr.bf16.mxu1 %v18722_v2  ;;  %v18782_v1 = vld [vmem:[#allocation9 + $0x5ac] ss:$24 sps:$4 sm:$0xff]   ;;  %v18777_v2 = vld [vmem:[#allocation9 + $0x5a0] ss:$24 sps:$4 sm:$0xff]  }
 0x36e   :  { %6520 = vmatpush1.bf16.msra.mxu0 %v18717_v3  ;;  %v18780_v3 = vld [vmem:[#allocation9 + $0x5a8] ss:$24 sps:$4 sm:$0xff]  }
 0x36f   :  { %6649 = vmatpush1.bf16.msra.mxu1 %v18720_v4  ;;  %6521 = vmatprep.subr.bf16.mxu0 %v18725_v5  ;;  %v18785_v4 = vld [vmem:[#allocation9 + $0x5d4] ss:$24 sps:$4 sm:$0xff]  }
 0x370   :  { %6650 = vmatprep.subr.bf16.mxu1 %v18728_v6  ;;  %v18788_v5 = vld [vmem:[#allocation9 + $0x5dc] ss:$24 sps:$4 sm:$0xff]   ;;  %v18783_v6 = vld [vmem:[#allocation9 + $0x5d0] ss:$24 sps:$4 sm:$0xff]  }
 0x372   :  { %6522 = vmatpush1.bf16.msra.mxu0 %v18723_v7  ;;  %v18786_v7 = vld [vmem:[#allocation9 + $0x5d8] ss:$24 sps:$4 sm:$0xff]  }
 0x373   :  { %6651 = vmatpush1.bf16.msra.mxu1 %v18726_v8  ;;  %6523 = vmatprep.subr.bf16.mxu0 %v18731_v9  ;;  %v18794_v8 = vld [vmem:[#allocation9 + $0x604] ss:$24 sps:$4 sm:$0xff]  }
 0x374   :  { %6652 = vmatprep.subr.bf16.mxu1 %v18734_v10  ;;  %v18797_v9 = vld [vmem:[#allocation9 + $0x60c] ss:$24 sps:$4 sm:$0xff]   ;;  %v20746_v10 = vld [vmem:[#allocation4 + $0x38] ss:$72 sps:$4 sm:$0xff]  }
 0x376   :  { %6524 = vmatpush1.bf16.msra.mxu0 %v18729_v11  ;;  %v18792_v11 = vld [vmem:[#allocation9 + $0x600] ss:$24 sps:$4 sm:$0xff]  }
 0x377   :  { %6653 = vmatpush1.bf16.msra.mxu1 %v18732_v12  ;;  %6525 = vmatprep.subr.bf16.mxu0 %v18737_v13  ;;  %v18795_v12 = vld [vmem:[#allocation9 + $0x608] ss:$24 sps:$4 sm:$0xff]   ;;  %v18800_v13 = vld [vmem:[#allocation9 + $0x634] ss:$24 sps:$4 sm:$0xff]  }
 0x378   :  { %6654 = vmatprep.subr.bf16.mxu1 %v18740_v14  ;;  %v18803_v14 = vld [vmem:[#allocation9 + $0x63c] ss:$24 sps:$4 sm:$0xff]  }
 0x37a   :  { %6526 = vmatpush1.bf16.msra.mxu0 %v18735_v19  ;;  %v20748_v19 = vld [vmem:[#allocation4 + $0x44] ss:$72 sps:$4 sm:$0xff]  }
 0x37b   :  { %6655 = vmatpush1.bf16.msra.mxu1 %v18738_v20  ;;  %6527 = vmatprep.subr.bf16.mxu0 %v18743_v24  ;;  %v18798_v20 = vld [vmem:[#allocation9 + $0x630] ss:$24 sps:$4 sm:$0xff]  }
 0x37c   :  { %6656 = vmatprep.subr.bf16.mxu1 %v18746_v29  ;;  %v18801_v24 = vld [vmem:[#allocation9 + $0x638] ss:$24 sps:$4 sm:$0xff]   ;;  %v18806_v29 = vld [vmem:[#allocation9 + $0x664] ss:$24 sps:$4 sm:$0xff]  }
 0x37e   :  { %6528 = vmatpush1.bf16.msra.mxu0 %v18741_v33  ;;  %v18809_v33 = vld [vmem:[#allocation9 + $0x66c] ss:$24 sps:$4 sm:$0xff]  }
 0x37f   :  { %6657 = vmatpush1.bf16.msra.mxu1 %v18744_v34  ;;  %6529 = vmatprep.subr.bf16.mxu0 %v18749_v35  ;;  %v18804_v34 = vld [vmem:[#allocation9 + $0x660] ss:$24 sps:$4 sm:$0xff]  }
 0x380   :  { %6658 = vmatprep.subr.bf16.mxu1 %v18752_v36  ;;  %v18807_v35 = vld [vmem:[#allocation9 + $0x668] ss:$24 sps:$4 sm:$0xff]   ;;  %v18812_v36 = vld [vmem:[#allocation9 + $0x694] ss:$24 sps:$4 sm:$0xff]  }
 0x382   :  { %6530 = vmatpush1.bf16.msra.mxu0 %v18747_v37  ;;  %v18815_v37 = vld [vmem:[#allocation9 + $0x69c] ss:$24 sps:$4 sm:$0xff]  }
 0x383   :  { %6659 = vmatpush1.bf16.msra.mxu1 %v18750_v38  ;;  %6531 = vmatprep.subr.bf16.mxu0 %v18755_v39  ;;  %v2418_v38 = vpop.permute.xlu1 %2417  ;;  %v18810_v39 = vld [vmem:[#allocation9 + $0x690] ss:$24 sps:$4 sm:$0xff]  }
 0x384   :  { %6660 = vmatprep.subr.bf16.mxu1 %v18758_v41  ;;  %v18813_v41 = vld [vmem:[#allocation9 + $0x698] ss:$24 sps:$4 sm:$0xff]  }
 0x386   :  { %6532 = vmatpush1.bf16.msra.mxu0 %v18753_v42  ;;  %v18818_v42 = vld [vmem:[#allocation9 + $0x6c4] ss:$24 sps:$4 sm:$0xff]  }
 0x387   :  { %6661 = vmatpush1.bf16.msra.mxu1 %v18756_v44  ;;  %6533 = vmatprep.subr.bf16.mxu0 %v18761_v45  ;;  %v18821_v44 = vld [vmem:[#allocation9 + $0x6cc] ss:$24 sps:$4 sm:$0xff]  }
 0x388   :  { %6662 = vmatprep.subr.bf16.mxu1 %v18764_v46 }
 0x38a   :  { %6534 = vmatpush1.bf16.msra.mxu0 %v18759_v47  ;;  %v18816_v47 = vld [vmem:[#allocation9 + $0x6c0] ss:$24 sps:$4 sm:$0xff]  }
 0x38b   :  { %6663 = vmatpush1.bf16.msra.mxu1 %v18762_v49  ;;  %6535 = vmatprep.subr.bf16.mxu0 %v18767_v50  ;;  %v18819_v50 = vld [vmem:[#allocation9 + $0x6c8] ss:$24 sps:$4 sm:$0xff]  }
 0x38c   :  { %6664 = vmatprep.subr.bf16.mxu1 %v18770_v52  ;;  %v18824_v52 = vld [vmem:[#allocation9 + $0x6f4] ss:$24 sps:$4 sm:$0xff]  }
 0x38e   :  { %6536 = vmatpush1.bf16.msra.mxu0 %v18765_v53  ;;  %v18827_v53 = vld [vmem:[#allocation9 + $0x6fc] ss:$24 sps:$4 sm:$0xff]  }
 0x38f   :  { %6665 = vmatpush1.bf16.msra.mxu1 %v18768_v54  ;;  %6537 = vmatprep.subr.bf16.mxu0 %v18773_v57 }
 0x390   :  { %6666 = vmatprep.subr.bf16.mxu1 %v18776_v58  ;;  %v18822_v58 = vld [vmem:[#allocation9 + $0x6f0] ss:$24 sps:$4 sm:$0xff]  }
 0x392   :  { %6538 = vmatpush1.bf16.msra.mxu0 %v18771_v60  ;;  %v18825_v60 = vld [vmem:[#allocation9 + $0x6f8] ss:$24 sps:$4 sm:$0xff]  }
 0x393   :  { %6667 = vmatpush1.bf16.msra.mxu1 %v18774_v61  ;;  %6539 = vmatprep.subr.bf16.mxu0 %v18779_v63  ;;  %v18830_v61 = vld [vmem:[#allocation9 + $0x724] ss:$24 sps:$4 sm:$0xff]  }
 0x394   :  { %6668 = vmatprep.subr.bf16.mxu1 %v18782_v1  ;;  %v18833_v63 = vld [vmem:[#allocation9 + $0x72c] ss:$24 sps:$4 sm:$0xff]  }
 0x396   :  { %6540 = vmatpush1.bf16.msra.mxu0 %v18777_v2 }
 0x397   :  { %6669 = vmatpush1.bf16.msra.mxu1 %v18780_v3  ;;  %6541 = vmatprep.subr.bf16.mxu0 %v18785_v4  ;;  %v18828_v4 = vld [vmem:[#allocation9 + $0x720] ss:$24 sps:$4 sm:$0xff]  }
 0x398   :  { %6670 = vmatprep.subr.bf16.mxu1 %v18788_v5 }
 0x39a   :  { %6542 = vmatpush1.bf16.msra.mxu0 %v18783_v6  ;;  %v18831_v6 = vld [vmem:[#allocation9 + $0x728] ss:$24 sps:$4 sm:$0xff]  }
 0x39b   :  { %6671 = vmatpush1.bf16.msra.mxu1 %v18786_v7  ;;  %6554 = vmatprep.subr.bf16.mxu0 %v18794_v8  ;;  %v18836_v7 = vld [vmem:[#allocation9 + $0x754] ss:$24 sps:$4 sm:$0xff]  }
 0x39c   :  { %6683 = vmatprep.subr.bf16.mxu1 %v18797_v9  ;;  %v18839_v8 = vld [vmem:[#allocation9 + $0x75c] ss:$24 sps:$4 sm:$0xff]   ;;  %v18834_v9 = vld [vmem:[#allocation9 + $0x750] ss:$24 sps:$4 sm:$0xff]  }
 0x39d   :  { %6544 = vmatmul.mubr.bf16.vlgmr.msra.gmra.mrb[12].mxu0 %v20746_v10 }
 0x39e   :  { %6555 = vmatpush1.bf16.msra.mxu0 %v18792_v11  ;;  %6673 = vmatmul.mubr.bf16.vlgmr.msra.gmra.mrb[12].mxu1 %v20746_v10  ;;  %v18837_v11 = vld [vmem:[#allocation9 + $0x758] ss:$24 sps:$4 sm:$0xff]  }
 0x39f   :  { %6684 = vmatpush1.bf16.msra.mxu1 %v18795_v12  ;;  %6556 = vmatprep.subr.bf16.mxu0 %v18800_v13  ;;  %v18842_v12 = vld [vmem:[#allocation9 + $0x784] ss:$24 sps:$4 sm:$0xff]  }
 0x3a0   :  { %6685 = vmatprep.subr.bf16.mxu1 %v18803_v14  ;;  %6586 = vmatprep.mubr.bf16.mxu0 %v20748_v19  ;;  %v18845_v13 = vld [vmem:[#allocation9 + $0x78c] ss:$24 sps:$4 sm:$0xff]   ;;  %v18840_v14 = vld [vmem:[#allocation9 + $0x780] ss:$24 sps:$4 sm:$0xff]  }
 0x3a1   :  { %6715 = vmatprep.mubr.bf16.mxu1 %v20748_v19 }
 0x3a2   :  { %6557 = vmatpush1.bf16.msra.mxu0 %v18798_v20  ;;  %v18843_v20 = vld [vmem:[#allocation9 + $0x788] ss:$24 sps:$4 sm:$0xff]  }
 0x3a3   :  { %6686 = vmatpush1.bf16.msra.mxu1 %v18801_v24  ;;  %6558 = vmatprep.subr.bf16.mxu0 %v18806_v29  ;;  %v18848_v24 = vld [vmem:[#allocation9 + $0x7b4] ss:$24 sps:$4 sm:$0xff]  }
 0x3a4   :  { %6687 = vmatprep.subr.bf16.mxu1 %v18809_v33  ;;  %v18851_v29 = vld [vmem:[#allocation9 + $0x7bc] ss:$24 sps:$4 sm:$0xff]   ;;  %v18846_v33 = vld [vmem:[#allocation9 + $0x7b0] ss:$24 sps:$4 sm:$0xff]  }
 0x3a6   :  { %6559 = vmatpush1.bf16.msra.mxu0 %v18804_v34  ;;  %v18849_v34 = vld [vmem:[#allocation9 + $0x7b8] ss:$24 sps:$4 sm:$0xff]  }
 0x3a7   :  { %6688 = vmatpush1.bf16.msra.mxu1 %v18807_v35  ;;  %6560 = vmatprep.subr.bf16.mxu0 %v18812_v36  ;;  %v18854_v35 = vld [vmem:[#allocation9 + $0x7e4] ss:$24 sps:$4 sm:$0xff]  }
 0x3a8   :  { %6689 = vmatprep.subr.bf16.mxu1 %v18815_v37  ;;  %v18857_v36 = vld [vmem:[#allocation9 + $0x7ec] ss:$24 sps:$4 sm:$0xff]   ;;  %v18852_v37 = vld [vmem:[#allocation9 + $0x7e0] ss:$24 sps:$4 sm:$0xff]  }
 0x3a9   :  { %v2427_v45 = vpop.permute.xlu1 %2426 }
 0x3aa   :  { %v2420_v46 = vpop.permute.xlu0 %2419  ;;  %6561 = vmatpush1.bf16.msra.mxu0 %v18810_v39  ;;  %v18860_v39 = vld [vmem:[#allocation9 + $0x814] ss:$24 sps:$4 sm:$0xff]  }
 0x3ab   :  { %v2421_v49 = vsel %vm22155_vm13, %v2418_v38, %v2420_v46  ;;  %6690 = vmatpush1.bf16.msra.mxu1 %v18813_v41  ;;  %6562 = vmatprep.subr.bf16.mxu0 %v18818_v42  ;;  %v18855_v38 = vld [vmem:[#allocation9 + $0x7e8] ss:$24 sps:$4 sm:$0xff]   ;;  %v18863_v41 = vld [vmem:[#allocation9 + $0x81c] ss:$24 sps:$4 sm:$0xff]   ;;  %v18869_v46 = vld [vmem:[#allocation9 + $0x84c] ss:$24 sps:$4 sm:$0xff]  }
 0x3ac   :  { %2424 = vst.msk [vmem:[#allocation2 + $0x118] sm:$0xff] %vm2385_vm14, %v2421_v49  ;;  %6691 = vmatprep.subr.bf16.mxu1 %v18821_v44  ;;  %v18858_v42 = vld [vmem:[#allocation9 + $0x810] ss:$24 sps:$4 sm:$0xff]  }
 0x3ad   :  { %v2435_v54 = vpop.permute.xlu1 %2434  ;;  %v18861_v44 = vld [vmem:[#allocation9 + $0x818] ss:$24 sps:$4 sm:$0xff]   ;;  %v18867_v49 = vld [vmem:[#allocation9 + $0x848] ss:$24 sps:$4 sm:$0xff]  }
 0x3ae   :  { %2438 = vst.msk [vmem:[#allocation2 + $0x188] sm:$0xff] %vm2385_vm14, %v2435_v54  ;;  %v4632_v57 = vpop.permute.xlu0 %4631  ;;  %6563 = vmatpush1.bf16.msra.mxu0 %v18816_v47  ;;  %v18864_v47 = vld [vmem:[#allocation9 + $0x840] ss:$24 sps:$4 sm:$0xff]  }
 0x3af   :  { %6692 = vmatpush1.bf16.msra.mxu1 %v18819_v50  ;;  %6564 = vmatprep.subr.bf16.mxu0 %v18824_v52  ;;  %v18872_v50 = vld [vmem:[#allocation9 + $0x874] ss:$24 sps:$4 sm:$0xff]   ;;  %v18873_v54 = vld [vmem:[#allocation9 + $0x878] ss:$24 sps:$4 sm:$0xff]  }
 0x3b0   :  { %6693 = vmatprep.subr.bf16.mxu1 %v18827_v53  ;;  %v18875_v52 = vld [vmem:[#allocation9 + $0x87c] ss:$24 sps:$4 sm:$0xff]   ;;  %v18870_v53 = vld [vmem:[#allocation9 + $0x870] ss:$24 sps:$4 sm:$0xff]  }
 0x3b1   :  { %v4634_v1 = vpop.permute.xlu1 %4633 }
 0x3b2   :  { %v4635_v2 = vsel %vm22155_vm13, %v4632_v57, %v4634_v1  ;;  %v2429_v3 = vpop.permute.xlu0 %2428  ;;  %6565 = vmatpush1.bf16.msra.mxu0 %v18822_v58  ;;  %v18878_v57 = vld [vmem:[#allocation9 + $0x8a4] ss:$24 sps:$4 sm:$0xff]  }
 0x3b3   :  { %4637 = vst.msk [vmem:[#allocation2 + $0x40] sm:$0xff] %vm2385_vm14, %v4635_v2  ;;  %v2430_v5 = vsel %vm2403_vm15, %v2427_v45, %v2429_v3  ;;  %6694 = vmatpush1.bf16.msra.mxu1 %v18825_v60  ;;  %6566 = vmatprep.subr.bf16.mxu0 %v18830_v61  ;;  %v18866_v45 = vld [vmem:[#allocation9 + $0x844] ss:$24 sps:$4 sm:$0xff]   ;;  %v18876_v60 = vld [vmem:[#allocation9 + $0x8a0] ss:$24 sps:$4 sm:$0xff]  }
 0x3b4   :  { %2433 = vst.msk [vmem:[#allocation2 + $0x150] sm:$0xff] %vm2385_vm14, %v2430_v5  ;;  %6695 = vmatprep.subr.bf16.mxu1 %v18833_v63  ;;  %v18881_v58 = vld [vmem:[#allocation9 + $0x8ac] ss:$24 sps:$4 sm:$0xff]   ;;  %v18879_v61 = vld [vmem:[#allocation9 + $0x8a8] ss:$24 sps:$4 sm:$0xff]  }
 0x3b5   :  { %v18884_v63 = vld [vmem:[#allocation9 + $0x8d4] ss:$24 sps:$4 sm:$0xff]   ;;  %v18882_v2 = vld [vmem:[#allocation9 + $0x8d0] ss:$24 sps:$4 sm:$0xff]  }
 0x3b6   :  { %6567 = vmatpush1.bf16.msra.mxu0 %v18828_v4  ;;  %v18887_v1 = vld [vmem:[#allocation9 + $0x8dc] ss:$24 sps:$4 sm:$0xff]   ;;  %v18885_v3 = vld [vmem:[#allocation9 + $0x8d8] ss:$24 sps:$4 sm:$0xff]   ;;  %v18896_v5 = vld [vmem:[#allocation12 + $0x4] ss:$24 sps:$4 sm:$0xff]   ;;  %v4640_v28 = vpop.permute.xlu0 %4639 }
 0x3b7   :  { %6696 = vmatpush1.bf16.msra.mxu1 %v18831_v6  ;;  %6568 = vmatprep.subr.bf16.mxu0 %v18836_v7  ;;  %v18893_v4 = vld [vmem:[#allocation9 + $0x14] ss:$24 sps:$4 sm:$0xff]   ;;  %v20761_v6 = vld [vmem:[#allocation4 + $0x40] ss:$72 sps:$4 sm:$0xff]  }
 0x3b8   :  { %6697 = vmatprep.subr.bf16.mxu1 %v18839_v8  ;;  %v18891_v7 = vld [vmem:[#allocation9 + $0x10] ss:$24 sps:$4 sm:$0xff]   ;;  %v20763_v8 = vld [vmem:[#allocation7] sm:$0xff] }
 0x3ba   :  { %6569 = vmatpush1.bf16.msra.mxu0 %v18834_v9  ;;  %v20765_v9 = vld [vmem:[#allocation7 + $0x20] sm:$0xff] }
 0x3bb   :  { %6698 = vmatpush1.bf16.msra.mxu1 %v18837_v11  ;;  %6570 = vmatprep.subr.bf16.mxu0 %v18842_v12  ;;  %v18894_v11 = vld [vmem:[#allocation12] ss:$24 sps:$4 sm:$0xff]  }
 0x3bc   :  { %6699 = vmatprep.subr.bf16.mxu1 %v18845_v13  ;;  %v18899_v12 = vld [vmem:[#allocation9 + $0x44] ss:$24 sps:$4 sm:$0xff]  }
 0x3bd   :  { %v18902_v13 = vld [vmem:[#allocation12 + $0x34] ss:$24 sps:$4 sm:$0xff]  }
 0x3be   :  { %6571 = vmatpush1.bf16.msra.mxu0 %v18840_v14  ;;  %v20770_v14 = vcombine.high %v20763_v8, %v20765_v9 }
 0x3bf   :  { %6700 = vmatpush1.bf16.msra.mxu1 %v18843_v20  ;;  %6572 = vmatprep.subr.bf16.mxu0 %v18848_v24  ;;  %v18897_v20 = vld [vmem:[#allocation9 + $0x40] ss:$24 sps:$4 sm:$0xff]  }
 0x3c0   :  { %6701 = vmatprep.subr.bf16.mxu1 %v18851_v29  ;;  %v18900_v24 = vld [vmem:[#allocation12 + $0x30] ss:$24 sps:$4 sm:$0xff]  }
 0x3c1   :  { %v18905_v29 = vld [vmem:[#allocation9 + $0x74] ss:$24 sps:$4 sm:$0xff]  }
 0x3c2   :  { %6573 = vmatpush1.bf16.msra.mxu0 %v18846_v33  ;;  %v18908_v33 = vld [vmem:[#allocation12 + $0x64] ss:$24 sps:$4 sm:$0xff]  }
 0x3c3   :  { %6702 = vmatpush1.bf16.msra.mxu1 %v18849_v34  ;;  %6574 = vmatprep.subr.bf16.mxu0 %v18854_v35  ;;  %v19384_v34 = vld [vmem:[#allocation4 + $0x34] ss:$72 sps:$4 sm:$0xff]   ;;  %v18903_v35 = vld [vmem:[#allocation9 + $0x70] ss:$24 sps:$4 sm:$0xff]  }
 0x3c4   :  { %6703 = vmatprep.subr.bf16.mxu1 %v18857_v36  ;;  %v18906_v36 = vld [vmem:[#allocation12 + $0x60] ss:$24 sps:$4 sm:$0xff]  }
 0x3c6   :  { %6575 = vmatpush1.bf16.msra.mxu0 %v18852_v37  ;;  %v18911_v37 = vld [vmem:[#allocation9 + $0xa4] ss:$24 sps:$4 sm:$0xff]  }
 0x3c7   :  { %6704 = vmatpush1.bf16.msra.mxu1 %v18855_v38  ;;  %6576 = vmatprep.subr.bf16.mxu0 %v18860_v39  ;;  %v18914_v38 = vld [vmem:[#allocation12 + $0x94] ss:$24 sps:$4 sm:$0xff]  }
 0x3c8   :  { %6705 = vmatprep.subr.bf16.mxu1 %v18863_v41  ;;  %v18909_v39 = vld [vmem:[#allocation9 + $0xa0] ss:$24 sps:$4 sm:$0xff]  }
 0x3c9   :  { %v18912_v41 = vld [vmem:[#allocation12 + $0x90] ss:$24 sps:$4 sm:$0xff]  }
 0x3ca   :  { %6577 = vmatpush1.bf16.msra.mxu0 %v18858_v42  ;;  %v18917_v42 = vld [vmem:[#allocation9 + $0xd4] ss:$24 sps:$4 sm:$0xff]  }
 0x3cb   :  { %6706 = vmatpush1.bf16.msra.mxu1 %v18861_v44  ;;  %6578 = vmatprep.subr.bf16.mxu0 %v18866_v45  ;;  %v18920_v44 = vld [vmem:[#allocation12 + $0xc4] ss:$24 sps:$4 sm:$0xff]  }
 0x3cc   :  { %6707 = vmatprep.subr.bf16.mxu1 %v18869_v46  ;;  %v18915_v45 = vld [vmem:[#allocation9 + $0xd0] ss:$24 sps:$4 sm:$0xff]  }
 0x3cd   :  { %v18918_v46 = vld [vmem:[#allocation12 + $0xc0] ss:$24 sps:$4 sm:$0xff]  }
 0x3ce   :  { %6579 = vmatpush1.bf16.msra.mxu0 %v18864_v47  ;;  %v18923_v47 = vld [vmem:[#allocation9 + $0x104] ss:$24 sps:$4 sm:$0xff]  }
 0x3cf   :  { %6708 = vmatpush1.bf16.msra.mxu1 %v18867_v49  ;;  %6580 = vmatprep.subr.bf16.mxu0 %v18872_v50  ;;  %v18926_v49 = vld [vmem:[#allocation12 + $0xf4] ss:$24 sps:$4 sm:$0xff]  }
 0x3d0   :  { %6709 = vmatprep.subr.bf16.mxu1 %v18875_v52  ;;  %v18921_v50 = vld [vmem:[#allocation9 + $0x100] ss:$24 sps:$4 sm:$0xff]  }
 0x3d1   :  { %v19385_v52 = vld [vmem:[#allocation10] sm:$0x3f] }
 0x3d2   :  { %6581 = vmatpush1.bf16.msra.mxu0 %v18870_v53  ;;  %v2746_v53 = vrot.slane %v19385_v52, %v20695_v55 }
 0x3d3   :  { %6710 = vmatpush1.bf16.msra.mxu1 %v18873_v54  ;;  %6582 = vmatprep.subr.bf16.mxu0 %v18878_v57  ;;  %v18924_v54 = vld [vmem:[#allocation12 + $0xf0] ss:$24 sps:$4 sm:$0xff]  }
 0x3d4   :  { %6711 = vmatprep.subr.bf16.mxu1 %v18881_v58  ;;  %v18929_v57 = vld [vmem:[#allocation9 + $0x134] ss:$24 sps:$4 sm:$0xff]  }
 0x3d6   :  { %6583 = vmatpush1.bf16.msra.mxu0 %v18876_v60  ;;  %v2754_v60 = vrot.slane %v19385_v52, %v20721_v62  ;;  %v19145_v62 = vld [vmem:[#allocation9 + $0x7f4] ss:$24 sps:$4 sm:$0xff]  }
 0x3d7   :  { %6712 = vmatpush1.bf16.msra.mxu1 %v18879_v61  ;;  %6584 = vmatprep.subr.bf16.mxu0 %v18884_v63  ;;  %v2750_v61 = vrot.slane %v19385_v52, %v20701_v59  ;;  %v18932_v63 = vld [vmem:[#allocation12 + $0x124] ss:$24 sps:$4 sm:$0xff]  }
 0x3d8   :  { %6713 = vmatprep.subr.bf16.mxu1 %v18887_v1 }
 0x3da   :  { %6585 = vmatpush1.bf16.msra.mxu0 %v18882_v2 }
 0x3db   :  { %6714 = vmatpush1.bf16.msra.mxu1 %v18885_v3  ;;  %6726 = vmatprep.subr.bf16.mxu0 %v18893_v4  ;;  %v2758_v3 = vrot.slane %v19385_v52, %v20724_v0  ;;  %v18944_v52 = vld [vmem:[#allocation12 + $0x184] ss:$24 sps:$4 sm:$0xff]  }
 0x3dc   :  { %7525 = vmatprep.subr.bf16.mxu1 %v18896_v5  ;;  %v20942_v0 = vld [vmem:[#allocation12 + $0x164] ss:$24 sps:$4 sm:$0xff]  }
 0x3dd   :  { %6587 = vmatmul.mubr.bf16.vlgmr.msra.gmra.mrb[12].mxu0 %v20761_v6  ;;  %22211 = vst [vmem:[#allocation60_spill] sm:$0xff] %v20942_v0 }
 0x3de   :  { %6716 = vmatmul.mubr.bf16.vlgmr.msra.gmra.mrb[12].mxu1 %v20761_v6  ;;  %6727 = vmatpush1.bf16.msra.mxu0 %v18891_v7  ;;  %v18927_v7 = vld [vmem:[#allocation9 + $0x130] ss:$24 sps:$4 sm:$0xff]  }
 0x3df   :  { %7526 = vmatpush1.bf16.msra.mxu1 %v18894_v11  ;;  %6728 = vmatprep.subr.bf16.mxu0 %v18899_v12 }
 0x3e0   :  { %7527 = vmatprep.subr.bf16.mxu1 %v18902_v13  ;;  %6758 = vmatprep.mubr.bf16.mxu0 %v19384_v34 }
 0x3e1   :  { %7557 = vmatprep.mubr.bf16.mxu1 %v20770_v14 }
 0x3e2   :  { %6729 = vmatpush1.bf16.msra.mxu0 %v18897_v20 }
 0x3e3   :  { %7528 = vmatpush1.bf16.msra.mxu1 %v18900_v24  ;;  %6730 = vmatprep.subr.bf16.mxu0 %v18905_v29  ;;  %v18930_v24 = vld [vmem:[#allocation12 + $0x120] ss:$24 sps:$4 sm:$0xff]  }
 0x3e4   :  { %7529 = vmatprep.subr.bf16.mxu1 %v18908_v33 }
 0x3e6   :  { %6731 = vmatpush1.bf16.msra.mxu0 %v18903_v35 }
 0x3e7   :  { %7530 = vmatpush1.bf16.msra.mxu1 %v18906_v36  ;;  %6732 = vmatprep.subr.bf16.mxu0 %v18911_v37  ;;  %v18935_v37 = vld [vmem:[#allocation9 + $0x164] ss:$24 sps:$4 sm:$0xff]  }
 0x3e8   :  { %7531 = vmatprep.subr.bf16.mxu1 %v18914_v38 }
 0x3ea   :  { %6733 = vmatpush1.bf16.msra.mxu0 %v18909_v39 }
 0x3eb   :  { %7532 = vmatpush1.bf16.msra.mxu1 %v18912_v41  ;;  %6734 = vmatprep.subr.bf16.mxu0 %v18917_v42  ;;  %v18938_v42 = vld [vmem:[#allocation12 + $0x154] ss:$24 sps:$4 sm:$0xff]  }
 0x3ec   :  { %7533 = vmatprep.subr.bf16.mxu1 %v18920_v44  ;;  %v18933_v44 = vld [vmem:[#allocation9 + $0x160] ss:$24 sps:$4 sm:$0xff]  }
 0x3ee   :  { %6735 = vmatpush1.bf16.msra.mxu0 %v18915_v45 }
 0x3ef   :  { %7534 = vmatpush1.bf16.msra.mxu1 %v18918_v46  ;;  %6736 = vmatprep.subr.bf16.mxu0 %v18923_v47  ;;  %v18936_v47 = vld [vmem:[#allocation12 + $0x150] ss:$24 sps:$4 sm:$0xff]  }
 0x3f0   :  { %v4484_v58 = vpop.f32.mrb[8].mxu0  ;;  %7535 = vmatprep.subr.bf16.mxu1 %v18926_v49 }
 0x3f1   :  { %v4613_v1 = vpop.f32.mrb[8].mxu1  ;;  %v4486_v2 = vpop.f32.mrb[9].mxu0  ;;  %v17455_v11 = vadd.f32 %v4484_v58, %v2746_v53  ;;  %v18950_v58 = vld [vmem:[#allocation12 + $0x1b4] ss:$24 sps:$4 sm:$0xff]  }
 0x3f2   :  { %v4615_v4 = vpop.f32.mrb[9].mxu1  ;;  %v4488_v5 = vpop.f32.mrb[10].mxu0  ;;  %6737 = vmatpush1.bf16.msra.mxu0 %v18921_v50  ;;  %v17459_v29 = vadd.f32 %v4613_v1, %v2754_v60  ;;  %v17456_v33 = vadd.f32 %v4486_v2, %v2750_v61  ;;  %v18941_v50 = vld [vmem:[#allocation9 + $0x194] ss:$24 sps:$4 sm:$0xff]   ;;  %v18951_v2 = vld [vmem:[#allocation9 + $0x1f0] ss:$24 sps:$4 sm:$0xff]  }
 0x3f3   :  { %v17457_v12 = vadd.f32 %v4488_v5, %v2746_v53  ;;  %v4617_v13 = vpop.f32.mrb[10].mxu1  ;;  %7536 = vmatpush1.bf16.msra.mxu1 %v18924_v54  ;;  %v4490_v20 = vpop.f32.mrb[11].mxu0  ;;  %6738 = vmatprep.subr.bf16.mxu0 %v18929_v57  ;;  %v17460_v38 = vadd.f32 %v4615_v4, %v2758_v3  ;;  %v18939_v53 = vld [vmem:[#allocation9 + $0x190] ss:$24 sps:$4 sm:$0xff]   ;;  %v18947_v57 = vld [vmem:[#allocation9 + $0x1c4] ss:$24 sps:$4 sm:$0xff]  }
 0x3f4   :  { %v17461_v34 = vadd.f32 %v4617_v13, %v2754_v60  ;;  %v17458_v35 = vadd.f32 %v4490_v20, %v2750_v61  ;;  %v4619_v36 = vpop.f32.mrb[11].mxu1  ;;  %7537 = vmatprep.subr.bf16.mxu1 %v18932_v63  ;;  %v18942_v54 = vld [vmem:[#allocation12 + $0x180] ss:$24 sps:$4 sm:$0xff]   ;;  %v18948_v61 = vld [vmem:[#allocation12 + $0x1b0] ss:$24 sps:$4 sm:$0xff]  }
 0x3f5   :  { %v17462_v39 = vadd.f32 %v4619_v36, %v2758_v3  ;;  %v4624_v41 = vpack.c.bf16 %v17457_v12, %v17455_v11  ;;  %v18945_v60 = vld [vmem:[#allocation9 + $0x1c0] ss:$24 sps:$4 sm:$0xff]   ;;  %v18953_v63 = vld [vmem:[#allocation9 + $0x1f4] ss:$24 sps:$4 sm:$0xff]   ;;  %v18959_v4 = vld [vmem:[#allocation9 + $0x224] ss:$24 sps:$4 sm:$0xff]  }
 0x3f6   :  { %6739 = vmatpush1.bf16.msra.mxu0 %v18927_v7  ;;  %v4626_v45 = vpack.c.bf16 %v17461_v34, %v17459_v29  ;;  %v4625_v46 = vpack.c.bf16 %v17458_v35, %v17456_v33  ;;  %v18956_v1 = vld [vmem:[#allocation12 + $0x1e4] ss:$24 sps:$4 sm:$0xff]   ;;  %v18954_v3 = vld [vmem:[#allocation12 + $0x1e0] ss:$24 sps:$4 sm:$0xff]   ;;  %v18962_v5 = vld [vmem:[#allocation12 + $0x214] ss:$24 sps:$4 sm:$0xff]  }
 0x3f7   :  { %7538 = vmatpush1.bf16.msra.mxu1 %v18930_v24  ;;  %4641 = vrot.lane.b32.xlu1 %v4624_v41, %s20385_s4  ;;  %v4627_v49 = vpack.c.bf16 %v17462_v39, %v17460_v38  ;;  %v18957_v7 = vld [vmem:[#allocation9 + $0x220] ss:$24 sps:$4 sm:$0xff]   ;;  %v18965_v12 = vld [vmem:[#allocation9 + $0x254] ss:$24 sps:$4 sm:$0xff]   ;;  %v18963_v20 = vld [vmem:[#allocation9 + $0x250] ss:$24 sps:$4 sm:$0xff]  }
 0x3f8   :  { %4646 = vrot.lane.b32.xlu0 %v4624_v41, %s20392_s11  ;;  %6740 = vmatprep.subr.bf16.mxu0 %v18935_v37  ;;  %4650 = vst.msk [vmem:[#allocation2 + $0xe8] sm:$0xff] %vm2385_vm14, %v4625_v46  ;;  %v18960_v11 = vld [vmem:[#allocation12 + $0x210] ss:$24 sps:$4 sm:$0xff]   ;;  %v18968_v13 = vld [vmem:[#allocation12 + $0x244] ss:$24 sps:$4 sm:$0xff]  }
 0x3f9   :  { %7539 = vmatprep.subr.bf16.mxu1 %v18938_v42  ;;  %v18966_v24 = vld [vmem:[#allocation12 + $0x240] ss:$24 sps:$4 sm:$0xff]   ;;  %v18974_v33 = vld [vmem:[#allocation12 + $0x274] ss:$24 sps:$4 sm:$0xff]   ;;  %v18972_v35 = vld [vmem:[#allocation12 + $0x270] ss:$24 sps:$4 sm:$0xff]  }
 0x3fa   :  { %6741 = vmatpush1.bf16.msra.mxu0 %v18933_v44  ;;  %v18971_v29 = vld [vmem:[#allocation9 + $0x284] ss:$24 sps:$4 sm:$0xff]   ;;  %v18969_v34 = vld [vmem:[#allocation9 + $0x280] ss:$24 sps:$4 sm:$0xff]   ;;  %v18977_v36 = vld [vmem:[#allocation9 + $0x2b4] ss:$24 sps:$4 sm:$0xff]  }
 0x3fb   :  { %7540 = vmatpush1.bf16.msra.mxu1 %v18936_v47  ;;  %4661 = vrot.lane.b32.xlu1 %v4626_v45, %s20385_s4  ;;  %v18980_v37 = vld [vmem:[#allocation12 + $0x2a4] ss:$24 sps:$4 sm:$0xff]   ;;  %v18978_v39 = vld [vmem:[#allocation12 + $0x2a0] ss:$24 sps:$4 sm:$0xff]   ;;  %v18986_v42 = vld [vmem:[#allocation12 + $0x2d4] ss:$24 sps:$4 sm:$0xff]  }
 0x3fc   :  { %4655 = vrot.lane.b32.xlu0 %v4626_v45, %s20372_s14  ;;  %6742 = vmatprep.subr.bf16.mxu0 %v18941_v50  ;;  %v18975_v38 = vld [vmem:[#allocation9 + $0x2b0] ss:$24 sps:$4 sm:$0xff]   ;;  %v18983_v41 = vld [vmem:[#allocation9 + $0x2e4] ss:$24 sps:$4 sm:$0xff]   ;;  %v18981_v44 = vld [vmem:[#allocation9 + $0x2e0] ss:$24 sps:$4 sm:$0xff]   ;;  %v20790_v50 = vcombine.low %v20763_v8, %v20765_v9 }
 0x3fd   :  { %7541 = vmatprep.subr.bf16.mxu1 %v18944_v52  ;;  %v18984_v45 = vld [vmem:[#allocation12 + $0x2d0] ss:$24 sps:$4 sm:$0xff]   ;;  %v20786_v47 = vld [vmem:[#allocation12 + $0xc] ss:$24 sps:$4 sm:$0xff]  }
 0x3fe   :  { %6743 = vmatpush1.bf16.msra.mxu0 %v18939_v53  ;;  %v20792_v52 = vld [vmem:[#allocation12 + $0x8] ss:$24 sps:$4 sm:$0xff]   ;;  %v20800_v8 = vld [vmem:[#allocation12 + $0x38] ss:$24 sps:$4 sm:$0xff]  }
 0x3ff   :  { %7542 = vmatpush1.bf16.msra.mxu1 %v18942_v54  ;;  %4653 = vrot.lane.b32.xlu1 %v4625_v46, %s20372_s14  ;;  %v18989_v46 = vld [vmem:[#allocation9 + $0x314] ss:$24 sps:$4 sm:$0xff]   ;;  %v18995_v53 = vld [vmem:[#allocation9 + $0x344] ss:$24 sps:$4 sm:$0xff]  }
 0x400   :  { %4663 = vrot.lane.b32.xlu0 %v4627_v49, %s20385_s4  ;;  %6744 = vmatprep.subr.bf16.mxu0 %v18947_v57  ;;  %v20795_v54 = vld [vmem:[#allocation12 + $0x3c] ss:$24 sps:$4 sm:$0xff]   ;;  %v19001_v9 = vld [vmem:[#allocation9 + $0x374] ss:$24 sps:$4 sm:$0xff]  }
 0x401   :  { %7543 = vmatprep.subr.bf16.mxu1 %v18950_v58  ;;  %v18993_v57 = vld [vmem:[#allocation9 + $0x340] ss:$24 sps:$4 sm:$0xff]   ;;  %v20803_v58 = vld [vmem:[#allocation12 + $0x6c] ss:$24 sps:$4 sm:$0xff]  }
 0x402   :  { %6745 = vmatpush1.bf16.msra.mxu0 %v18945_v60  ;;  %v20808_v60 = vld [vmem:[#allocation12 + $0x68] ss:$24 sps:$4 sm:$0xff]  }
 0x403   :  { %7544 = vmatpush1.bf16.msra.mxu1 %v18948_v61  ;;  %4668 = vrot.lane.b32.xlu1 %v4627_v49, %s20392_s11  ;;  %v18987_v49 = vld [vmem:[#allocation9 + $0x310] ss:$24 sps:$4 sm:$0xff]   ;;  %v19007_v61 = vld [vmem:[#allocation9 + $0x3a4] ss:$24 sps:$4 sm:$0xff]  }
 0x404   :  { %6746 = vmatprep.subr.bf16.mxu0 %v18953_v63  ;;  %7545 = vmatprep.subr.bf16.mxu1 %v18956_v1  ;;  %v20811_v63 = vld [vmem:[#allocation12 + $0x9c] ss:$24 sps:$4 sm:$0xff]  }
 0x405   :  { %v19005_v1 = vld [vmem:[#allocation9 + $0x3a0] ss:$24 sps:$4 sm:$0xff]  }
 0x406   :  { %6747 = vmatpush1.bf16.msra.mxu0 %v18951_v2  ;;  %v20814_v2 = vld [vmem:[#allocation12 + $0x98] ss:$24 sps:$4 sm:$0xff]  }
 0x407   :  { %7546 = vmatpush1.bf16.msra.mxu1 %v18954_v3  ;;  %6748 = vmatprep.subr.bf16.mxu0 %v18959_v4  ;;  %v20817_v3 = vld [vmem:[#allocation12 + $0xcc] ss:$24 sps:$4 sm:$0xff]  }
 0x408   :  { %7547 = vmatprep.subr.bf16.mxu1 %v18962_v5  ;;  %v19011_v4 = vld [vmem:[#allocation9 + $0x3d0] ss:$24 sps:$4 sm:$0xff]  }
 0x409   :  { %v20820_v5 = vld [vmem:[#allocation12 + $0xc8] ss:$24 sps:$4 sm:$0xff]  }
 0x40a   :  { %6749 = vmatpush1.bf16.msra.mxu0 %v18957_v7  ;;  %v19019_v7 = vld [vmem:[#allocation9 + $0x404] ss:$24 sps:$4 sm:$0xff]  }
 0x40b   :  { %7548 = vmatpush1.bf16.msra.mxu1 %v18960_v11  ;;  %6750 = vmatprep.subr.bf16.mxu0 %v18965_v12  ;;  %v20823_v11 = vld [vmem:[#allocation12 + $0xfc] ss:$24 sps:$4 sm:$0xff]  }
 0x40c   :  { %7549 = vmatprep.subr.bf16.mxu1 %v18968_v13  ;;  %v19017_v12 = vld [vmem:[#allocation9 + $0x400] ss:$24 sps:$4 sm:$0xff]  }
 0x40d   :  { %v20826_v13 = vld [vmem:[#allocation12 + $0xf8] ss:$24 sps:$4 sm:$0xff]  }
 0x40e   :  { %6751 = vmatpush1.bf16.msra.mxu0 %v18963_v20  ;;  %v19025_v20 = vld [vmem:[#allocation9 + $0x434] ss:$24 sps:$4 sm:$0xff]  }
 0x40f   :  { %7550 = vmatpush1.bf16.msra.mxu1 %v18966_v24  ;;  %6752 = vmatprep.subr.bf16.mxu0 %v18971_v29  ;;  %v20829_v24 = vld [vmem:[#allocation12 + $0x12c] ss:$24 sps:$4 sm:$0xff]  }
 0x410   :  { %7551 = vmatprep.subr.bf16.mxu1 %v18974_v33  ;;  %v19023_v29 = vld [vmem:[#allocation9 + $0x430] ss:$24 sps:$4 sm:$0xff]  }
 0x411   :  { %v20832_v33 = vld [vmem:[#allocation12 + $0x128] ss:$24 sps:$4 sm:$0xff]  }
 0x412   :  { %6753 = vmatpush1.bf16.msra.mxu0 %v18969_v34  ;;  %v19031_v34 = vld [vmem:[#allocation9 + $0x464] ss:$24 sps:$4 sm:$0xff]  }
 0x413   :  { %7552 = vmatpush1.bf16.msra.mxu1 %v18972_v35  ;;  %6754 = vmatprep.subr.bf16.mxu0 %v18977_v36  ;;  %v20835_v35 = vld [vmem:[#allocation12 + $0x15c] ss:$24 sps:$4 sm:$0xff]  }
 0x414   :  { %7553 = vmatprep.subr.bf16.mxu1 %v18980_v37  ;;  %v19029_v36 = vld [vmem:[#allocation9 + $0x460] ss:$24 sps:$4 sm:$0xff]  }
 0x415   :  { %v20838_v37 = vld [vmem:[#allocation12 + $0x158] ss:$24 sps:$4 sm:$0xff]  }
 0x416   :  { %6755 = vmatpush1.bf16.msra.mxu0 %v18975_v38  ;;  %v19037_v38 = vld [vmem:[#allocation9 + $0x494] ss:$24 sps:$4 sm:$0xff]  }
 0x417   :  { %7554 = vmatpush1.bf16.msra.mxu1 %v18978_v39  ;;  %6756 = vmatprep.subr.bf16.mxu0 %v18983_v41  ;;  %v20841_v39 = vld [vmem:[#allocation12 + $0x18c] ss:$24 sps:$4 sm:$0xff]  }
 0x418   :  { %7555 = vmatprep.subr.bf16.mxu1 %v18986_v42  ;;  %v19035_v41 = vld [vmem:[#allocation9 + $0x490] ss:$24 sps:$4 sm:$0xff]  }
 0x419   :  { %v20844_v42 = vld [vmem:[#allocation12 + $0x188] ss:$24 sps:$4 sm:$0xff]  }
 0x41a   :  { %6757 = vmatpush1.bf16.msra.mxu0 %v18981_v44  ;;  %v19043_v44 = vld [vmem:[#allocation9 + $0x4c4] ss:$24 sps:$4 sm:$0xff]  }
 0x41b   :  { %7556 = vmatpush1.bf16.msra.mxu1 %v18984_v45  ;;  %6769 = vmatprep.subr.bf16.mxu0 %v18989_v46  ;;  %v20847_v45 = vld [vmem:[#allocation12 + $0x1bc] ss:$24 sps:$4 sm:$0xff]  }
 0x41c   :  { %7568 = vmatprep.subr.bf16.mxu1 %v20786_v47  ;;  %v19041_v46 = vld [vmem:[#allocation9 + $0x4c0] ss:$24 sps:$4 sm:$0xff]  }
 0x41d   :  { %6759 = vmatmul.mubr.bf16.vlgmr.msra.gmra.mrb[16].mxu0 %v20738_v43  ;;  %v18999_v43 = vld [vmem:[#allocation9 + $0x370] ss:$24 sps:$4 sm:$0xff]  }
 0x41e   :  { %6770 = vmatpush1.bf16.msra.mxu0 %v18987_v49  ;;  %7558 = vmatmul.mubr.bf16.vlgmr.msra.gmra.mrb[16].mxu1 %v20790_v50  ;;  %v20850_v49 = vld [vmem:[#allocation12 + $0x1b8] ss:$24 sps:$4 sm:$0xff]  }
 0x41f   :  { %7569 = vmatpush1.bf16.msra.mxu1 %v20792_v52  ;;  %6771 = vmatprep.subr.bf16.mxu0 %v18995_v53  ;;  %v19049_v53 = vld [vmem:[#allocation9 + $0x4f4] ss:$24 sps:$4 sm:$0xff]  }
 0x420   :  { %7570 = vmatprep.subr.bf16.mxu1 %v20795_v54  ;;  %7600 = vmatprep.mubr.bf16.mxu1 %v20770_v14 }
 0x421   :  { %6801 = vmatprep.mubr.bf16.mxu0 %v20740_v48  ;;  %v19013_v48 = vld [vmem:[#allocation9 + $0x3d4] ss:$24 sps:$4 sm:$0xff]  }
 0x422   :  { %6772 = vmatpush1.bf16.msra.mxu0 %v18993_v57  ;;  %v20853_v57 = vld [vmem:[#allocation12 + $0x1ec] ss:$24 sps:$4 sm:$0xff]  }
 0x423   :  { %7571 = vmatpush1.bf16.msra.mxu1 %v20800_v8  ;;  %6773 = vmatprep.subr.bf16.mxu0 %v19001_v9  ;;  %v19047_v9 = vld [vmem:[#allocation9 + $0x4f0] ss:$24 sps:$4 sm:$0xff]  }
 0x424   :  { %7572 = vmatprep.subr.bf16.mxu1 %v20803_v58 }
 0x426   :  { %6774 = vmatpush1.bf16.msra.mxu0 %v18999_v43  ;;  %v20856_v43 = vld [vmem:[#allocation12 + $0x1e8] ss:$24 sps:$4 sm:$0xff]  }
 0x427   :  { %7573 = vmatpush1.bf16.msra.mxu1 %v20808_v60  ;;  %6775 = vmatprep.subr.bf16.mxu0 %v19007_v61  ;;  %v19055_v61 = vld [vmem:[#allocation9 + $0x524] ss:$24 sps:$4 sm:$0xff]  }
 0x428   :  { %7574 = vmatprep.subr.bf16.mxu1 %v20811_v63 }
 0x42a   :  { %6776 = vmatpush1.bf16.msra.mxu0 %v19005_v1  ;;  %v20859_v1 = vld [vmem:[#allocation12 + $0x21c] ss:$24 sps:$4 sm:$0xff]  }
 0x42b   :  { %7575 = vmatpush1.bf16.msra.mxu1 %v20814_v2  ;;  %6777 = vmatprep.subr.bf16.mxu0 %v19013_v48  ;;  %v19053_v48 = vld [vmem:[#allocation9 + $0x520] ss:$24 sps:$4 sm:$0xff]  }
 0x42c   :  { %7576 = vmatprep.subr.bf16.mxu1 %v20817_v3 }
 0x42e   :  { %6778 = vmatpush1.bf16.msra.mxu0 %v19011_v4  ;;  %v20862_v4 = vld [vmem:[#allocation12 + $0x218] ss:$24 sps:$4 sm:$0xff]  }
 0x42f   :  { %7577 = vmatpush1.bf16.msra.mxu1 %v20820_v5  ;;  %6779 = vmatprep.subr.bf16.mxu0 %v19019_v7  ;;  %v19061_v7 = vld [vmem:[#allocation9 + $0x554] ss:$24 sps:$4 sm:$0xff]  }
 0x430   :  { %7578 = vmatprep.subr.bf16.mxu1 %v20823_v11 }
 0x432   :  { %6780 = vmatpush1.bf16.msra.mxu0 %v19017_v12  ;;  %v20865_v12 = vld [vmem:[#allocation12 + $0x24c] ss:$24 sps:$4 sm:$0xff]  }
 0x433   :  { %7579 = vmatpush1.bf16.msra.mxu1 %v20826_v13  ;;  %6781 = vmatprep.subr.bf16.mxu0 %v19025_v20  ;;  %v19059_v20 = vld [vmem:[#allocation9 + $0x550] ss:$24 sps:$4 sm:$0xff]  }
 0x434   :  { %7580 = vmatprep.subr.bf16.mxu1 %v20829_v24 }
 0x436   :  { %6782 = vmatpush1.bf16.msra.mxu0 %v19023_v29  ;;  %v20868_v29 = vld [vmem:[#allocation12 + $0x248] ss:$24 sps:$4 sm:$0xff]  }
 0x437   :  { %7581 = vmatpush1.bf16.msra.mxu1 %v20832_v33  ;;  %6783 = vmatprep.subr.bf16.mxu0 %v19031_v34  ;;  %v19067_v34 = vld [vmem:[#allocation9 + $0x584] ss:$24 sps:$4 sm:$0xff]  }
 0x438   :  { %7582 = vmatprep.subr.bf16.mxu1 %v20835_v35 }
 0x43a   :  { %6784 = vmatpush1.bf16.msra.mxu0 %v19029_v36  ;;  %v20871_v36 = vld [vmem:[#allocation12 + $0x27c] ss:$24 sps:$4 sm:$0xff]  }
 0x43b   :  { %7583 = vmatpush1.bf16.msra.mxu1 %v20838_v37  ;;  %6785 = vmatprep.subr.bf16.mxu0 %v19037_v38  ;;  %v19065_v38 = vld [vmem:[#allocation9 + $0x580] ss:$24 sps:$4 sm:$0xff]  }
 0x43c   :  { %7584 = vmatprep.subr.bf16.mxu1 %v20841_v39 }
 0x43e   :  { %6786 = vmatpush1.bf16.msra.mxu0 %v19035_v41  ;;  %v20874_v41 = vld [vmem:[#allocation12 + $0x278] ss:$24 sps:$4 sm:$0xff]  }
 0x43f   :  { %7585 = vmatpush1.bf16.msra.mxu1 %v20844_v42  ;;  %6787 = vmatprep.subr.bf16.mxu0 %v19043_v44  ;;  %v19073_v44 = vld [vmem:[#allocation9 + $0x5b4] ss:$24 sps:$4 sm:$0xff]  }
 0x440   :  { %7586 = vmatprep.subr.bf16.mxu1 %v20847_v45 }
 0x442   :  { %6788 = vmatpush1.bf16.msra.mxu0 %v19041_v46  ;;  %v20877_v46 = vld [vmem:[#allocation12 + $0x2ac] ss:$24 sps:$4 sm:$0xff]  }
 0x443   :  { %7587 = vmatpush1.bf16.msra.mxu1 %v20850_v49  ;;  %6789 = vmatprep.subr.bf16.mxu0 %v19049_v53  ;;  %v19071_v53 = vld [vmem:[#allocation9 + $0x5b0] ss:$24 sps:$4 sm:$0xff]  }
 0x444   :  { %7588 = vmatprep.subr.bf16.mxu1 %v20853_v57 }
 0x446   :  { %6790 = vmatpush1.bf16.msra.mxu0 %v19047_v9  ;;  %v20880_v9 = vld [vmem:[#allocation12 + $0x2a8] ss:$24 sps:$4 sm:$0xff]  }
 0x447   :  { %7589 = vmatpush1.bf16.msra.mxu1 %v20856_v43  ;;  %6791 = vmatprep.subr.bf16.mxu0 %v19055_v61  ;;  %v19079_v61 = vld [vmem:[#allocation9 + $0x5e4] ss:$24 sps:$4 sm:$0xff]  }
 0x448   :  { %7590 = vmatprep.subr.bf16.mxu1 %v20859_v1 }
 0x44a   :  { %6792 = vmatpush1.bf16.msra.mxu0 %v19053_v48  ;;  %v20883_v48 = vld [vmem:[#allocation12 + $0x2dc] ss:$24 sps:$4 sm:$0xff]  }
 0x44b   :  { %7591 = vmatpush1.bf16.msra.mxu1 %v20862_v4  ;;  %6793 = vmatprep.subr.bf16.mxu0 %v19061_v7  ;;  %v19077_v7 = vld [vmem:[#allocation9 + $0x5e0] ss:$24 sps:$4 sm:$0xff]  }
 0x44c   :  { %7592 = vmatprep.subr.bf16.mxu1 %v20865_v12 }
 0x44e   :  { %6794 = vmatpush1.bf16.msra.mxu0 %v19059_v20  ;;  %v20886_v20 = vld [vmem:[#allocation12 + $0x2d8] ss:$24 sps:$4 sm:$0xff]  }
 0x44f   :  { %7593 = vmatpush1.bf16.msra.mxu1 %v20868_v29  ;;  %6795 = vmatprep.subr.bf16.mxu0 %v19067_v34  ;;  %v19085_v34 = vld [vmem:[#allocation9 + $0x614] ss:$24 sps:$4 sm:$0xff]  }
 0x450   :  { %7594 = vmatprep.subr.bf16.mxu1 %v20871_v36 }
 0x452   :  { %6796 = vmatpush1.bf16.msra.mxu0 %v19065_v38  ;;  %v20889_v38 = vld [vmem:[#allocation12 + $0x14] ss:$24 sps:$4 sm:$0xff]  }
 0x453   :  { %7595 = vmatpush1.bf16.msra.mxu1 %v20874_v41  ;;  %6797 = vmatprep.subr.bf16.mxu0 %v19073_v44  ;;  %v19083_v44 = vld [vmem:[#allocation9 + $0x610] ss:$24 sps:$4 sm:$0xff]  }
 0x454   :  { %7596 = vmatprep.subr.bf16.mxu1 %v20877_v46 }
 0x456   :  { %6798 = vmatpush1.bf16.msra.mxu0 %v19071_v53  ;;  %v20895_v53 = vld [vmem:[#allocation12 + $0x44] ss:$24 sps:$4 sm:$0xff]  }
 0x457   :  { %7597 = vmatpush1.bf16.msra.mxu1 %v20880_v9  ;;  %6799 = vmatprep.subr.bf16.mxu0 %v19079_v61  ;;  %v19089_v61 = vld [vmem:[#allocation9 + $0x640] ss:$24 sps:$4 sm:$0xff]  }
 0x458   :  { %7598 = vmatprep.subr.bf16.mxu1 %v20883_v48 }
 0x45a   :  { %6800 = vmatpush1.bf16.msra.mxu0 %v19077_v7  ;;  %v20900_v7 = vld [vmem:[#allocation12 + $0x40] ss:$24 sps:$4 sm:$0xff]  }
 0x45b   :  { %7599 = vmatpush1.bf16.msra.mxu1 %v20886_v20  ;;  %6812 = vmatprep.subr.bf16.mxu0 %v19085_v34  ;;  %v20903_v34 = vld [vmem:[#allocation12 + $0x74] ss:$24 sps:$4 sm:$0xff]  }
 0x45c   :  { %7611 = vmatprep.subr.bf16.mxu1 %v20889_v38 }
 0x45d   :  { %6802 = vmatmul.mubr.bf16.vlgmr.msra.gmra.mrb[16].mxu0 %v20746_v10  ;;  %v19095_v10 = vld [vmem:[#allocation9 + $0x670] ss:$24 sps:$4 sm:$0xff]  }
 0x45e   :  { %7601 = vmatmul.mubr.bf16.vlgmr.msra.gmra.mrb[20].mxu1 %v20790_v50  ;;  %6813 = vmatpush1.bf16.msra.mxu0 %v19083_v44  ;;  %v20908_v44 = vld [vmem:[#allocation12 + $0x70] ss:$24 sps:$4 sm:$0xff]  }
 0x45f   :  { %7612 = vmatpush1.bf16.msra.mxu1 %v20892_v40  ;;  %6814 = vmatprep.subr.bf16.mxu0 %v19091_v32  ;;  %v20911_v32 = vld [vmem:[#allocation12 + $0xa4] ss:$24 sps:$4 sm:$0xff]  }
 0x460   :  { %7613 = vmatprep.subr.bf16.mxu1 %v20895_v53  ;;  %6844 = vmatprep.mubr.bf16.mxu0 %v20748_v19  ;;  %v20914_v19 = vld [vmem:[#allocation12 + $0xa0] ss:$24 sps:$4 sm:$0xff]  }
 0x461   :  { %7643 = vmatprep.mubr.bf16.mxu1 %v20770_v14  ;;  %v19109_v14 = vld [vmem:[#allocation9 + $0x6d4] ss:$24 sps:$4 sm:$0xff]  }
 0x462   :  { %6815 = vmatpush1.bf16.msra.mxu0 %v19089_v61  ;;  %v20917_v61 = vld [vmem:[#allocation12 + $0xd4] ss:$24 sps:$4 sm:$0xff]  }
 0x463   :  { %7614 = vmatpush1.bf16.msra.mxu1 %v20900_v7  ;;  %6816 = vmatprep.subr.bf16.mxu0 %v19097_v31  ;;  %22205 = vst [vmem:[#allocation54_spill] sm:$0xff] %v20917_v61 }
 0x464   :  { %7615 = vmatprep.subr.bf16.mxu1 %v20903_v34 }
 0x466   :  { %6817 = vmatpush1.bf16.msra.mxu0 %v19095_v10  ;;  %v19115_v10 = vld [vmem:[#allocation9 + $0x704] ss:$24 sps:$4 sm:$0xff]  }
 0x467   :  { %7616 = vmatpush1.bf16.msra.mxu1 %v20908_v44  ;;  %6818 = vmatprep.subr.bf16.mxu0 %v19103_v30  ;;  %v20923_v30 = vld [vmem:[#allocation12 + $0xd0] ss:$24 sps:$4 sm:$0xff]  }
 0x468   :  { %7617 = vmatprep.subr.bf16.mxu1 %v20911_v32  ;;  %22206 = vst [vmem:[#allocation55_spill] sm:$0xff] %v20923_v30 }
 0x469   :  { %v4642_v31 = vpop.permute.xlu1 %4641 }
 0x46a   :  { %v4643_v26 = vsel %vm2403_vm15, %v4640_v28, %v4642_v31  ;;  %v4647_v23 = vpop.permute.xlu0 %4646  ;;  %6819 = vmatpush1.bf16.msra.mxu0 %v19101_v27  ;;  %v19113_v28 = vld [vmem:[#allocation9 + $0x700] ss:$24 sps:$4 sm:$0xff]  }
 0x46b   :  { %4645 = vst.msk [vmem:[#allocation2 + $0x78] sm:$0xff] %vm2385_vm14, %v4643_v26  ;;  %4649 = vst.msk [vmem:[#allocation2 + $0xb0] sm:$0xff] %vm2385_vm14, %v4647_v23  ;;  %7618 = vmatpush1.bf16.msra.mxu1 %v20914_v19  ;;  %6820 = vmatprep.subr.bf16.mxu0 %v19109_v14  ;;  %v20929_v26 = vld [vmem:[#allocation12 + $0x100] ss:$24 sps:$4 sm:$0xff]   ;;  %v19121_v23 = vld [vmem:[#allocation9 + $0x734] ss:$24 sps:$4 sm:$0xff]  }
 0x46c   :  { %7619 = vmatprep.subr.bf16.mxu1 %v20917_v61  ;;  %22208 = vst [vmem:[#allocation57_spill] sm:$0xff] %v20929_v26  ;;  %v20932_v27 = vld [vmem:[#allocation12 + $0x134] ss:$24 sps:$4 sm:$0xff]  }
 0x46d   :  { %v4662_v21 = vpop.permute.xlu1 %4661  ;;  %22209 = vst [vmem:[#allocation58_spill] sm:$0xff] %v20932_v27 }
 0x46e   :  { %v4656_v18 = vpop.permute.xlu0 %4655  ;;  %6821 = vmatpush1.bf16.msra.mxu0 %v19107_v25 }
 0x46f   :  { %7620 = vmatpush1.bf16.msra.mxu1 %v20923_v30  ;;  %6822 = vmatprep.subr.bf16.mxu0 %v19115_v10  ;;  %v20938_v10 = vld [vmem:[#allocation12 + $0x130] ss:$24 sps:$4 sm:$0xff]  }
 0x470   :  { %7621 = vmatprep.subr.bf16.mxu1 %v20926_v22  ;;  %22210 = vst [vmem:[#allocation59_spill] sm:$0xff] %v20938_v10 }
 0x471   :  { %v4654_v14 = vpop.permute.xlu1 %4653 }
 0x472   :  { %v4657_v31 = vsel %vm22155_vm13, %v4654_v14, %v4656_v18  ;;  %v4664_v17 = vpop.permute.xlu0 %4663  ;;  %6823 = vmatpush1.bf16.msra.mxu0 %v19113_v28  ;;  %v19125_v28 = vld [vmem:[#allocation9 + $0x760] ss:$24 sps:$4 sm:$0xff]   ;;  %v19131_v14 = vld [vmem:[#allocation9 + $0x790] ss:$24 sps:$4 sm:$0xff]  }
 0x473   :  { %4659 = vst.msk [vmem:[#allocation2 + $0x120] sm:$0xff] %vm2385_vm14, %v4657_v31  ;;  %v4665_v25 = vsel %vm2403_vm15, %v4662_v21, %v4664_v17  ;;  %7622 = vmatpush1.bf16.msra.mxu1 %v20929_v26  ;;  %6824 = vmatprep.subr.bf16.mxu0 %v19121_v23  ;;  %v20946_v17 = vld [vmem:[#allocation12 + $0x160] ss:$24 sps:$4 sm:$0xff]   ;;  %v19133_v21 = vld [vmem:[#allocation9 + $0x794] ss:$24 sps:$4 sm:$0xff]  }
 0x474   :  { %4667 = vst.msk [vmem:[#allocation2 + $0x158] sm:$0xff] %vm2385_vm14, %v4665_v25  ;;  %7623 = vmatprep.subr.bf16.mxu1 %v20932_v27  ;;  %22212 = vst [vmem:[#allocation61_spill] sm:$0xff] %v20946_v17  ;;  %v20949_v23 = vld [vmem:[#allocation12 + $0x194] ss:$24 sps:$4 sm:$0xff]   ;;  %v20952_v31 = vld [vmem:[#allocation12 + $0x190] ss:$24 sps:$4 sm:$0xff]  }
 0x475   :  { %v4669_v18 = vpop.permute.xlu1 %4668  ;;  %22213 = vst [vmem:[#allocation62_spill] sm:$0xff] %v20949_v23  ;;  %22214 = vst [vmem:[#allocation63_spill] sm:$0xff] %v20952_v31  ;;  %v19139_v25 = vld [vmem:[#allocation9 + $0x7c4] ss:$24 sps:$4 sm:$0xff]  }
 0x476   :  { %4671 = vst.msk [vmem:[#allocation2 + $0x190] sm:$0xff] %vm2385_vm14, %v4669_v18  ;;  %6825 = vmatpush1.bf16.msra.mxu0 %v19119_v16  ;;  %v20955_v16 = vld [vmem:[#allocation12 + $0x1c4] ss:$24 sps:$4 sm:$0xff]   ;;  %v20958_v18 = vld [vmem:[#allocation12 + $0x1c0] ss:$24 sps:$4 sm:$0xff]  }
 0x477   :  { %7624 = vmatpush1.bf16.msra.mxu1 %v20938_v10  ;;  %6826 = vmatprep.subr.bf16.mxu0 %v19127_v15  ;;  %22215 = vst [vmem:[#allocation64_spill] sm:$0xff] %v20955_v16  ;;  %v19137_v15 = vld [vmem:[#allocation9 + $0x7c0] ss:$24 sps:$4 sm:$0xff]   ;;  %22216 = vst [vmem:[#allocation65_spill] sm:$0xff] %v20958_v18 }
 0x478   :  { %7625 = vmatprep.subr.bf16.mxu1 %v20942_v0  ;;  %v21069_v26 = vld [vmem:[#allocation12 + $0x120] ss:$24 sps:$4 sm:$0xff]  }
 0x47a   :  { %6827 = vmatpush1.bf16.msra.mxu0 %v19125_v28  ;;  %v20961_v28 = vld [vmem:[#allocation12 + $0x1f4] ss:$24 sps:$4 sm:$0xff]  }
 0x47b   :  { %7626 = vmatpush1.bf16.msra.mxu1 %v20946_v17  ;;  %6828 = vmatprep.subr.bf16.mxu0 %v19133_v21  ;;  %22217 = vst [vmem:[#allocation66_spill] sm:$0xff] %v20961_v28  ;;  %v19143_v21 = vld [vmem:[#allocation9 + $0x7f0] ss:$24 sps:$4 sm:$0xff]   ;;  %v19151_v17 = vld [vmem:[#allocation9 + $0x824] ss:$24 sps:$4 sm:$0xff]  }
 0x47c   :  { %7627 = vmatprep.subr.bf16.mxu1 %v20949_v23  ;;  %v20964_v23 = vld [vmem:[#allocation12 + $0x1f0] ss:$24 sps:$4 sm:$0xff]  }
 0x47d   :  { %22218 = vst [vmem:[#allocation67_spill] sm:$0xff] %v20964_v23 }
 0x47e   :  { %6829 = vmatpush1.bf16.msra.mxu0 %v19131_v14  ;;  %v20967_v14 = vld [vmem:[#allocation12 + $0x224] ss:$24 sps:$4 sm:$0xff]  }
 0x47f   :  { %7628 = vmatpush1.bf16.msra.mxu1 %v20952_v31  ;;  %6830 = vmatprep.subr.bf16.mxu0 %v19139_v25  ;;  %22219 = vst [vmem:[#allocation68_spill] sm:$0xff] %v20967_v14  ;;  %v19149_v25 = vld [vmem:[#allocation9 + $0x820] ss:$24 sps:$4 sm:$0xff]   ;;  %v19157_v31 = vld [vmem:[#allocation9 + $0x854] ss:$24 sps:$4 sm:$0xff]  }
 0x480   :  { %7629 = vmatprep.subr.bf16.mxu1 %v20955_v16  ;;  %v20970_v16 = vld [vmem:[#allocation12 + $0x220] ss:$24 sps:$4 sm:$0xff]  }
 0x481   :  { %22220 = vst [vmem:[#allocation69_spill] sm:$0xff] %v20970_v16 }
 0x482   :  { %6831 = vmatpush1.bf16.msra.mxu0 %v19137_v15  ;;  %v20973_v15 = vld [vmem:[#allocation12 + $0x254] ss:$24 sps:$4 sm:$0xff]  }
 0x483   :  { %7630 = vmatpush1.bf16.msra.mxu1 %v20958_v18  ;;  %6832 = vmatprep.subr.bf16.mxu0 %v19145_v62  ;;  %22221 = vst [vmem:[#allocation70_spill] sm:$0xff] %v20973_v15  ;;  %v19155_v62 = vld [vmem:[#allocation9 + $0x850] ss:$24 sps:$4 sm:$0xff]   ;;  %v19163_v18 = vld [vmem:[#allocation9 + $0x884] ss:$24 sps:$4 sm:$0xff]  }
 0x484   :  { %7631 = vmatprep.subr.bf16.mxu1 %v20961_v28  ;;  %v20976_v28 = vld [vmem:[#allocation12 + $0x250] ss:$24 sps:$4 sm:$0xff]  }
 0x485   :  { %22222 = vst [vmem:[#allocation71_spill] sm:$0xff] %v20976_v28 }
 0x486   :  { %6833 = vmatpush1.bf16.msra.mxu0 %v19143_v21  ;;  %v20979_v21 = vld [vmem:[#allocation12 + $0x284] ss:$24 sps:$4 sm:$0xff]  }
 0x487   :  { %7632 = vmatpush1.bf16.msra.mxu1 %v20964_v23  ;;  %6834 = vmatprep.subr.bf16.mxu0 %v19151_v17  ;;  %22223 = vst [vmem:[#allocation72_spill] sm:$0xff] %v20979_v21  ;;  %v19161_v17 = vld [vmem:[#allocation9 + $0x880] ss:$24 sps:$4 sm:$0xff]   ;;  %v19169_v23 = vld [vmem:[#allocation9 + $0x8b4] ss:$24 sps:$4 sm:$0xff]  }
 0x488   :  { %7633 = vmatprep.subr.bf16.mxu1 %v20967_v14  ;;  %v20982_v14 = vld [vmem:[#allocation12 + $0x280] ss:$24 sps:$4 sm:$0xff]  }
 0x489   :  { %22224 = vst [vmem:[#allocation73_spill] sm:$0xff] %v20982_v14 }
 0x48a   :  { %6835 = vmatpush1.bf16.msra.mxu0 %v19149_v25  ;;  %v20985_v25 = vld [vmem:[#allocation12 + $0x2b4] ss:$24 sps:$4 sm:$0xff]  }
 0x48b   :  { %7634 = vmatpush1.bf16.msra.mxu1 %v20970_v16  ;;  %6836 = vmatprep.subr.bf16.mxu0 %v19157_v31  ;;  %22225 = vst [vmem:[#allocation74_spill] sm:$0xff] %v20985_v25  ;;  %v19167_v31 = vld [vmem:[#allocation9 + $0x8b0] ss:$24 sps:$4 sm:$0xff]   ;;  %v19175_v16 = vld [vmem:[#allocation9 + $0x8e4] ss:$24 sps:$4 sm:$0xff]  }
 0x48c   :  { %7635 = vmatprep.subr.bf16.mxu1 %v20973_v15  ;;  %v20988_v15 = vld [vmem:[#allocation12 + $0x2b0] ss:$24 sps:$4 sm:$0xff]  }
 0x48d   :  { %22226 = vst [vmem:[#allocation75_spill] sm:$0xff] %v20988_v15 }
 0x48e   :  { %6837 = vmatpush1.bf16.msra.mxu0 %v19155_v62  ;;  %v20991_v62 = vld [vmem:[#allocation12 + $0x2e4] ss:$24 sps:$4 sm:$0xff]  }
 0x48f   :  { %7636 = vmatpush1.bf16.msra.mxu1 %v20976_v28  ;;  %6838 = vmatprep.subr.bf16.mxu0 %v19163_v18  ;;  %22227 = vst [vmem:[#allocation76_spill] sm:$0xff] %v20991_v62  ;;  %v19173_v18 = vld [vmem:[#allocation9 + $0x8e0] ss:$24 sps:$4 sm:$0xff]  }
 0x490   :  { %7637 = vmatprep.subr.bf16.mxu1 %v20979_v21  ;;  %v20994_v21 = vld [vmem:[#allocation12 + $0x2e0] ss:$24 sps:$4 sm:$0xff]   ;;  %v20996_v28 = vld [vmem:[#allocation12 + $0x4] ss:$24 sps:$4 sm:$0xff]  }
 0x491   :  { %22228 = vst [vmem:[#allocation77_spill] sm:$0xff] %v20994_v21 }
 0x492   :  { %6839 = vmatpush1.bf16.msra.mxu0 %v19161_v17  ;;  %v20999_v17 = vld [vmem:[#allocation7 + $0x8] sm:$0xff] }
 0x493   :  { %7638 = vmatpush1.bf16.msra.mxu1 %v20982_v14  ;;  %6840 = vmatprep.subr.bf16.mxu0 %v19169_v23  ;;  %v21001_v23 = vld [vmem:[#allocation7 + $0x28] sm:$0xff] }
 0x494   :  { %7639 = vmatprep.subr.bf16.mxu1 %v20985_v25  ;;  %v21003_v14 = vld [vmem:[#allocation12] ss:$24 sps:$4 sm:$0xff]  }
 0x496   :  { %6841 = vmatpush1.bf16.msra.mxu0 %v19167_v31  ;;  %v21007_v31 = vld [vmem:[#allocation12 + $0x34] ss:$24 sps:$4 sm:$0xff]  }
 0x497   :  { %7640 = vmatpush1.bf16.msra.mxu1 %v20988_v15  ;;  %6842 = vmatprep.subr.bf16.mxu0 %v19175_v16  ;;  %v21012_v16 = vcombine.high %v20999_v17, %v21001_v23 }
 0x498   :  { %7641 = vmatprep.subr.bf16.mxu1 %v20991_v62 }
 0x49a   :  { %6843 = vmatpush1.bf16.msra.mxu0 %v19173_v18  ;;  %v21017_v18 = vld [vmem:[#allocation12 + $0x30] ss:$24 sps:$4 sm:$0xff]  }
 0x49b   :  { %7642 = vmatpush1.bf16.msra.mxu1 %v20994_v21  ;;  %8324 = vmatprep.subr.bf16.mxu0 %v20996_v28  ;;  %v21021_v21 = vld [vmem:[#allocation12 + $0x64] ss:$24 sps:$4 sm:$0xff]  }
 0x49c   :  { %8367 = vmatprep.subr.bf16.mxu1 %v20786_v47  ;;  %v21031_v47 = vld [vmem:[#allocation12 + $0x94] ss:$24 sps:$4 sm:$0xff]  }
 0x49d   :  { %6845 = vmatmul.mubr.bf16.vlgmr.msra.gmra.mrb[16].mxu0 %v20761_v6  ;;  %v21027_v6 = vld [vmem:[#allocation12 + $0x60] ss:$24 sps:$4 sm:$0xff]  }
 0x49e   :  { %7644 = vmatmul.mubr.bf16.vlgmr.msra.gmra.mrb[24].mxu1 %v20790_v50  ;;  %8325 = vmatpush1.bf16.msra.mxu0 %v21003_v14  ;;  %v21035_v50 = vld [vmem:[#allocation12 + $0x90] ss:$24 sps:$4 sm:$0xff]  }
 0x49f   :  { %8368 = vmatpush1.bf16.msra.mxu1 %v20792_v52  ;;  %8326 = vmatprep.subr.bf16.mxu0 %v21007_v31  ;;  %v21039_v52 = vld [vmem:[#allocation12 + $0xc4] ss:$24 sps:$4 sm:$0xff]  }
 0x4a0   :  { %8369 = vmatprep.subr.bf16.mxu1 %v20795_v54  ;;  %8356 = vmatprep.mubr.bf16.mxu0 %v21012_v16  ;;  %22229 = vst [vmem:[#allocation78_spill] sm:$0xff] %v21039_v52  ;;  %v21043_v54 = vld [vmem:[#allocation12 + $0xc0] ss:$24 sps:$4 sm:$0xff]  }
 0x4a1   :  { %8399 = vmatprep.mubr.bf16.mxu1 %v21012_v16  ;;  %22230 = vst [vmem:[#allocation79_spill] sm:$0xff] %v21043_v54 }
 0x4a2   :  { %8327 = vmatpush1.bf16.msra.mxu0 %v21017_v18 }
 0x4a3   :  { %8370 = vmatpush1.bf16.msra.mxu1 %v20800_v8  ;;  %8328 = vmatprep.subr.bf16.mxu0 %v21021_v21  ;;  %v21047_v8 = vld [vmem:[#allocation12 + $0xf4] ss:$24 sps:$4 sm:$0xff]  }
 0x4a4   :  { %8371 = vmatprep.subr.bf16.mxu1 %v20803_v58  ;;  %22231 = vst [vmem:[#allocation80_spill] sm:$0xff] %v21047_v8  ;;  %v21050_v58 = vld [vmem:[#allocation10] sm:$0x3f] }
 0x4a5   :  { %22232 = vst [vmem:[#allocation81_spill] sm:$0xff] %v21050_v58  ;;  %v4979_v15 = vrot.slane %v21050_v58, %v20695_v55 }
 0x4a6   :  { %8329 = vmatpush1.bf16.msra.mxu0 %v21027_v6 }
 0x4a7   :  { %8372 = vmatpush1.bf16.msra.mxu1 %v20808_v60  ;;  %8330 = vmatprep.subr.bf16.mxu0 %v21031_v47  ;;  %v21053_v60 = vld [vmem:[#allocation12 + $0xf0] ss:$24 sps:$4 sm:$0xff]  }
 0x4a8   :  { %8373 = vmatprep.subr.bf16.mxu1 %v20811_v63  ;;  %22233 = vst [vmem:[#allocation82_spill] sm:$0xff] %v21053_v60  ;;  %v4971_v63 = vrot.slane %v21050_v58, %v20692_v51 }
 0x4aa   :  { %8331 = vmatpush1.bf16.msra.mxu0 %v21035_v50 }
 0x4ab   :  { %8374 = vmatpush1.bf16.msra.mxu1 %v20814_v2  ;;  %8332 = vmatprep.subr.bf16.mxu0 %v21039_v52  ;;  %v21059_v2 = vld [vmem:[#allocation12 + $0x124] ss:$24 sps:$4 sm:$0xff]  }
 0x4ac   :  { %8375 = vmatprep.subr.bf16.mxu1 %v20817_v3  ;;  %v4975_v3 = vrot.slane %v21050_v58, %v20698_v56 }
 0x4ae   :  { %8333 = vmatpush1.bf16.msra.mxu0 %v21043_v54 }
 0x4af   :  { %8376 = vmatpush1.bf16.msra.mxu1 %v20820_v5  ;;  %8334 = vmatprep.subr.bf16.mxu0 %v21047_v8  ;;  %v4983_v5 = vrot.slane %v21050_v58, %v20701_v59  ;;  %v21074_v58 = vld [vmem:[#allocation12 + $0x154] ss:$24 sps:$4 sm:$0xff]  }
 0x4b0   :  { %v6588_v62 = vpop.f32.mrb[12].mxu0  ;;  %8377 = vmatprep.subr.bf16.mxu1 %v20823_v11 }
 0x4b1   :  { %v6717_v25 = vpop.f32.mrb[12].mxu1  ;;  %v6590_v0 = vpop.f32.mrb[13].mxu0  ;;  %v17463_v8 = vadd.f32 %v6588_v62, %v4971_v63  ;;  %v21077_v62 = vld [vmem:[#allocation12 + $0x150] ss:$24 sps:$4 sm:$0xff]  }
 0x4b2   :  { %v6719_v10 = vpop.f32.mrb[13].mxu1  ;;  %v6592_v27 = vpop.f32.mrb[14].mxu0  ;;  %8335 = vmatpush1.bf16.msra.mxu0 %v21053_v60  ;;  %v17467_v11 = vadd.f32 %v6717_v25, %v4979_v15  ;;  %v17464_v56 = vadd.f32 %v6590_v0, %v4975_v3  ;;  %v21084_v0 = vld [vmem:[#allocation12 + $0x184] ss:$24 sps:$4 sm:$0xff]  }
 0x4b3   :  { %v17465_v22 = vadd.f32 %v6592_v27, %v4971_v63  ;;  %v6721_v54 = vpop.f32.mrb[14].mxu1  ;;  %8378 = vmatpush1.bf16.msra.mxu1 %v20826_v13  ;;  %v6594_v55 = vpop.f32.mrb[15].mxu0  ;;  %8336 = vmatprep.subr.bf16.mxu0 %v21059_v2  ;;  %v17468_v59 = vadd.f32 %v6719_v10, %v4983_v5  ;;  %v22243_v10 = vld [vmem:[#allocation82_spill] sm:$0xff] }
 0x4b4   :  { %v17469_v51 = vadd.f32 %v6721_v54, %v4979_v15  ;;  %v17466_v30 = vadd.f32 %v6594_v55, %v4975_v3  ;;  %v6723_v52 = vpop.f32.mrb[15].mxu1  ;;  %8379 = vmatprep.subr.bf16.mxu1 %v20829_v24  ;;  %v21109_v24 = vld [vmem:[#allocation12 + $0x1e0] ss:$24 sps:$4 sm:$0xff]   ;;  %v22252_v54 = vld [vmem:[#allocation66_spill] sm:$0xff] }
 0x4b5   :  { %v17470_v60 = vadd.f32 %v6723_v52, %v4983_v5  ;;  %v6855_v61 = vpack.c.bf16 %v17465_v22, %v17463_v8  ;;  %v21089_v22 = vld [vmem:[#allocation12 + $0x180] ss:$24 sps:$4 sm:$0xff]   ;;  %v22256_v63 = vld [vmem:[#allocation70_spill] sm:$0xff] }
 0x4b6   :  { %8337 = vmatpush1.bf16.msra.mxu0 %v21069_v26  ;;  %v6857_v27 = vpack.c.bf16 %v17469_v51, %v17467_v11  ;;  %v6856_v13 = vpack.c.bf16 %v17466_v30, %v17464_v56  ;;  %v21095_v51 = vld [vmem:[#allocation12 + $0x1b4] ss:$24 sps:$4 sm:$0xff]   ;;  %v21099_v56 = vld [vmem:[#allocation12 + $0x1b0] ss:$24 sps:$4 sm:$0xff]   ;;  %v22258_v3 = vld [vmem:[#allocation72_spill] sm:$0xff] }
 0x4b7   :  { %8380 = vmatpush1.bf16.msra.mxu1 %v20832_v33  ;;  %6861 = vst.msk [vmem:[#allocation2 + $0x10] sm:$0xff] %vm2385_vm14, %v6855_v61  ;;  %6864 = vrot.lane.b32.xlu0 %v6855_v61, %s20372_s14  ;;  %v6858_v55 = vpack.c.bf16 %v17470_v60, %v17468_v59  ;;  %v21103_v59 = vld [vmem:[#allocation12 + $0x1e4] ss:$24 sps:$4 sm:$0xff]   ;;  %v21113_v33 = vld [vmem:[#allocation12 + $0x214] ss:$24 sps:$4 sm:$0xff]  }
 0x4b8   :  { %6874 = vrot.lane.b32.xlu1 %v6857_v27, %s20385_s4  ;;  %8338 = vmatprep.subr.bf16.mxu0 %v21074_v58  ;;  %v22251_v52 = vld [vmem:[#allocation65_spill] sm:$0xff]  ;;  %v22253_v8 = vld [vmem:[#allocation67_spill] sm:$0xff]  ;;  %v22260_v11 = vld [vmem:[#allocation74_spill] sm:$0xff] }
 0x4b9   :  { %8381 = vmatprep.subr.bf16.mxu1 %v20835_v35  ;;  %6883 = vst.msk [vmem:[#allocation2 + $0xf0] sm:$0xff] %vm2385_vm14, %v6858_v55  ;;  %v21117_v35 = vld [vmem:[#allocation12 + $0x210] ss:$24 sps:$4 sm:$0xff]  }
 0x4ba   :  { %8339 = vmatpush1.bf16.msra.mxu0 %v21077_v62  ;;  %v22255_v60 = vld [vmem:[#allocation69_spill] sm:$0xff] }
 0x4bb   :  { %8382 = vmatpush1.bf16.msra.mxu1 %v20838_v37  ;;  %6879 = vrot.lane.b32.xlu0 %v6857_v27, %s20392_s11  ;;  %v21121_v37 = vld [vmem:[#allocation12 + $0x244] ss:$24 sps:$4 sm:$0xff]   ;;  %v22261_v27 = vld [vmem:[#allocation75_spill] sm:$0xff] }
 0x4bc   :  { %6866 = vrot.lane.b32.xlu1 %v6856_v13, %s20372_s14  ;;  %8340 = vmatprep.subr.bf16.mxu0 %v21084_v0  ;;  %v22259_v5 = vld [vmem:[#allocation73_spill] sm:$0xff] }
 0x4bd   :  { %8383 = vmatprep.subr.bf16.mxu1 %v20841_v39  ;;  %v21125_v39 = vld [vmem:[#allocation12 + $0x240] ss:$24 sps:$4 sm:$0xff]  }
 0x4be   :  { %8341 = vmatpush1.bf16.msra.mxu0 %v21089_v22 }
 0x4bf   :  { %8384 = vmatpush1.bf16.msra.mxu1 %v20844_v42  ;;  %6872 = vrot.lane.b32.xlu0 %v6856_v13, %s20385_s4  ;;  %v21129_v42 = vld [vmem:[#allocation12 + $0x274] ss:$24 sps:$4 sm:$0xff]  }
 0x4c0   :  { %6886 = vrot.lane.b32.xlu1 %v6858_v55, %s20372_s14  ;;  %8342 = vmatprep.subr.bf16.mxu0 %v21095_v51  ;;  %v21243_v13 = vld [vmem:[#allocation12 + $0xc] ss:$24 sps:$4 sm:$0xff]  }
 0x4c1   :  { %8385 = vmatprep.subr.bf16.mxu1 %v20847_v45  ;;  %v21133_v45 = vld [vmem:[#allocation12 + $0x270] ss:$24 sps:$4 sm:$0xff]   ;;  %v21246_v55 = vld [vmem:[#allocation12 + $0x14] ss:$24 sps:$4 sm:$0xff]  }
 0x4c2   :  { %8343 = vmatpush1.bf16.msra.mxu0 %v21099_v56 }
 0x4c3   :  { %8386 = vmatpush1.bf16.msra.mxu1 %v20850_v49  ;;  %8344 = vmatprep.subr.bf16.mxu0 %v21103_v59  ;;  %v21137_v49 = vld [vmem:[#allocation12 + $0x2a4] ss:$24 sps:$4 sm:$0xff]  }
 0x4c4   :  { %8387 = vmatprep.subr.bf16.mxu1 %v20853_v57  ;;  %v21141_v57 = vld [vmem:[#allocation12 + $0x2a0] ss:$24 sps:$4 sm:$0xff]  }
 0x4c6   :  { %8345 = vmatpush1.bf16.msra.mxu0 %v21109_v24 }
 0x4c7   :  { %8388 = vmatpush1.bf16.msra.mxu1 %v20856_v43  ;;  %8346 = vmatprep.subr.bf16.mxu0 %v21113_v33  ;;  %v21145_v43 = vld [vmem:[#allocation12 + $0x2d4] ss:$24 sps:$4 sm:$0xff]  }
 0x4c8   :  { %8389 = vmatprep.subr.bf16.mxu1 %v20859_v1  ;;  %v21149_v1 = vld [vmem:[#allocation12 + $0x2d0] ss:$24 sps:$4 sm:$0xff]  }
 0x4ca   :  { %8347 = vmatpush1.bf16.msra.mxu0 %v21117_v35 }
 0x4cb   :  { %8390 = vmatpush1.bf16.msra.mxu1 %v20862_v4  ;;  %8348 = vmatprep.subr.bf16.mxu0 %v21121_v37  ;;  %v21156_v4 = vcombine.low %v20999_v17, %v21001_v23  ;;  %v22245_v23 = vld [vmem:[#allocation59_spill] sm:$0xff] }
 0x4cc   :  { %8391 = vmatprep.subr.bf16.mxu1 %v20865_v12  ;;  %v21159_v12 = vld [vmem:[#allocation7 + $0x10] sm:$0xff] }
 0x4ce   :  { %8349 = vmatpush1.bf16.msra.mxu0 %v21125_v39 }
 0x4cf   :  { %8392 = vmatpush1.bf16.msra.mxu1 %v20868_v29  ;;  %8350 = vmatprep.subr.bf16.mxu0 %v21129_v42  ;;  %v21161_v29 = vld [vmem:[#allocation7 + $0x30] sm:$0xff] }
 0x4d0   :  { %8393 = vmatprep.subr.bf16.mxu1 %v20871_v36  ;;  %v21169_v36 = vcombine.high %v21159_v12, %v21161_v29 }
 0x4d2   :  { %8351 = vmatpush1.bf16.msra.mxu0 %v21133_v45 }
 0x4d3   :  { %8394 = vmatpush1.bf16.msra.mxu1 %v20874_v41  ;;  %8352 = vmatprep.subr.bf16.mxu0 %v21137_v49  ;;  %v21189_v41 = vld [vmem:[#allocation13] sm:$0x3f] }
 0x4d4   :  { %8395 = vmatprep.subr.bf16.mxu1 %v20877_v46  ;;  %v22235_v46 = vld [vmem:[#allocation78_spill] sm:$0xff] }
 0x4d6   :  { %8353 = vmatpush1.bf16.msra.mxu0 %v21141_v57 }
 0x4d7   :  { %8396 = vmatpush1.bf16.msra.mxu1 %v20880_v9  ;;  %8354 = vmatprep.subr.bf16.mxu0 %v21145_v43  ;;  %v22236_v9 = vld [vmem:[#allocation55_spill] sm:$0xff] }
 0x4d8   :  { %8397 = vmatprep.subr.bf16.mxu1 %v20883_v48  ;;  %v22237_v48 = vld [vmem:[#allocation48_spill] sm:$0xff] }
 0x4da   :  { %8355 = vmatpush1.bf16.msra.mxu0 %v21149_v1 }
 0x4db   :  { %8398 = vmatpush1.bf16.msra.mxu1 %v20886_v20  ;;  %8410 = vmatprep.subr.bf16.mxu0 %v20889_v38  ;;  %v7008_v20 = vrot.slane %v21189_v41, %v22237_v48  ;;  %v22238_v38 = vld [vmem:[#allocation79_spill] sm:$0xff] }
 0x4dc   :  { %9123 = vmatprep.subr.bf16.mxu1 %v20996_v28  ;;  %v22244_v28 = vld [vmem:[#allocation58_spill] sm:$0xff] }
 0x4dd   :  { %8357 = vmatmul.mubr.bf16.vlgmr.msra.gmra.mrb[20].mxu0 %v21156_v4 }
 0x4de   :  { %8400 = vmatmul.mubr.bf16.vlgmr.msra.gmra.mrb[28].mxu1 %v21156_v4  ;;  %8411 = vmatpush1.bf16.msra.mxu0 %v20892_v40  ;;  %v22234_v40 = vld [vmem:[#allocation54_spill] sm:$0xff] }
 0x4df   :  { %9124 = vmatpush1.bf16.msra.mxu1 %v21003_v14  ;;  %8412 = vmatprep.subr.bf16.mxu0 %v20895_v53  ;;  %v22239_v53 = vld [vmem:[#allocation56_spill] sm:$0xff] }
 0x4e0   :  { %9125 = vmatprep.subr.bf16.mxu1 %v21007_v31  ;;  %8442 = vmatprep.mubr.bf16.mxu0 %v21012_v16  ;;  %v22246_v16 = vld [vmem:[#allocation60_spill] sm:$0xff] }
 0x4e1   :  { %9155 = vmatprep.mubr.bf16.mxu1 %v21169_v36 }
 0x4e2   :  { %8413 = vmatpush1.bf16.msra.mxu0 %v20900_v7  ;;  %v22240_v7 = vld [vmem:[#allocation50_spill] sm:$0xff] }
 0x4e3   :  { %9126 = vmatpush1.bf16.msra.mxu1 %v21017_v18  ;;  %8414 = vmatprep.subr.bf16.mxu0 %v20903_v34  ;;  %v7012_v34 = vrot.slane %v21189_v41, %v22240_v7 }
 0x4e4   :  { %9127 = vmatprep.subr.bf16.mxu1 %v21021_v21 }
 0x4e6   :  { %8415 = vmatpush1.bf16.msra.mxu0 %v20908_v44  ;;  %v22241_v44 = vld [vmem:[#allocation80_spill] sm:$0xff] }
 0x4e7   :  { %9128 = vmatpush1.bf16.msra.mxu1 %v21027_v6  ;;  %8416 = vmatprep.subr.bf16.mxu0 %v20911_v32  ;;  %v22247_v6 = vld [vmem:[#allocation61_spill] sm:$0xff] }
 0x4e8   :  { %9129 = vmatprep.subr.bf16.mxu1 %v21031_v47  ;;  %v22248_v47 = vld [vmem:[#allocation62_spill] sm:$0xff] }
 0x4ea   :  { %8417 = vmatpush1.bf16.msra.mxu0 %v20914_v19  ;;  %v22242_v19 = vld [vmem:[#allocation57_spill] sm:$0xff] }
 0x4eb   :  { %9130 = vmatpush1.bf16.msra.mxu1 %v21035_v50  ;;  %8418 = vmatprep.subr.bf16.mxu0 %v22234_v40  ;;  %v22250_v50 = vld [vmem:[#allocation64_spill] sm:$0xff] }
 0x4ec   :  { %9131 = vmatprep.subr.bf16.mxu1 %v22235_v46  ;;  %v21305_v40 = vld [vmem:[#allocation12 + $0xc8] ss:$24 sps:$4 sm:$0xff]  }
 0x4ed   :  { %v21309_v46 = vld [vmem:[#allocation12 + $0xd0] ss:$24 sps:$4 sm:$0xff]  }
 0x4ee   :  { %8419 = vmatpush1.bf16.msra.mxu0 %v22236_v9  ;;  %v21311_v9 = vld [vmem:[#allocation12 + $0xfc] ss:$24 sps:$4 sm:$0xff]  }
 0x4ef   :  { %9132 = vmatpush1.bf16.msra.mxu1 %v22238_v38  ;;  %8420 = vmatprep.subr.bf16.mxu0 %v22239_v53 }
 0x4f0   :  { %9133 = vmatprep.subr.bf16.mxu1 %v22241_v44 }
 0x4f1   :  { %v7559_v32 = vpop.f32.mrb[16].mxu1 }
 0x4f2   :  { %8421 = vmatpush1.bf16.msra.mxu0 %v22242_v19  ;;  %v7560_v61 = vadd.f32 %v7559_v32, %v7008_v20  ;;  %v7561_v30 = vpop.f32.mrb[17].mxu1  ;;  %v21320_v32 = vld [vmem:[#allocation12 + $0xf8] ss:$24 sps:$4 sm:$0xff]  }
 0x4f3   :  { %9134 = vmatpush1.bf16.msra.mxu1 %v22243_v10  ;;  %8422 = vmatprep.subr.bf16.mxu0 %v22244_v28  ;;  %v7562_v14 = vadd.f32 %v7561_v30, %v7012_v34  ;;  %v7563_v15 = vpop.f32.mrb[18].mxu1  ;;  %v21327_v10 = vld [vmem:[#allocation12 + $0x100] ss:$24 sps:$4 sm:$0xff]   ;;  %v21329_v28 = vld [vmem:[#allocation12 + $0x12c] ss:$24 sps:$4 sm:$0xff]  }
 0x4f4   :  { %9135 = vmatprep.subr.bf16.mxu1 %v21059_v2  ;;  %v7564_v21 = vadd.f32 %v7563_v15, %v7008_v20  ;;  %v7565_v25 = vpop.f32.mrb[19].mxu1  ;;  %v22257_v2 = vld [vmem:[#allocation71_spill] sm:$0xff]  ;;  %v21314_v20 = vld [vmem:[#allocation12 + $0x104] ss:$24 sps:$4 sm:$0xff]   ;;  %22266 = vst [vmem:[#allocation54_spill] sm:$0xff] %v21327_v10 }
 0x4f5   :  { %v7566_v17 = vadd.f32 %v7565_v25, %v7012_v34  ;;  %v22264_v34 = vld [vmem:[#allocation49_spill] sm:$0xff] }
 0x4f6   :  { %8423 = vmatpush1.bf16.msra.mxu0 %v22245_v23  ;;  %v7654_v31 = vpack.c.bf16 %v7564_v21, %v7560_v61  ;;  %v7016_v44 = vrot.slane %v21189_v41, %v22264_v34  ;;  %v22265_v61 = vld [vmem:[#allocation51_spill] sm:$0xff] }
 0x4f7   :  { %9136 = vmatpush1.bf16.msra.mxu1 %v21069_v26  ;;  %8424 = vmatprep.subr.bf16.mxu0 %v22246_v16  ;;  %v7655_v18 = vpack.c.bf16 %v7566_v17, %v7562_v14  ;;  %v22249_v26 = vld [vmem:[#allocation63_spill] sm:$0xff]  ;;  %v7020_v30 = vrot.slane %v21189_v41, %v22265_v61 }
 0x4f8   :  { %9137 = vmatprep.subr.bf16.mxu1 %v21074_v58  ;;  %7660 = vst.msk [vmem:[#allocation2 + $0x18] sm:$0xff] %vm2385_vm14, %v7654_v31  ;;  %7663 = vrot.lane.b32.xlu0 %v7654_v31, %s20372_s14  ;;  %v22254_v58 = vld [vmem:[#allocation68_spill] sm:$0xff]  ;;  %v21333_v14 = vld [vmem:[#allocation12 + $0x134] ss:$24 sps:$4 sm:$0xff]  }
 0x4f9   :  { %7665 = vrot.lane.b32.xlu1 %v7655_v18, %s20372_s14  ;;  %22267 = vst [vmem:[#allocation78_spill] sm:$0xff] %v21333_v14  ;;  %v21337_v31 = vld [vmem:[#allocation12 + $0x128] ss:$24 sps:$4 sm:$0xff]  }
 0x4fa   :  { %8425 = vmatpush1.bf16.msra.mxu0 %v22247_v6  ;;  %v21342_v6 = vld [vmem:[#allocation12 + $0x130] ss:$24 sps:$4 sm:$0xff]  }
 0x4fb   :  { %9138 = vmatpush1.bf16.msra.mxu1 %v21077_v62  ;;  %8426 = vmatprep.subr.bf16.mxu0 %v22248_v47  ;;  %v22262_v62 = vld [vmem:[#allocation76_spill] sm:$0xff]  ;;  %22268 = vst [vmem:[#allocation55_spill] sm:$0xff] %v21342_v6 }
 0x4fc   :  { %9139 = vmatprep.subr.bf16.mxu1 %v21084_v0  ;;  %7671 = vrot.lane.b32.xlu0 %v7655_v18, %s20385_s4  ;;  %v22263_v0 = vld [vmem:[#allocation77_spill] sm:$0xff]  ;;  %v21344_v47 = vld [vmem:[#allocation12 + $0x15c] ss:$24 sps:$4 sm:$0xff]  }
 0x4fe   :  { %8427 = vmatpush1.bf16.msra.mxu0 %v22249_v26 }
 0x4ff   :  { %9140 = vmatpush1.bf16.msra.mxu1 %v21089_v22  ;;  %8428 = vmatprep.subr.bf16.mxu0 %v22250_v50  ;;  %v21251_v22 = vcombine.low %v21159_v12, %v21161_v29  ;;  %v21302_v12 = vld [vmem:[#allocation12 + $0xd4] ss:$24 sps:$4 sm:$0xff]   ;;  %v21347_v50 = vld [vmem:[#allocation12 + $0x164] ss:$24 sps:$4 sm:$0xff]  }
 0x500   :  { %9141 = vmatprep.subr.bf16.mxu1 %v21095_v51  ;;  %v21253_v51 = vld [vmem:[#allocation12 + $0x8] ss:$24 sps:$4 sm:$0xff]   ;;  %22269 = vst [vmem:[#allocation79_spill] sm:$0xff] %v21347_v50 }
 0x502   :  { %8429 = vmatpush1.bf16.msra.mxu0 %v22251_v52 }
 0x503   :  { %9142 = vmatpush1.bf16.msra.mxu1 %v21099_v56  ;;  %8430 = vmatprep.subr.bf16.mxu0 %v22252_v54  ;;  %v21257_v56 = vld [vmem:[#allocation12 + $0x10] ss:$24 sps:$4 sm:$0xff]  }
 0x504   :  { %9143 = vmatprep.subr.bf16.mxu1 %v21103_v59  ;;  %v21259_v59 = vld [vmem:[#allocation12 + $0x3c] ss:$24 sps:$4 sm:$0xff]  }
 0x506   :  { %8431 = vmatpush1.bf16.msra.mxu0 %v22253_v8 }
 0x507   :  { %9144 = vmatpush1.bf16.msra.mxu1 %v21109_v24  ;;  %8432 = vmatprep.subr.bf16.mxu0 %v22254_v58  ;;  %v21262_v24 = vld [vmem:[#allocation12 + $0x44] ss:$24 sps:$4 sm:$0xff]   ;;  %v21350_v58 = vld [vmem:[#allocation12 + $0x158] ss:$24 sps:$4 sm:$0xff]  }
 0x508   :  { %9145 = vmatprep.subr.bf16.mxu1 %v21113_v33  ;;  %v21267_v33 = vld [vmem:[#allocation12 + $0x38] ss:$24 sps:$4 sm:$0xff]  }
 0x50a   :  { %8433 = vmatpush1.bf16.msra.mxu0 %v22255_v60  ;;  %v21354_v60 = vld [vmem:[#allocation12 + $0x160] ss:$24 sps:$4 sm:$0xff]  }
 0x50b   :  { %9146 = vmatpush1.bf16.msra.mxu1 %v21117_v35  ;;  %8434 = vmatprep.subr.bf16.mxu0 %v22256_v63  ;;  %v21271_v35 = vld [vmem:[#allocation12 + $0x40] ss:$24 sps:$4 sm:$0xff]   ;;  %22270 = vst [vmem:[#allocation56_spill] sm:$0xff] %v21354_v60  ;;  %v21356_v63 = vld [vmem:[#allocation12 + $0x18c] ss:$24 sps:$4 sm:$0xff]  }
 0x50c   :  { %9147 = vmatprep.subr.bf16.mxu1 %v21121_v37  ;;  %v21273_v37 = vld [vmem:[#allocation12 + $0x6c] ss:$24 sps:$4 sm:$0xff]  }
 0x50e   :  { %8435 = vmatpush1.bf16.msra.mxu0 %v22257_v2 }
 0x50f   :  { %9148 = vmatpush1.bf16.msra.mxu1 %v21125_v39  ;;  %8436 = vmatprep.subr.bf16.mxu0 %v22258_v3  ;;  %v21276_v39 = vld [vmem:[#allocation12 + $0x74] ss:$24 sps:$4 sm:$0xff]  }
 0x510   :  { %9149 = vmatprep.subr.bf16.mxu1 %v21129_v42  ;;  %v21281_v42 = vld [vmem:[#allocation12 + $0x68] ss:$24 sps:$4 sm:$0xff]   ;;  %v21360_v3 = vld [vmem:[#allocation12 + $0x194] ss:$24 sps:$4 sm:$0xff]  }
 0x511   :  { %22271 = vst [vmem:[#allocation80_spill] sm:$0xff] %v21360_v3 }
 0x512   :  { %8437 = vmatpush1.bf16.msra.mxu0 %v22259_v5  ;;  %v21365_v5 = vld [vmem:[#allocation12 + $0x188] ss:$24 sps:$4 sm:$0xff]  }
 0x513   :  { %9150 = vmatpush1.bf16.msra.mxu1 %v21133_v45  ;;  %8438 = vmatprep.subr.bf16.mxu0 %v22260_v11  ;;  %v21285_v45 = vld [vmem:[#allocation12 + $0x70] ss:$24 sps:$4 sm:$0xff]  }
 0x514   :  { %9151 = vmatprep.subr.bf16.mxu1 %v21137_v49  ;;  %v21287_v49 = vld [vmem:[#allocation12 + $0x9c] ss:$24 sps:$4 sm:$0xff]   ;;  %v21369_v11 = vld [vmem:[#allocation12 + $0x190] ss:$24 sps:$4 sm:$0xff]  }
 0x515   :  { %22272 = vst [vmem:[#allocation57_spill] sm:$0xff] %v21369_v11 }
 0x516   :  { %8439 = vmatpush1.bf16.msra.mxu0 %v22261_v27  ;;  %v21371_v27 = vld [vmem:[#allocation12 + $0x1bc] ss:$24 sps:$4 sm:$0xff]  }
 0x517   :  { %9152 = vmatpush1.bf16.msra.mxu1 %v21141_v57  ;;  %8440 = vmatprep.subr.bf16.mxu0 %v22262_v62  ;;  %v21290_v57 = vld [vmem:[#allocation12 + $0xa4] ss:$24 sps:$4 sm:$0xff]  }
 0x518   :  { %9153 = vmatprep.subr.bf16.mxu1 %v21145_v43  ;;  %v21293_v43 = vld [vmem:[#allocation12 + $0x98] ss:$24 sps:$4 sm:$0xff]   ;;  %v21374_v62 = vld [vmem:[#allocation12 + $0x1c4] ss:$24 sps:$4 sm:$0xff]  }
 0x519   :  { %22273 = vst [vmem:[#allocation82_spill] sm:$0xff] %v21374_v62 }
 0x51a   :  { %8441 = vmatpush1.bf16.msra.mxu0 %v22263_v0  ;;  %v21378_v0 = vld [vmem:[#allocation12 + $0x1b8] ss:$24 sps:$4 sm:$0xff]  }
 0x51b   :  { %9154 = vmatpush1.bf16.msra.mxu1 %v21149_v1  ;;  %9166 = vmatprep.subr.bf16.mxu0 %v21243_v13  ;;  %v21297_v1 = vld [vmem:[#allocation12 + $0xa0] ss:$24 sps:$4 sm:$0xff]  }
 0x51c   :  { %9209 = vmatprep.subr.bf16.mxu1 %v21246_v55 }
 0x51d   :  { %8443 = vmatmul.mubr.bf16.vlgmr.msra.gmra.mrb[24].mxu0 %v21156_v4  ;;  %v21299_v4 = vld [vmem:[#allocation12 + $0xcc] ss:$24 sps:$4 sm:$0xff]  }
 0x51e   :  { %9156 = vmatmul.mubr.bf16.vlgmr.msra.gmra.mrb[32].mxu1 %v21251_v22  ;;  %9167 = vmatpush1.bf16.msra.mxu0 %v21253_v51 }
 0x51f   :  { %9210 = vmatpush1.bf16.msra.mxu1 %v21257_v56  ;;  %9168 = vmatprep.subr.bf16.mxu0 %v21259_v59 }
 0x520   :  { %9211 = vmatprep.subr.bf16.mxu1 %v21262_v24  ;;  %9198 = vmatprep.mubr.bf16.mxu0 %v21169_v36 }
 0x521   :  { %9241 = vmatprep.mubr.bf16.mxu1 %v21169_v36 }
 0x522   :  { %9169 = vmatpush1.bf16.msra.mxu0 %v21267_v33 }
 0x523   :  { %9212 = vmatpush1.bf16.msra.mxu1 %v21271_v35  ;;  %9170 = vmatprep.subr.bf16.mxu0 %v21273_v37 }
 0x524   :  { %9213 = vmatprep.subr.bf16.mxu1 %v21276_v39 }
 0x526   :  { %9171 = vmatpush1.bf16.msra.mxu0 %v21281_v42 }
 0x527   :  { %9214 = vmatpush1.bf16.msra.mxu1 %v21285_v45  ;;  %9172 = vmatprep.subr.bf16.mxu0 %v21287_v49 }
 0x528   :  { %9215 = vmatprep.subr.bf16.mxu1 %v21290_v57 }
 0x529   :  { %v6865_v29 = vpop.permute.xlu0 %6864 }
 0x52a   :  { %v6875_v36 = vpop.permute.xlu1 %6874  ;;  %9173 = vmatpush1.bf16.msra.mxu0 %v21293_v43 }
 0x52b   :  { %9216 = vmatpush1.bf16.msra.mxu1 %v21297_v1  ;;  %9174 = vmatprep.subr.bf16.mxu0 %v21299_v4 }
 0x52c   :  { %9217 = vmatprep.subr.bf16.mxu1 %v21302_v12 }
 0x52d   :  { %v6880_v38 = vpop.permute.xlu0 %6879 }
 0x52e   :  { %v6867_v53 = vpop.permute.xlu1 %6866  ;;  %6882 = vst.msk [vmem:[#allocation2 + $0xb8] sm:$0xff] %vm2385_vm14, %v6880_v38  ;;  %9175 = vmatpush1.bf16.msra.mxu0 %v21305_v40  ;;  %v21387_v38 = vld [vmem:[#allocation12 + $0x1f4] ss:$24 sps:$4 sm:$0xff]  }
 0x52f   :  { %v6868_v19 = vsel %vm22155_vm13, %v6865_v29, %v6867_v53  ;;  %9218 = vmatpush1.bf16.msra.mxu1 %v21309_v46  ;;  %9176 = vmatprep.subr.bf16.mxu0 %v21311_v9  ;;  %v21382_v29 = vld [vmem:[#allocation12 + $0x1c0] ss:$24 sps:$4 sm:$0xff]   ;;  %22275 = vst [vmem:[#allocation59_spill] sm:$0xff] %v21387_v38 }
 0x530   :  { %6870 = vst.msk [vmem:[#allocation2 + $0x48] sm:$0xff] %vm2385_vm14, %v6868_v19  ;;  %9219 = vmatprep.subr.bf16.mxu1 %v21314_v20  ;;  %22274 = vst [vmem:[#allocation58_spill] sm:$0xff] %v21382_v29  ;;  %v21390_v53 = vld [vmem:[#allocation12 + $0x1e8] ss:$24 sps:$4 sm:$0xff]   ;;  %v21396_v19 = vld [vmem:[#allocation12 + $0x21c] ss:$24 sps:$4 sm:$0xff]  }
 0x531   :  { %v7602_v15 = vpop.f32.mrb[20].mxu1  ;;  %v6873_v21 = vpop.permute.xlu0 %6872 }
 0x532   :  { %v7603_v25 = vadd.f32 %v7602_v15, %v7016_v44  ;;  %v7604_v17 = vpop.f32.mrb[21].mxu1  ;;  %v6876_v23 = vsel %vm2403_vm15, %v6873_v21, %v6875_v36  ;;  %9177 = vmatpush1.bf16.msra.mxu0 %v21320_v32  ;;  %v21384_v36 = vld [vmem:[#allocation12 + $0x1ec] ss:$24 sps:$4 sm:$0xff]   ;;  %v21402_v15 = vld [vmem:[#allocation12 + $0x218] ss:$24 sps:$4 sm:$0xff]  }
 0x533   :  { %v7605_v16 = vadd.f32 %v7604_v17, %v7020_v30  ;;  %6878 = vst.msk [vmem:[#allocation2 + $0x80] sm:$0xff] %vm2385_vm14, %v6876_v23  ;;  %v7606_v18 = vpop.f32.mrb[22].mxu1  ;;  %9220 = vmatpush1.bf16.msra.mxu1 %v21327_v10  ;;  %9178 = vmatprep.subr.bf16.mxu0 %v21329_v28  ;;  %v21406_v21 = vld [vmem:[#allocation12 + $0x220] ss:$24 sps:$4 sm:$0xff]   ;;  %v21411_v17 = vld [vmem:[#allocation12 + $0x254] ss:$24 sps:$4 sm:$0xff]  }
 0x534   :  { %v7607_v26 = vadd.f32 %v7606_v18, %v7016_v44  ;;  %9221 = vmatprep.subr.bf16.mxu1 %v21333_v14  ;;  %v7608_v52 = vpop.f32.mrb[23].mxu1  ;;  %v21394_v44 = vld [vmem:[#allocation12 + $0x1f0] ss:$24 sps:$4 sm:$0xff]   ;;  %22278 = vst [vmem:[#allocation62_spill] sm:$0xff] %v21406_v21  ;;  %22279 = vst [vmem:[#allocation63_spill] sm:$0xff] %v21411_v17 }
 0x535   :  { %v7609_v54 = vadd.f32 %v7608_v52, %v7020_v30  ;;  %22276 = vst [vmem:[#allocation60_spill] sm:$0xff] %v21394_v44  ;;  %v21399_v30 = vld [vmem:[#allocation12 + $0x224] ss:$24 sps:$4 sm:$0xff]   ;;  %v21414_v23 = vld [vmem:[#allocation12 + $0x248] ss:$24 sps:$4 sm:$0xff]  }
 0x536   :  { %9179 = vmatpush1.bf16.msra.mxu0 %v21337_v31  ;;  %v7656_v8 = vpack.c.bf16 %v7607_v26, %v7603_v25  ;;  %22277 = vst [vmem:[#allocation61_spill] sm:$0xff] %v21399_v30  ;;  %v21408_v25 = vld [vmem:[#allocation12 + $0x24c] ss:$24 sps:$4 sm:$0xff]   ;;  %v21420_v18 = vld [vmem:[#allocation12 + $0x27c] ss:$24 sps:$4 sm:$0xff]  }
 0x537   :  { %9222 = vmatpush1.bf16.msra.mxu1 %v21342_v6  ;;  %9180 = vmatprep.subr.bf16.mxu0 %v21344_v47  ;;  %v7657_v2 = vpack.c.bf16 %v7609_v54, %v7605_v16  ;;  %v21418_v16 = vld [vmem:[#allocation12 + $0x250] ss:$24 sps:$4 sm:$0xff]   ;;  %v21423_v26 = vld [vmem:[#allocation12 + $0x284] ss:$24 sps:$4 sm:$0xff]   ;;  %v21430_v54 = vld [vmem:[#allocation12 + $0x280] ss:$24 sps:$4 sm:$0xff]  }
 0x538   :  { %7673 = vrot.lane.b32.xlu1 %v7656_v8, %s20385_s4  ;;  %9223 = vmatprep.subr.bf16.mxu1 %v21347_v50  ;;  %22280 = vst [vmem:[#allocation64_spill] sm:$0xff] %v21418_v16  ;;  %22281 = vst [vmem:[#allocation65_spill] sm:$0xff] %v21423_v26  ;;  %v21426_v52 = vld [vmem:[#allocation12 + $0x278] ss:$24 sps:$4 sm:$0xff]  }
 0x539   :  { %7682 = vst.msk [vmem:[#allocation2 + $0xf8] sm:$0xff] %vm2385_vm14, %v7657_v2  ;;  %7678 = vrot.lane.b32.xlu0 %v7656_v8, %s20392_s11  ;;  %22282 = vst [vmem:[#allocation66_spill] sm:$0xff] %v21430_v54  ;;  %v21432_v8 = vld [vmem:[#allocation12 + $0x2ac] ss:$24 sps:$4 sm:$0xff]   ;;  %v19344_v10 = vld [vmem:[#allocation12 + $0x150] ss:$24 sps:$4 sm:$0xff]  }
 0x53a   :  { %9181 = vmatpush1.bf16.msra.mxu0 %v21350_v58 }
 0x53b   :  { %9224 = vmatpush1.bf16.msra.mxu1 %v21354_v60  ;;  %9182 = vmatprep.subr.bf16.mxu0 %v21356_v63 }
 0x53c   :  { %9225 = vmatprep.subr.bf16.mxu1 %v21360_v3  ;;  %7685 = vrot.lane.b32.xlu1 %v7657_v2, %s20372_s14  ;;  %v21435_v2 = vld [vmem:[#allocation12 + $0x2b4] ss:$24 sps:$4 sm:$0xff]  }
 0x53d   :  { %22283 = vst [vmem:[#allocation67_spill] sm:$0xff] %v21435_v2 }
 0x53e   :  { %9183 = vmatpush1.bf16.msra.mxu0 %v21365_v5 }
 0x53f   :  { %9226 = vmatpush1.bf16.msra.mxu1 %v21369_v11  ;;  %9184 = vmatprep.subr.bf16.mxu0 %v21371_v27  ;;  %v19331_v11 = vld [vmem:[#allocation12 + $0x64] ss:$24 sps:$4 sm:$0xff]  }
 0x540   :  { %9227 = vmatprep.subr.bf16.mxu1 %v21374_v62  ;;  %v19328_v62 = vld [vmem:[#allocation12 + $0x34] ss:$24 sps:$4 sm:$0xff]  }
 0x542   :  { %9185 = vmatpush1.bf16.msra.mxu0 %v21378_v0 }
 0x543   :  { %9228 = vmatpush1.bf16.msra.mxu1 %v21382_v29  ;;  %9186 = vmatprep.subr.bf16.mxu0 %v21384_v36  ;;  %v21459_v29 = vld [vmem:[#allocation7 + $0x38] sm:$0xff] }
 0x544   :  { %9229 = vmatprep.subr.bf16.mxu1 %v21387_v38  ;;  %v21457_v38 = vld [vmem:[#allocation7 + $0x18] sm:$0xff] }
 0x546   :  { %9187 = vmatpush1.bf16.msra.mxu0 %v21390_v53 }
 0x547   :  { %9230 = vmatpush1.bf16.msra.mxu1 %v21394_v44  ;;  %9188 = vmatprep.subr.bf16.mxu0 %v21396_v19  ;;  %v21454_v44 = vld [vmem:[#allocation12 + $0x2e0] ss:$24 sps:$4 sm:$0xff]  }
 0x548   :  { %9231 = vmatprep.subr.bf16.mxu1 %v21399_v30  ;;  %v21447_v30 = vld [vmem:[#allocation12 + $0x2e4] ss:$24 sps:$4 sm:$0xff]   ;;  %22286 = vst [vmem:[#allocation70_spill] sm:$0xff] %v21454_v44 }
 0x549   :  { %22285 = vst [vmem:[#allocation69_spill] sm:$0xff] %v21447_v30 }
 0x54a   :  { %9189 = vmatpush1.bf16.msra.mxu0 %v21402_v15 }
 0x54b   :  { %9232 = vmatpush1.bf16.msra.mxu1 %v21406_v21  ;;  %9190 = vmatprep.subr.bf16.mxu0 %v21408_v25  ;;  %v21442_v21 = vld [vmem:[#allocation12 + $0x2b0] ss:$24 sps:$4 sm:$0xff]  }
 0x54c   :  { %9233 = vmatprep.subr.bf16.mxu1 %v21411_v17  ;;  %v21438_v17 = vld [vmem:[#allocation12 + $0x2a8] ss:$24 sps:$4 sm:$0xff]   ;;  %22284 = vst [vmem:[#allocation68_spill] sm:$0xff] %v21442_v21 }
 0x54e   :  { %9191 = vmatpush1.bf16.msra.mxu0 %v21414_v23 }
 0x54f   :  { %9234 = vmatpush1.bf16.msra.mxu1 %v21418_v16  ;;  %9192 = vmatprep.subr.bf16.mxu0 %v21420_v18  ;;  %v21444_v16 = vld [vmem:[#allocation12 + $0x2dc] ss:$24 sps:$4 sm:$0xff]  }
 0x550   :  { %9235 = vmatprep.subr.bf16.mxu1 %v21423_v26  ;;  %v21450_v26 = vld [vmem:[#allocation12 + $0x2d8] ss:$24 sps:$4 sm:$0xff]  }
 0x552   :  { %9193 = vmatpush1.bf16.msra.mxu0 %v21426_v52 }
 0x553   :  { %9236 = vmatpush1.bf16.msra.mxu1 %v21430_v54  ;;  %9194 = vmatprep.subr.bf16.mxu0 %v21432_v8  ;;  %v19325_v54 = vld [vmem:[#allocation12 + $0x4] ss:$24 sps:$4 sm:$0xff]  }
 0x554   :  { %9237 = vmatprep.subr.bf16.mxu1 %v21435_v2  ;;  %v19323_v2 = vld [vmem:[#allocation12] ss:$24 sps:$4 sm:$0xff]  }
 0x556   :  { %9195 = vmatpush1.bf16.msra.mxu0 %v21438_v17 }
 0x557   :  { %9238 = vmatpush1.bf16.msra.mxu1 %v21442_v21  ;;  %9196 = vmatprep.subr.bf16.mxu0 %v21444_v16  ;;  %v21466_v21 = vcombine.high %v21457_v38, %v21459_v29 }
 0x558   :  { %9239 = vmatprep.subr.bf16.mxu1 %v21447_v30  ;;  %v19326_v30 = vld [vmem:[#allocation12 + $0x30] ss:$24 sps:$4 sm:$0xff]  }
 0x55a   :  { %9197 = vmatpush1.bf16.msra.mxu0 %v21450_v26 }
 0x55b   :  { %9240 = vmatpush1.bf16.msra.mxu1 %v21454_v44  ;;  %9922 = vmatprep.subr.bf16.mxu0 %v19325_v54  ;;  %v19334_v54 = vld [vmem:[#allocation12 + $0x94] ss:$24 sps:$4 sm:$0xff]   ;;  %v19341_v44 = vld [vmem:[#allocation12 + $0x120] ss:$24 sps:$4 sm:$0xff]  }
 0x55c   :  { %9965 = vmatprep.subr.bf16.mxu1 %v21243_v13  ;;  %v19329_v13 = vld [vmem:[#allocation12 + $0x60] ss:$24 sps:$4 sm:$0xff]  }
 0x55d   :  { %9199 = vmatmul.mubr.bf16.vlgmr.msra.gmra.mrb[28].mxu0 %v21251_v22 }
 0x55e   :  { %9242 = vmatmul.mubr.bf16.vlgmr.msra.gmra.mrb[36].mxu1 %v21251_v22  ;;  %9923 = vmatpush1.bf16.msra.mxu0 %v19323_v2  ;;  %v19332_v22 = vld [vmem:[#allocation12 + $0x90] ss:$24 sps:$4 sm:$0xff]   ;;  %v21476_v2 = vpop.permute.xlu1 %6886 }
 0x55f   :  { %9966 = vmatpush1.bf16.msra.mxu1 %v21253_v51  ;;  %9924 = vmatprep.subr.bf16.mxu0 %v19328_v62  ;;  %22287 = vst [vmem:[#allocation71_spill] sm:$0xff] %v21476_v2  ;;  %v19337_v51 = vld [vmem:[#allocation12 + $0xc4] ss:$24 sps:$4 sm:$0xff]  }
 0x560   :  { %9967 = vmatprep.subr.bf16.mxu1 %v21259_v59  ;;  %9954 = vmatprep.mubr.bf16.mxu0 %v21466_v21  ;;  %v19335_v59 = vld [vmem:[#allocation12 + $0xc0] ss:$24 sps:$4 sm:$0xff]  }
 0x561   :  { %9997 = vmatprep.mubr.bf16.mxu1 %v21466_v21 }
 0x562   :  { %9925 = vmatpush1.bf16.msra.mxu0 %v19326_v30  ;;  %v22288_v30 = vld [vmem:[#allocation52_spill] sm:$0xff] }
 0x563   :  { %9968 = vmatpush1.bf16.msra.mxu1 %v21267_v33  ;;  %9926 = vmatprep.subr.bf16.mxu0 %v19331_v11  ;;  %v19340_v33 = vld [vmem:[#allocation12 + $0xf4] ss:$24 sps:$4 sm:$0xff]  }
 0x564   :  { %9969 = vmatprep.subr.bf16.mxu1 %v21273_v37 }
 0x566   :  { %9927 = vmatpush1.bf16.msra.mxu0 %v19329_v13  ;;  %v7024_v13 = vrot.slane %v21189_v41, %v22288_v30 }
 0x567   :  { %9970 = vmatpush1.bf16.msra.mxu1 %v21281_v42  ;;  %9928 = vmatprep.subr.bf16.mxu0 %v19334_v54  ;;  %v19338_v42 = vld [vmem:[#allocation12 + $0xf0] ss:$24 sps:$4 sm:$0xff]  }
 0x568   :  { %9971 = vmatprep.subr.bf16.mxu1 %v21287_v49  ;;  %v22289_v49 = vld [vmem:[#allocation81_spill] sm:$0xff] }
 0x569   :  { %v22290_v54 = vld [vmem:[#allocation53_spill] sm:$0xff] }
 0x56a   :  { %9929 = vmatpush1.bf16.msra.mxu0 %v19332_v22  ;;  %v7664_v11 = vpop.permute.xlu0 %7663  ;;  %v7028_v22 = vrot.slane %v21189_v41, %v22290_v54 }
 0x56b   :  { %9972 = vmatpush1.bf16.msra.mxu1 %v21293_v43  ;;  %9930 = vmatprep.subr.bf16.mxu0 %v19337_v51  ;;  %v7666_v62 = vpop.permute.xlu1 %7665  ;;  %v4987_v43 = vrot.slane %v22289_v49, %v22288_v30  ;;  %v19343_v51 = vld [vmem:[#allocation12 + $0x124] ss:$24 sps:$4 sm:$0xff]  }
 0x56c   :  { %9973 = vmatprep.subr.bf16.mxu1 %v21299_v4  ;;  %v7667_v37 = vsel %vm22155_vm13, %v7664_v11, %v7666_v62  ;;  %v4991_v11 = vrot.slane %v22289_v49, %v22290_v54  ;;  %v19346_v49 = vld [vmem:[#allocation12 + $0x154] ss:$24 sps:$4 sm:$0xff]  }
 0x56d   :  { %7669 = vst.msk [vmem:[#allocation2 + $0x50] sm:$0xff] %vm2385_vm14, %v7667_v37 }
 0x56e   :  { %9931 = vmatpush1.bf16.msra.mxu0 %v19335_v59 }
 0x56f   :  { %9974 = vmatpush1.bf16.msra.mxu1 %v21305_v40  ;;  %9932 = vmatprep.subr.bf16.mxu0 %v19340_v33 }
 0x570   :  { %v6846_v4 = vpop.f32.mrb[16].mxu0  ;;  %9975 = vmatprep.subr.bf16.mxu1 %v21311_v9 }
 0x571   :  { %v6848_v59 = vpop.f32.mrb[17].mxu0  ;;  %v7645_v62 = vpop.f32.mrb[24].mxu1  ;;  %v17471_v3 = vadd.f32 %v6846_v4, %v4987_v43 }
 0x572   :  { %v6850_v37 = vpop.f32.mrb[18].mxu0  ;;  %9933 = vmatpush1.bf16.msra.mxu0 %v19338_v42  ;;  %v7646_v2 = vadd.f32 %v7645_v62, %v7024_v13  ;;  %v7647_v40 = vpop.f32.mrb[25].mxu1  ;;  %v17472_v50 = vadd.f32 %v6848_v59, %v4991_v11 }
 0x573   :  { %v17473_v30 = vadd.f32 %v6850_v37, %v4987_v43  ;;  %9976 = vmatpush1.bf16.msra.mxu1 %v21320_v32  ;;  %v6852_v33 = vpop.f32.mrb[19].mxu0  ;;  %v7648_v41 = vadd.f32 %v7647_v40, %v7028_v22  ;;  %9934 = vmatprep.subr.bf16.mxu0 %v19343_v51  ;;  %v7649_v60 = vpop.f32.mrb[26].mxu1  ;;  %v19349_v43 = vld [vmem:[#allocation12 + $0x184] ss:$24 sps:$4 sm:$0xff]  }
 0x574   :  { %v17474_v6 = vadd.f32 %v6852_v33, %v4991_v11  ;;  %9977 = vmatprep.subr.bf16.mxu1 %v21329_v28  ;;  %v7650_v9 = vadd.f32 %v7649_v60, %v7024_v13  ;;  %v7651_v54 = vpop.f32.mrb[27].mxu1  ;;  %v19347_v28 = vld [vmem:[#allocation12 + $0x180] ss:$24 sps:$4 sm:$0xff]  }
 0x575   :  { %v6859_v14 = vpack.c.bf16 %v17473_v30, %v17471_v3  ;;  %v7652_v42 = vadd.f32 %v7651_v54, %v7028_v22  ;;  %v19359_v60 = vld [vmem:[#allocation12 + $0x240] ss:$24 sps:$4 sm:$0xff]   ;;  %v19362_v3 = vld [vmem:[#allocation12 + $0x270] ss:$24 sps:$4 sm:$0xff]  }
 0x576   :  { %v6860_v62 = vpack.c.bf16 %v17474_v6, %v17472_v50  ;;  %9935 = vmatpush1.bf16.msra.mxu0 %v19341_v44  ;;  %v7658_v4 = vpack.c.bf16 %v7650_v9, %v7646_v2  ;;  %v19352_v6 = vld [vmem:[#allocation12 + $0x1b4] ss:$24 sps:$4 sm:$0xff]   ;;  %v19356_v50 = vld [vmem:[#allocation12 + $0x210] ss:$24 sps:$4 sm:$0xff]   ;;  %v22295_v37 = vld [vmem:[#allocation56_spill] sm:$0xff] }
 0x577   :  { %9978 = vmatpush1.bf16.msra.mxu1 %v21337_v31  ;;  %6894 = vrot.lane.b32.xlu1 %v6859_v14, %s20385_s4  ;;  %v7659_v32 = vpack.c.bf16 %v7652_v42, %v7648_v41  ;;  %v19350_v31 = vld [vmem:[#allocation12 + $0x1b0] ss:$24 sps:$4 sm:$0xff]   ;;  %v22296_v40 = vld [vmem:[#allocation80_spill] sm:$0xff] }
 0x578   :  { %6888 = vrot.lane.b32.xlu0 %v6859_v14, %s20372_s14  ;;  %9936 = vmatprep.subr.bf16.mxu0 %v19346_v49  ;;  %v19355_v14 = vld [vmem:[#allocation12 + $0x1e4] ss:$24 sps:$4 sm:$0xff]   ;;  %v22293_v54 = vld [vmem:[#allocation55_spill] sm:$0xff]  ;;  %v22298_v41 = vld [vmem:[#allocation82_spill] sm:$0xff] }
 0x579   :  { %9979 = vmatprep.subr.bf16.mxu1 %v21344_v47  ;;  %v19358_v47 = vld [vmem:[#allocation12 + $0x214] ss:$24 sps:$4 sm:$0xff]   ;;  %v22297_v33 = vld [vmem:[#allocation57_spill] sm:$0xff]  ;;  %v22301_v42 = vld [vmem:[#allocation60_spill] sm:$0xff] }
 0x57a   :  { %9937 = vmatpush1.bf16.msra.mxu0 %v19344_v10  ;;  %v19353_v10 = vld [vmem:[#allocation12 + $0x1e0] ss:$24 sps:$4 sm:$0xff]   ;;  %v22299_v9 = vld [vmem:[#allocation58_spill] sm:$0xff] }
 0x57b   :  { %9980 = vmatpush1.bf16.msra.mxu1 %v21350_v58  ;;  %7693 = vrot.lane.b32.xlu1 %v7658_v4, %s20385_s4  ;;  %v19361_v58 = vld [vmem:[#allocation12 + $0x244] ss:$24 sps:$4 sm:$0xff]   ;;  %v22294_v11 = vld [vmem:[#allocation79_spill] sm:$0xff] }
 0x57c   :  { %7687 = vrot.lane.b32.xlu0 %v7658_v4, %s20372_s14  ;;  %9938 = vmatprep.subr.bf16.mxu0 %v19349_v43  ;;  %v22300_v49 = vld [vmem:[#allocation59_spill] sm:$0xff]  ;;  %v22303_v4 = vld [vmem:[#allocation62_spill] sm:$0xff]  ;;  %v22305_v43 = vld [vmem:[#allocation64_spill] sm:$0xff] }
 0x57d   :  { %9981 = vmatprep.subr.bf16.mxu1 %v21356_v63  ;;  %v19364_v63 = vld [vmem:[#allocation12 + $0x274] ss:$24 sps:$4 sm:$0xff]  }
 0x57e   :  { %9939 = vmatpush1.bf16.msra.mxu0 %v19347_v28  ;;  %v22306_v28 = vld [vmem:[#allocation65_spill] sm:$0xff] }
 0x57f   :  { %9982 = vmatpush1.bf16.msra.mxu1 %v21365_v5  ;;  %6901 = vrot.lane.b32.xlu1 %v6860_v62, %s20392_s11  ;;  %v19367_v5 = vld [vmem:[#allocation12 + $0x2a4] ss:$24 sps:$4 sm:$0xff]  }
 0x580   :  { %6896 = vrot.lane.b32.xlu0 %v6860_v62, %s20385_s4  ;;  %9940 = vmatprep.subr.bf16.mxu0 %v19352_v6  ;;  %v22302_v62 = vld [vmem:[#allocation61_spill] sm:$0xff]  ;;  %v22307_v6 = vld [vmem:[#allocation66_spill] sm:$0xff] }
 0x581   :  { %9983 = vmatprep.subr.bf16.mxu1 %v21371_v27  ;;  %v19365_v27 = vld [vmem:[#allocation12 + $0x2a0] ss:$24 sps:$4 sm:$0xff]  }
 0x582   :  { %9941 = vmatpush1.bf16.msra.mxu0 %v19350_v31  ;;  %v22308_v31 = vld [vmem:[#allocation67_spill] sm:$0xff] }
 0x583   :  { %9984 = vmatpush1.bf16.msra.mxu1 %v21378_v0  ;;  %9942 = vmatprep.subr.bf16.mxu0 %v19355_v14  ;;  %v19370_v0 = vld [vmem:[#allocation12 + $0x2d4] ss:$24 sps:$4 sm:$0xff]   ;;  %v22309_v14 = vld [vmem:[#allocation68_spill] sm:$0xff] }
 0x584   :  { %9985 = vmatprep.subr.bf16.mxu1 %v21384_v36  ;;  %7700 = vrot.lane.b32.xlu1 %v7659_v32, %s20392_s11  ;;  %v19368_v36 = vld [vmem:[#allocation12 + $0x2d0] ss:$24 sps:$4 sm:$0xff]  }
 0x585   :  { %7695 = vrot.lane.b32.xlu0 %v7659_v32, %s20385_s4  ;;  %v22304_v32 = vld [vmem:[#allocation63_spill] sm:$0xff] }
 0x586   :  { %9943 = vmatpush1.bf16.msra.mxu0 %v19353_v10  ;;  %v22310_v10 = vld [vmem:[#allocation69_spill] sm:$0xff] }
 0x587   :  { %9986 = vmatpush1.bf16.msra.mxu1 %v21390_v53  ;;  %9944 = vmatprep.subr.bf16.mxu0 %v19358_v47  ;;  %v21524_v53 = vcombine.low %v21457_v38, %v21459_v29  ;;  %v7672_v29 = vpop.permute.xlu0 %7671  ;;  %v21538_v38 = vld [vmem:[#allocation13] sm:$0x3f]  ;;  %v22311_v47 = vld [vmem:[#allocation70_spill] sm:$0xff] }
 0x588   :  { %9987 = vmatprep.subr.bf16.mxu1 %v21396_v19 }
 0x58a   :  { %9945 = vmatpush1.bf16.msra.mxu0 %v19356_v50 }
 0x58b   :  { %9988 = vmatpush1.bf16.msra.mxu1 %v21402_v15  ;;  %9946 = vmatprep.subr.bf16.mxu0 %v19361_v58 }
 0x58c   :  { %9989 = vmatprep.subr.bf16.mxu1 %v21408_v25 }
 0x58e   :  { %9947 = vmatpush1.bf16.msra.mxu0 %v19359_v60 }
 0x58f   :  { %9990 = vmatpush1.bf16.msra.mxu1 %v21414_v23  ;;  %9948 = vmatprep.subr.bf16.mxu0 %v19364_v63  ;;  %v22312_v63 = vld [vmem:[#allocation71_spill] sm:$0xff] }
 0x590   :  { %9991 = vmatprep.subr.bf16.mxu1 %v21420_v18 }
 0x592   :  { %9949 = vmatpush1.bf16.msra.mxu0 %v19362_v3 }
 0x593   :  { %9992 = vmatpush1.bf16.msra.mxu1 %v21426_v52  ;;  %9950 = vmatprep.subr.bf16.mxu0 %v19367_v5 }
 0x594   :  { %9993 = vmatprep.subr.bf16.mxu1 %v21432_v8 }
 0x596   :  { %9951 = vmatpush1.bf16.msra.mxu0 %v19365_v27  ;;  %v22313_v27 = vld [vmem:[#allocation52_spill] sm:$0xff] }
 0x597   :  { %9994 = vmatpush1.bf16.msra.mxu1 %v21438_v17  ;;  %9952 = vmatprep.subr.bf16.mxu0 %v19370_v0  ;;  %v22291_v17 = vld [vmem:[#allocation54_spill] sm:$0xff]  ;;  %v7823_v0 = vrot.slane %v21538_v38, %v22313_v27 }
 0x598   :  { %9995 = vmatprep.subr.bf16.mxu1 %v21444_v16 }
 0x59a   :  { %9953 = vmatpush1.bf16.msra.mxu0 %v19368_v36 }
 0x59b   :  { %9996 = vmatpush1.bf16.msra.mxu1 %v21450_v26  ;;  %10008 = vmatprep.subr.bf16.mxu0 %v21246_v55  ;;  %v22292_v26 = vld [vmem:[#allocation78_spill] sm:$0xff] }
 0x59d   :  { %9955 = vmatmul.mubr.bf16.vlgmr.msra.gmra.mrb[32].mxu0 %v21524_v53 }
 0x59e   :  { %9998 = vmatmul.mubr.bf16.vlgmr.msra.gmra.mrb[40].mxu1 %v21524_v53  ;;  %10009 = vmatpush1.bf16.msra.mxu0 %v21257_v56 }
 0x59f   :  { %10010 = vmatprep.subr.bf16.mxu0 %v21262_v24  ;;  %10040 = vmatprep.mubr.bf16.mxu0 %v21466_v21 }
 0x5a2   :  { %10011 = vmatpush1.bf16.msra.mxu0 %v21271_v35  ;;  %v7807_v35 = vrot.slane %v21538_v38, %v22237_v48 }
 0x5a3   :  { %10012 = vmatprep.subr.bf16.mxu0 %v21276_v39  ;;  %v7815_v39 = vrot.slane %v21538_v38, %v22264_v34 }
 0x5a6   :  { %10013 = vmatpush1.bf16.msra.mxu0 %v21285_v45  ;;  %v7819_v45 = vrot.slane %v21538_v38, %v22265_v61 }
 0x5a7   :  { %10014 = vmatprep.subr.bf16.mxu0 %v21290_v57 }
 0x5aa   :  { %v7674_v55 = vpop.permute.xlu1 %7673  ;;  %10015 = vmatpush1.bf16.msra.mxu0 %v21297_v1  ;;  %v7811_v1 = vrot.slane %v21538_v38, %v22240_v7 }
 0x5ab   :  { %v7675_v56 = vsel %vm2403_vm15, %v7672_v29, %v7674_v55  ;;  %10016 = vmatprep.subr.bf16.mxu0 %v21302_v12  ;;  %v7679_v24 = vpop.permute.xlu0 %7678  ;;  %v8601_v29 = vld [vmem:[#allocation13] sm:$0x3f] }
 0x5ac   :  { %7677 = vst.msk [vmem:[#allocation2 + $0x88] sm:$0xff] %vm2385_vm14, %v7675_v56  ;;  %7681 = vst.msk [vmem:[#allocation2 + $0xc0] sm:$0xff] %vm2385_vm14, %v7679_v24 }
 0x5ae   :  { %10017 = vmatpush1.bf16.msra.mxu0 %v21309_v46  ;;  %v7686_v50 = vpop.permute.xlu1 %7685 }
 0x5af   :  { %10018 = vmatprep.subr.bf16.mxu0 %v21314_v20 }
 0x5b0   :  { %v8358_v57 = vpop.f32.mrb[20].mxu0 }
 0x5b1   :  { %v8359_v12 = vadd.f32 %v8358_v57, %v7807_v35  ;;  %v8401_v44 = vpop.f32.mrb[28].mxu1  ;;  %v8360_v19 = vpop.f32.mrb[21].mxu0 }
 0x5b2   :  { %v8402_v15 = vadd.f32 %v8401_v44, %v7815_v39  ;;  %v8403_v21 = vpop.f32.mrb[29].mxu1  ;;  %v8362_v25 = vpop.f32.mrb[22].mxu0  ;;  %10019 = vmatpush1.bf16.msra.mxu0 %v22291_v17  ;;  %v8361_v52 = vadd.f32 %v8360_v19, %v7811_v1 }
 0x5b3   :  { %v8404_v46 = vadd.f32 %v8403_v21, %v7819_v45  ;;  %v8363_v23 = vadd.f32 %v8362_v25, %v7807_v35  ;;  %v8405_v16 = vpop.f32.mrb[30].mxu1  ;;  %v8364_v18 = vpop.f32.mrb[23].mxu0  ;;  %10020 = vmatprep.subr.bf16.mxu0 %v22292_v26  ;;  %v8606_v35 = vrot.slane %v8601_v29, %v22237_v48 }
 0x5b4   :  { %v8406_v20 = vadd.f32 %v8405_v16, %v7815_v39  ;;  %v8365_v8 = vadd.f32 %v8364_v18, %v7811_v1  ;;  %v8407_v2 = vpop.f32.mrb[31].mxu1  ;;  %v8610_v1 = vrot.slane %v8601_v29, %v22240_v7 }
 0x5b5   :  { %v8453_v30 = vpack.c.bf16 %v8363_v23, %v8359_v12  ;;  %v8408_v13 = vadd.f32 %v8407_v2, %v7819_v45 }
 0x5b6   :  { %10021 = vmatpush1.bf16.msra.mxu0 %v22293_v54  ;;  %v8455_v22 = vpack.c.bf16 %v8406_v20, %v8402_v15  ;;  %v8454_v51 = vpack.c.bf16 %v8365_v8, %v8361_v52 }
 0x5b7   :  { %8459 = vst.msk [vmem:[#allocation2 + $0x20] sm:$0xff] %vm2385_vm14, %v8453_v30  ;;  %8462 = vrot.lane.b32.xlu0 %v8453_v30, %s20372_s14  ;;  %10022 = vmatprep.subr.bf16.mxu0 %v22294_v11  ;;  %v8456_v59 = vpack.c.bf16 %v8408_v13, %v8404_v46 }
 0x5b8   :  { %8472 = vrot.lane.b32.xlu1 %v8455_v22, %s20385_s4 }
 0x5b9   :  { %8481 = vst.msk [vmem:[#allocation2 + $0x100] sm:$0xff] %vm2385_vm14, %v8456_v59 }
 0x5ba   :  { %10023 = vmatpush1.bf16.msra.mxu0 %v22295_v37 }
 0x5bb   :  { %8477 = vrot.lane.b32.xlu0 %v8455_v22, %s20392_s11  ;;  %10024 = vmatprep.subr.bf16.mxu0 %v22296_v40 }
 0x5bc   :  { %8464 = vrot.lane.b32.xlu1 %v8454_v51, %s20372_s14 }
 0x5be   :  { %10025 = vmatpush1.bf16.msra.mxu0 %v22297_v33  ;;  %v8614_v33 = vrot.slane %v8601_v29, %v22264_v34 }
 0x5bf   :  { %8470 = vrot.lane.b32.xlu0 %v8454_v51, %s20385_s4  ;;  %10026 = vmatprep.subr.bf16.mxu0 %v22298_v41  ;;  %v8622_v41 = vrot.slane %v8601_v29, %v22313_v27 }
 0x5c2   :  { %10027 = vmatpush1.bf16.msra.mxu0 %v22299_v9 }
 0x5c3   :  { %10028 = vmatprep.subr.bf16.mxu0 %v22300_v49  ;;  %8484 = vrot.lane.b32.xlu0 %v8456_v59, %s20372_s14 }
 0x5c6   :  { %10029 = vmatpush1.bf16.msra.mxu0 %v22301_v42 }
 0x5c7   :  { %10030 = vmatprep.subr.bf16.mxu0 %v22302_v62 }
 0x5ca   :  { %10031 = vmatpush1.bf16.msra.mxu0 %v22303_v4  ;;  %v8618_v4 = vrot.slane %v8601_v29, %v22265_v61 }
 0x5cb   :  { %10032 = vmatprep.subr.bf16.mxu0 %v22304_v32 }
 0x5ce   :  { %10033 = vmatpush1.bf16.msra.mxu0 %v22305_v43 }
 0x5cf   :  { %10034 = vmatprep.subr.bf16.mxu0 %v22306_v28 }
 0x5d2   :  { %10035 = vmatpush1.bf16.msra.mxu0 %v22307_v6 }
 0x5d3   :  { %10036 = vmatprep.subr.bf16.mxu0 %v22308_v31 }
 0x5d6   :  { %10037 = vmatpush1.bf16.msra.mxu0 %v22309_v14 }
 0x5d7   :  { %10038 = vmatprep.subr.bf16.mxu0 %v22310_v10 }
 0x5da   :  { %10039 = vmatpush1.bf16.msra.mxu0 %v22311_v47 }
 0x5dd   :  { %10041 = vmatmul.mubr.bf16.vlgmr.msra.gmra.mrb[36].mxu0 %v21524_v53  ;;  %v22314_v53 = vld [vmem:[#allocation53_spill] sm:$0xff] }
 0x5de   :  { %v7827_v24 = vrot.slane %v21538_v38, %v22314_v53  ;;  %v8626_v49 = vrot.slane %v8601_v29, %v22314_v53 }
 0x5e9   :  { %v6895_v58 = vpop.permute.xlu1 %6894 }
 0x5ea   :  { %v6889_v60 = vpop.permute.xlu0 %6888 }
 0x5eb   :  { %v6890_v3 = vsel %vm22155_vm13, %v22312_v63, %v6889_v60 }
 0x5ec   :  { %6892 = vst.msk [vmem:[#allocation2 + $0x128] sm:$0xff] %vm2385_vm14, %v6890_v3 }
 0x5ed   :  { %v7694_v5 = vpop.permute.xlu1 %7693 }
 0x5ee   :  { %v7688_v36 = vpop.permute.xlu0 %7687 }
 0x5ef   :  { %v7689_v55 = vsel %vm22155_vm13, %v7686_v50, %v7688_v36 }
 0x5f0   :  { %7691 = vst.msk [vmem:[#allocation2 + $0x130] sm:$0xff] %vm2385_vm14, %v7689_v55  ;;  %v8444_v56 = vpop.f32.mrb[24].mxu0 }
 0x5f1   :  { %v8445_v39 = vadd.f32 %v8444_v56, %v7823_v0  ;;  %v8446_v45 = vpop.f32.mrb[25].mxu0  ;;  %v6902_v57 = vpop.permute.xlu1 %6901 }
 0x5f2   :  { %6904 = vst.msk [vmem:[#allocation2 + $0x198] sm:$0xff] %vm2385_vm14, %v6902_v57  ;;  %v6897_v12 = vpop.permute.xlu0 %6896  ;;  %v8448_v44 = vpop.f32.mrb[26].mxu0  ;;  %v8447_v17 = vadd.f32 %v8446_v45, %v7827_v24  ;;  %v9400_v57 = vld [vmem:[#allocation13] sm:$0x3f] }
 0x5f3   :  { %v6898_v19 = vsel %vm2403_vm15, %v6895_v58, %v6897_v12  ;;  %v8449_v15 = vadd.f32 %v8448_v44, %v7823_v0  ;;  %v8450_v21 = vpop.f32.mrb[27].mxu0  ;;  %v9157_v25 = vpop.f32.mrb[32].mxu1 }
 0x5f4   :  { %6900 = vst.msk [vmem:[#allocation2 + $0x160] sm:$0xff] %vm2385_vm14, %v6898_v19  ;;  %v8451_v38 = vadd.f32 %v8450_v21, %v7827_v24  ;;  %v9158_v46 = vadd.f32 %v9157_v25, %v8606_v35  ;;  %v9159_v23 = vpop.f32.mrb[33].mxu1  ;;  %v9405_v19 = vrot.slane %v9400_v57, %v22237_v48  ;;  %v9417_v25 = vrot.slane %v9400_v57, %v22265_v61 }
 0x5f5   :  { %v8457_v16 = vpack.c.bf16 %v8449_v15, %v8445_v39  ;;  %v9160_v18 = vadd.f32 %v9159_v23, %v8610_v1  ;;  %v9161_v26 = vpop.f32.mrb[34].mxu1  ;;  %v9413_v15 = vrot.slane %v9400_v57, %v22264_v34 }
 0x5f6   :  { %v9162_v52 = vadd.f32 %v9161_v26, %v8606_v35  ;;  %v9163_v20 = vpop.f32.mrb[35].mxu1  ;;  %v8458_v8 = vpack.c.bf16 %v8451_v38, %v8447_v17  ;;  %v7701_v2 = vpop.permute.xlu1 %7700 }
 0x5f7   :  { %8486 = vrot.lane.b32.xlu1 %v8457_v16, %s20372_s14  ;;  %8492 = vrot.lane.b32.xlu0 %v8457_v16, %s20385_s4  ;;  %v9164_v30 = vadd.f32 %v9163_v20, %v8610_v1  ;;  %7703 = vst.msk [vmem:[#allocation2 + $0x1a0] sm:$0xff] %vm2385_vm14, %v7701_v2  ;;  %v7696_v13 = vpop.permute.xlu0 %7695 }
 0x5f8   :  { %v7697_v54 = vsel %vm2403_vm15, %v7694_v5, %v7696_v13  ;;  %v9252_v22 = vpack.c.bf16 %v9162_v52, %v9158_v46  ;;  %v9409_v46 = vrot.slane %v9400_v57, %v22240_v7 }
 0x5f9   :  { %v9253_v51 = vpack.c.bf16 %v9164_v30, %v9160_v18  ;;  %7699 = vst.msk [vmem:[#allocation2 + $0x168] sm:$0xff] %vm2385_vm14, %v7697_v54 }
 0x5fa   :  { %9258 = vst.msk [vmem:[#allocation2 + $0x28] sm:$0xff] %vm2385_vm14, %v9252_v22 }
 0x5fb   :  { %8494 = vrot.lane.b32.xlu1 %v8458_v8, %s20385_s4  ;;  %9261 = vrot.lane.b32.xlu0 %v9252_v22, %s20372_s14 }
 0x5ff   :  { %9263 = vrot.lane.b32.xlu1 %v9253_v51, %s20372_s14  ;;  %9269 = vrot.lane.b32.xlu0 %v9253_v51, %s20385_s4 }
 0x603   :  { %8499 = vrot.lane.b32.xlu1 %v8458_v8, %s20392_s11 }
 0x629   :  { %v8463_v11 = vpop.permute.xlu0 %8462 }
 0x62a   :  { %v8473_v59 = vpop.permute.xlu1 %8472 }
 0x62d   :  { %v8478_v37 = vpop.permute.xlu0 %8477 }
 0x62e   :  { %v8465_v40 = vpop.permute.xlu1 %8464  ;;  %8480 = vst.msk [vmem:[#allocation2 + $0xc8] sm:$0xff] %vm2385_vm14, %v8478_v37 }
 0x62f   :  { %v8466_v9 = vsel %vm22155_vm13, %v8463_v11, %v8465_v40 }
 0x630   :  { %8468 = vst.msk [vmem:[#allocation2 + $0x58] sm:$0xff] %vm2385_vm14, %v8466_v9  ;;  %v9200_v42 = vpop.f32.mrb[28].mxu0 }
 0x631   :  { %v9243_v62 = vpop.f32.mrb[36].mxu1  ;;  %v9202_v32 = vpop.f32.mrb[29].mxu0  ;;  %v9201_v43 = vadd.f32 %v9200_v42, %v8614_v33 }
 0x632   :  { %v9244_v28 = vadd.f32 %v9243_v62, %v8622_v41  ;;  %v9245_v6 = vpop.f32.mrb[37].mxu1  ;;  %v8471_v31 = vpop.permute.xlu0 %8470  ;;  %v9203_v5 = vadd.f32 %v9202_v32, %v8618_v4  ;;  %v9421_v62 = vrot.slane %v9400_v57, %v22313_v27 }
 0x633   :  { %v9246_v14 = vadd.f32 %v9245_v6, %v8626_v49  ;;  %v8474_v10 = vsel %vm2403_vm15, %v8471_v31, %v8473_v59  ;;  %v9204_v47 = vpop.f32.mrb[30].mxu0  ;;  %v9247_v50 = vpop.f32.mrb[38].mxu1 }
 0x634   :  { %8476 = vst.msk [vmem:[#allocation2 + $0x90] sm:$0xff] %vm2385_vm14, %v8474_v10  ;;  %v9205_v58 = vadd.f32 %v9204_v47, %v8614_v33  ;;  %v9248_v60 = vadd.f32 %v9247_v50, %v8622_v41  ;;  %v9206_v63 = vpop.f32.mrb[31].mxu0  ;;  %v9249_v3 = vpop.f32.mrb[39].mxu1 }
 0x635   :  { %v9207_v0 = vadd.f32 %v9206_v63, %v8618_v4  ;;  %v9250_v36 = vadd.f32 %v9249_v3, %v8626_v49 }
 0x636   :  { %v9254_v29 = vpack.c.bf16 %v9205_v58, %v9201_v43  ;;  %v9256_v55 = vpack.c.bf16 %v9248_v60, %v9244_v28  ;;  %v8485_v35 = vpop.permute.xlu0 %8484  ;;  %v9425_v43 = vrot.slane %v9400_v57, %v22314_v53 }
 0x637   :  { %v9255_v56 = vpack.c.bf16 %v9207_v0, %v9203_v5  ;;  %v9257_v24 = vpack.c.bf16 %v9250_v36, %v9246_v14 }
 0x638   :  { %9271 = vrot.lane.b32.xlu1 %v9254_v29, %s20385_s4  ;;  %9291 = vrot.lane.b32.xlu0 %v9256_v55, %s20385_s4 }
 0x639   :  { %9280 = vst.msk [vmem:[#allocation2 + $0x108] sm:$0xff] %vm2385_vm14, %v9255_v56 }
 0x63c   :  { %9276 = vrot.lane.b32.xlu0 %v9254_v29, %s20392_s11  ;;  %9285 = vrot.lane.b32.xlu1 %v9256_v55, %s20372_s14 }
 0x640   :  { %9283 = vrot.lane.b32.xlu0 %v9255_v56, %s20372_s14  ;;  %9293 = vrot.lane.b32.xlu1 %v9257_v24, %s20385_s4 }
 0x644   :  { %9298 = vrot.lane.b32.xlu1 %v9257_v24, %s20392_s11 }
 0x669   :  { %v8487_v39 = vpop.permute.xlu1 %8486  ;;  %v8493_v1 = vpop.permute.xlu0 %8492 }
 0x66a   :  { %v8488_v45 = vsel %vm22155_vm13, %v8485_v35, %v8487_v39 }
 0x66b   :  { %8490 = vst.msk [vmem:[#allocation2 + $0x138] sm:$0xff] %vm2385_vm14, %v8488_v45 }
 0x66d   :  { %v8495_v12 = vpop.permute.xlu1 %8494  ;;  %v9262_v17 = vpop.permute.xlu0 %9261 }
 0x66e   :  { %v8496_v44 = vsel %vm2403_vm15, %v8493_v1, %v8495_v12 }
 0x66f   :  { %8498 = vst.msk [vmem:[#allocation2 + $0x170] sm:$0xff] %vm2385_vm14, %v8496_v44 }
 0x670   :  { %v9956_v21 = vpop.f32.mrb[32].mxu0 }
 0x671   :  { %v9999_v38 = vpop.f32.mrb[40].mxu1  ;;  %v9958_v23 = vpop.f32.mrb[33].mxu0  ;;  %v9957_v16 = vadd.f32 %v9956_v21, %v9405_v19 }
 0x672   :  { %v10000_v18 = vadd.f32 %v9999_v38, %v9413_v15  ;;  %v10001_v26 = vpop.f32.mrb[41].mxu1  ;;  %v9264_v52 = vpop.permute.xlu1 %9263  ;;  %v9959_v61 = vadd.f32 %v9958_v23, %v9409_v46 }
 0x673   :  { %v9960_v20 = vpop.f32.mrb[34].mxu0  ;;  %v10003_v8 = vpop.f32.mrb[42].mxu1  ;;  %v9265_v48 = vsel %vm22155_vm13, %v9262_v17, %v9264_v52  ;;  %v10002_v2 = vadd.f32 %v10001_v26, %v9417_v25 }
 0x674   :  { %v9961_v34 = vadd.f32 %v9960_v20, %v9405_v19  ;;  %v10004_v30 = vadd.f32 %v10003_v8, %v9413_v15  ;;  %v9962_v13 = vpop.f32.mrb[35].mxu0  ;;  %9267 = vst.msk [vmem:[#allocation2 + $0x60] sm:$0xff] %vm2385_vm14, %v9265_v48  ;;  %v10005_v22 = vpop.f32.mrb[43].mxu1 }
 0x675   :  { %v9963_v54 = vadd.f32 %v9962_v13, %v9409_v46  ;;  %v10006_v59 = vadd.f32 %v10005_v22, %v9417_v25  ;;  %v9270_v33 = vpop.permute.xlu0 %9269 }
 0x676   :  { %v8500_v51 = vpop.permute.xlu1 %8499  ;;  %v10053_v7 = vpack.c.bf16 %v10004_v30, %v10000_v18  ;;  %v10051_v11 = vpack.c.bf16 %v9961_v34, %v9957_v16 }
 0x677   :  { %8502 = vst.msk [vmem:[#allocation2 + $0x1a8] sm:$0xff] %vm2385_vm14, %v8500_v51  ;;  %v10052_v37 = vpack.c.bf16 %v9963_v54, %v9959_v61  ;;  %v10054_v40 = vpack.c.bf16 %v10006_v59, %v10002_v2 }
 0x678   :  { %10070 = vrot.lane.b32.xlu1 %v10053_v7, %s20385_s4  ;;  %10057 = vst.msk [vmem:[#allocation2 + $0x30] sm:$0xff] %vm2385_vm14, %v10051_v11  ;;  %10060 = vrot.lane.b32.xlu0 %v10051_v11, %s20372_s14 }
 0x679   :  { %10079 = vst.msk [vmem:[#allocation2 + $0x110] sm:$0xff] %vm2385_vm14, %v10054_v40 }
 0x67c   :  { %10062 = vrot.lane.b32.xlu1 %v10052_v37, %s20372_s14  ;;  %10068 = vrot.lane.b32.xlu0 %v10052_v37, %s20385_s4 }
 0x680   :  { %10082 = vrot.lane.b32.xlu0 %v10054_v40, %s20372_s14 }
 0x6aa   :  { %v9272_v41 = vpop.permute.xlu1 %9271  ;;  %v9292_v9 = vpop.permute.xlu0 %9291 }
 0x6ab   :  { %v9273_v49 = vsel %vm2403_vm15, %v9270_v33, %v9272_v41 }
 0x6ac   :  { %9275 = vst.msk [vmem:[#allocation2 + $0x98] sm:$0xff] %vm2385_vm14, %v9273_v49 }
 0x6ae   :  { %v9277_v42 = vpop.permute.xlu0 %9276  ;;  %v9286_v4 = vpop.permute.xlu1 %9285 }
 0x6af   :  { %9279 = vst.msk [vmem:[#allocation2 + $0xd0] sm:$0xff] %vm2385_vm14, %v9277_v42 }
 0x6b0   :  { %v10042_v32 = vpop.f32.mrb[36].mxu0 }
 0x6b1   :  { %v10044_v28 = vpop.f32.mrb[37].mxu0  ;;  %v10043_v14 = vadd.f32 %v10042_v32, %v9421_v62 }
 0x6b2   :  { %v9284_v6 = vpop.permute.xlu0 %9283  ;;  %v10046_v31 = vpop.f32.mrb[38].mxu0  ;;  %v10045_v60 = vadd.f32 %v10044_v28, %v9425_v43 }
 0x6b3   :  { %v9287_v10 = vsel %vm22155_vm13, %v9284_v6, %v9286_v4  ;;  %v10047_v47 = vadd.f32 %v10046_v31, %v9421_v62  ;;  %v10048_v50 = vpop.f32.mrb[39].mxu0  ;;  %v9294_v58 = vpop.permute.xlu1 %9293 }
 0x6b4   :  { %9289 = vst.msk [vmem:[#allocation2 + $0x140] sm:$0xff] %vm2385_vm14, %v9287_v10  ;;  %v10049_v63 = vadd.f32 %v10048_v50, %v9425_v43  ;;  %v9295_v3 = vsel %vm2403_vm15, %v9292_v9, %v9294_v58 }
 0x6b5   :  { %v10055_v27 = vpack.c.bf16 %v10047_v47, %v10043_v14  ;;  %9297 = vst.msk [vmem:[#allocation2 + $0x178] sm:$0xff] %vm2385_vm14, %v9295_v3 }
 0x6b6   :  { %v10056_v5 = vpack.c.bf16 %v10049_v63, %v10045_v60 }
 0x6b7   :  { %10084 = vrot.lane.b32.xlu1 %v10055_v27, %s20372_s14  ;;  %10090 = vrot.lane.b32.xlu0 %v10055_v27, %s20385_s4  ;;  %v9299_v53 = vpop.permute.xlu1 %9298  ;;  %s21669_s14 = smov 0  }
 0x6b8   :  { %9301 = vst.msk [vmem:[#allocation2 + $0x1b0] sm:$0xff] %vm2385_vm14, %v9299_v53 }
 0x6bb   :  { %10092 = vrot.lane.b32.xlu1 %v10056_v5, %s20385_s4  ;;  %10075 = vrot.lane.b32.xlu0 %v10053_v7, %s20392_s11 }
 0x6bf   :  { %10097 = vrot.lane.b32.xlu1 %v10056_v5, %s20392_s11 }
 0x6ea   :  { %v10071_v0 = vpop.permute.xlu1 %10070  ;;  %v10061_v36 = vpop.permute.xlu0 %10060 }
 0x6ee   :  { %v10063_v29 = vpop.permute.xlu1 %10062  ;;  %v10069_v55 = vpop.permute.xlu0 %10068 }
 0x6ef   :  { %v10064_v56 = vsel %vm22155_vm13, %v10061_v36, %v10063_v29  ;;  %v10072_v24 = vsel %vm2403_vm15, %v10069_v55, %v10071_v0 }
 0x6f0   :  { %10066 = vst.msk [vmem:[#allocation2 + $0x68] sm:$0xff] %vm2385_vm14, %v10064_v56  ;;  %10074 = vst.msk [vmem:[#allocation2 + $0xa0] sm:$0xff] %vm2385_vm14, %v10072_v24 }
 0x6f2   :  { %v10083_v35 = vpop.permute.xlu0 %10082 }
 0x729   :  { %v10085_v39 = vpop.permute.xlu1 %10084  ;;  %v10091_v45 = vpop.permute.xlu0 %10090 }
 0x72a   :  { %v10086_v57 = vsel %vm22155_vm13, %v10083_v35, %v10085_v39 }
 0x72b   :  { %10088 = vst.msk [vmem:[#allocation2 + $0x148] sm:$0xff] %vm2385_vm14, %v10086_v57 }
 0x72d   :  { %v10093_v1 = vpop.permute.xlu1 %10092  ;;  %v10076_v12 = vpop.permute.xlu0 %10075 }
 0x72e   :  { %v10094_v44 = vsel %vm2403_vm15, %v10091_v45, %v10093_v1  ;;  %10078 = vst.msk [vmem:[#allocation2 + $0xd8] sm:$0xff] %vm2385_vm14, %v10076_v12 }
 0x72f   :  { %10096 = vst.msk [vmem:[#allocation2 + $0x180] sm:$0xff] %vm2385_vm14, %v10094_v44 }
 0x731   :  { %v10098_v19 = vpop.permute.xlu1 %10097 }
 0x732   :  { %10100 = vst.msk [vmem:[#allocation2 + $0x1b8] sm:$0xff] %vm2385_vm14, %v10098_v19 }
 0x733 LB: > { %v20393_v15 = vmov 0.0   ;;  %s16986_s4 = smul.u32 56, %s20368_s14  ;;  %s20394_s26 = smov 96   ;;  %vm20395_vm14 = vmmov 0   ;;  %vm22315_vm13 = vcmask 261120   ;;  %v22316_v41 = vld [vmem:[#allocation34_spill] sm:$0xff]  ;;  %s20368_s14 = sphi %s21669_s14, %s10173_s14  }
 0x734   : > { %17163 = vmatprep.subr.bf16.mxu0 %v20393_v15  ;;  %17547 = vmatprep.subr.bf16.mxu1 %v20393_v15  ;;  %s20396_s28 = smov 64   ;;  %vm22317_vm0 = vnez %v22316_v41  ;;  %vm10379_vm15 = vcmask 916480   ;;  %v22330_v36 = vld [vmem:[#allocation47_spill] sm:$0xff]  ;;  %s16987_s1 = sshll.u32 %s20368_s14, 4 }
 0x735   : > { %s10176_s18 = scalar_lea.vmem [#allocation2], %s16986_s4  ;;  %17177 = vmatprep.mubr.msk.bf16.mxu0 %vm20395_vm14, %v20393_v15  ;;  %17223 = vmatprep.mubr.msk.bf16.mxu1 %vm20395_vm14, %v20393_v15  ;;  %s21828_s7 = scalar_lea.vmem [#allocation15], %s16987_s1 }
 0x736   : > { %s10173_s14 = sadd.s32 1, %s20368_s14  }
 0x737   : > { %p10170_p12 = scmp.ge.s32.totalorder %s10173_s14, 8  }
 0x738   :  { %s20400_s25 = smov (%p10170_p12), [#allocation24]  }
 0x739   : > { %v10177_v21 = vld [vmem:[%s10176_s18] sm:$0xff]  ;;  %v10179_v25 = vld [vmem:[%s10176_s18 + $0x10] sm:$0xff]  ;;  %v10178_v17 = vld [vmem:[%s10176_s18 + $0x8] sm:$0xff]  ;;  %s15209_s22 = sshll.u32 (%p10170_p12), %s20400_s25, 4  ;;  %s15210_s22 = int_to_ptr.vmem [resolvable:$true] %s15209_s22 }
 0x73a   : > { %10191 = vrot.lane.b32.xlu0 %v10177_v21, %s20394_s26  ;;  %10195 = vrot.lane.b32.xlu1 %v10179_v25, %s20394_s26  ;;  %v10180_v38 = vld [vmem:[%s10176_s18 + $0x18] sm:$0xff]  ;;  %v10181_v46 = vld [vmem:[%s10176_s18 + $0x20] sm:$0xff]  ;;  %s20324_s30 = scalar_lea.vmem (%p10170_p12), %s15210_s22, 256  ;;  %p20329_p0 = scmp.lt.s32.totalorder (%p10170_p12), %s15210_s22, %s15210_s22 }
 0x73b   : > { %v21677_v23 = vld [vmem:[%s10176_s18 + $0x28] sm:$0xff]  ;;  %v21680_v16 = vld [vmem:[%s10176_s18 + $0x30] sm:$0xff]  ;;  %p20325_p13 = scmp.ne.s32.totalorder (%p10170_p12), %s15210_s22, %s20324_s30  ;;  %p20330_p1 = scmp.lt.s32.totalorder (%p10170_p12), %s20324_s30, %s20324_s30 }
 0x73d   :  { %p20331_p2 = por (%p10170_p12), %p20330_p1, %p20329_p0 }
 0x73e   : > { %10193 = vrot.lane.b32.xlu0 %v10178_v17, %s20394_s26  ;;  %10197 = vrot.lane.b32.xlu1 %v10180_v38, %s20394_s26 }
 0x73f   :  { %p20332_p3 = pnand (%p10170_p12), %p20331_p2, %p20325_p13 }
 0x742   : > { %10199 = vrot.lane.b32.xlu0 %v10181_v46, %s20394_s26  ;;  %10201 = vrot.lane.b32.xlu1 %v21677_v23, %s20394_s26 }
 0x746   : > { %10203 = vrot.lane.b32.xlu0 %v21680_v16, %s20394_s26  ;;  %10459 = vrot.lane.b32.xlu1 %v10178_v17, %s20396_s28 }
 0x74a   : > { %10457 = vrot.lane.b32.xlu0 %v10177_v21, %s20396_s28  ;;  %10463 = vrot.lane.b32.xlu1 %v10180_v38, %s20396_s28 }
 0x74e   : > { %10461 = vrot.lane.b32.xlu0 %v10179_v25, %s20396_s28 }
 0x752   : > { %10465 = vrot.lane.b32.xlu0 %v10181_v46, %s20396_s28 }
 0x7ac   : > { %v10192_v18 = vpop.permute.xlu0 %10191  ;;  %v10196_v8 = vpop.permute.xlu1 %10195 }
 0x7ad   : > { %v10228_v26 = vsel %vm22315_vm13, %v10192_v18, 0  ;;  %v10234_v48 = vsel %vm22315_vm13, %v10196_v8, 0 }
 0x7ae   : > { %17164 = vmatpush3.bf16.xpose.msra.mxu0 %v10228_v26 }
 0x7af   : > { %17165 = vmatprep.subr.bf16.mxu0 %v20393_v15 }
 0x7b0   : > { %v10194_v52 = vpop.permute.xlu0 %10193  ;;  %v10198_v2 = vpop.permute.xlu1 %10197 }
 0x7b1   : > { %v10231_v20 = vsel %vm22315_vm13, %v10194_v52, 0  ;;  %v10237_v34 = vsel %vm22315_vm13, %v10198_v2, 0 }
 0x7b4   : > { %v10200_v30 = vpop.permute.xlu0 %10199  ;;  %v10202_v61 = vpop.permute.xlu1 %10201 }
 0x7b5   : > { %v10240_v13 = vsel %vm22315_vm13, %v10200_v30, 0  ;;  %v10243_v54 = vsel %vm22315_vm13, %v10202_v61, 0 }
 0x7b6   : > { %17166 = vmatpush3.bf16.xpose.msra.mxu0 %v10231_v20 }
 0x7b7   : > { %17167 = vmatprep.subr.bf16.mxu0 %v20393_v15 }
 0x7b8   : > { %v10204_v22 = vpop.permute.xlu0 %10203  ;;  %v10460_v11 = vpop.permute.xlu1 %10459 }
 0x7b9   : > { %v10246_v51 = vsel %vm22315_vm13, %v10204_v22, 0 }
 0x7bc   : > { %v10458_v7 = vpop.permute.xlu0 %10457  ;;  %v10464_v37 = vpop.permute.xlu1 %10463 }
 0x7bd   : > { %17554 = vmatpush3.bf16.msra.mxu1 %v10458_v7 }
 0x7be   : > { %17168 = vmatpush3.bf16.xpose.msra.mxu0 %v10234_v48  ;;  %17548 = vmatprep.subr.bf16.mxu1 %v20393_v15 }
 0x7bf   : > { %17169 = vmatprep.subr.bf16.mxu0 %v20393_v15 }
 0x7c0   : > { %v10462_v59 = vpop.permute.xlu0 %10461 }
 0x7c1   : > { %17555 = vmatpush3.bf16.msra.mxu1 %v10460_v11 }
 0x7c2   : > { %17549 = vmatprep.subr.bf16.mxu1 %v20393_v15 }
 0x7c4   : > { %v10466_v40 = vpop.permute.xlu0 %10465 }
 0x7c5   : > { %17556 = vmatpush3.bf16.msra.mxu1 %v10462_v59 }
 0x7c6   : > { %17170 = vmatpush3.bf16.xpose.msra.mxu0 %v10237_v34  ;;  %17550 = vmatprep.subr.bf16.mxu1 %v20393_v15 }
 0x7c7   : > { %17171 = vmatprep.subr.bf16.mxu0 %v20393_v15 }
 0x7c9   : > { %17557 = vmatpush3.bf16.msra.mxu1 %v10464_v37 }
 0x7ca   : > { %17551 = vmatprep.subr.bf16.mxu1 %v20393_v15 }
 0x7cd   : > { %17558 = vmatpush3.bf16.msra.mxu1 %v10466_v40 }
 0x7ce   : > { %17172 = vmatpush3.bf16.xpose.msra.mxu0 %v10240_v13  ;;  %17552 = vmatprep.subr.bf16.mxu1 %v20393_v15 }
 0x7cf   : > { %17173 = vmatprep.subr.bf16.mxu0 %v20393_v15 }
 0x7d6   : > { %17174 = vmatpush3.bf16.xpose.msra.mxu0 %v10243_v54 }
 0x7d7   : > { %17175 = vmatprep.subr.bf16.mxu0 %v20393_v15 }
 0x7de   : > { %17176 = vmatpush3.bf16.xpose.msra.mxu0 %v10246_v51 }
 0x7df   : > { %17205 = vmatprep.subr.bf16.mxu0 %v20393_v15 }
 0x7e5   : > { %17178 = vmatmul.mubr.msk.bf16.vlgmr.msra.gmra.mrb[0].mxu0 %vm22315_vm13, %v10177_v21 }
 0x7e6   : > { %17181 = vmatprep.mubr.msk.bf16.mxu0 %vm20395_vm14, %v20393_v15  ;;  %17206 = vmatpush3.bf16.msra.mxu0 %v10458_v7 }
 0x7e7   : > { %17207 = vmatprep.subr.bf16.mxu0 %v20393_v15 }
 0x7ea   : > { %17208 = vmatpush3.bf16.msra.mxu0 %v10460_v11 }
 0x7eb   : > { %17209 = vmatprep.subr.bf16.mxu0 %v20393_v15 }
 0x7ed   : > { %17182 = vmatmul.mubr.msk.bf16.gmra.mrb[4].mxu0 %vm22315_vm13, %v10178_v17 }
 0x7ee   : > { %17185 = vmatprep.mubr.msk.bf16.mxu0 %vm20395_vm14, %v20393_v15  ;;  %17210 = vmatpush3.bf16.msra.mxu0 %v10462_v59 }
 0x7ef   : > { %17211 = vmatprep.subr.bf16.mxu0 %v20393_v15 }
 0x7f2   : > { %17212 = vmatpush3.bf16.msra.mxu0 %v10464_v37 }
 0x7f3   : > { %17213 = vmatprep.subr.bf16.mxu0 %v20393_v15 }
 0x7f5   : > { %17186 = vmatmul.mubr.msk.bf16.gmra.mrb[8].mxu0 %vm22315_vm13, %v10179_v25 }
 0x7f6   : > { %17189 = vmatprep.mubr.msk.bf16.mxu0 %vm20395_vm14, %v20393_v15  ;;  %17214 = vmatpush3.bf16.msra.mxu0 %v10466_v40 }
 0x7f7   : > { %17215 = vmatprep.subr.bf16.mxu0 %v20393_v15 }
 0x7fd   : > { %17190 = vmatmul.mubr.msk.bf16.gmra.mrb[12].mxu0 %vm22315_vm13, %v10180_v38 }
 0x7fe   : > { %17193 = vmatprep.mubr.msk.bf16.mxu0 %vm20395_vm14, %v20393_v15 }
 0x805   : > { %17194 = vmatmul.mubr.msk.bf16.gmra.mrb[16].mxu0 %vm22315_vm13, %v10181_v46 }
 0x806   : > { %17197 = vmatprep.mubr.msk.bf16.mxu0 %vm20395_vm14, %v20393_v15 }
 0x80d   : > { %17198 = vmatmul.mubr.msk.bf16.gmra.mrb[20].mxu0 %vm22315_vm13, %v21677_v23 }
 0x80e   : > { %17201 = vmatprep.mubr.msk.bf16.mxu0 %vm20395_vm14, %v20393_v15 }
 0x815   : > { %17202 = vmatmul.mubr.msk.bf16.gmra.mrb[24].mxu0 %vm22315_vm13, %v21680_v16  ;;  %vm22331_vm13 = vnez %v22330_v36 }
 0x816   : > { %17219 = vmatprep.mubr.msk.bf16.mxu0 %vm20395_vm14, %v20393_v15 }
 0x8b8   : > { %v10282_v33 = vpop.f32.mrb[0].mxu0 }
 0x8b9   : > { %v10337_v9 = vsel %vm22317_vm0, %v10282_v33, -1e+30  ;;  %v17179_v49 = vpop.f32.mrb[1].mxu0 }
 0x8ba   : > { %v10351_v42 = vmul.f32 1.442695, %v10337_v9  ;;  %v10285_v62 = vpop.f32.mrb[2].mxu0 }
 0x8bb   : > { %v10338_v32 = vsel %vm20639_vm1, %v10285_v62, -1e+30  ;;  %v17180_v43 = vpop.f32.mrb[3].mxu0  ;;  %vm20399_vm1 = vmmov (%p10170_p12), 0  }
 0x8bc   : > { %19388 = vpow2.f32 %v10351_v42  ;;  %v10353_v28 = vmul.f32 1.442695, %v10338_v32 }
 0x8be   : > { %19390 = vpow2.f32 %v10353_v28 }
 0x8c0   : > { %v10290_v6 = vpop.f32.mrb[4].mxu0 }
 0x8c1   : > { %v10339_v14 = vsel %vm20643_vm2, %v10290_v6, -1e+30  ;;  %v17183_v10 = vpop.f32.mrb[5].mxu0 }
 0x8c2   : > { %v10355_v47 = vmul.f32 1.442695, %v10339_v14  ;;  %v10293_v50 = vpop.f32.mrb[6].mxu0 }
 0x8c3   : > { %v10340_v60 = vsel %vm20647_vm3, %v10293_v50, -1e+30  ;;  %v17184_v63 = vpop.f32.mrb[7].mxu0 }
 0x8c4   : > { %19392 = vpow2.f32 %v10355_v47  ;;  %v10357_v3 = vmul.f32 1.442695, %v10340_v60 }
 0x8c6   : > { %v21747_v27 = vpop.eup %19388  ;;  %19394 = vpow2.f32 %v10357_v3 }
 0x8c7   : > { %v10380_v5 = vsel %vm10379_vm15, %v21747_v27, 0.0 }
 0x8c8   : > { %v21751_v53 = vpop.eup %19390  ;;  %10381 = vadd.xlane.f32.xlu1 %v10380_v5  ;;  %v10298_v0 = vpop.f32.mrb[8].mxu0 }
 0x8c9   : > { %v10341_v29 = vsel %vm20651_vm4, %v10298_v0, -1e+30  ;;  %v17187_v55 = vpop.f32.mrb[9].mxu0  ;;  %v10383_v56 = vsel %vm10379_vm15, %v21751_v53, 0.0 }
 0x8ca   : > { %v10359_v24 = vmul.f32 1.442695, %v10341_v29  ;;  %10384 = vadd.xlane.f32.xlu0 %v10383_v56  ;;  %v10301_v35 = vpop.f32.mrb[10].mxu0 }
 0x8cb   : > { %v10342_v45 = vsel %vm20655_vm5, %v10301_v35, -1e+30  ;;  %v17188_v57 = vpop.f32.mrb[11].mxu0 }
 0x8cc   : > { %19396 = vpow2.f32 %v10359_v24  ;;  %v10361_v1 = vmul.f32 1.442695, %v10342_v45 }
 0x8ce   : > { %v21759_v12 = vpop.eup %19392  ;;  %19398 = vpow2.f32 %v10361_v1 }
 0x8cf   : > { %v10386_v44 = vsel %vm10379_vm15, %v21759_v12, 0.0 }
 0x8d0   : > { %v21763_v19 = vpop.eup %19394  ;;  %10387 = vadd.xlane.f32.xlu1 %v10386_v44  ;;  %v10306_v21 = vpop.f32.mrb[12].mxu0 }
 0x8d1   : > { %v17191_v25 = vpop.f32.mrb[13].mxu0  ;;  %v10389_v17 = vsel %vm10379_vm15, %v21763_v19, 0.0  ;;  %v10343_v49 = vsel %vm20659_vm6, %v10306_v21, -1e+30 }
 0x8d2   : > { %10390 = vadd.xlane.f32.xlu0 %v10389_v17  ;;  %v10309_v38 = vpop.f32.mrb[14].mxu0  ;;  %v10363_v4 = vmul.f32 1.442695, %v10343_v49 }
 0x8d3   : > { %v10344_v18 = vsel %vm20663_vm7, %v10309_v38, -1e+30  ;;  %v17192_v26 = vpop.f32.mrb[15].mxu0 }
 0x8d4   : > { %v10365_v52 = vmul.f32 1.442695, %v10344_v18 }
 0x8d6   : > { %v21769_v20 = vpop.eup %19396  ;;  %19400 = vpow2.f32 %v10365_v52 }
 0x8d7   : > { %v10392_v8 = vsel %vm10379_vm15, %v21769_v20, 0.0  ;;  %19402 = vpow2.f32 %v10363_v4 }
 0x8d8   : > { %v21773_v48 = vpop.eup %19398  ;;  %10393 = vadd.xlane.f32.xlu1 %v10392_v8  ;;  %v10314_v2 = vpop.f32.mrb[16].mxu0 }
 0x8d9   : > { %v10395_v34 = vsel %vm10379_vm15, %v21773_v48, 0.0  ;;  %v17195_v30 = vpop.f32.mrb[17].mxu0  ;;  %v10345_v62 = vsel %vm20667_vm8, %v10314_v2, -1e+30 }
 0x8da   : > { %10396 = vadd.xlane.f32.xlu0 %v10395_v34  ;;  %v10317_v13 = vpop.f32.mrb[18].mxu0  ;;  %v10367_v32 = vmul.f32 1.442695, %v10345_v62 }
 0x8db   : > { %v17196_v61 = vpop.f32.mrb[19].mxu0  ;;  %v10346_v28 = vsel %vm20671_vm9, %v10317_v13, -1e+30 }
 0x8dc   : > { %19404 = vpow2.f32 %v10367_v32  ;;  %v10369_v31 = vmul.f32 1.442695, %v10346_v28 }
 0x8de   : > { %19406 = vpow2.f32 %v10369_v31 }
 0x8e0   : > { %v21777_v54 = vpop.eup %19400  ;;  %v10322_v22 = vpop.f32.mrb[20].mxu0 }
 0x8e1   : > { %v10401_v51 = vsel %vm10379_vm15, %v21777_v54, 0.0  ;;  %v17199_v7 = vpop.f32.mrb[21].mxu0  ;;  %v10347_v6 = vsel %vm20675_vm10, %v10322_v22, -1e+30 }
 0x8e2   : > { %10402 = vadd.xlane.f32.xlu0 %v10401_v51  ;;  %v10325_v11 = vpop.f32.mrb[22].mxu0  ;;  %v10371_v14 = vmul.f32 1.442695, %v10347_v6 }
 0x8e3   : > { %v17200_v59 = vpop.f32.mrb[23].mxu0  ;;  %v10348_v47 = vsel %vm20679_vm11, %v10325_v11, -1e+30 }
 0x8e4   : > { %19408 = vpow2.f32 %v10371_v14  ;;  %v10373_v63 = vmul.f32 1.442695, %v10348_v47 }
 0x8e6   : > { %19410 = vpow2.f32 %v10373_v63 }
 0x8e8   : > { %v10330_v37 = vpop.f32.mrb[24].mxu0 }
 0x8e9   : > { %10467 = vrot.lane.b32.xlu1 %v21677_v23, %s20396_s28  ;;  %v17203_v40 = vpop.f32.mrb[25].mxu0  ;;  %v10349_v58 = vsel %vm20683_vm12, %v10330_v37, -1e+30  ;;  %v19386_v37 = vld [vmem:[%s21828_s7] sm:$0xff]  }
 0x8ea   : > { %v10333_v33 = vpop.f32.mrb[26].mxu0  ;;  %v10375_v5 = vmul.f32 1.442695, %v10349_v58 }
 0x8eb   : > { %v17204_v41 = vpop.f32.mrb[27].mxu0  ;;  %v10350_v29 = vsel %vm22331_vm13, %v10333_v33, -1e+30  ;;  %vm22332_vm13 = vcmask 261120  }
 0x8ec   : > { %19412 = vpow2.f32 %v10375_v5  ;;  %v10377_v24 = vmul.f32 1.442695, %v10350_v29  ;;  %vm22334_vm0 = vmmov %vm22332_vm13 }
 0x8ee   : > { %19414 = vpow2.f32 %v10377_v24 }
 0x8f8   : > { %10469 = vrot.lane.b32.xlu0 %v21680_v16, %s20396_s28  ;;  %v21795_v16 = vpop.eup %19402 }
 0x8f9   : > { %v21799_v60 = vpop.eup %19404  ;;  %v10398_v3 = vsel %vm10379_vm15, %v21795_v16, 0.0 }
 0x8fa   : > { %v10404_v0 = vsel %vm10379_vm15, %v21799_v60, 0.0  ;;  %v21807_v55 = vpop.eup %19406 }
 0x8fb   : > { %v21809_v56 = vpop.eup %19408  ;;  %v10407_v35 = vsel %vm10379_vm15, %v21807_v55, 0.0 }
 0x8fc   : > { %v10410_v39 = vsel %vm10379_vm15, %v21809_v56, 0.0  ;;  %v21815_v45 = vpop.eup %19410 }
 0x8fd   : > { %v21817_v57 = vpop.eup %19412  ;;  %v10413_v1 = vsel %vm10379_vm15, %v21815_v45, 0.0 }
 0x8fe   : > { %v10416_v44 = vsel %vm10379_vm15, %v21817_v57, 0.0  ;;  %v21823_v21 = vpop.eup %19414 }
 0x8ff   : > { %v10419_v25 = vsel %vm10379_vm15, %v21823_v21, 0.0 }
 0x90d   : > { %10399 = vadd.xlane.f32.xlu1 %v10398_v3 }
 0x911   : > { %10405 = vadd.xlane.f32.xlu1 %v10404_v0 }
 0x915   : > { %10408 = vadd.xlane.f32.xlu1 %v10407_v35 }
 0x919   : > { %10411 = vadd.xlane.f32.xlu1 %v10410_v39 }
 0x91d   : > { %10414 = vadd.xlane.f32.xlu1 %v10413_v1 }
 0x921   : > { %10417 = vadd.xlane.f32.xlu1 %v10416_v44 }
 0x925   : > { %10420 = vadd.xlane.f32.xlu1 %v10419_v25 }
 0x955   : > { %v10382_v17 = vpop.xlane.xlu1 %10381 }
 0x957   : > { %v10385_v38 = vpop.xlane.xlu0 %10384 }
 0x958   : > { %19416 = vrcp.f32 %v10385_v38 }
 0x95d   : > { %v10388_v46 = vpop.xlane.xlu1 %10387 }
 0x95f   : > { %v10391_v18 = vpop.xlane.xlu0 %10390 }
 0x960   : > { %19418 = vrcp.f32 %v10391_v18 }
 0x961   : > { %19420 = vrcp.f32 %v10382_v17 }
 0x962   : > { %19422 = vrcp.f32 %v10388_v46  ;;  %v19417_v2 = vpop.eup %19416 }
 0x963   : > { %v10437_v22 = vmul.f32 %v19417_v2, %v21751_v53 }
 0x965   : > { %v10394_v26 = vpop.xlane.xlu1 %10393 }
 0x967   : > { %v10397_v52 = vpop.xlane.xlu0 %10396 }
 0x968   : > { %19424 = vrcp.f32 %v10397_v52 }
 0x969   : > { %v10468_v8 = vpop.permute.xlu1 %10467  ;;  %19426 = vrcp.f32 %v10394_v26 }
 0x96a   : > { %17216 = vmatpush3.bf16.msra.mxu0 %v10468_v8  ;;  %17559 = vmatpush3.bf16.msra.mxu1 %v10468_v8  ;;  %v19419_v34 = vpop.eup %19418 }
 0x96b   : > { %17217 = vmatprep.subr.bf16.mxu0 %v20393_v15  ;;  %17553 = vmatprep.subr.bf16.mxu1 %v20393_v15  ;;  %v19421_v30 = vpop.eup %19420  ;;  %v10439_v51 = vmul.f32 %v19419_v34, %v21763_v19 }
 0x96c   : > { %v19423_v61 = vpop.eup %19422  ;;  %v10436_v7 = vmul.f32 %v19421_v30, %v21747_v27 }
 0x96d   : > { %v10438_v59 = vmul.f32 %v19423_v61, %v21759_v12 }
 0x96e   : > { %v10450_v40 = vpack.c.bf16 %v10437_v22, %v10436_v7 }
 0x96f   : > { %v10403_v13 = vpop.xlane.xlu0 %10402  ;;  %v10451_v33 = vpack.c.bf16 %v10439_v51, %v10438_v59 }
 0x970   : > { %19428 = vrcp.f32 %v10403_v13 }
 0x972   : > { %v19425_v41 = vpop.eup %19424 }
 0x973   : > { %v10470_v11 = vpop.permute.xlu0 %10469  ;;  %v19427_v53 = vpop.eup %19426  ;;  %v10441_v27 = vmul.f32 %v19425_v41, %v21773_v48 }
 0x974   : > { %17218 = vmatpush3.bf16.msra.mxu0 %v10470_v11  ;;  %17560 = vmatpush3.bf16.msra.mxu1 %v10470_v11  ;;  %v10440_v12 = vmul.f32 %v19427_v53, %v21769_v20 }
 0x975   : > { %17247 = vmatprep.subr.bf16.mxu1 %v20393_v15 }
 0x976   : > { %v10452_v19 = vpack.c.bf16 %v10441_v27, %v10440_v12 }
 0x977   : > { %17220 = vmatmul.mubr.msk.bf16.vlgmr.msra.gmra.mrb[28].mxu0 %vm10379_vm15, %v10450_v40  ;;  %17224 = vmatmul.mubr.msk.bf16.vlgmr.msra.gmra.mrb[0].mxu1 %vm10379_vm15, %v10451_v33 }
 0x978   : > { %17227 = vmatprep.mubr.msk.bf16.mxu1 %vm20395_vm14, %v20393_v15  ;;  %17248 = vmatpush3.bf16.msra.mxu1 %v19386_v37 }
 0x979   : > { %17249 = vmatprep.subr.bf16.mxu1 %v20393_v15 }
 0x97a   : > { %v19429_v62 = vpop.eup %19428 }
 0x97b   : > { %v10443_v20 = vmul.f32 %v19429_v62, %v21777_v54 }
 0x97f   : > { %17228 = vmatmul.mubr.msk.bf16.gmra.mrb[4].mxu1 %vm10379_vm15, %v10452_v19 }
 0x980   : > { %17231 = vmatprep.mubr.msk.bf16.mxu1 %vm20395_vm14, %v20393_v15 }
 0x99a   : > { %v10400_v9 = vpop.xlane.xlu1 %10399 }
 0x99b   : > { %19430 = vrcp.f32 %v10400_v9  ;;  %v10588_v9 = vld [vmem:[#allocation3] sm:$0xff] }
 0x99e   : > { %v10406_v49 = vpop.xlane.xlu1 %10405 }
 0x99f   : > { %19432 = vrcp.f32 %v10406_v49 }
 0x9a2   : > { %v10409_v42 = vpop.xlane.xlu1 %10408 }
 0x9a3   : > { %19434 = vrcp.f32 %v10409_v42  ;;  %v10589_v42 = vld [vmem:[#allocation3 + $0x8] sm:$0xff] }
 0x9a5   : > { %v19431_v4 = vpop.eup %19430 }
 0x9a6   : > { %v10412_v48 = vpop.xlane.xlu1 %10411  ;;  %v10442_v32 = vmul.f32 %v19431_v4, %v21795_v16 }
 0x9a7   : > { %19436 = vrcp.f32 %v10412_v48 }
 0x9a8   : > { %v10453_v43 = vpack.c.bf16 %v10443_v20, %v10442_v32 }
 0x9a9   : > { %v19433_v23 = vpop.eup %19432 }
 0x9aa   : > { %v10415_v28 = vpop.xlane.xlu1 %10414  ;;  %17232 = vmatmul.mubr.msk.bf16.gmra.mrb[8].mxu1 %vm10379_vm15, %v10453_v43  ;;  %v10444_v14 = vmul.f32 %v19433_v23, %v21799_v60  ;;  %v10590_v43 = vld [vmem:[#allocation3 + $0x10] sm:$0xff] }
 0x9ab   : > { %19438 = vrcp.f32 %v10415_v28  ;;  %17235 = vmatprep.mubr.msk.bf16.mxu1 %vm20395_vm14, %v20393_v15 }
 0x9ad   : > { %v19435_v6 = vpop.eup %19434 }
 0x9ae   : > { %v10418_v31 = vpop.xlane.xlu1 %10417  ;;  %v10445_v10 = vmul.f32 %v19435_v6, %v21807_v55  ;;  %v19387_v55 = vld [vmem:[%s21828_s7 + $0x8] sm:$0xff]  }
 0x9af   : > { %19440 = vrcp.f32 %v10418_v31  ;;  %17250 = vmatpush3.bf16.msra.mxu1 %v19387_v55 }
 0x9b0   : > { %v10454_v47 = vpack.c.bf16 %v10445_v10, %v10444_v14 }
 0x9b1   : > { %v19437_v54 = vpop.eup %19436 }
 0x9b2   : > { %v10421_v16 = vpop.xlane.xlu1 %10420  ;;  %17236 = vmatmul.mubr.msk.bf16.gmra.mrb[12].mxu1 %vm10379_vm15, %v10454_v47  ;;  %v10446_v58 = vmul.f32 %v19437_v54, %v21809_v56  ;;  %v10592_v47 = vld [vmem:[#allocation3 + $0x20] sm:$0xff]  ;;  %v10593_v54 = vld [vmem:[#allocation3 + $0x28] sm:$0xff] }
 0x9b3   : > { %19442 = vrcp.f32 %v10421_v16  ;;  %17239 = vmatprep.mubr.msk.bf16.mxu1 %vm20395_vm14, %v20393_v15 }
 0x9b5   : > { %v19439_v50 = vpop.eup %19438 }
 0x9b6   : > { %v10447_v63 = vmul.f32 %v19439_v50, %v21815_v45 }
 0x9b8   : > { %v10455_v3 = vpack.c.bf16 %v10447_v63, %v10446_v58 }
 0x9b9   : > { %v19441_v60 = vpop.eup %19440 }
 0x9ba   : > { %17240 = vmatmul.mubr.msk.bf16.gmra.mrb[16].mxu1 %vm10379_vm15, %v10455_v3  ;;  %v10448_v0 = vmul.f32 %v19441_v60, %v21817_v57 }
 0x9bb   : > { %17243 = vmatprep.mubr.msk.bf16.mxu1 %vm20395_vm14, %v20393_v15 }
 0x9bd   : > { %v19443_v5 = vpop.eup %19442 }
 0x9be   : > { %v10449_v36 = vmul.f32 %v19443_v5, %v21823_v21  ;;  %v10594_v5 = vld [vmem:[#allocation3 + $0x30] sm:$0xff] }
 0x9c0   : > { %v10456_v29 = vpack.c.bf16 %v10449_v36, %v10448_v0  ;;  %v10595_v36 = vld [vmem:[#allocation3 + $0x38] sm:$0xff] }
 0x9c2   : > { %17244 = vmatmul.mubr.msk.bf16.gmra.mrb[20].mxu1 %vm10379_vm15, %v10456_v29  ;;  %vm22333_vm15 = vmmov %vm22332_vm13 }
 0x9c3   : > { %17251 = vmatprep.mubr.msk.bf16.mxu1 %vm20395_vm14, %v20393_v15 }
 0xa4a   : > { %v10533_v56 = vpop.f32.mrb[28].mxu0  ;;  %v10541_v24 = vpop.f32.mrb[0].mxu1 }
 0xa4b   : > { %v17221_v35 = vpop.f32.mrb[29].mxu0  ;;  %v17225_v39 = vpop.f32.mrb[1].mxu1 }
 0xa4c   : > { %v10536_v45 = vpop.f32.mrb[30].mxu0  ;;  %v10544_v1 = vpop.f32.mrb[2].mxu1  ;;  %v10596_v39 = vld [vmem:[#allocation3 + $0x40] sm:$0xff] }
 0xa4d   : > { %v10602_v44 = vpack.c.bf16 %v10536_v45, %v10533_v56  ;;  %v10603_v25 = vpack.c.bf16 %v10544_v1, %v10541_v24  ;;  %v17222_v17 = vpop.f32.mrb[31].mxu0  ;;  %v17226_v57 = vpop.f32.mrb[3].mxu1  ;;  %v10597_v1 = vld [vmem:[#allocation3 + $0x48] sm:$0xff] }
 0xa4f   : > { %17252 = vmatmul.mubr.msk.bf16.vlgmr.msra.gmra.mrb[24].mxu1 %vm22332_vm13, %v10602_v44  ;;  %vm22335_vm13 = vmmov %vm22334_vm0 }
 0xa50   : > { %17255 = vmatprep.mubr.msk.bf16.mxu1 %vm20395_vm14, %v20393_v15 }
 0xa52   : > { %v10549_v21 = vpop.f32.mrb[4].mxu1 }
 0xa53   : > { %v17229_v38 = vpop.f32.mrb[5].mxu1 }
 0xa54   : > { %v10552_v46 = vpop.f32.mrb[6].mxu1  ;;  %v10598_v38 = vld [vmem:[#allocation3 + $0x50] sm:$0xff] }
 0xa55   : > { %v10604_v18 = vpack.c.bf16 %v10552_v46, %v10549_v21  ;;  %v17230_v26 = vpop.f32.mrb[7].mxu1 }
 0xa57   : > { %17256 = vmatmul.mubr.msk.bf16.gmra.mrb[28].mxu1 %vm22333_vm15, %v10603_v25  ;;  %vm22336_vm15 = vmmov %vm22334_vm0 }
 0xa58   : > { %17259 = vmatprep.mubr.msk.bf16.mxu1 %vm20395_vm14, %v20393_v15 }
 0xa5f   : > { %17260 = vmatmul.mubr.msk.bf16.gmra.mrb[32].mxu1 %vm22334_vm0, %v10604_v18  ;;  %v10599_v18 = vld [vmem:[#allocation3 + $0x58] sm:$0xff] }
 0xa60   : > { %17263 = vmatprep.mubr.msk.bf16.mxu1 %vm20395_vm14, %v20393_v15 }
 0xa7d   : > { %v10557_v52 = vpop.f32.mrb[8].mxu1 }
 0xa7e   : > { %v17233_v8 = vpop.f32.mrb[9].mxu1 }
 0xa7f   : > { %v10560_v2 = vpop.f32.mrb[10].mxu1 }
 0xa80   : > { %v10605_v34 = vpack.c.bf16 %v10560_v2, %v10557_v52  ;;  %v17234_v30 = vpop.f32.mrb[11].mxu1 }
 0xa81   : > { %v10600_v30 = vld [vmem:[#allocation3 + $0x60] sm:$0xff] }
 0xa82   : > { %17264 = vmatmul.mubr.msk.bf16.gmra.mrb[36].mxu1 %vm22335_vm13, %v10605_v34  ;;  %vm22337_vm13 = vmmov %vm22334_vm0 }
 0xa83   : > { %17267 = vmatprep.mubr.msk.bf16.mxu1 %vm20395_vm14, %v20393_v15 }
 0xa85   : > { %v10565_v13 = vpop.f32.mrb[12].mxu1 }
 0xa86   : > { %v17237_v61 = vpop.f32.mrb[13].mxu1 }
 0xa87   : > { %v10568_v22 = vpop.f32.mrb[14].mxu1  ;;  %v10601_v61 = vld [vmem:[#allocation3 + $0x68] sm:$0xff] }
 0xa88   : > { %v10606_v51 = vpack.c.bf16 %v10568_v22, %v10565_v13  ;;  %v17238_v7 = vpop.f32.mrb[15].mxu1 }
 0xa8a   : > { %17268 = vmatmul.mubr.msk.bf16.gmra.mrb[40].mxu1 %vm22336_vm15, %v10606_v51 }
 0xa8b   : > { %17271 = vmatprep.mubr.msk.bf16.mxu1 %vm20395_vm14, %v20393_v15 }
 0xa8d   : > { %v10573_v11 = vpop.f32.mrb[16].mxu1 }
 0xa8e   : > { %v17241_v59 = vpop.f32.mrb[17].mxu1 }
 0xa8f   : > { %v10576_v37 = vpop.f32.mrb[18].mxu1 }
 0xa90   : > { %v10607_v40 = vpack.c.bf16 %v10576_v37, %v10573_v11  ;;  %v17242_v33 = vpop.f32.mrb[19].mxu1  ;;  %v19444_v37 = vld [vmem:[#allocation18 + $0x4] ss:$28 sps:$4 sm:$0xff] (%p10170_p12)  }
 0xa91   :  { %v20397_v33 = vmov (%p10170_p12), 0   ;;  %11122 = vmatprep.subr.bf16.mxu0 (%p10170_p12), %v19444_v37  ;;  %v19527_v37 = vld [vmem:[#allocation18 + $0x1c8] ss:$28 sps:$4 sm:$0xff] (%p10170_p12)  }
 0xa92   : > { %17272 = vmatmul.mubr.msk.bf16.gmra.mrb[44].mxu1 %vm22334_vm0, %v10607_v40  ;;  %v19446_v40 = vld [vmem:[#allocation18 + $0xc] ss:$28 sps:$4 sm:$0xff] (%p10170_p12)   ;;  %11154 = vmatprep.mubr.bf16.mxu0 (%p10170_p12), %v20397_v33 }
 0xa93   : > { %17275 = vmatprep.mubr.msk.bf16.mxu1 %vm20395_vm14, %v20393_v15  ;;  %v10591_v15 = vld [vmem:[#allocation3 + $0x18] sm:$0xff]  ;;  %11165 = vmatprep.subr.bf16.mxu1 (%p10170_p12), %v19446_v40  ;;  %v19532_v40 = vld [vmem:[#allocation18 + $0x1fc] ss:$28 sps:$4 sm:$0xff] (%p10170_p12)  }
 0xa95   : > { %v10581_v41 = vpop.f32.mrb[20].mxu1 }
 0xa96   : > { %v17245_v53 = vpop.f32.mrb[21].mxu1 }
 0xa97   : > { %v10584_v27 = vpop.f32.mrb[22].mxu1  ;;  %v19449_v53 = vld [vmem:[#allocation18 + $0x8] ss:$28 sps:$4 sm:$0xff] (%p10170_p12)  }
 0xa98   : > { %v10608_v12 = vpack.c.bf16 %v10584_v27, %v10581_v41  ;;  %v17246_v19 = vpop.f32.mrb[23].mxu1  ;;  %v19448_v41 = vld [vmem:[#allocation18] ss:$28 sps:$4 sm:$0xff] (%p10170_p12)   ;;  %11166 = vmatpush1.bf16.msra.mxu1 (%p10170_p12), %v19449_v53  ;;  %v19530_v53 = vld [vmem:[#allocation18 + $0x1f8] ss:$28 sps:$4 sm:$0xff] (%p10170_p12)  }
 0xa99   :  { %v19450_v27 = vld [vmem:[#allocation18 + $0x3c] ss:$28 sps:$4 sm:$0xff] (%p10170_p12)   ;;  %11123 = vmatpush1.bf16.msra.mxu0 (%p10170_p12), %v19448_v41  ;;  %v19535_v41 = vld [vmem:[#allocation18 + $0x204] ss:$28 sps:$4 sm:$0xff] (%p10170_p12)  }
 0xa9a   : > { %17276 = vmatmul.mubr.msk.bf16.gmra.mrb[48].mxu1 %vm22337_vm13, %v10608_v12  ;;  %v19452_v12 = vld [vmem:[#allocation18 + $0x44] ss:$28 sps:$4 sm:$0xff] (%p10170_p12)   ;;  %v19454_v19 = vld [vmem:[#allocation18 + $0x38] ss:$28 sps:$4 sm:$0xff] (%p10170_p12)   ;;  %11124 = vmatprep.subr.bf16.mxu0 (%p10170_p12), %v19450_v27 }
 0xa9b   :  { %11197 = vmatprep.mubr.bf16.mxu1 (%p10170_p12), %v20397_v33  ;;  %11167 = vmatprep.subr.bf16.mxu1 (%p10170_p12), %v19452_v12  ;;  %v19533_v27 = vld [vmem:[#allocation18 + $0x200] ss:$28 sps:$4 sm:$0xff] (%p10170_p12)   ;;  %v19538_v12 = vld [vmem:[#allocation18 + $0x234] ss:$28 sps:$4 sm:$0xff] (%p10170_p12)  }
 0xa9d   :  { %11125 = vmatpush1.bf16.msra.mxu0 (%p10170_p12), %v19454_v19  ;;  %v19541_v19 = vld [vmem:[#allocation18 + $0x23c] ss:$28 sps:$4 sm:$0xff] (%p10170_p12)  }
 0xb22   : > { %v10683_v49 = vpop.f32.mrb[24].mxu1 }
 0xb23   : > { %v10738_v62 = vadd.f32 %v10683_v49, %v10588_v9  ;;  %v17253_v4 = vpop.f32.mrb[25].mxu1  ;;  %v19455_v9 = vld [vmem:[#allocation18 + $0x40] ss:$28 sps:$4 sm:$0xff] (%p10170_p12)   ;;  %v19456_v49 = vld [vmem:[#allocation18 + $0x74] ss:$28 sps:$4 sm:$0xff] (%p10170_p12)  }
 0xb24   : > { %v10686_v48 = vpop.f32.mrb[26].mxu1  ;;  %v19461_v4 = vld [vmem:[#allocation18 + $0x78] ss:$28 sps:$4 sm:$0xff] (%p10170_p12)   ;;  %11168 = vmatpush1.bf16.msra.mxu1 (%p10170_p12), %v19455_v9  ;;  %11126 = vmatprep.subr.bf16.mxu0 (%p10170_p12), %v19456_v49  ;;  %v19536_v9 = vld [vmem:[#allocation18 + $0x230] ss:$28 sps:$4 sm:$0xff] (%p10170_p12)  }
 0xb25   : > { %10752 = vst [vmem:[#allocation3] sm:$0xff] %v10738_v62  ;;  %v10739_v32 = vadd.f32 %v10686_v48, %v10589_v42  ;;  %v17254_v20 = vpop.f32.mrb[27].mxu1  ;;  %v19458_v42 = vld [vmem:[#allocation18 + $0x7c] ss:$28 sps:$4 sm:$0xff] (%p10170_p12)   ;;  %v19460_v62 = vld [vmem:[#allocation18 + $0x70] ss:$28 sps:$4 sm:$0xff] (%p10170_p12)  }
 0xb26   :  { %v19462_v48 = vld [vmem:[#allocation18 + $0xac] ss:$28 sps:$4 sm:$0xff] (%p10170_p12)   ;;  %11169 = vmatprep.subr.bf16.mxu1 (%p10170_p12), %v19458_v42  ;;  %11127 = vmatpush1.bf16.msra.mxu0 (%p10170_p12), %v19460_v62  ;;  %v19539_v49 = vld [vmem:[#allocation18 + $0x238] ss:$28 sps:$4 sm:$0xff] (%p10170_p12)  }
 0xb27   : > { %10753 = vst [vmem:[#allocation3 + $0x8] sm:$0xff] %v10739_v32  ;;  %v19464_v32 = vld [vmem:[#allocation18 + $0xb4] ss:$28 sps:$4 sm:$0xff] (%p10170_p12)   ;;  %v19466_v20 = vld [vmem:[#allocation18 + $0xa8] ss:$28 sps:$4 sm:$0xff] (%p10170_p12)   ;;  %11128 = vmatprep.subr.bf16.mxu0 (%p10170_p12), %v19462_v48 }
 0xb28   :  { %11170 = vmatpush1.bf16.msra.mxu1 (%p10170_p12), %v19461_v4  ;;  %v19544_v42 = vld [vmem:[#allocation18 + $0x26c] ss:$28 sps:$4 sm:$0xff] (%p10170_p12)   ;;  %v19547_v62 = vld [vmem:[#allocation18 + $0x274] ss:$28 sps:$4 sm:$0xff] (%p10170_p12)  }
 0xb29   :  { %11171 = vmatprep.subr.bf16.mxu1 (%p10170_p12), %v19464_v32  ;;  %v19542_v4 = vld [vmem:[#allocation18 + $0x268] ss:$28 sps:$4 sm:$0xff] (%p10170_p12)   ;;  %v19545_v48 = vld [vmem:[#allocation18 + $0x270] ss:$28 sps:$4 sm:$0xff] (%p10170_p12)  }
 0xb2a   : > { %v10691_v28 = vpop.f32.mrb[28].mxu1  ;;  %11129 = vmatpush1.bf16.msra.mxu0 (%p10170_p12), %v19466_v20  ;;  %v19550_v32 = vld [vmem:[#allocation18 + $0x2a4] ss:$28 sps:$4 sm:$0xff] (%p10170_p12)   ;;  %v19553_v20 = vld [vmem:[#allocation18 + $0x2ac] ss:$28 sps:$4 sm:$0xff] (%p10170_p12)  }
 0xb2b   : > { %v10740_v23 = vadd.f32 %v10691_v28, %v10590_v43  ;;  %v17257_v6 = vpop.f32.mrb[29].mxu1  ;;  %v19467_v43 = vld [vmem:[#allocation18 + $0xb0] ss:$28 sps:$4 sm:$0xff] (%p10170_p12)   ;;  %v19468_v28 = vld [vmem:[#allocation18 + $0xe4] ss:$28 sps:$4 sm:$0xff] (%p10170_p12)  }
 0xb2c   : > { %v10694_v31 = vpop.f32.mrb[30].mxu1  ;;  %v19473_v6 = vld [vmem:[#allocation18 + $0xe8] ss:$28 sps:$4 sm:$0xff] (%p10170_p12)   ;;  %11172 = vmatpush1.bf16.msra.mxu1 (%p10170_p12), %v19467_v43  ;;  %11130 = vmatprep.subr.bf16.mxu0 (%p10170_p12), %v19468_v28  ;;  %v19548_v43 = vld [vmem:[#allocation18 + $0x2a0] ss:$28 sps:$4 sm:$0xff] (%p10170_p12)  }
 0xb2d   : > { %10754 = vst [vmem:[#allocation3 + $0x10] sm:$0xff] %v10740_v23  ;;  %v10741_v14 = vadd.f32 %v10694_v31, %v10591_v15  ;;  %v17258_v10 = vpop.f32.mrb[31].mxu1  ;;  %v19470_v15 = vld [vmem:[#allocation18 + $0xec] ss:$28 sps:$4 sm:$0xff] (%p10170_p12)   ;;  %v19472_v23 = vld [vmem:[#allocation18 + $0xe0] ss:$28 sps:$4 sm:$0xff] (%p10170_p12)  }
 0xb2e   :  { %v19474_v31 = vld [vmem:[#allocation18 + $0x11c] ss:$28 sps:$4 sm:$0xff] (%p10170_p12)   ;;  %11173 = vmatprep.subr.bf16.mxu1 (%p10170_p12), %v19470_v15  ;;  %11131 = vmatpush1.bf16.msra.mxu0 (%p10170_p12), %v19472_v23  ;;  %v19551_v28 = vld [vmem:[#allocation18 + $0x2a8] ss:$28 sps:$4 sm:$0xff] (%p10170_p12)  }
 0xb2f   : > { %10755 = vst [vmem:[#allocation3 + $0x18] sm:$0xff] %v10741_v14  ;;  %v19476_v14 = vld [vmem:[#allocation18 + $0x124] ss:$28 sps:$4 sm:$0xff] (%p10170_p12)   ;;  %v19478_v10 = vld [vmem:[#allocation18 + $0x118] ss:$28 sps:$4 sm:$0xff] (%p10170_p12)   ;;  %11132 = vmatprep.subr.bf16.mxu0 (%p10170_p12), %v19474_v31 }
 0xb30   :  { %11174 = vmatpush1.bf16.msra.mxu1 (%p10170_p12), %v19473_v6  ;;  %v19556_v15 = vld [vmem:[#allocation18 + $0x2dc] ss:$28 sps:$4 sm:$0xff] (%p10170_p12)   ;;  %v19559_v23 = vld [vmem:[#allocation18 + $0x2e4] ss:$28 sps:$4 sm:$0xff] (%p10170_p12)  }
 0xb31   :  { %11175 = vmatprep.subr.bf16.mxu1 (%p10170_p12), %v19476_v14  ;;  %v19554_v6 = vld [vmem:[#allocation18 + $0x2d8] ss:$28 sps:$4 sm:$0xff] (%p10170_p12)   ;;  %v19557_v31 = vld [vmem:[#allocation18 + $0x2e0] ss:$28 sps:$4 sm:$0xff] (%p10170_p12)  }
 0xb32   : > { %v10699_v16 = vpop.f32.mrb[32].mxu1  ;;  %11133 = vmatpush1.bf16.msra.mxu0 (%p10170_p12), %v19478_v10  ;;  %v19562_v14 = vld [vmem:[#allocation18 + $0x314] ss:$28 sps:$4 sm:$0xff] (%p10170_p12)   ;;  %v19565_v10 = vld [vmem:[#allocation18 + $0x31c] ss:$28 sps:$4 sm:$0xff] (%p10170_p12)  }
 0xb33   : > { %v10742_v50 = vadd.f32 %v10699_v16, %v10592_v47  ;;  %v17261_v58 = vpop.f32.mrb[33].mxu1  ;;  %v19479_v47 = vld [vmem:[#allocation18 + $0x120] ss:$28 sps:$4 sm:$0xff] (%p10170_p12)   ;;  %v19480_v16 = vld [vmem:[#allocation18 + $0x154] ss:$28 sps:$4 sm:$0xff] (%p10170_p12)  }
 0xb34   : > { %v10702_v63 = vpop.f32.mrb[34].mxu1  ;;  %11176 = vmatpush1.bf16.msra.mxu1 (%p10170_p12), %v19479_v47  ;;  %v19485_v58 = vld [vmem:[#allocation18 + $0x158] ss:$28 sps:$4 sm:$0xff] (%p10170_p12)   ;;  %11134 = vmatprep.subr.bf16.mxu0 (%p10170_p12), %v19480_v16  ;;  %v19560_v47 = vld [vmem:[#allocation18 + $0x310] ss:$28 sps:$4 sm:$0xff] (%p10170_p12)  }
 0xb35   : > { %10756 = vst [vmem:[#allocation3 + $0x20] sm:$0xff] %v10742_v50  ;;  %v10743_v3 = vadd.f32 %v10702_v63, %v10593_v54  ;;  %v17262_v60 = vpop.f32.mrb[35].mxu1  ;;  %v19482_v54 = vld [vmem:[#allocation18 + $0x15c] ss:$28 sps:$4 sm:$0xff] (%p10170_p12)   ;;  %v19484_v50 = vld [vmem:[#allocation18 + $0x150] ss:$28 sps:$4 sm:$0xff] (%p10170_p12)  }
 0xb36   :  { %11177 = vmatprep.subr.bf16.mxu1 (%p10170_p12), %v19482_v54  ;;  %v19486_v63 = vld [vmem:[#allocation18 + $0x18c] ss:$28 sps:$4 sm:$0xff] (%p10170_p12)   ;;  %11135 = vmatpush1.bf16.msra.mxu0 (%p10170_p12), %v19484_v50  ;;  %v19563_v16 = vld [vmem:[#allocation18 + $0x318] ss:$28 sps:$4 sm:$0xff] (%p10170_p12)  }
 0xb37   : > { %10757 = vst [vmem:[#allocation3 + $0x28] sm:$0xff] %v10743_v3  ;;  %v19488_v3 = vld [vmem:[#allocation18 + $0x194] ss:$28 sps:$4 sm:$0xff] (%p10170_p12)   ;;  %v19490_v60 = vld [vmem:[#allocation18 + $0x188] ss:$28 sps:$4 sm:$0xff] (%p10170_p12)   ;;  %11136 = vmatprep.subr.bf16.mxu0 (%p10170_p12), %v19486_v63 }
 0xb38   :  { %11178 = vmatpush1.bf16.msra.mxu1 (%p10170_p12), %v19485_v58  ;;  %v19568_v54 = vld [vmem:[#allocation18 + $0x34c] ss:$28 sps:$4 sm:$0xff] (%p10170_p12)   ;;  %v19571_v50 = vld [vmem:[#allocation18 + $0x354] ss:$28 sps:$4 sm:$0xff] (%p10170_p12)  }
 0xb39   :  { %11179 = vmatprep.subr.bf16.mxu1 (%p10170_p12), %v19488_v3  ;;  %v19566_v58 = vld [vmem:[#allocation18 + $0x348] ss:$28 sps:$4 sm:$0xff] (%p10170_p12)   ;;  %v19569_v63 = vld [vmem:[#allocation18 + $0x350] ss:$28 sps:$4 sm:$0xff] (%p10170_p12)  }
 0xb3a   :  { %11137 = vmatpush1.bf16.msra.mxu0 (%p10170_p12), %v19490_v60  ;;  %v11342_v3 = vld [vmem:[#allocation3 + $0x10] sm:$0xff] (%p10170_p12)  ;;  %v11343_v60 = vld [vmem:[#allocation3 + $0x18] sm:$0xff] (%p10170_p12) }
 0xb55   : > { %v10707_v0 = vpop.f32.mrb[36].mxu1 }
 0xb56   : > { %v10744_v29 = vadd.f32 %v10707_v0, %v10594_v5  ;;  %v17265_v55 = vpop.f32.mrb[37].mxu1  ;;  %v19491_v5 = vld [vmem:[#allocation18 + $0x190] ss:$28 sps:$4 sm:$0xff] (%p10170_p12)  }
 0xb57   : > { %v10710_v56 = vpop.f32.mrb[38].mxu1  ;;  %v10767_v0 = vld [vmem:[#allocation3] sm:$0xff] (%p10170_p12)  ;;  %11180 = vmatpush1.bf16.msra.mxu1 (%p10170_p12), %v19491_v5 }
 0xb58   : > { %10758 = vst [vmem:[#allocation3 + $0x30] sm:$0xff] %v10744_v29  ;;  %v10745_v24 = vadd.f32 %v10710_v56, %v10595_v36  ;;  %v17266_v35 = vpop.f32.mrb[39].mxu1  ;;  %v10768_v36 = vld [vmem:[#allocation3 + $0x8] sm:$0xff] (%p10170_p12)  ;;  %v19494_v29 = vld [vmem:[#allocation18 + $0x14] ss:$28 sps:$4 sm:$0xff] (%p10170_p12)  }
 0xb59   :  { %v21893_v55 = vpack.c.bf16 (%p10170_p12), %v10768_v36, %v10767_v0  ;;  %v19492_v56 = vld [vmem:[#allocation18 + $0x10] ss:$28 sps:$4 sm:$0xff] (%p10170_p12)   ;;  %11208 = vmatprep.subr.bf16.mxu0 (%p10170_p12), %v19494_v29  ;;  %v20398_v35 = vmov (%p10170_p12), 0.0   ;;  %v21912_v36 = vpack.c.bf16 (%p10170_p12), %v11343_v60, %v11342_v3  ;;  %v19575_v29 = vld [vmem:[#allocation18 + $0x1d8] ss:$28 sps:$4 sm:$0xff] (%p10170_p12)  }
 0xb5a   : > { %10759 = vst [vmem:[#allocation3 + $0x38] sm:$0xff] %v10745_v24  ;;  %v19495_v24 = vld [vmem:[#allocation18 + $0x18] ss:$28 sps:$4 sm:$0xff] (%p10170_p12)   ;;  %17279 = vmatprep.subr.bf16.mxu1 (%p10170_p12), %v20398_v35  ;;  %v19572_v0 = vld [vmem:[#allocation18 + $0x1d0] ss:$28 sps:$4 sm:$0xff] (%p10170_p12)  }
 0xb5b   :  { %11155 = vmatmul.mubr.bf16.vlgmr.msra.gmra.mrb[0].mxu0 (%p10170_p12), %v21893_v55  ;;  %11198 = vmatmul.mubr.bf16.vlgmr.msra.gmra.mrb[0].mxu1 (%p10170_p12), %v21893_v55  ;;  %v19574_v5 = vld [vmem:[#allocation18 + $0x1d4] ss:$28 sps:$4 sm:$0xff] (%p10170_p12)  }
 0xb5c   :  { %11209 = vmatpush1.bf16.msra.mxu0 (%p10170_p12), %v19492_v56  ;;  %17280 = vmatpush3.bf16.msra.mxu1 (%p10170_p12), %v19495_v24  ;;  %v19576_v56 = vld [vmem:[#allocation18 + $0x208] ss:$28 sps:$4 sm:$0xff] (%p10170_p12)   ;;  %v19579_v24 = vld [vmem:[#allocation18 + $0x210] ss:$28 sps:$4 sm:$0xff] (%p10170_p12)  }
 0xb5d   : > { %v10715_v45 = vpop.f32.mrb[40].mxu1  ;;  %17281 = vmatprep.subr.bf16.mxu1 (%p10170_p12), %v20398_v35  ;;  %11240 = vmatprep.mubr.bf16.mxu0 (%p10170_p12), %v20397_v33  ;;  %v19652_v3 = vld [vmem:[#allocation18 + $0x390] ss:$28 sps:$4 sm:$0xff] (%p10170_p12)  }
 0xb5e   : > { %v10746_v44 = vadd.f32 %v10715_v45, %v10596_v39  ;;  %v17269_v25 = vpop.f32.mrb[41].mxu1  ;;  %v19498_v39 = vld [vmem:[#allocation18 + $0x4c] ss:$28 sps:$4 sm:$0xff] (%p10170_p12)   ;;  %17295 = vmatprep.mubr.msk.bf16.mxu1 (%p10170_p12), %vm20399_vm1, %v20398_v35 }
 0xb5f   : > { %v10718_v17 = vpop.f32.mrb[42].mxu1  ;;  %v19496_v45 = vld [vmem:[#allocation18 + $0x48] ss:$28 sps:$4 sm:$0xff] (%p10170_p12)   ;;  %11210 = vmatprep.subr.bf16.mxu0 (%p10170_p12), %v19498_v39  ;;  %v19500_v25 = vld [vmem:[#allocation18 + $0x80] ss:$28 sps:$4 sm:$0xff] (%p10170_p12)  }
 0xb60   : > { %10760 = vst [vmem:[#allocation3 + $0x40] sm:$0xff] %v10746_v44  ;;  %v10747_v57 = vadd.f32 %v10718_v17, %v10597_v1  ;;  %v17270_v21 = vpop.f32.mrb[43].mxu1  ;;  %v19499_v1 = vld [vmem:[#allocation18 + $0x50] ss:$28 sps:$4 sm:$0xff] (%p10170_p12)   ;;  %v19502_v44 = vld [vmem:[#allocation18 + $0x84] ss:$28 sps:$4 sm:$0xff] (%p10170_p12)   ;;  %11211 = vmatpush1.bf16.msra.mxu0 (%p10170_p12), %v19496_v45 }
 0xb61   :  { %17282 = vmatpush3.bf16.msra.mxu1 (%p10170_p12), %v19499_v1  ;;  %v19503_v17 = vld [vmem:[#allocation18 + $0x88] ss:$28 sps:$4 sm:$0xff] (%p10170_p12)   ;;  %11212 = vmatprep.subr.bf16.mxu0 (%p10170_p12), %v19502_v44  ;;  %v19504_v21 = vld [vmem:[#allocation18 + $0xb8] ss:$28 sps:$4 sm:$0xff] (%p10170_p12)   ;;  %v19580_v45 = vld [vmem:[#allocation18 + $0x240] ss:$28 sps:$4 sm:$0xff] (%p10170_p12)  }
 0xb62   : > { %10761 = vst [vmem:[#allocation3 + $0x48] sm:$0xff] %v10747_v57  ;;  %17283 = vmatprep.subr.bf16.mxu1 (%p10170_p12), %v20398_v35  ;;  %v19506_v57 = vld [vmem:[#allocation18 + $0xbc] ss:$28 sps:$4 sm:$0xff] (%p10170_p12)   ;;  %v19582_v39 = vld [vmem:[#allocation18 + $0x244] ss:$28 sps:$4 sm:$0xff] (%p10170_p12)  }
 0xb63   :  { %v19583_v1 = vld [vmem:[#allocation18 + $0x248] ss:$28 sps:$4 sm:$0xff] (%p10170_p12)   ;;  %v19586_v44 = vld [vmem:[#allocation18 + $0x27c] ss:$28 sps:$4 sm:$0xff] (%p10170_p12)  }
 0xb64   :  { %11213 = vmatpush1.bf16.msra.mxu0 (%p10170_p12), %v19500_v25  ;;  %v19584_v25 = vld [vmem:[#allocation18 + $0x278] ss:$28 sps:$4 sm:$0xff] (%p10170_p12)  }
 0xb65   : > { %v10723_v46 = vpop.f32.mrb[44].mxu1  ;;  %17284 = vmatpush3.bf16.msra.mxu1 (%p10170_p12), %v19503_v17  ;;  %11214 = vmatprep.subr.bf16.mxu0 (%p10170_p12), %v19506_v57  ;;  %v19587_v17 = vld [vmem:[#allocation18 + $0x280] ss:$28 sps:$4 sm:$0xff] (%p10170_p12)   ;;  %v19590_v57 = vld [vmem:[#allocation18 + $0x2b4] ss:$28 sps:$4 sm:$0xff] (%p10170_p12)  }
 0xb66   : > { %v10748_v26 = vadd.f32 %v10723_v46, %v10598_v38  ;;  %v17273_v52 = vpop.f32.mrb[45].mxu1  ;;  %v19507_v38 = vld [vmem:[#allocation18 + $0xc0] ss:$28 sps:$4 sm:$0xff] (%p10170_p12)   ;;  %17285 = vmatprep.subr.bf16.mxu1 (%p10170_p12), %v20398_v35  ;;  %v19510_v46 = vld [vmem:[#allocation18 + $0xf4] ss:$28 sps:$4 sm:$0xff] (%p10170_p12)  }
 0xb67   : > { %v10726_v8 = vpop.f32.mrb[46].mxu1  ;;  %v19514_v52 = vld [vmem:[#allocation18 + $0x12c] ss:$28 sps:$4 sm:$0xff] (%p10170_p12)  }
 0xb68   : > { %10762 = vst [vmem:[#allocation3 + $0x50] sm:$0xff] %v10748_v26  ;;  %v10749_v2 = vadd.f32 %v10726_v8, %v10599_v18  ;;  %v17274_v34 = vpop.f32.mrb[47].mxu1  ;;  %11215 = vmatpush1.bf16.msra.mxu0 (%p10170_p12), %v19504_v21  ;;  %v19508_v18 = vld [vmem:[#allocation18 + $0xf0] ss:$28 sps:$4 sm:$0xff] (%p10170_p12)   ;;  %v19511_v26 = vld [vmem:[#allocation18 + $0xf8] ss:$28 sps:$4 sm:$0xff] (%p10170_p12)  }
 0xb69   :  { %17286 = vmatpush3.bf16.msra.mxu1 (%p10170_p12), %v19507_v38  ;;  %11216 = vmatprep.subr.bf16.mxu0 (%p10170_p12), %v19510_v46  ;;  %v19512_v8 = vld [vmem:[#allocation18 + $0x128] ss:$28 sps:$4 sm:$0xff] (%p10170_p12)   ;;  %v19588_v21 = vld [vmem:[#allocation18 + $0x2b0] ss:$28 sps:$4 sm:$0xff] (%p10170_p12)   ;;  %v19591_v38 = vld [vmem:[#allocation18 + $0x2b8] ss:$28 sps:$4 sm:$0xff] (%p10170_p12)  }
 0xb6a   : > { %10763 = vst [vmem:[#allocation3 + $0x58] sm:$0xff] %v10749_v2  ;;  %17287 = vmatprep.subr.bf16.mxu1 (%p10170_p12), %v20398_v35  ;;  %v19515_v2 = vld [vmem:[#allocation18 + $0x130] ss:$28 sps:$4 sm:$0xff] (%p10170_p12)   ;;  %v19518_v34 = vld [vmem:[#allocation18 + $0x164] ss:$28 sps:$4 sm:$0xff] (%p10170_p12)  }
 0xb6b   :  { %v19594_v46 = vld [vmem:[#allocation18 + $0x2ec] ss:$28 sps:$4 sm:$0xff] (%p10170_p12)  }
 0xb6c   :  { %10172 = sbr.rel (!%p10170_p12) target bundleno = 1843 (0x733), region = 132  ;;  %11217 = vmatpush1.bf16.msra.mxu0 (%p10170_p12), %v19508_v18  ;;  %v19592_v18 = vld [vmem:[#allocation18 + $0x2e8] ss:$28 sps:$4 sm:$0xff] (%p10170_p12)  }
 0xb6d   : > { %v10731_v13 = vpop.f32.mrb[48].mxu1  ;;  %17288 = vmatpush3.bf16.msra.mxu1 (%p10170_p12), %v19511_v26  ;;  %11218 = vmatprep.subr.bf16.mxu0 (%p10170_p12), %v19514_v52  ;;  %v19595_v26 = vld [vmem:[#allocation18 + $0x2f0] ss:$28 sps:$4 sm:$0xff] (%p10170_p12)   ;;  %v19598_v52 = vld [vmem:[#allocation18 + $0x324] ss:$28 sps:$4 sm:$0xff] (%p10170_p12)  }
 0xb6e   : > { %v10750_v22 = vadd.f32 %v10731_v13, %v10600_v30  ;;  %v17277_v51 = vpop.f32.mrb[49].mxu1  ;;  %17289 = vmatprep.subr.bf16.mxu1 (%p10170_p12), %v20398_v35  ;;  %v19516_v30 = vld [vmem:[#allocation18 + $0x160] ss:$28 sps:$4 sm:$0xff] (%p10170_p12)   ;;  %v19519_v13 = vld [vmem:[#allocation18 + $0x168] ss:$28 sps:$4 sm:$0xff] (%p10170_p12)  }
 0xb6f   : > { %v10734_v7 = vpop.f32.mrb[50].mxu1  ;;  %v19523_v51 = vld [vmem:[#allocation18 + $0x1a0] ss:$28 sps:$4 sm:$0xff] (%p10170_p12)  }
 0xb70   : > { %10764 = vst [vmem:[#allocation3 + $0x60] sm:$0xff] %v10750_v22  ;;  %v10751_v11 = vadd.f32 %v10734_v7, %v10601_v61  ;;  %v17278_v59 = vpop.f32.mrb[51].mxu1  ;;  %11219 = vmatpush1.bf16.msra.mxu0 (%p10170_p12), %v19512_v8  ;;  %v19522_v61 = vld [vmem:[#allocation18 + $0x19c] ss:$28 sps:$4 sm:$0xff] (%p10170_p12)   ;;  %v19526_v7 = vld [vmem:[#allocation18 + $0x1c4] ss:$28 sps:$4 sm:$0xff] (%p10170_p12)  }
 0xb71   :  { %17290 = vmatpush3.bf16.msra.mxu1 (%p10170_p12), %v19515_v2  ;;  %11220 = vmatprep.subr.bf16.mxu0 (%p10170_p12), %v19518_v34  ;;  %v19520_v22 = vld [vmem:[#allocation18 + $0x198] ss:$28 sps:$4 sm:$0xff] (%p10170_p12)   ;;  %v19524_v59 = vld [vmem:[#allocation18 + $0x1c0] ss:$28 sps:$4 sm:$0xff] (%p10170_p12)   ;;  %v19599_v2 = vld [vmem:[#allocation18 + $0x328] ss:$28 sps:$4 sm:$0xff] (%p10170_p12)  }
 0xb72   : > { %10765 = vst [vmem:[#allocation3 + $0x68] sm:$0xff] %v10751_v11  ;;  %17291 = vmatprep.subr.bf16.mxu1 (%p10170_p12), %v20398_v35  ;;  %v19529_v11 = vld [vmem:[#allocation18 + $0x1cc] ss:$28 sps:$4 sm:$0xff] (%p10170_p12)   ;;  %v19596_v8 = vld [vmem:[#allocation18 + $0x320] ss:$28 sps:$4 sm:$0xff] (%p10170_p12)  }
 0xb73   :  { %v19602_v34 = vld [vmem:[#allocation18 + $0x35c] ss:$28 sps:$4 sm:$0xff]  }
 0xb74   :  { %11221 = vmatpush1.bf16.msra.mxu0 %v19516_v30  ;;  %v19600_v30 = vld [vmem:[#allocation18 + $0x358] ss:$28 sps:$4 sm:$0xff]  }
 0xb75   :  { %17292 = vmatpush3.bf16.msra.mxu1 %v19519_v13  ;;  %11222 = vmatprep.subr.bf16.mxu0 %v19522_v61  ;;  %v19603_v13 = vld [vmem:[#allocation18 + $0x360] ss:$28 sps:$4 sm:$0xff]  }
 0xb76   :  { %17293 = vmatprep.subr.bf16.mxu1 %v20398_v35  ;;  %v19606_v61 = vld [vmem:[#allocation18 + $0x384] ss:$28 sps:$4 sm:$0xff]  }
 0xb78   :  { %11223 = vmatpush1.bf16.msra.mxu0 %v19520_v22  ;;  %v19609_v22 = vld [vmem:[#allocation18 + $0x38c] ss:$28 sps:$4 sm:$0xff]  }
 0xb79   :  { %17294 = vmatpush3.bf16.msra.mxu1 %v19523_v51  ;;  %11697 = vmatprep.subr.bf16.mxu0 %v19526_v7  ;;  %v19604_v51 = vld [vmem:[#allocation18 + $0x380] ss:$28 sps:$4 sm:$0xff]   ;;  %v19607_v7 = vld [vmem:[#allocation18 + $0x388] ss:$28 sps:$4 sm:$0xff]  }
 0xb7a   :  { %11740 = vmatprep.subr.bf16.mxu1 %v19529_v11  ;;  %v19612_v11 = vld [vmem:[#allocation18 + $0x3bc] ss:$28 sps:$4 sm:$0xff]  }
 0xb7b   :  { %11241 = vmatmul.mubr.bf16.vlgmr.msra.gmra.mrb[4].mxu0 %v21893_v55 }
 0xb7c   :  { %17296 = vmatmul.mubr.bf16.vlgmr.msra.gmra.mrb[4].mxu1 %v21893_v55  ;;  %11698 = vmatpush1.bf16.msra.mxu0 %v19524_v59  ;;  %v19578_v55 = vld [vmem:[#allocation18 + $0x20c] ss:$28 sps:$4 sm:$0xff]   ;;  %v19615_v59 = vld [vmem:[#allocation18 + $0x3c4] ss:$28 sps:$4 sm:$0xff]  }
 0xb7d   :  { %11741 = vmatpush1.bf16.msra.mxu1 %v19527_v37  ;;  %11699 = vmatprep.subr.bf16.mxu0 %v19532_v40  ;;  %v19610_v37 = vld [vmem:[#allocation18 + $0x3b8] ss:$28 sps:$4 sm:$0xff]   ;;  %v19613_v40 = vld [vmem:[#allocation18 + $0x3c0] ss:$28 sps:$4 sm:$0xff]  }
 0xb7e   :  { %11742 = vmatprep.subr.bf16.mxu1 %v19535_v41  ;;  %11729 = vmatprep.mubr.bf16.mxu0 %v20397_v33  ;;  %v19618_v41 = vld [vmem:[#allocation18 + $0x3f4] ss:$28 sps:$4 sm:$0xff]  }
 0xb7f   :  { %11772 = vmatprep.mubr.bf16.mxu1 %v20397_v33 }
 0xb80   :  { %11700 = vmatpush1.bf16.msra.mxu0 %v19530_v53  ;;  %v19621_v53 = vld [vmem:[#allocation18 + $0x3fc] ss:$28 sps:$4 sm:$0xff]  }
 0xb81   :  { %11743 = vmatpush1.bf16.msra.mxu1 %v19533_v27  ;;  %11701 = vmatprep.subr.bf16.mxu0 %v19538_v12  ;;  %v19616_v27 = vld [vmem:[#allocation18 + $0x3f0] ss:$28 sps:$4 sm:$0xff]   ;;  %v19619_v12 = vld [vmem:[#allocation18 + $0x3f8] ss:$28 sps:$4 sm:$0xff]  }
 0xb82   :  { %11744 = vmatprep.subr.bf16.mxu1 %v19541_v19  ;;  %v19624_v19 = vld [vmem:[#allocation18 + $0x42c] ss:$28 sps:$4 sm:$0xff]  }
 0xb84   :  { %11702 = vmatpush1.bf16.msra.mxu0 %v19536_v9  ;;  %v19627_v9 = vld [vmem:[#allocation18 + $0x434] ss:$28 sps:$4 sm:$0xff]  }
 0xb85   :  { %11745 = vmatpush1.bf16.msra.mxu1 %v19539_v49  ;;  %11703 = vmatprep.subr.bf16.mxu0 %v19544_v42  ;;  %v19622_v49 = vld [vmem:[#allocation18 + $0x428] ss:$28 sps:$4 sm:$0xff]   ;;  %v19625_v42 = vld [vmem:[#allocation18 + $0x430] ss:$28 sps:$4 sm:$0xff]  }
 0xb86   :  { %11746 = vmatprep.subr.bf16.mxu1 %v19547_v62  ;;  %v19630_v62 = vld [vmem:[#allocation18 + $0x464] ss:$28 sps:$4 sm:$0xff]  }
 0xb88   :  { %11704 = vmatpush1.bf16.msra.mxu0 %v19542_v4  ;;  %v19633_v4 = vld [vmem:[#allocation18 + $0x46c] ss:$28 sps:$4 sm:$0xff]  }
 0xb89   :  { %11747 = vmatpush1.bf16.msra.mxu1 %v19545_v48  ;;  %11705 = vmatprep.subr.bf16.mxu0 %v19550_v32  ;;  %v19628_v48 = vld [vmem:[#allocation18 + $0x460] ss:$28 sps:$4 sm:$0xff]   ;;  %v19631_v32 = vld [vmem:[#allocation18 + $0x468] ss:$28 sps:$4 sm:$0xff]  }
 0xb8a   :  { %11748 = vmatprep.subr.bf16.mxu1 %v19553_v20  ;;  %v19636_v20 = vld [vmem:[#allocation18 + $0x49c] ss:$28 sps:$4 sm:$0xff]  }
 0xb8c   :  { %11706 = vmatpush1.bf16.msra.mxu0 %v19548_v43  ;;  %v19639_v43 = vld [vmem:[#allocation18 + $0x4a4] ss:$28 sps:$4 sm:$0xff]  }
 0xb8d   :  { %11749 = vmatpush1.bf16.msra.mxu1 %v19551_v28  ;;  %11707 = vmatprep.subr.bf16.mxu0 %v19556_v15  ;;  %v19634_v28 = vld [vmem:[#allocation18 + $0x498] ss:$28 sps:$4 sm:$0xff]   ;;  %v19637_v15 = vld [vmem:[#allocation18 + $0x4a0] ss:$28 sps:$4 sm:$0xff]  }
 0xb8e   :  { %11750 = vmatprep.subr.bf16.mxu1 %v19559_v23  ;;  %v19642_v23 = vld [vmem:[#allocation18 + $0x4d4] ss:$28 sps:$4 sm:$0xff]  }
 0xb90   :  { %11708 = vmatpush1.bf16.msra.mxu0 %v19554_v6  ;;  %v19645_v6 = vld [vmem:[#allocation18 + $0x4dc] ss:$28 sps:$4 sm:$0xff]  }
 0xb91   :  { %11751 = vmatpush1.bf16.msra.mxu1 %v19557_v31  ;;  %11709 = vmatprep.subr.bf16.mxu0 %v19562_v14  ;;  %v19640_v31 = vld [vmem:[#allocation18 + $0x4d0] ss:$28 sps:$4 sm:$0xff]   ;;  %v19643_v14 = vld [vmem:[#allocation18 + $0x4d8] ss:$28 sps:$4 sm:$0xff]  }
 0xb92   :  { %11752 = vmatprep.subr.bf16.mxu1 %v19565_v10  ;;  %v19648_v10 = vld [vmem:[#allocation18 + $0x50c] ss:$28 sps:$4 sm:$0xff]  }
 0xb94   :  { %11710 = vmatpush1.bf16.msra.mxu0 %v19560_v47  ;;  %v19651_v47 = vld [vmem:[#allocation18 + $0x514] ss:$28 sps:$4 sm:$0xff]  }
 0xb95   :  { %11753 = vmatpush1.bf16.msra.mxu1 %v19563_v16  ;;  %11711 = vmatprep.subr.bf16.mxu0 %v19568_v54  ;;  %v19646_v16 = vld [vmem:[#allocation18 + $0x508] ss:$28 sps:$4 sm:$0xff]   ;;  %v19649_v54 = vld [vmem:[#allocation18 + $0x510] ss:$28 sps:$4 sm:$0xff]  }
 0xb96   :  { %11754 = vmatprep.subr.bf16.mxu1 %v19571_v50  ;;  %v11881_v50 = vld [vmem:[#allocation3 + $0x20] sm:$0xff] }
 0xb98   :  { %11712 = vmatpush1.bf16.msra.mxu0 %v19566_v58  ;;  %v11882_v58 = vld [vmem:[#allocation3 + $0x28] sm:$0xff] }
 0xb99   :  { %11755 = vmatpush1.bf16.msra.mxu1 %v19569_v63  ;;  %11783 = vmatprep.subr.bf16.mxu0 %v19574_v5  ;;  %v19654_v63 = vld [vmem:[#allocation18 + $0x394] ss:$28 sps:$4 sm:$0xff]   ;;  %v21931_v60 = vpack.c.bf16 %v11882_v58, %v11881_v50 }
 0xb9a   :  { %17299 = vmatprep.subr.bf16.mxu1 %v20398_v35  ;;  %v19655_v5 = vld [vmem:[#allocation18 + $0x398] ss:$28 sps:$4 sm:$0xff]   ;;  %v19732_v58 = vld [vmem:[#allocation18 + $0x550] ss:$28 sps:$4 sm:$0xff]  }
 0xb9b   :  { %11730 = vmatmul.mubr.bf16.vlgmr.msra.gmra.mrb[0].mxu0 %v21912_v36 }
 0xb9c   :  { %11773 = vmatmul.mubr.bf16.vlgmr.msra.gmra.mrb[0].mxu1 %v21912_v36  ;;  %11784 = vmatpush1.bf16.msra.mxu0 %v19572_v0  ;;  %v19658_v0 = vld [vmem:[#allocation18 + $0x3cc] ss:$28 sps:$4 sm:$0xff]  }
 0xb9d   :  { %17300 = vmatpush3.bf16.msra.mxu1 %v19575_v29  ;;  %11785 = vmatprep.subr.bf16.mxu0 %v19578_v55  ;;  %v19659_v29 = vld [vmem:[#allocation18 + $0x3d0] ss:$28 sps:$4 sm:$0xff]   ;;  %v19662_v55 = vld [vmem:[#allocation18 + $0x404] ss:$28 sps:$4 sm:$0xff]  }
 0xb9e   :  { %17301 = vmatprep.subr.bf16.mxu1 %v20398_v35  ;;  %11815 = vmatprep.mubr.bf16.mxu0 %v20397_v33 }
 0xb9f   :  { %17315 = vmatprep.mubr.msk.bf16.mxu1 %vm20399_vm1, %v20398_v35 }
 0xba0   :  { %11786 = vmatpush1.bf16.msra.mxu0 %v19576_v56  ;;  %v19660_v56 = vld [vmem:[#allocation18 + $0x400] ss:$28 sps:$4 sm:$0xff]  }
 0xba1   :  { %17302 = vmatpush3.bf16.msra.mxu1 %v19579_v24  ;;  %11787 = vmatprep.subr.bf16.mxu0 %v19582_v39  ;;  %v19663_v24 = vld [vmem:[#allocation18 + $0x408] ss:$28 sps:$4 sm:$0xff]   ;;  %v19666_v39 = vld [vmem:[#allocation18 + $0x43c] ss:$28 sps:$4 sm:$0xff]  }
 0xba2   :  { %17303 = vmatprep.subr.bf16.mxu1 %v20398_v35 }
 0xba4   :  { %11788 = vmatpush1.bf16.msra.mxu0 %v19580_v45  ;;  %v19664_v45 = vld [vmem:[#allocation18 + $0x438] ss:$28 sps:$4 sm:$0xff]  }
 0xba5   :  { %17304 = vmatpush3.bf16.msra.mxu1 %v19583_v1  ;;  %11789 = vmatprep.subr.bf16.mxu0 %v19586_v44  ;;  %v19667_v1 = vld [vmem:[#allocation18 + $0x440] ss:$28 sps:$4 sm:$0xff]   ;;  %v19670_v44 = vld [vmem:[#allocation18 + $0x474] ss:$28 sps:$4 sm:$0xff]  }
 0xba6   :  { %17305 = vmatprep.subr.bf16.mxu1 %v20398_v35 }
 0xba8   :  { %11790 = vmatpush1.bf16.msra.mxu0 %v19584_v25  ;;  %v19668_v25 = vld [vmem:[#allocation18 + $0x470] ss:$28 sps:$4 sm:$0xff]  }
 0xba9   :  { %17306 = vmatpush3.bf16.msra.mxu1 %v19587_v17  ;;  %11791 = vmatprep.subr.bf16.mxu0 %v19590_v57  ;;  %v19671_v17 = vld [vmem:[#allocation18 + $0x478] ss:$28 sps:$4 sm:$0xff]   ;;  %v19674_v57 = vld [vmem:[#allocation18 + $0x4ac] ss:$28 sps:$4 sm:$0xff]  }
 0xbaa   :  { %17307 = vmatprep.subr.bf16.mxu1 %v20398_v35 }
 0xbac   :  { %11792 = vmatpush1.bf16.msra.mxu0 %v19588_v21  ;;  %v19672_v21 = vld [vmem:[#allocation18 + $0x4a8] ss:$28 sps:$4 sm:$0xff]  }
 0xbad   :  { %17308 = vmatpush3.bf16.msra.mxu1 %v19591_v38  ;;  %11793 = vmatprep.subr.bf16.mxu0 %v19594_v46  ;;  %v19675_v38 = vld [vmem:[#allocation18 + $0x4b0] ss:$28 sps:$4 sm:$0xff]   ;;  %v19678_v46 = vld [vmem:[#allocation18 + $0x4e4] ss:$28 sps:$4 sm:$0xff]  }
 0xbae   :  { %17309 = vmatprep.subr.bf16.mxu1 %v20398_v35 }
 0xbb0   :  { %11794 = vmatpush1.bf16.msra.mxu0 %v19592_v18  ;;  %v19676_v18 = vld [vmem:[#allocation18 + $0x4e0] ss:$28 sps:$4 sm:$0xff]  }
 0xbb1   :  { %17310 = vmatpush3.bf16.msra.mxu1 %v19595_v26  ;;  %11795 = vmatprep.subr.bf16.mxu0 %v19598_v52  ;;  %v19679_v26 = vld [vmem:[#allocation18 + $0x4e8] ss:$28 sps:$4 sm:$0xff]   ;;  %v19682_v52 = vld [vmem:[#allocation18 + $0x51c] ss:$28 sps:$4 sm:$0xff]  }
 0xbb2   :  { %17311 = vmatprep.subr.bf16.mxu1 %v20398_v35 }
 0xbb4   :  { %11796 = vmatpush1.bf16.msra.mxu0 %v19596_v8  ;;  %v19680_v8 = vld [vmem:[#allocation18 + $0x518] ss:$28 sps:$4 sm:$0xff]  }
 0xbb5   :  { %17312 = vmatpush3.bf16.msra.mxu1 %v19599_v2  ;;  %11797 = vmatprep.subr.bf16.mxu0 %v19602_v34  ;;  %v19683_v2 = vld [vmem:[#allocation18 + $0x520] ss:$28 sps:$4 sm:$0xff]  }
 0xbb6   :  { %17313 = vmatprep.subr.bf16.mxu1 %v20398_v35  ;;  %v19686_v34 = vld [vmem:[#allocation18 + $0x544] ss:$28 sps:$4 sm:$0xff]  }
 0xbb8   :  { %11798 = vmatpush1.bf16.msra.mxu0 %v19600_v30  ;;  %v19689_v30 = vld [vmem:[#allocation18 + $0x54c] ss:$28 sps:$4 sm:$0xff]  }
 0xbb9   :  { %17314 = vmatpush3.bf16.msra.mxu1 %v19603_v13  ;;  %12236 = vmatprep.subr.bf16.mxu0 %v19606_v61  ;;  %v19684_v13 = vld [vmem:[#allocation18 + $0x540] ss:$28 sps:$4 sm:$0xff]   ;;  %v19687_v61 = vld [vmem:[#allocation18 + $0x548] ss:$28 sps:$4 sm:$0xff]  }
 0xbba   :  { %12279 = vmatprep.subr.bf16.mxu1 %v19609_v22  ;;  %v19692_v22 = vld [vmem:[#allocation18 + $0x57c] ss:$28 sps:$4 sm:$0xff]  }
 0xbbb   :  { %11816 = vmatmul.mubr.bf16.vlgmr.msra.gmra.mrb[4].mxu0 %v21912_v36 }
 0xbbc   :  { %17316 = vmatmul.mubr.bf16.vlgmr.msra.gmra.mrb[4].mxu1 %v21912_v36  ;;  %12237 = vmatpush1.bf16.msra.mxu0 %v19604_v51  ;;  %v19656_v36 = vld [vmem:[#allocation18 + $0x3c8] ss:$28 sps:$4 sm:$0xff]  }
 0xbbd   :  { %12280 = vmatpush1.bf16.msra.mxu1 %v19607_v7  ;;  %12238 = vmatprep.subr.bf16.mxu0 %v19612_v11  ;;  %v19695_v51 = vld [vmem:[#allocation18 + $0x584] ss:$28 sps:$4 sm:$0xff]   ;;  %v19690_v7 = vld [vmem:[#allocation18 + $0x578] ss:$28 sps:$4 sm:$0xff]  }
 0xbbe   :  { %12281 = vmatprep.subr.bf16.mxu1 %v19615_v59  ;;  %12268 = vmatprep.mubr.bf16.mxu0 %v20397_v33  ;;  %v19693_v11 = vld [vmem:[#allocation18 + $0x580] ss:$28 sps:$4 sm:$0xff]   ;;  %v19698_v59 = vld [vmem:[#allocation18 + $0x5b4] ss:$28 sps:$4 sm:$0xff]  }
 0xbbf   :  { %12311 = vmatprep.mubr.bf16.mxu1 %v20397_v33 }
 0xbc0   :  { %12239 = vmatpush1.bf16.msra.mxu0 %v19610_v37  ;;  %v19701_v37 = vld [vmem:[#allocation18 + $0x5bc] ss:$28 sps:$4 sm:$0xff]  }
 0xbc1   :  { %12282 = vmatpush1.bf16.msra.mxu1 %v19613_v40  ;;  %12240 = vmatprep.subr.bf16.mxu0 %v19618_v41  ;;  %v19696_v40 = vld [vmem:[#allocation18 + $0x5b0] ss:$28 sps:$4 sm:$0xff]   ;;  %v19699_v41 = vld [vmem:[#allocation18 + $0x5b8] ss:$28 sps:$4 sm:$0xff]  }
 0xbc2   :  { %12283 = vmatprep.subr.bf16.mxu1 %v19621_v53  ;;  %v19704_v53 = vld [vmem:[#allocation18 + $0x5ec] ss:$28 sps:$4 sm:$0xff]  }
 0xbc4   :  { %12241 = vmatpush1.bf16.msra.mxu0 %v19616_v27  ;;  %v19707_v27 = vld [vmem:[#allocation18 + $0x5f4] ss:$28 sps:$4 sm:$0xff]  }
 0xbc5   :  { %12284 = vmatpush1.bf16.msra.mxu1 %v19619_v12  ;;  %12242 = vmatprep.subr.bf16.mxu0 %v19624_v19  ;;  %v19702_v12 = vld [vmem:[#allocation18 + $0x5e8] ss:$28 sps:$4 sm:$0xff]   ;;  %v19705_v19 = vld [vmem:[#allocation18 + $0x5f0] ss:$28 sps:$4 sm:$0xff]  }
 0xbc6   :  { %12285 = vmatprep.subr.bf16.mxu1 %v19627_v9  ;;  %v19710_v9 = vld [vmem:[#allocation18 + $0x624] ss:$28 sps:$4 sm:$0xff]  }
 0xbc8   :  { %12243 = vmatpush1.bf16.msra.mxu0 %v19622_v49  ;;  %v19713_v49 = vld [vmem:[#allocation18 + $0x62c] ss:$28 sps:$4 sm:$0xff]  }
 0xbc9   :  { %12286 = vmatpush1.bf16.msra.mxu1 %v19625_v42  ;;  %12244 = vmatprep.subr.bf16.mxu0 %v19630_v62  ;;  %v19708_v42 = vld [vmem:[#allocation18 + $0x620] ss:$28 sps:$4 sm:$0xff]   ;;  %v19711_v62 = vld [vmem:[#allocation18 + $0x628] ss:$28 sps:$4 sm:$0xff]  }
 0xbca   :  { %12287 = vmatprep.subr.bf16.mxu1 %v19633_v4  ;;  %v19716_v4 = vld [vmem:[#allocation18 + $0x65c] ss:$28 sps:$4 sm:$0xff]  }
 0xbcc   :  { %12245 = vmatpush1.bf16.msra.mxu0 %v19628_v48  ;;  %v19719_v48 = vld [vmem:[#allocation18 + $0x664] ss:$28 sps:$4 sm:$0xff]  }
 0xbcd   :  { %12288 = vmatpush1.bf16.msra.mxu1 %v19631_v32  ;;  %12246 = vmatprep.subr.bf16.mxu0 %v19636_v20  ;;  %v19714_v32 = vld [vmem:[#allocation18 + $0x658] ss:$28 sps:$4 sm:$0xff]   ;;  %v19717_v20 = vld [vmem:[#allocation18 + $0x660] ss:$28 sps:$4 sm:$0xff]  }
 0xbce   :  { %12289 = vmatprep.subr.bf16.mxu1 %v19639_v43  ;;  %v19722_v43 = vld [vmem:[#allocation18 + $0x694] ss:$28 sps:$4 sm:$0xff]  }
 0xbd0   :  { %12247 = vmatpush1.bf16.msra.mxu0 %v19634_v28  ;;  %v19725_v28 = vld [vmem:[#allocation18 + $0x69c] ss:$28 sps:$4 sm:$0xff]  }
 0xbd1   :  { %12290 = vmatpush1.bf16.msra.mxu1 %v19637_v15  ;;  %12248 = vmatprep.subr.bf16.mxu0 %v19642_v23  ;;  %v19720_v15 = vld [vmem:[#allocation18 + $0x690] ss:$28 sps:$4 sm:$0xff]   ;;  %v19723_v23 = vld [vmem:[#allocation18 + $0x698] ss:$28 sps:$4 sm:$0xff]  }
 0xbd2   :  { %12291 = vmatprep.subr.bf16.mxu1 %v19645_v6  ;;  %v19728_v6 = vld [vmem:[#allocation18 + $0x6cc] ss:$28 sps:$4 sm:$0xff]  }
 0xbd4   :  { %12249 = vmatpush1.bf16.msra.mxu0 %v19640_v31  ;;  %v19731_v31 = vld [vmem:[#allocation18 + $0x6d4] ss:$28 sps:$4 sm:$0xff]  }
 0xbd5   :  { %12292 = vmatpush1.bf16.msra.mxu1 %v19643_v14  ;;  %12250 = vmatprep.subr.bf16.mxu0 %v19648_v10  ;;  %v19726_v14 = vld [vmem:[#allocation18 + $0x6c8] ss:$28 sps:$4 sm:$0xff]   ;;  %v19729_v10 = vld [vmem:[#allocation18 + $0x6d0] ss:$28 sps:$4 sm:$0xff]  }
 0xbd6   :  { %12293 = vmatprep.subr.bf16.mxu1 %v19651_v47  ;;  %v12420_v47 = vld [vmem:[#allocation3 + $0x30] sm:$0xff] }
 0xbd8   :  { %12251 = vmatpush1.bf16.msra.mxu0 %v19646_v16  ;;  %v12421_v16 = vld [vmem:[#allocation3 + $0x38] sm:$0xff] }
 0xbd9   :  { %12294 = vmatpush1.bf16.msra.mxu1 %v19649_v54  ;;  %12322 = vmatprep.subr.bf16.mxu0 %v19654_v63  ;;  %v19734_v54 = vld [vmem:[#allocation18 + $0x554] ss:$28 sps:$4 sm:$0xff]   ;;  %v21950_v50 = vpack.c.bf16 %v12421_v16, %v12420_v47 }
 0xbda   :  { %17319 = vmatprep.subr.bf16.mxu1 %v20398_v35  ;;  %v19735_v63 = vld [vmem:[#allocation18 + $0x558] ss:$28 sps:$4 sm:$0xff]   ;;  %v19812_v16 = vld [vmem:[#allocation18 + $0x710] ss:$28 sps:$4 sm:$0xff]  }
 0xbdb   :  { %12269 = vmatmul.mubr.bf16.vlgmr.msra.gmra.mrb[0].mxu0 %v21931_v60 }
 0xbdc   :  { %12312 = vmatmul.mubr.bf16.vlgmr.msra.gmra.mrb[0].mxu1 %v21931_v60  ;;  %12323 = vmatpush1.bf16.msra.mxu0 %v19652_v3  ;;  %v19738_v3 = vld [vmem:[#allocation18 + $0x58c] ss:$28 sps:$4 sm:$0xff]  }
 0xbdd   :  { %17320 = vmatpush3.bf16.msra.mxu1 %v19655_v5  ;;  %12324 = vmatprep.subr.bf16.mxu0 %v19658_v0  ;;  %v19739_v5 = vld [vmem:[#allocation18 + $0x590] ss:$28 sps:$4 sm:$0xff]   ;;  %v19742_v0 = vld [vmem:[#allocation18 + $0x5c4] ss:$28 sps:$4 sm:$0xff]  }
 0xbde   :  { %17321 = vmatprep.subr.bf16.mxu1 %v20398_v35  ;;  %12354 = vmatprep.mubr.bf16.mxu0 %v20397_v33 }
 0xbdf   :  { %17335 = vmatprep.mubr.msk.bf16.mxu1 %vm20399_vm1, %v20398_v35 }
 0xbe0   :  { %12325 = vmatpush1.bf16.msra.mxu0 %v19656_v36  ;;  %v19740_v36 = vld [vmem:[#allocation18 + $0x5c0] ss:$28 sps:$4 sm:$0xff]  }
 0xbe1   :  { %17322 = vmatpush3.bf16.msra.mxu1 %v19659_v29  ;;  %12326 = vmatprep.subr.bf16.mxu0 %v19662_v55  ;;  %v19743_v29 = vld [vmem:[#allocation18 + $0x5c8] ss:$28 sps:$4 sm:$0xff]   ;;  %v19746_v55 = vld [vmem:[#allocation18 + $0x5fc] ss:$28 sps:$4 sm:$0xff]  }
 0xbe2   :  { %17323 = vmatprep.subr.bf16.mxu1 %v20398_v35 }
 0xbe4   :  { %12327 = vmatpush1.bf16.msra.mxu0 %v19660_v56  ;;  %v19744_v56 = vld [vmem:[#allocation18 + $0x5f8] ss:$28 sps:$4 sm:$0xff]  }
 0xbe5   :  { %17324 = vmatpush3.bf16.msra.mxu1 %v19663_v24  ;;  %12328 = vmatprep.subr.bf16.mxu0 %v19666_v39  ;;  %v19747_v24 = vld [vmem:[#allocation18 + $0x600] ss:$28 sps:$4 sm:$0xff]   ;;  %v19750_v39 = vld [vmem:[#allocation18 + $0x634] ss:$28 sps:$4 sm:$0xff]  }
 0xbe6   :  { %17325 = vmatprep.subr.bf16.mxu1 %v20398_v35 }
 0xbe8   :  { %12329 = vmatpush1.bf16.msra.mxu0 %v19664_v45  ;;  %v19748_v45 = vld [vmem:[#allocation18 + $0x630] ss:$28 sps:$4 sm:$0xff]  }
 0xbe9   :  { %17326 = vmatpush3.bf16.msra.mxu1 %v19667_v1  ;;  %12330 = vmatprep.subr.bf16.mxu0 %v19670_v44  ;;  %v19751_v1 = vld [vmem:[#allocation18 + $0x638] ss:$28 sps:$4 sm:$0xff]   ;;  %v19754_v44 = vld [vmem:[#allocation18 + $0x66c] ss:$28 sps:$4 sm:$0xff]  }
 0xbea   :  { %17327 = vmatprep.subr.bf16.mxu1 %v20398_v35 }
 0xbec   :  { %12331 = vmatpush1.bf16.msra.mxu0 %v19668_v25  ;;  %v19752_v25 = vld [vmem:[#allocation18 + $0x668] ss:$28 sps:$4 sm:$0xff]  }
 0xbed   :  { %17328 = vmatpush3.bf16.msra.mxu1 %v19671_v17  ;;  %12332 = vmatprep.subr.bf16.mxu0 %v19674_v57  ;;  %v19755_v17 = vld [vmem:[#allocation18 + $0x670] ss:$28 sps:$4 sm:$0xff]   ;;  %v19758_v57 = vld [vmem:[#allocation18 + $0x6a4] ss:$28 sps:$4 sm:$0xff]  }
 0xbee   :  { %17329 = vmatprep.subr.bf16.mxu1 %v20398_v35 }
 0xbf0   :  { %12333 = vmatpush1.bf16.msra.mxu0 %v19672_v21  ;;  %v19756_v21 = vld [vmem:[#allocation18 + $0x6a0] ss:$28 sps:$4 sm:$0xff]  }
 0xbf1   :  { %17330 = vmatpush3.bf16.msra.mxu1 %v19675_v38  ;;  %12334 = vmatprep.subr.bf16.mxu0 %v19678_v46  ;;  %v19759_v38 = vld [vmem:[#allocation18 + $0x6a8] ss:$28 sps:$4 sm:$0xff]   ;;  %v19762_v46 = vld [vmem:[#allocation18 + $0x6dc] ss:$28 sps:$4 sm:$0xff]  }
 0xbf2   :  { %17331 = vmatprep.subr.bf16.mxu1 %v20398_v35 }
 0xbf4   :  { %12335 = vmatpush1.bf16.msra.mxu0 %v19676_v18  ;;  %v19760_v18 = vld [vmem:[#allocation18 + $0x6d8] ss:$28 sps:$4 sm:$0xff]  }
 0xbf5   :  { %17332 = vmatpush3.bf16.msra.mxu1 %v19679_v26  ;;  %12336 = vmatprep.subr.bf16.mxu0 %v19682_v52  ;;  %v19763_v26 = vld [vmem:[#allocation18 + $0x6e0] ss:$28 sps:$4 sm:$0xff]  }
 0xbf6   :  { %17333 = vmatprep.subr.bf16.mxu1 %v20398_v35  ;;  %v19766_v52 = vld [vmem:[#allocation18 + $0x704] ss:$28 sps:$4 sm:$0xff]  }
 0xbf8   :  { %12337 = vmatpush1.bf16.msra.mxu0 %v19680_v8  ;;  %v19769_v8 = vld [vmem:[#allocation18 + $0x70c] ss:$28 sps:$4 sm:$0xff]  }
 0xbf9   :  { %17334 = vmatpush3.bf16.msra.mxu1 %v19683_v2  ;;  %12775 = vmatprep.subr.bf16.mxu0 %v19686_v34  ;;  %v19764_v2 = vld [vmem:[#allocation18 + $0x700] ss:$28 sps:$4 sm:$0xff]   ;;  %v19767_v34 = vld [vmem:[#allocation18 + $0x708] ss:$28 sps:$4 sm:$0xff]  }
 0xbfa   :  { %12818 = vmatprep.subr.bf16.mxu1 %v19689_v30  ;;  %v19772_v30 = vld [vmem:[#allocation18 + $0x73c] ss:$28 sps:$4 sm:$0xff]  }
 0xbfb   :  { %12355 = vmatmul.mubr.bf16.vlgmr.msra.gmra.mrb[4].mxu0 %v21931_v60 }
 0xbfc   :  { %17336 = vmatmul.mubr.bf16.vlgmr.msra.gmra.mrb[4].mxu1 %v21931_v60  ;;  %12776 = vmatpush1.bf16.msra.mxu0 %v19684_v13  ;;  %v19736_v60 = vld [vmem:[#allocation18 + $0x588] ss:$28 sps:$4 sm:$0xff]  }
 0xbfd   :  { %12819 = vmatpush1.bf16.msra.mxu1 %v19687_v61  ;;  %12777 = vmatprep.subr.bf16.mxu0 %v19692_v22  ;;  %v19775_v13 = vld [vmem:[#allocation18 + $0x744] ss:$28 sps:$4 sm:$0xff]   ;;  %v19770_v61 = vld [vmem:[#allocation18 + $0x738] ss:$28 sps:$4 sm:$0xff]  }
 0xbfe   :  { %12820 = vmatprep.subr.bf16.mxu1 %v19695_v51  ;;  %12807 = vmatprep.mubr.bf16.mxu0 %v20397_v33  ;;  %v19773_v22 = vld [vmem:[#allocation18 + $0x740] ss:$28 sps:$4 sm:$0xff]   ;;  %v19778_v51 = vld [vmem:[#allocation18 + $0x774] ss:$28 sps:$4 sm:$0xff]  }
 0xbff   :  { %12850 = vmatprep.mubr.bf16.mxu1 %v20397_v33 }
 0xc00   :  { %12778 = vmatpush1.bf16.msra.mxu0 %v19690_v7  ;;  %v19781_v7 = vld [vmem:[#allocation18 + $0x77c] ss:$28 sps:$4 sm:$0xff]  }
 0xc01   :  { %12821 = vmatpush1.bf16.msra.mxu1 %v19693_v11  ;;  %12779 = vmatprep.subr.bf16.mxu0 %v19698_v59  ;;  %v19776_v11 = vld [vmem:[#allocation18 + $0x770] ss:$28 sps:$4 sm:$0xff]   ;;  %v19779_v59 = vld [vmem:[#allocation18 + $0x778] ss:$28 sps:$4 sm:$0xff]  }
 0xc02   :  { %12822 = vmatprep.subr.bf16.mxu1 %v19701_v37  ;;  %v19784_v37 = vld [vmem:[#allocation18 + $0x7ac] ss:$28 sps:$4 sm:$0xff]  }
 0xc04   :  { %12780 = vmatpush1.bf16.msra.mxu0 %v19696_v40  ;;  %v19787_v40 = vld [vmem:[#allocation18 + $0x7b4] ss:$28 sps:$4 sm:$0xff]  }
 0xc05   :  { %12823 = vmatpush1.bf16.msra.mxu1 %v19699_v41  ;;  %12781 = vmatprep.subr.bf16.mxu0 %v19704_v53  ;;  %v19782_v41 = vld [vmem:[#allocation18 + $0x7a8] ss:$28 sps:$4 sm:$0xff]   ;;  %v19785_v53 = vld [vmem:[#allocation18 + $0x7b0] ss:$28 sps:$4 sm:$0xff]  }
 0xc06   :  { %12824 = vmatprep.subr.bf16.mxu1 %v19707_v27  ;;  %v19790_v27 = vld [vmem:[#allocation18 + $0x7e4] ss:$28 sps:$4 sm:$0xff]  }
 0xc08   :  { %12782 = vmatpush1.bf16.msra.mxu0 %v19702_v12  ;;  %v19793_v12 = vld [vmem:[#allocation18 + $0x7ec] ss:$28 sps:$4 sm:$0xff]  }
 0xc09   :  { %12825 = vmatpush1.bf16.msra.mxu1 %v19705_v19  ;;  %12783 = vmatprep.subr.bf16.mxu0 %v19710_v9  ;;  %v19788_v19 = vld [vmem:[#allocation18 + $0x7e0] ss:$28 sps:$4 sm:$0xff]   ;;  %v19791_v9 = vld [vmem:[#allocation18 + $0x7e8] ss:$28 sps:$4 sm:$0xff]  }
 0xc0a   :  { %12826 = vmatprep.subr.bf16.mxu1 %v19713_v49  ;;  %v19796_v49 = vld [vmem:[#allocation18 + $0x81c] ss:$28 sps:$4 sm:$0xff]  }
 0xc0c   :  { %12784 = vmatpush1.bf16.msra.mxu0 %v19708_v42  ;;  %v19799_v42 = vld [vmem:[#allocation18 + $0x824] ss:$28 sps:$4 sm:$0xff]  }
 0xc0d   :  { %12827 = vmatpush1.bf16.msra.mxu1 %v19711_v62  ;;  %12785 = vmatprep.subr.bf16.mxu0 %v19716_v4  ;;  %v19794_v62 = vld [vmem:[#allocation18 + $0x818] ss:$28 sps:$4 sm:$0xff]   ;;  %v19797_v4 = vld [vmem:[#allocation18 + $0x820] ss:$28 sps:$4 sm:$0xff]  }
 0xc0e   :  { %12828 = vmatprep.subr.bf16.mxu1 %v19719_v48  ;;  %v19802_v48 = vld [vmem:[#allocation18 + $0x854] ss:$28 sps:$4 sm:$0xff]  }
 0xc10   :  { %12786 = vmatpush1.bf16.msra.mxu0 %v19714_v32  ;;  %v19805_v32 = vld [vmem:[#allocation18 + $0x85c] ss:$28 sps:$4 sm:$0xff]  }
 0xc11   :  { %12829 = vmatpush1.bf16.msra.mxu1 %v19717_v20  ;;  %12787 = vmatprep.subr.bf16.mxu0 %v19722_v43  ;;  %v19800_v20 = vld [vmem:[#allocation18 + $0x850] ss:$28 sps:$4 sm:$0xff]   ;;  %v19803_v43 = vld [vmem:[#allocation18 + $0x858] ss:$28 sps:$4 sm:$0xff]  }
 0xc12   :  { %12830 = vmatprep.subr.bf16.mxu1 %v19725_v28  ;;  %v19808_v28 = vld [vmem:[#allocation18 + $0x88c] ss:$28 sps:$4 sm:$0xff]  }
 0xc14   :  { %12788 = vmatpush1.bf16.msra.mxu0 %v19720_v15  ;;  %v19811_v15 = vld [vmem:[#allocation18 + $0x894] ss:$28 sps:$4 sm:$0xff]  }
 0xc15   :  { %12831 = vmatpush1.bf16.msra.mxu1 %v19723_v23  ;;  %12789 = vmatprep.subr.bf16.mxu0 %v19728_v6  ;;  %v19806_v23 = vld [vmem:[#allocation18 + $0x888] ss:$28 sps:$4 sm:$0xff]   ;;  %v19809_v6 = vld [vmem:[#allocation18 + $0x890] ss:$28 sps:$4 sm:$0xff]  }
 0xc16   :  { %12832 = vmatprep.subr.bf16.mxu1 %v19731_v31  ;;  %v12959_v31 = vld [vmem:[#allocation3 + $0x40] sm:$0xff] }
 0xc18   :  { %12790 = vmatpush1.bf16.msra.mxu0 %v19726_v14  ;;  %v12960_v14 = vld [vmem:[#allocation3 + $0x48] sm:$0xff] }
 0xc19   :  { %12833 = vmatpush1.bf16.msra.mxu1 %v19729_v10  ;;  %12861 = vmatprep.subr.bf16.mxu0 %v19734_v54  ;;  %v19814_v10 = vld [vmem:[#allocation18 + $0x714] ss:$28 sps:$4 sm:$0xff]   ;;  %v21969_v47 = vpack.c.bf16 %v12960_v14, %v12959_v31 }
 0xc1a   :  { %17339 = vmatprep.subr.bf16.mxu1 %v20398_v35  ;;  %v19815_v54 = vld [vmem:[#allocation18 + $0x718] ss:$28 sps:$4 sm:$0xff]   ;;  %v19892_v14 = vld [vmem:[#allocation18 + $0x8d0] ss:$28 sps:$4 sm:$0xff]  }
 0xc1b   :  { %12808 = vmatmul.mubr.bf16.vlgmr.msra.gmra.mrb[0].mxu0 %v21950_v50 }
 0xc1c   :  { %12851 = vmatmul.mubr.bf16.vlgmr.msra.gmra.mrb[0].mxu1 %v21950_v50  ;;  %12862 = vmatpush1.bf16.msra.mxu0 %v19732_v58  ;;  %v19816_v58 = vld [vmem:[#allocation18 + $0x748] ss:$28 sps:$4 sm:$0xff]  }
 0xc1d   :  { %17340 = vmatpush3.bf16.msra.mxu1 %v19735_v63  ;;  %12863 = vmatprep.subr.bf16.mxu0 %v19738_v3  ;;  %v19819_v63 = vld [vmem:[#allocation18 + $0x750] ss:$28 sps:$4 sm:$0xff]   ;;  %v19822_v3 = vld [vmem:[#allocation18 + $0x784] ss:$28 sps:$4 sm:$0xff]  }
 0xc1e   :  { %17341 = vmatprep.subr.bf16.mxu1 %v20398_v35  ;;  %12893 = vmatprep.mubr.bf16.mxu0 %v20397_v33 }
 0xc1f   :  { %17355 = vmatprep.mubr.msk.bf16.mxu1 %vm20399_vm1, %v20398_v35 }
 0xc20   :  { %12864 = vmatpush1.bf16.msra.mxu0 %v19736_v60  ;;  %v19820_v60 = vld [vmem:[#allocation18 + $0x780] ss:$28 sps:$4 sm:$0xff]  }
 0xc21   :  { %17342 = vmatpush3.bf16.msra.mxu1 %v19739_v5  ;;  %12865 = vmatprep.subr.bf16.mxu0 %v19742_v0  ;;  %v19823_v5 = vld [vmem:[#allocation18 + $0x788] ss:$28 sps:$4 sm:$0xff]   ;;  %v19826_v0 = vld [vmem:[#allocation18 + $0x7bc] ss:$28 sps:$4 sm:$0xff]  }
 0xc22   :  { %17343 = vmatprep.subr.bf16.mxu1 %v20398_v35 }
 0xc24   :  { %12866 = vmatpush1.bf16.msra.mxu0 %v19740_v36  ;;  %v19824_v36 = vld [vmem:[#allocation18 + $0x7b8] ss:$28 sps:$4 sm:$0xff]  }
 0xc25   :  { %17344 = vmatpush3.bf16.msra.mxu1 %v19743_v29  ;;  %12867 = vmatprep.subr.bf16.mxu0 %v19746_v55  ;;  %v19827_v29 = vld [vmem:[#allocation18 + $0x7c0] ss:$28 sps:$4 sm:$0xff]   ;;  %v19830_v55 = vld [vmem:[#allocation18 + $0x7f4] ss:$28 sps:$4 sm:$0xff]  }
 0xc26   :  { %17345 = vmatprep.subr.bf16.mxu1 %v20398_v35 }
 0xc28   :  { %12868 = vmatpush1.bf16.msra.mxu0 %v19744_v56  ;;  %v19828_v56 = vld [vmem:[#allocation18 + $0x7f0] ss:$28 sps:$4 sm:$0xff]  }
 0xc29   :  { %17346 = vmatpush3.bf16.msra.mxu1 %v19747_v24  ;;  %12869 = vmatprep.subr.bf16.mxu0 %v19750_v39  ;;  %v19831_v24 = vld [vmem:[#allocation18 + $0x7f8] ss:$28 sps:$4 sm:$0xff]   ;;  %v19834_v39 = vld [vmem:[#allocation18 + $0x82c] ss:$28 sps:$4 sm:$0xff]  }
 0xc2a   :  { %17347 = vmatprep.subr.bf16.mxu1 %v20398_v35 }
 0xc2c   :  { %12870 = vmatpush1.bf16.msra.mxu0 %v19748_v45  ;;  %v19832_v45 = vld [vmem:[#allocation18 + $0x828] ss:$28 sps:$4 sm:$0xff]  }
 0xc2d   :  { %17348 = vmatpush3.bf16.msra.mxu1 %v19751_v1  ;;  %12871 = vmatprep.subr.bf16.mxu0 %v19754_v44  ;;  %v19835_v1 = vld [vmem:[#allocation18 + $0x830] ss:$28 sps:$4 sm:$0xff]   ;;  %v19838_v44 = vld [vmem:[#allocation18 + $0x864] ss:$28 sps:$4 sm:$0xff]  }
 0xc2e   :  { %17349 = vmatprep.subr.bf16.mxu1 %v20398_v35 }
 0xc30   :  { %12872 = vmatpush1.bf16.msra.mxu0 %v19752_v25  ;;  %v19836_v25 = vld [vmem:[#allocation18 + $0x860] ss:$28 sps:$4 sm:$0xff]  }
 0xc31   :  { %17350 = vmatpush3.bf16.msra.mxu1 %v19755_v17  ;;  %12873 = vmatprep.subr.bf16.mxu0 %v19758_v57  ;;  %v19839_v17 = vld [vmem:[#allocation18 + $0x868] ss:$28 sps:$4 sm:$0xff]   ;;  %v19842_v57 = vld [vmem:[#allocation18 + $0x89c] ss:$28 sps:$4 sm:$0xff]  }
 0xc32   :  { %17351 = vmatprep.subr.bf16.mxu1 %v20398_v35 }
 0xc34   :  { %12874 = vmatpush1.bf16.msra.mxu0 %v19756_v21  ;;  %v19840_v21 = vld [vmem:[#allocation18 + $0x898] ss:$28 sps:$4 sm:$0xff]  }
 0xc35   :  { %17352 = vmatpush3.bf16.msra.mxu1 %v19759_v38  ;;  %12875 = vmatprep.subr.bf16.mxu0 %v19762_v46  ;;  %v19843_v38 = vld [vmem:[#allocation18 + $0x8a0] ss:$28 sps:$4 sm:$0xff]  }
 0xc36   :  { %17353 = vmatprep.subr.bf16.mxu1 %v20398_v35  ;;  %v19846_v46 = vld [vmem:[#allocation18 + $0x8c4] ss:$28 sps:$4 sm:$0xff]  }
 0xc38   :  { %12876 = vmatpush1.bf16.msra.mxu0 %v19760_v18  ;;  %v19849_v18 = vld [vmem:[#allocation18 + $0x8cc] ss:$28 sps:$4 sm:$0xff]  }
 0xc39   :  { %17354 = vmatpush3.bf16.msra.mxu1 %v19763_v26  ;;  %13314 = vmatprep.subr.bf16.mxu0 %v19766_v52  ;;  %v19844_v26 = vld [vmem:[#allocation18 + $0x8c0] ss:$28 sps:$4 sm:$0xff]   ;;  %v19847_v52 = vld [vmem:[#allocation18 + $0x8c8] ss:$28 sps:$4 sm:$0xff]  }
 0xc3a   :  { %13357 = vmatprep.subr.bf16.mxu1 %v19769_v8  ;;  %v19852_v8 = vld [vmem:[#allocation18 + $0x8fc] ss:$28 sps:$4 sm:$0xff]  }
 0xc3b   :  { %12894 = vmatmul.mubr.bf16.vlgmr.msra.gmra.mrb[4].mxu0 %v21950_v50 }
 0xc3c   :  { %17356 = vmatmul.mubr.bf16.vlgmr.msra.gmra.mrb[4].mxu1 %v21950_v50  ;;  %13315 = vmatpush1.bf16.msra.mxu0 %v19764_v2  ;;  %v19818_v50 = vld [vmem:[#allocation18 + $0x74c] ss:$28 sps:$4 sm:$0xff]   ;;  %v19855_v2 = vld [vmem:[#allocation18 + $0x904] ss:$28 sps:$4 sm:$0xff]  }
 0xc3d   :  { %13358 = vmatpush1.bf16.msra.mxu1 %v19767_v34  ;;  %13316 = vmatprep.subr.bf16.mxu0 %v19772_v30  ;;  %v19850_v34 = vld [vmem:[#allocation18 + $0x8f8] ss:$28 sps:$4 sm:$0xff]   ;;  %v19853_v30 = vld [vmem:[#allocation18 + $0x900] ss:$28 sps:$4 sm:$0xff]  }
 0xc3e   :  { %13359 = vmatprep.subr.bf16.mxu1 %v19775_v13  ;;  %13346 = vmatprep.mubr.bf16.mxu0 %v20397_v33  ;;  %v19858_v13 = vld [vmem:[#allocation18 + $0x934] ss:$28 sps:$4 sm:$0xff]  }
 0xc3f   :  { %13389 = vmatprep.mubr.bf16.mxu1 %v20397_v33 }
 0xc40   :  { %13317 = vmatpush1.bf16.msra.mxu0 %v19770_v61  ;;  %v19861_v61 = vld [vmem:[#allocation18 + $0x93c] ss:$28 sps:$4 sm:$0xff]  }
 0xc41   :  { %13360 = vmatpush1.bf16.msra.mxu1 %v19773_v22  ;;  %13318 = vmatprep.subr.bf16.mxu0 %v19778_v51  ;;  %v19856_v22 = vld [vmem:[#allocation18 + $0x930] ss:$28 sps:$4 sm:$0xff]   ;;  %v19859_v51 = vld [vmem:[#allocation18 + $0x938] ss:$28 sps:$4 sm:$0xff]  }
 0xc42   :  { %13361 = vmatprep.subr.bf16.mxu1 %v19781_v7  ;;  %v19864_v7 = vld [vmem:[#allocation18 + $0x96c] ss:$28 sps:$4 sm:$0xff]  }
 0xc44   :  { %13319 = vmatpush1.bf16.msra.mxu0 %v19776_v11  ;;  %v19867_v11 = vld [vmem:[#allocation18 + $0x974] ss:$28 sps:$4 sm:$0xff]  }
 0xc45   :  { %13362 = vmatpush1.bf16.msra.mxu1 %v19779_v59  ;;  %13320 = vmatprep.subr.bf16.mxu0 %v19784_v37  ;;  %v19862_v59 = vld [vmem:[#allocation18 + $0x968] ss:$28 sps:$4 sm:$0xff]   ;;  %v19865_v37 = vld [vmem:[#allocation18 + $0x970] ss:$28 sps:$4 sm:$0xff]  }
 0xc46   :  { %13363 = vmatprep.subr.bf16.mxu1 %v19787_v40  ;;  %v19870_v40 = vld [vmem:[#allocation18 + $0x9a4] ss:$28 sps:$4 sm:$0xff]  }
 0xc48   :  { %13321 = vmatpush1.bf16.msra.mxu0 %v19782_v41  ;;  %v19873_v41 = vld [vmem:[#allocation18 + $0x9ac] ss:$28 sps:$4 sm:$0xff]  }
 0xc49   :  { %13364 = vmatpush1.bf16.msra.mxu1 %v19785_v53  ;;  %13322 = vmatprep.subr.bf16.mxu0 %v19790_v27  ;;  %v19868_v53 = vld [vmem:[#allocation18 + $0x9a0] ss:$28 sps:$4 sm:$0xff]   ;;  %v19871_v27 = vld [vmem:[#allocation18 + $0x9a8] ss:$28 sps:$4 sm:$0xff]  }
 0xc4a   :  { %13365 = vmatprep.subr.bf16.mxu1 %v19793_v12  ;;  %v19876_v12 = vld [vmem:[#allocation18 + $0x9dc] ss:$28 sps:$4 sm:$0xff]  }
 0xc4c   :  { %13323 = vmatpush1.bf16.msra.mxu0 %v19788_v19  ;;  %v19879_v19 = vld [vmem:[#allocation18 + $0x9e4] ss:$28 sps:$4 sm:$0xff]  }
 0xc4d   :  { %13366 = vmatpush1.bf16.msra.mxu1 %v19791_v9  ;;  %13324 = vmatprep.subr.bf16.mxu0 %v19796_v49  ;;  %v19874_v9 = vld [vmem:[#allocation18 + $0x9d8] ss:$28 sps:$4 sm:$0xff]   ;;  %v19877_v49 = vld [vmem:[#allocation18 + $0x9e0] ss:$28 sps:$4 sm:$0xff]  }
 0xc4e   :  { %13367 = vmatprep.subr.bf16.mxu1 %v19799_v42  ;;  %v19882_v42 = vld [vmem:[#allocation18 + $0xa14] ss:$28 sps:$4 sm:$0xff]  }
 0xc50   :  { %13325 = vmatpush1.bf16.msra.mxu0 %v19794_v62  ;;  %v19885_v62 = vld [vmem:[#allocation18 + $0xa1c] ss:$28 sps:$4 sm:$0xff]  }
 0xc51   :  { %13368 = vmatpush1.bf16.msra.mxu1 %v19797_v4  ;;  %13326 = vmatprep.subr.bf16.mxu0 %v19802_v48  ;;  %v19880_v4 = vld [vmem:[#allocation18 + $0xa10] ss:$28 sps:$4 sm:$0xff]   ;;  %v19883_v48 = vld [vmem:[#allocation18 + $0xa18] ss:$28 sps:$4 sm:$0xff]  }
 0xc52   :  { %13369 = vmatprep.subr.bf16.mxu1 %v19805_v32  ;;  %v19888_v32 = vld [vmem:[#allocation18 + $0xa4c] ss:$28 sps:$4 sm:$0xff]  }
 0xc54   :  { %13327 = vmatpush1.bf16.msra.mxu0 %v19800_v20  ;;  %v19891_v20 = vld [vmem:[#allocation18 + $0xa54] ss:$28 sps:$4 sm:$0xff]  }
 0xc55   :  { %13370 = vmatpush1.bf16.msra.mxu1 %v19803_v43  ;;  %13328 = vmatprep.subr.bf16.mxu0 %v19808_v28  ;;  %v19886_v43 = vld [vmem:[#allocation18 + $0xa48] ss:$28 sps:$4 sm:$0xff]   ;;  %v19889_v28 = vld [vmem:[#allocation18 + $0xa50] ss:$28 sps:$4 sm:$0xff]  }
 0xc56   :  { %13371 = vmatprep.subr.bf16.mxu1 %v19811_v15  ;;  %v13498_v15 = vld [vmem:[#allocation3 + $0x50] sm:$0xff] }
 0xc58   :  { %13329 = vmatpush1.bf16.msra.mxu0 %v19806_v23  ;;  %v13499_v23 = vld [vmem:[#allocation3 + $0x58] sm:$0xff] }
 0xc59   :  { %13372 = vmatpush1.bf16.msra.mxu1 %v19809_v6  ;;  %13400 = vmatprep.subr.bf16.mxu0 %v19814_v10  ;;  %v19894_v6 = vld [vmem:[#allocation18 + $0x8d4] ss:$28 sps:$4 sm:$0xff]   ;;  %v21988_v31 = vpack.c.bf16 %v13499_v23, %v13498_v15 }
 0xc5a   :  { %17359 = vmatprep.subr.bf16.mxu1 %v20398_v35  ;;  %v19895_v10 = vld [vmem:[#allocation18 + $0x8d8] ss:$28 sps:$4 sm:$0xff]   ;;  %v19972_v23 = vld [vmem:[#allocation18 + $0xa90] ss:$28 sps:$4 sm:$0xff]  }
 0xc5b   :  { %13347 = vmatmul.mubr.bf16.vlgmr.msra.gmra.mrb[0].mxu0 %v21969_v47 }
 0xc5c   :  { %13390 = vmatmul.mubr.bf16.vlgmr.msra.gmra.mrb[0].mxu1 %v21969_v47  ;;  %13401 = vmatpush1.bf16.msra.mxu0 %v19812_v16  ;;  %v19896_v16 = vld [vmem:[#allocation18 + $0x908] ss:$28 sps:$4 sm:$0xff]  }
 0xc5d   :  { %17360 = vmatpush3.bf16.msra.mxu1 %v19815_v54  ;;  %13402 = vmatprep.subr.bf16.mxu0 %v19818_v50  ;;  %v19899_v54 = vld [vmem:[#allocation18 + $0x910] ss:$28 sps:$4 sm:$0xff]   ;;  %v19902_v50 = vld [vmem:[#allocation18 + $0x944] ss:$28 sps:$4 sm:$0xff]  }
 0xc5e   :  { %17361 = vmatprep.subr.bf16.mxu1 %v20398_v35  ;;  %13432 = vmatprep.mubr.bf16.mxu0 %v20397_v33 }
 0xc5f   :  { %17375 = vmatprep.mubr.msk.bf16.mxu1 %vm20399_vm1, %v20398_v35 }
 0xc60   :  { %13403 = vmatpush1.bf16.msra.mxu0 %v19816_v58  ;;  %v19900_v58 = vld [vmem:[#allocation18 + $0x940] ss:$28 sps:$4 sm:$0xff]  }
 0xc61   :  { %17362 = vmatpush3.bf16.msra.mxu1 %v19819_v63  ;;  %13404 = vmatprep.subr.bf16.mxu0 %v19822_v3  ;;  %v19903_v63 = vld [vmem:[#allocation18 + $0x948] ss:$28 sps:$4 sm:$0xff]   ;;  %v19906_v3 = vld [vmem:[#allocation18 + $0x97c] ss:$28 sps:$4 sm:$0xff]  }
 0xc62   :  { %17363 = vmatprep.subr.bf16.mxu1 %v20398_v35 }
 0xc64   :  { %13405 = vmatpush1.bf16.msra.mxu0 %v19820_v60  ;;  %v19904_v60 = vld [vmem:[#allocation18 + $0x978] ss:$28 sps:$4 sm:$0xff]  }
 0xc65   :  { %17364 = vmatpush3.bf16.msra.mxu1 %v19823_v5  ;;  %13406 = vmatprep.subr.bf16.mxu0 %v19826_v0  ;;  %v19907_v5 = vld [vmem:[#allocation18 + $0x980] ss:$28 sps:$4 sm:$0xff]   ;;  %v19910_v0 = vld [vmem:[#allocation18 + $0x9b4] ss:$28 sps:$4 sm:$0xff]  }
 0xc66   :  { %17365 = vmatprep.subr.bf16.mxu1 %v20398_v35 }
 0xc68   :  { %13407 = vmatpush1.bf16.msra.mxu0 %v19824_v36  ;;  %v19908_v36 = vld [vmem:[#allocation18 + $0x9b0] ss:$28 sps:$4 sm:$0xff]  }
 0xc69   :  { %17366 = vmatpush3.bf16.msra.mxu1 %v19827_v29  ;;  %13408 = vmatprep.subr.bf16.mxu0 %v19830_v55  ;;  %v19911_v29 = vld [vmem:[#allocation18 + $0x9b8] ss:$28 sps:$4 sm:$0xff]   ;;  %v19914_v55 = vld [vmem:[#allocation18 + $0x9ec] ss:$28 sps:$4 sm:$0xff]  }
 0xc6a   :  { %17367 = vmatprep.subr.bf16.mxu1 %v20398_v35 }
 0xc6c   :  { %13409 = vmatpush1.bf16.msra.mxu0 %v19828_v56  ;;  %v19912_v56 = vld [vmem:[#allocation18 + $0x9e8] ss:$28 sps:$4 sm:$0xff]  }
 0xc6d   :  { %17368 = vmatpush3.bf16.msra.mxu1 %v19831_v24  ;;  %13410 = vmatprep.subr.bf16.mxu0 %v19834_v39  ;;  %v19915_v24 = vld [vmem:[#allocation18 + $0x9f0] ss:$28 sps:$4 sm:$0xff]   ;;  %v19918_v39 = vld [vmem:[#allocation18 + $0xa24] ss:$28 sps:$4 sm:$0xff]  }
 0xc6e   :  { %17369 = vmatprep.subr.bf16.mxu1 %v20398_v35 }
 0xc70   :  { %13411 = vmatpush1.bf16.msra.mxu0 %v19832_v45  ;;  %v19916_v45 = vld [vmem:[#allocation18 + $0xa20] ss:$28 sps:$4 sm:$0xff]  }
 0xc71   :  { %17370 = vmatpush3.bf16.msra.mxu1 %v19835_v1  ;;  %13412 = vmatprep.subr.bf16.mxu0 %v19838_v44  ;;  %v19919_v1 = vld [vmem:[#allocation18 + $0xa28] ss:$28 sps:$4 sm:$0xff]   ;;  %v19922_v44 = vld [vmem:[#allocation18 + $0xa5c] ss:$28 sps:$4 sm:$0xff]  }
 0xc72   :  { %17371 = vmatprep.subr.bf16.mxu1 %v20398_v35 }
 0xc74   :  { %13413 = vmatpush1.bf16.msra.mxu0 %v19836_v25  ;;  %v19920_v25 = vld [vmem:[#allocation18 + $0xa58] ss:$28 sps:$4 sm:$0xff]  }
 0xc75   :  { %17372 = vmatpush3.bf16.msra.mxu1 %v19839_v17  ;;  %13414 = vmatprep.subr.bf16.mxu0 %v19842_v57  ;;  %v19923_v17 = vld [vmem:[#allocation18 + $0xa60] ss:$28 sps:$4 sm:$0xff]  }
 0xc76   :  { %17373 = vmatprep.subr.bf16.mxu1 %v20398_v35  ;;  %v19926_v57 = vld [vmem:[#allocation18 + $0xa84] ss:$28 sps:$4 sm:$0xff]  }
 0xc78   :  { %13415 = vmatpush1.bf16.msra.mxu0 %v19840_v21  ;;  %v19929_v21 = vld [vmem:[#allocation18 + $0xa8c] ss:$28 sps:$4 sm:$0xff]  }
 0xc79   :  { %17374 = vmatpush3.bf16.msra.mxu1 %v19843_v38  ;;  %13853 = vmatprep.subr.bf16.mxu0 %v19846_v46  ;;  %v19924_v38 = vld [vmem:[#allocation18 + $0xa80] ss:$28 sps:$4 sm:$0xff]   ;;  %v19927_v46 = vld [vmem:[#allocation18 + $0xa88] ss:$28 sps:$4 sm:$0xff]  }
 0xc7a   :  { %13896 = vmatprep.subr.bf16.mxu1 %v19849_v18  ;;  %v19932_v18 = vld [vmem:[#allocation18 + $0xabc] ss:$28 sps:$4 sm:$0xff]  }
 0xc7b   :  { %13433 = vmatmul.mubr.bf16.vlgmr.msra.gmra.mrb[4].mxu0 %v21969_v47 }
 0xc7c   :  { %17376 = vmatmul.mubr.bf16.vlgmr.msra.gmra.mrb[4].mxu1 %v21969_v47  ;;  %13854 = vmatpush1.bf16.msra.mxu0 %v19844_v26  ;;  %v19898_v47 = vld [vmem:[#allocation18 + $0x90c] ss:$28 sps:$4 sm:$0xff]   ;;  %v19935_v26 = vld [vmem:[#allocation18 + $0xac4] ss:$28 sps:$4 sm:$0xff]  }
 0xc7d   :  { %13897 = vmatpush1.bf16.msra.mxu1 %v19847_v52  ;;  %13855 = vmatprep.subr.bf16.mxu0 %v19852_v8  ;;  %v19930_v52 = vld [vmem:[#allocation18 + $0xab8] ss:$28 sps:$4 sm:$0xff]   ;;  %v19933_v8 = vld [vmem:[#allocation18 + $0xac0] ss:$28 sps:$4 sm:$0xff]  }
 0xc7e   :  { %13898 = vmatprep.subr.bf16.mxu1 %v19855_v2  ;;  %13885 = vmatprep.mubr.bf16.mxu0 %v20397_v33  ;;  %v19938_v2 = vld [vmem:[#allocation18 + $0xaf4] ss:$28 sps:$4 sm:$0xff]  }
 0xc7f   :  { %13928 = vmatprep.mubr.bf16.mxu1 %v20397_v33 }
 0xc80   :  { %13856 = vmatpush1.bf16.msra.mxu0 %v19850_v34  ;;  %v19941_v34 = vld [vmem:[#allocation18 + $0xafc] ss:$28 sps:$4 sm:$0xff]  }
 0xc81   :  { %13899 = vmatpush1.bf16.msra.mxu1 %v19853_v30  ;;  %13857 = vmatprep.subr.bf16.mxu0 %v19858_v13  ;;  %v19936_v30 = vld [vmem:[#allocation18 + $0xaf0] ss:$28 sps:$4 sm:$0xff]   ;;  %v19939_v13 = vld [vmem:[#allocation18 + $0xaf8] ss:$28 sps:$4 sm:$0xff]  }
 0xc82   :  { %13900 = vmatprep.subr.bf16.mxu1 %v19861_v61  ;;  %v19944_v61 = vld [vmem:[#allocation18 + $0xb2c] ss:$28 sps:$4 sm:$0xff]  }
 0xc84   :  { %13858 = vmatpush1.bf16.msra.mxu0 %v19856_v22  ;;  %v19947_v22 = vld [vmem:[#allocation18 + $0xb34] ss:$28 sps:$4 sm:$0xff]  }
 0xc85   :  { %13901 = vmatpush1.bf16.msra.mxu1 %v19859_v51  ;;  %13859 = vmatprep.subr.bf16.mxu0 %v19864_v7  ;;  %v19942_v51 = vld [vmem:[#allocation18 + $0xb28] ss:$28 sps:$4 sm:$0xff]   ;;  %v19945_v7 = vld [vmem:[#allocation18 + $0xb30] ss:$28 sps:$4 sm:$0xff]  }
 0xc86   :  { %13902 = vmatprep.subr.bf16.mxu1 %v19867_v11  ;;  %v19950_v11 = vld [vmem:[#allocation18 + $0xb64] ss:$28 sps:$4 sm:$0xff]  }
 0xc88   :  { %13860 = vmatpush1.bf16.msra.mxu0 %v19862_v59  ;;  %v19953_v59 = vld [vmem:[#allocation18 + $0xb6c] ss:$28 sps:$4 sm:$0xff]  }
 0xc89   :  { %13903 = vmatpush1.bf16.msra.mxu1 %v19865_v37  ;;  %13861 = vmatprep.subr.bf16.mxu0 %v19870_v40  ;;  %v19948_v37 = vld [vmem:[#allocation18 + $0xb60] ss:$28 sps:$4 sm:$0xff]   ;;  %v19951_v40 = vld [vmem:[#allocation18 + $0xb68] ss:$28 sps:$4 sm:$0xff]  }
 0xc8a   :  { %13904 = vmatprep.subr.bf16.mxu1 %v19873_v41  ;;  %v19956_v41 = vld [vmem:[#allocation18 + $0xb9c] ss:$28 sps:$4 sm:$0xff]  }
 0xc8c   :  { %13862 = vmatpush1.bf16.msra.mxu0 %v19868_v53  ;;  %v19959_v53 = vld [vmem:[#allocation18 + $0xba4] ss:$28 sps:$4 sm:$0xff]  }
 0xc8d   :  { %13905 = vmatpush1.bf16.msra.mxu1 %v19871_v27  ;;  %13863 = vmatprep.subr.bf16.mxu0 %v19876_v12  ;;  %v19954_v27 = vld [vmem:[#allocation18 + $0xb98] ss:$28 sps:$4 sm:$0xff]   ;;  %v19957_v12 = vld [vmem:[#allocation18 + $0xba0] ss:$28 sps:$4 sm:$0xff]  }
 0xc8e   :  { %13906 = vmatprep.subr.bf16.mxu1 %v19879_v19  ;;  %v19962_v19 = vld [vmem:[#allocation18 + $0xbd4] ss:$28 sps:$4 sm:$0xff]  }
 0xc90   :  { %13864 = vmatpush1.bf16.msra.mxu0 %v19874_v9  ;;  %v19965_v9 = vld [vmem:[#allocation18 + $0xbdc] ss:$28 sps:$4 sm:$0xff]  }
 0xc91   :  { %13907 = vmatpush1.bf16.msra.mxu1 %v19877_v49  ;;  %13865 = vmatprep.subr.bf16.mxu0 %v19882_v42  ;;  %v19960_v49 = vld [vmem:[#allocation18 + $0xbd0] ss:$28 sps:$4 sm:$0xff]   ;;  %v19963_v42 = vld [vmem:[#allocation18 + $0xbd8] ss:$28 sps:$4 sm:$0xff]  }
 0xc92   :  { %13908 = vmatprep.subr.bf16.mxu1 %v19885_v62  ;;  %v19968_v62 = vld [vmem:[#allocation18 + $0xc0c] ss:$28 sps:$4 sm:$0xff]  }
 0xc94   :  { %13866 = vmatpush1.bf16.msra.mxu0 %v19880_v4  ;;  %v19971_v4 = vld [vmem:[#allocation18 + $0xc14] ss:$28 sps:$4 sm:$0xff]  }
 0xc95   :  { %13909 = vmatpush1.bf16.msra.mxu1 %v19883_v48  ;;  %13867 = vmatprep.subr.bf16.mxu0 %v19888_v32  ;;  %v19966_v48 = vld [vmem:[#allocation18 + $0xc08] ss:$28 sps:$4 sm:$0xff]   ;;  %v19969_v32 = vld [vmem:[#allocation18 + $0xc10] ss:$28 sps:$4 sm:$0xff]  }
 0xc96   :  { %13910 = vmatprep.subr.bf16.mxu1 %v19891_v20  ;;  %v14037_v20 = vld [vmem:[#allocation3 + $0x60] sm:$0xff] }
 0xc98   :  { %13868 = vmatpush1.bf16.msra.mxu0 %v19886_v43  ;;  %v14038_v43 = vld [vmem:[#allocation3 + $0x68] sm:$0xff] }
 0xc99   :  { %13911 = vmatpush1.bf16.msra.mxu1 %v19889_v28  ;;  %13939 = vmatprep.subr.bf16.mxu0 %v19894_v6  ;;  %v19974_v28 = vld [vmem:[#allocation18 + $0xa94] ss:$28 sps:$4 sm:$0xff]   ;;  %v22007_v15 = vpack.c.bf16 %v14038_v43, %v14037_v20  ;;  %v22339_v20 = vld [vmem:[#allocation49_spill] sm:$0xff] }
 0xc9a   :  { %17379 = vmatprep.subr.bf16.mxu1 %v20398_v35  ;;  %v19975_v6 = vld [vmem:[#allocation18 + $0xa98] ss:$28 sps:$4 sm:$0xff]  }
 0xc9b   :  { %13886 = vmatmul.mubr.bf16.vlgmr.msra.gmra.mrb[0].mxu0 %v21988_v31 }
 0xc9c   :  { %13929 = vmatmul.mubr.bf16.vlgmr.msra.gmra.mrb[0].mxu1 %v21988_v31  ;;  %13940 = vmatpush1.bf16.msra.mxu0 %v19892_v14  ;;  %v19976_v14 = vld [vmem:[#allocation18 + $0xac8] ss:$28 sps:$4 sm:$0xff]  }
 0xc9d   :  { %17380 = vmatpush3.bf16.msra.mxu1 %v19895_v10  ;;  %13941 = vmatprep.subr.bf16.mxu0 %v19898_v47  ;;  %v19979_v10 = vld [vmem:[#allocation18 + $0xad0] ss:$28 sps:$4 sm:$0xff]   ;;  %v19982_v47 = vld [vmem:[#allocation18 + $0xb04] ss:$28 sps:$4 sm:$0xff]  }
 0xc9e   :  { %17381 = vmatprep.subr.bf16.mxu1 %v20398_v35  ;;  %13971 = vmatprep.mubr.bf16.mxu0 %v20397_v33 }
 0xc9f   :  { %17395 = vmatprep.mubr.msk.bf16.mxu1 %vm20399_vm1, %v20398_v35 }
 0xca0   :  { %13942 = vmatpush1.bf16.msra.mxu0 %v19896_v16  ;;  %v19980_v16 = vld [vmem:[#allocation18 + $0xb00] ss:$28 sps:$4 sm:$0xff]  }
 0xca1   :  { %17382 = vmatpush3.bf16.msra.mxu1 %v19899_v54  ;;  %13943 = vmatprep.subr.bf16.mxu0 %v19902_v50  ;;  %v19983_v54 = vld [vmem:[#allocation18 + $0xb08] ss:$28 sps:$4 sm:$0xff]   ;;  %v19986_v50 = vld [vmem:[#allocation18 + $0xb3c] ss:$28 sps:$4 sm:$0xff]  }
 0xca2   :  { %17383 = vmatprep.subr.bf16.mxu1 %v20398_v35 }
 0xca4   :  { %13944 = vmatpush1.bf16.msra.mxu0 %v19900_v58  ;;  %v19984_v58 = vld [vmem:[#allocation18 + $0xb38] ss:$28 sps:$4 sm:$0xff]  }
 0xca5   :  { %17384 = vmatpush3.bf16.msra.mxu1 %v19903_v63  ;;  %13945 = vmatprep.subr.bf16.mxu0 %v19906_v3  ;;  %v19987_v63 = vld [vmem:[#allocation18 + $0xb40] ss:$28 sps:$4 sm:$0xff]   ;;  %v19990_v3 = vld [vmem:[#allocation18 + $0xb74] ss:$28 sps:$4 sm:$0xff]  }
 0xca6   :  { %17385 = vmatprep.subr.bf16.mxu1 %v20398_v35 }
 0xca8   :  { %13946 = vmatpush1.bf16.msra.mxu0 %v19904_v60  ;;  %v19991_v60 = vld [vmem:[#allocation18 + $0xb78] ss:$28 sps:$4 sm:$0xff]  }
 0xca9   :  { %17386 = vmatpush3.bf16.msra.mxu1 %v19907_v5  ;;  %13947 = vmatprep.subr.bf16.mxu0 %v19910_v0  ;;  %v19994_v5 = vld [vmem:[#allocation18 + $0xbac] ss:$28 sps:$4 sm:$0xff]  }
 0xcaa   :  { %17387 = vmatprep.subr.bf16.mxu1 %v20398_v35  ;;  %v19992_v0 = vld [vmem:[#allocation18 + $0xba8] ss:$28 sps:$4 sm:$0xff]  }
 0xcac   :  { %13948 = vmatpush1.bf16.msra.mxu0 %v19908_v36  ;;  %v19995_v36 = vld [vmem:[#allocation18 + $0xbb0] ss:$28 sps:$4 sm:$0xff]  }
 0xcad   :  { %17388 = vmatpush3.bf16.msra.mxu1 %v19911_v29  ;;  %13949 = vmatprep.subr.bf16.mxu0 %v19914_v55  ;;  %v19998_v29 = vld [vmem:[#allocation18 + $0xbe4] ss:$28 sps:$4 sm:$0xff]  }
 0xcae   :  { %17389 = vmatprep.subr.bf16.mxu1 %v20398_v35  ;;  %v19996_v55 = vld [vmem:[#allocation18 + $0xbe0] ss:$28 sps:$4 sm:$0xff]  }
 0xcb0   :  { %13950 = vmatpush1.bf16.msra.mxu0 %v19912_v56  ;;  %v19999_v56 = vld [vmem:[#allocation18 + $0xbe8] ss:$28 sps:$4 sm:$0xff]  }
 0xcb1   :  { %17390 = vmatpush3.bf16.msra.mxu1 %v19915_v24  ;;  %13951 = vmatprep.subr.bf16.mxu0 %v19918_v39  ;;  %v20002_v24 = vld [vmem:[#allocation18 + $0xc1c] ss:$28 sps:$4 sm:$0xff]  }
 0xcb2   :  { %17391 = vmatprep.subr.bf16.mxu1 %v20398_v35  ;;  %v20000_v39 = vld [vmem:[#allocation18 + $0xc18] ss:$28 sps:$4 sm:$0xff]  }
 0xcb4   :  { %13952 = vmatpush1.bf16.msra.mxu0 %v19916_v45  ;;  %v20003_v45 = vld [vmem:[#allocation18 + $0xc20] ss:$28 sps:$4 sm:$0xff]  }
 0xcb5   :  { %17392 = vmatpush3.bf16.msra.mxu1 %v19919_v1  ;;  %13953 = vmatprep.subr.bf16.mxu0 %v19922_v44  ;;  %v20004_v1 = vld [vmem:[#allocation21 + $0xc0] sm:$0xff]  }
 0xcb6   :  { %17393 = vmatprep.subr.bf16.mxu1 %v20398_v35  ;;  %v20005_v44 = vld [vmem:[#allocation21 + $0x40] sm:$0xff]  }
 0xcb8   :  { %13954 = vmatpush1.bf16.msra.mxu0 %v19920_v25  ;;  %v20006_v25 = vld [vmem:[#allocation21 + $0x80] sm:$0xff]  }
 0xcb9   :  { %17394 = vmatpush3.bf16.msra.mxu1 %v19923_v17  ;;  %14392 = vmatprep.subr.bf16.mxu0 %v19926_v57  ;;  %v20007_v17 = vld [vmem:[#allocation21] sm:$0xff]   ;;  %v20008_v57 = vld [vmem:[#allocation21 + $0xc8] sm:$0xff]  }
 0xcba   :  { %14435 = vmatprep.subr.bf16.mxu1 %v19929_v21  ;;  %v20009_v21 = vld [vmem:[#allocation21 + $0x48] sm:$0xff]  }
 0xcbb   :  { %13972 = vmatmul.mubr.bf16.vlgmr.msra.gmra.mrb[4].mxu0 %v21988_v31 }
 0xcbc   :  { %17396 = vmatmul.mubr.bf16.vlgmr.msra.gmra.mrb[4].mxu1 %v21988_v31  ;;  %14393 = vmatpush1.bf16.msra.mxu0 %v19924_v38  ;;  %v19978_v31 = vld [vmem:[#allocation18 + $0xacc] ss:$28 sps:$4 sm:$0xff]   ;;  %v20010_v38 = vld [vmem:[#allocation21 + $0x88] sm:$0xff]  }
 0xcbd   :  { %14436 = vmatpush1.bf16.msra.mxu1 %v19927_v46  ;;  %14394 = vmatprep.subr.bf16.mxu0 %v19932_v18  ;;  %v20011_v46 = vld [vmem:[#allocation21 + $0x8] sm:$0xff]   ;;  %v20012_v18 = vld [vmem:[#allocation21 + $0xd0] sm:$0xff]  }
 0xcbe   :  { %14437 = vmatprep.subr.bf16.mxu1 %v19935_v26  ;;  %14424 = vmatprep.mubr.bf16.mxu0 %v20397_v33  ;;  %v20013_v26 = vld [vmem:[#allocation21 + $0x50] sm:$0xff]  }
 0xcbf   :  { %14467 = vmatprep.mubr.bf16.mxu1 %v20397_v33 }
 0xcc0   :  { %14395 = vmatpush1.bf16.msra.mxu0 %v19930_v52  ;;  %v20014_v52 = vld [vmem:[#allocation21 + $0x90] sm:$0xff]  }
 0xcc1   :  { %14438 = vmatpush1.bf16.msra.mxu1 %v19933_v8  ;;  %14396 = vmatprep.subr.bf16.mxu0 %v19938_v2  ;;  %v20015_v8 = vld [vmem:[#allocation21 + $0x10] sm:$0xff]   ;;  %v20016_v2 = vld [vmem:[#allocation21 + $0xd8] sm:$0xff]  }
 0xcc2   :  { %14439 = vmatprep.subr.bf16.mxu1 %v19941_v34  ;;  %v20017_v34 = vld [vmem:[#allocation21 + $0x58] sm:$0xff]  }
 0xcc4   :  { %14397 = vmatpush1.bf16.msra.mxu0 %v19936_v30  ;;  %v20018_v30 = vld [vmem:[#allocation21 + $0x98] sm:$0xff]  }
 0xcc5   :  { %14440 = vmatpush1.bf16.msra.mxu1 %v19939_v13  ;;  %14398 = vmatprep.subr.bf16.mxu0 %v19944_v61  ;;  %v20019_v13 = vld [vmem:[#allocation21 + $0x18] sm:$0xff]   ;;  %v20020_v61 = vld [vmem:[#allocation21 + $0xe0] sm:$0xff]  }
 0xcc6   :  { %14441 = vmatprep.subr.bf16.mxu1 %v19947_v22  ;;  %v20021_v22 = vld [vmem:[#allocation21 + $0x60] sm:$0xff]  }
 0xcc8   :  { %14399 = vmatpush1.bf16.msra.mxu0 %v19942_v51  ;;  %v20022_v51 = vld [vmem:[#allocation21 + $0xa0] sm:$0xff]  }
 0xcc9   :  { %14442 = vmatpush1.bf16.msra.mxu1 %v19945_v7  ;;  %14400 = vmatprep.subr.bf16.mxu0 %v19950_v11  ;;  %v20023_v7 = vld [vmem:[#allocation21 + $0x20] sm:$0xff]   ;;  %v20024_v11 = vld [vmem:[#allocation21 + $0xe8] sm:$0xff]  }
 0xcca   :  { %14443 = vmatprep.subr.bf16.mxu1 %v19953_v59  ;;  %v20025_v59 = vld [vmem:[#allocation21 + $0x68] sm:$0xff]  }
 0xccc   :  { %14401 = vmatpush1.bf16.msra.mxu0 %v19948_v37  ;;  %v20026_v37 = vld [vmem:[#allocation21 + $0xa8] sm:$0xff]  }
 0xccd   :  { %14444 = vmatpush1.bf16.msra.mxu1 %v19951_v40  ;;  %14402 = vmatprep.subr.bf16.mxu0 %v19956_v41  ;;  %v20027_v40 = vld [vmem:[#allocation21 + $0x28] sm:$0xff]   ;;  %v20028_v41 = vld [vmem:[#allocation21 + $0xf0] sm:$0xff]  }
 0xcce   :  { %14445 = vmatprep.subr.bf16.mxu1 %v19959_v53  ;;  %v20029_v53 = vld [vmem:[#allocation21 + $0x70] sm:$0xff]  }
 0xcd0   :  { %14403 = vmatpush1.bf16.msra.mxu0 %v19954_v27  ;;  %v20030_v27 = vld [vmem:[#allocation21 + $0xb0] sm:$0xff]  }
 0xcd1   :  { %14446 = vmatpush1.bf16.msra.mxu1 %v19957_v12  ;;  %14404 = vmatprep.subr.bf16.mxu0 %v19962_v19  ;;  %v20031_v12 = vld [vmem:[#allocation21 + $0x30] sm:$0xff]   ;;  %v20032_v19 = vld [vmem:[#allocation21 + $0xf8] sm:$0xff]  }
 0xcd2   :  { %14447 = vmatprep.subr.bf16.mxu1 %v19965_v9  ;;  %v20033_v9 = vld [vmem:[#allocation21 + $0x78] sm:$0xff]  }
 0xcd4   :  { %14405 = vmatpush1.bf16.msra.mxu0 %v19960_v49  ;;  %v20034_v49 = vld [vmem:[#allocation21 + $0xb8] sm:$0xff]  }
 0xcd5   :  { %14448 = vmatpush1.bf16.msra.mxu1 %v19963_v42  ;;  %14406 = vmatprep.subr.bf16.mxu0 %v19968_v62  ;;  %v20035_v42 = vld [vmem:[#allocation21 + $0x38] sm:$0xff]   ;;  %v20036_v62 = vld [vmem:[#allocation21 + $0x140] sm:$0xff]  }
 0xcd6   :  { %14449 = vmatprep.subr.bf16.mxu1 %v19971_v4  ;;  %v22025_v4 = vld [vmem:[#allocation19] sm:$0xff] }
 0xcd7   :  { %v11304_v43 = vrot.slane %v22025_v4, %v22339_v20  ;;  %v20059_v20 = vld [vmem:[#allocation21 + $0x138] sm:$0xff]  }
 0xcd8   :  { %14407 = vmatpush1.bf16.msra.mxu0 %v19966_v48  ;;  %v22338_v48 = vld [vmem:[#allocation48_spill] sm:$0xff] }
 0xcd9   :  { %14450 = vmatpush1.bf16.msra.mxu1 %v19969_v32  ;;  %14478 = vmatprep.subr.bf16.mxu0 %v19974_v28  ;;  %v11296_v32 = vrot.slane %v22025_v4, %v22338_v48 }
 0xcda   :  { %17399 = vmatprep.subr.bf16.mxu1 %v20398_v35 }
 0xcdb   :  { %14425 = vmatmul.mubr.bf16.vlgmr.msra.gmra.mrb[0].mxu0 %v22007_v15 }
 0xcdc   :  { %14468 = vmatmul.mubr.bf16.vlgmr.msra.gmra.mrb[0].mxu1 %v22007_v15  ;;  %14479 = vmatpush1.bf16.msra.mxu0 %v19972_v23  ;;  %v22340_v23 = vld [vmem:[#allocation50_spill] sm:$0xff] }
 0xcdd   :  { %17400 = vmatpush3.bf16.msra.mxu1 %v19975_v6  ;;  %14480 = vmatprep.subr.bf16.mxu0 %v19978_v31  ;;  %v11300_v6 = vrot.slane %v22025_v4, %v22340_v23  ;;  %v22341_v31 = vld [vmem:[#allocation51_spill] sm:$0xff] }
 0xcde   :  { %17401 = vmatprep.subr.bf16.mxu1 %v20398_v35  ;;  %14510 = vmatprep.mubr.bf16.mxu0 %v20397_v33  ;;  %v19988_v33 = vld [vmem:[#allocation18 + $0xb70] ss:$28 sps:$4 sm:$0xff]  }
 0xcdf   :  { %17415 = vmatprep.mubr.msk.bf16.mxu1 %vm20399_vm1, %v20398_v35 }
 0xce0   :  { %14481 = vmatpush1.bf16.msra.mxu0 %v19976_v14  ;;  %v11308_v14 = vrot.slane %v22025_v4, %v22341_v31 }
 0xce1   :  { %17402 = vmatpush3.bf16.msra.mxu1 %v19979_v10  ;;  %14482 = vmatprep.subr.bf16.mxu0 %v19982_v47 }
 0xce2   :  { %17403 = vmatprep.subr.bf16.mxu1 %v20398_v35 }
 0xce4   :  { %14483 = vmatpush1.bf16.msra.mxu0 %v19980_v16 }
 0xce5   :  { %17404 = vmatpush3.bf16.msra.mxu1 %v19983_v54  ;;  %14484 = vmatprep.subr.bf16.mxu0 %v19986_v50 }
 0xce6   :  { %17405 = vmatprep.subr.bf16.mxu1 %v20398_v35 }
 0xce8   :  { %14485 = vmatpush1.bf16.msra.mxu0 %v19984_v58 }
 0xce9   :  { %17406 = vmatpush3.bf16.msra.mxu1 %v19987_v63  ;;  %14486 = vmatprep.subr.bf16.mxu0 %v19990_v3 }
 0xcea   :  { %17407 = vmatprep.subr.bf16.mxu1 %v20398_v35 }
 0xcec   :  { %14487 = vmatpush1.bf16.msra.mxu0 %v19988_v33 }
 0xced   :  { %17408 = vmatpush3.bf16.msra.mxu1 %v19991_v60  ;;  %14488 = vmatprep.subr.bf16.mxu0 %v19994_v5 }
 0xcee   :  { %17409 = vmatprep.subr.bf16.mxu1 %v20398_v35 }
 0xcf0   :  { %14489 = vmatpush1.bf16.msra.mxu0 %v19992_v0 }
 0xcf1   :  { %17410 = vmatpush3.bf16.msra.mxu1 %v19995_v36  ;;  %14490 = vmatprep.subr.bf16.mxu0 %v19998_v29 }
 0xcf2   :  { %17411 = vmatprep.subr.bf16.mxu1 %v20398_v35 }
 0xcf4   :  { %14491 = vmatpush1.bf16.msra.mxu0 %v19996_v55 }
 0xcf5   :  { %17412 = vmatpush3.bf16.msra.mxu1 %v19999_v56  ;;  %14492 = vmatprep.subr.bf16.mxu0 %v20002_v24 }
 0xcf6   :  { %17413 = vmatprep.subr.bf16.mxu1 %v20398_v35 }
 0xcf8   :  { %14493 = vmatpush1.bf16.msra.mxu0 %v20000_v39 }
 0xcf9   :  { %17414 = vmatpush3.bf16.msra.mxu1 %v20003_v45  ;;  %17088 = vmatprep.subr.bf16.mxu0 %v20005_v44  ;;  %v20037_v45 = vld [vmem:[#allocation21 + $0x180] sm:$0xff]   ;;  %v20039_v44 = vld [vmem:[#allocation21 + $0x148] sm:$0xff]  }
 0xcfa   :  { %17110 = vmatprep.subr.bf16.mxu1 %v20004_v1  ;;  %v20038_v1 = vld [vmem:[#allocation21 + $0x100] sm:$0xff]  }
 0xcfb   :  { %14511 = vmatmul.mubr.bf16.vlgmr.msra.gmra.mrb[4].mxu0 %v22007_v15 }
 0xcfc   :  { %17416 = vmatmul.mubr.bf16.vlgmr.msra.gmra.mrb[4].mxu1 %v22007_v15  ;;  %17089 = vmatpush3.bf16.msra.mxu0 %v20007_v17  ;;  %v20041_v17 = vld [vmem:[#allocation21 + $0x108] sm:$0xff]  }
 0xcfd   :  { %17111 = vmatpush3.bf16.msra.mxu1 %v20006_v25  ;;  %17090 = vmatprep.subr.bf16.mxu0 %v20009_v21  ;;  %v20040_v25 = vld [vmem:[#allocation21 + $0x188] sm:$0xff]   ;;  %v20043_v21 = vld [vmem:[#allocation21 + $0x190] sm:$0xff]  }
 0xcfe   :  { %17112 = vmatprep.subr.bf16.mxu1 %v20008_v57  ;;  %v20042_v57 = vld [vmem:[#allocation21 + $0x150] sm:$0xff]  }
 0xd00   :  { %17091 = vmatpush3.bf16.msra.mxu0 %v20011_v46  ;;  %v20045_v46 = vld [vmem:[#allocation21 + $0x158] sm:$0xff]  }
 0xd01   :  { %17113 = vmatpush3.bf16.msra.mxu1 %v20010_v38  ;;  %17092 = vmatprep.subr.bf16.mxu0 %v20013_v26  ;;  %v20044_v38 = vld [vmem:[#allocation21 + $0x110] sm:$0xff]   ;;  %v20047_v26 = vld [vmem:[#allocation21 + $0x118] sm:$0xff]  }
 0xd02   :  { %17114 = vmatprep.subr.bf16.mxu1 %v20012_v18  ;;  %v20046_v18 = vld [vmem:[#allocation21 + $0x198] sm:$0xff]  }
 0xd04   :  { %17093 = vmatpush3.bf16.msra.mxu0 %v20015_v8  ;;  %v20049_v8 = vld [vmem:[#allocation21 + $0x1a0] sm:$0xff]  }
 0xd05   :  { %17115 = vmatpush3.bf16.msra.mxu1 %v20014_v52  ;;  %17094 = vmatprep.subr.bf16.mxu0 %v20017_v34  ;;  %v20048_v52 = vld [vmem:[#allocation21 + $0x160] sm:$0xff]   ;;  %v20051_v34 = vld [vmem:[#allocation21 + $0x168] sm:$0xff]  }
 0xd06   :  { %17116 = vmatprep.subr.bf16.mxu1 %v20016_v2  ;;  %v20050_v2 = vld [vmem:[#allocation21 + $0x120] sm:$0xff]  }
 0xd08   :  { %17095 = vmatpush3.bf16.msra.mxu0 %v20019_v13  ;;  %v20053_v13 = vld [vmem:[#allocation21 + $0x128] sm:$0xff]  }
 0xd09   :  { %17117 = vmatpush3.bf16.msra.mxu1 %v20018_v30  ;;  %17096 = vmatprep.subr.bf16.mxu0 %v20021_v22  ;;  %v20052_v30 = vld [vmem:[#allocation21 + $0x1a8] sm:$0xff]  }
 0xd0a   :  { %17118 = vmatprep.subr.bf16.mxu1 %v20020_v61  ;;  %v22342_v61 = vld [vmem:[#allocation33_spill] sm:$0xff] }
 0xd0b   :  { %v11319_v22 = vsub.s32 6, %v22342_v61 }
 0xd0c   :  { %17097 = vmatpush3.bf16.msra.mxu0 %v20023_v7  ;;  %v22343_v7 = vld [vmem:[#allocation52_spill] sm:$0xff] }
 0xd0d   :  { %17119 = vmatpush3.bf16.msra.mxu1 %v20022_v51  ;;  %17098 = vmatprep.subr.bf16.mxu0 %v20025_v59  ;;  %v20054_v51 = vld [vmem:[#allocation21 + $0x170] sm:$0xff]  }
 0xd0e   :  { %17120 = vmatprep.subr.bf16.mxu1 %v20024_v11  ;;  %v11312_v11 = vrot.slane %v22025_v4, %v22343_v7  ;;  %v20055_v59 = vld [vmem:[#allocation21 + $0x1b0] sm:$0xff]  }
 0xd10   :  { %17099 = vmatpush3.bf16.msra.mxu0 %v20027_v40  ;;  %v11320_v40 = vrot.slane %v22025_v4, %v11319_v22 }
 0xd11   :  { %17121 = vmatpush3.bf16.msra.mxu1 %v20026_v37  ;;  %17100 = vmatprep.subr.bf16.mxu0 %v20029_v53  ;;  %v20056_v37 = vld [vmem:[#allocation21 + $0x130] sm:$0xff]  }
 0xd12   :  { %17122 = vmatprep.subr.bf16.mxu1 %v20028_v41  ;;  %v20057_v41 = vld [vmem:[#allocation21 + $0x178] sm:$0xff]  }
 0xd14   :  { %17101 = vmatpush3.bf16.msra.mxu0 %v20031_v12  ;;  %v22344_v12 = vld [vmem:[#allocation53_spill] sm:$0xff] }
 0xd15   :  { %17123 = vmatpush3.bf16.msra.mxu1 %v20030_v27  ;;  %17102 = vmatprep.subr.bf16.mxu0 %v20033_v9 }
 0xd16   :  { %17124 = vmatprep.subr.bf16.mxu1 %v20032_v19  ;;  %v11316_v19 = vrot.slane %v22025_v4, %v22344_v12 }
 0xd18   :  { %17103 = vmatpush3.bf16.msra.mxu0 %v20035_v42 }
 0xd19   :  { %17125 = vmatpush3.bf16.msra.mxu1 %v20034_v49  ;;  %17132 = vmatprep.subr.bf16.mxu0 %v20036_v62 }
 0xd1a   :  { %17419 = vmatprep.subr.bf16.mxu1 %v20398_v35 }
 0xdae   :  { %v14426_v28 = vpop.f32.mrb[0].mxu0 }
 0xdaf   :  { %v14469_v15 = vpop.f32.mrb[0].mxu1  ;;  %v14428_v10 = vpop.f32.mrb[1].mxu0  ;;  %v17561_v50 = vadd.f32 %v14426_v28, %v11296_v32 }
 0xdb0   :  { %v14471_v47 = vpop.f32.mrb[1].mxu1  ;;  %v14430_v16 = vpop.f32.mrb[2].mxu0  ;;  %v17565_v58 = vadd.f32 %v14469_v15, %v11304_v43  ;;  %v17562_v5 = vadd.f32 %v14428_v10, %v11300_v6 }
 0xdb1   :  { %v14473_v54 = vpop.f32.mrb[2].mxu1  ;;  %v17563_v63 = vadd.f32 %v14430_v16, %v11296_v32  ;;  %v14432_v33 = vpop.f32.mrb[3].mxu0  ;;  %v17566_v0 = vadd.f32 %v14471_v47, %v11308_v14  ;;  %v20058_v32 = vld [vmem:[#allocation21 + $0x1b8] sm:$0xff]  }
 0xdb2   :  { %v17567_v3 = vadd.f32 %v14473_v54, %v11304_v43  ;;  %v14475_v60 = vpop.f32.mrb[3].mxu1  ;;  %v17564_v36 = vadd.f32 %v14432_v33, %v11300_v6 }
 0xdb3   :  { %v17568_v29 = vadd.f32 %v14475_v60, %v11308_v14  ;;  %v14576_v55 = vpack.c.bf16 %v17563_v63, %v17561_v50  ;;  %v16929_v50 = vld [vmem:[#allocation22] ss:$0 sm:$0xff] }
 0xdb4   :  { %v14578_v56 = vpack.c.bf16 %v17567_v3, %v17565_v58  ;;  %v14577_v24 = vpack.c.bf16 %v17564_v36, %v17562_v5 }
 0xdb5   :  { %v14579_v39 = vpack.c.bf16 %v17568_v29, %v17566_v0 }
 0xdb6   :  { %15070 = vmatprep.mubr.bf16.mxu0 %v14577_v24 }
 0xdb7   :  { %15111 = vmatprep.mubr.bf16.mxu1 %v14579_v39  ;;  %15071 = vmatmul.mubr.bf16.vlgmr.msra.gmra.mrb[8].mxu0 %v14576_v55 }
 0xdb8   :  { %15112 = vmatmul.mubr.bf16.vlgmr.msra.gmra.mrb[8].mxu1 %v14578_v56  ;;  %17133 = vmatpush3.bf16.msra.mxu0 %v20038_v1 }
 0xdb9   :  { %17420 = vmatpush3.bf16.msra.mxu1 %v20037_v45  ;;  %17134 = vmatprep.subr.bf16.mxu0 %v20039_v44 }
 0xdba   :  { %17421 = vmatprep.subr.bf16.mxu1 %v20398_v35  ;;  %17435 = vmatprep.mubr.msk.bf16.mxu1 %vm20399_vm1, %v20398_v35 }
 0xdbc   :  { %17135 = vmatpush3.bf16.msra.mxu0 %v20041_v17 }
 0xdbd   :  { %17422 = vmatpush3.bf16.msra.mxu1 %v20040_v25  ;;  %17136 = vmatprep.subr.bf16.mxu0 %v20042_v57 }
 0xdbe   :  { %17423 = vmatprep.subr.bf16.mxu1 %v20398_v35 }
 0xdc0   :  { %17137 = vmatpush3.bf16.msra.mxu0 %v20044_v38 }
 0xdc1   :  { %17424 = vmatpush3.bf16.msra.mxu1 %v20043_v21  ;;  %17138 = vmatprep.subr.bf16.mxu0 %v20045_v46 }
 0xdc2   :  { %17425 = vmatprep.subr.bf16.mxu1 %v20398_v35 }
 0xdc4   :  { %17139 = vmatpush3.bf16.msra.mxu0 %v20047_v26 }
 0xdc5   :  { %17426 = vmatpush3.bf16.msra.mxu1 %v20046_v18  ;;  %17140 = vmatprep.subr.bf16.mxu0 %v20048_v52 }
 0xdc6   :  { %17427 = vmatprep.subr.bf16.mxu1 %v20398_v35 }
 0xdc8   :  { %17141 = vmatpush3.bf16.msra.mxu0 %v20050_v2 }
 0xdc9   :  { %17428 = vmatpush3.bf16.msra.mxu1 %v20049_v8  ;;  %17142 = vmatprep.subr.bf16.mxu0 %v20051_v34 }
 0xdca   :  { %17429 = vmatprep.subr.bf16.mxu1 %v20398_v35 }
 0xdcc   :  { %17143 = vmatpush3.bf16.msra.mxu0 %v20053_v13 }
 0xdcd   :  { %17430 = vmatpush3.bf16.msra.mxu1 %v20052_v30  ;;  %17144 = vmatprep.subr.bf16.mxu0 %v20054_v51 }
 0xdce   :  { %17431 = vmatprep.subr.bf16.mxu1 %v20398_v35  ;;  %v14512_v53 = vpop.f32.mrb[4].mxu0 }
 0xdcf   :  { %v14555_v27 = vpop.f32.mrb[4].mxu1  ;;  %v14514_v9 = vpop.f32.mrb[5].mxu0  ;;  %v17569_v42 = vadd.f32 %v14512_v53, %v11312_v11 }
 0xdd0   :  { %v17417_v49 = vpop.f32.mrb[5].mxu1  ;;  %v14516_v62 = vpop.f32.mrb[6].mxu0  ;;  %17145 = vmatpush3.bf16.msra.mxu0 %v20056_v37  ;;  %v17573_v43 = vadd.f32 %v14555_v27, %v11320_v40  ;;  %v17570_v31 = vadd.f32 %v14514_v9, %v11316_v19 }
 0xdd1   :  { %17432 = vmatpush3.bf16.msra.mxu1 %v20055_v59  ;;  %v14558_v48 = vpop.f32.mrb[6].mxu1  ;;  %v17571_v28 = vadd.f32 %v14516_v62, %v11312_v11  ;;  %v14518_v23 = vpop.f32.mrb[7].mxu0  ;;  %17146 = vmatprep.subr.bf16.mxu0 %v20057_v41 }
 0xdd2   :  { %v17574_v15 = vadd.f32 %v14558_v48, %v11320_v40  ;;  %v17418_v6 = vpop.f32.mrb[7].mxu1  ;;  %17433 = vmatprep.subr.bf16.mxu1 %v20398_v35  ;;  %v17572_v14 = vadd.f32 %v14518_v23, %v11316_v19 }
 0xdd3   :  { %v14580_v4 = vpack.c.bf16 %v17571_v28, %v17569_v42 }
 0xdd4   :  { %v14582_v10 = vpack.c.bf16 %v17574_v15, %v17573_v43  ;;  %v14581_v47 = vpack.c.bf16 %v17572_v14, %v17570_v31  ;;  %17147 = vmatpush3.bf16.msra.mxu0 %v20059_v20 }
 0xdd5   :  { %17434 = vmatpush3.bf16.msra.mxu1 %v20058_v32 }
 0xdd6   :  { %15152 = vmatprep.mubr.bf16.mxu0 %v14581_v47 }
 0xdd7   :  { %15153 = vmatmul.mubr.bf16.vlgmr.msra.gmra.mrb[12].mxu0 %v14580_v4 }
 0xdd8   :  { %17436 = vmatmul.mubr.bf16.vlgmr.msra.gmra.mrb[12].mxu1 %v14582_v10 }
 0xe8a   :  { %v17104_v16 = vpop.f32.mrb[8].mxu0 }
 0xe8b   :  { %v17126_v54 = vpop.f32.mrb[8].mxu1  ;;  %v17105_v58 = vpop.f32.mrb[9].mxu0 }
 0xe8c   :  { %v17127_v63 = vpop.f32.mrb[9].mxu1  ;;  %v17106_v3 = vadd.f32 %v17105_v58, %v17104_v16  ;;  %v17107_v60 = vpop.f32.mrb[10].mxu0 }
 0xe8d   :  { %v17128_v33 = vadd.f32 %v17127_v63, %v17126_v54  ;;  %v17129_v35 = vpop.f32.mrb[10].mxu1  ;;  %v17108_v5 = vpop.f32.mrb[11].mxu0 }
 0xe8e   :  { %v17130_v0 = vpop.f32.mrb[11].mxu1  ;;  %v15073_v36 = vadd.f32 %v17106_v3, %v16929_v50  ;;  %v17109_v29 = vadd.f32 %v17108_v5, %v17107_v60 }
 0xe8f   :  { %v17131_v55 = vadd.f32 %v17130_v0, %v17129_v35 }
 0xe90   :  { %v15114_v56 = vadd.f32 %v17128_v33, %v15073_v36  ;;  %v15076_v24 = vadd.f32 %v17109_v29, %v16929_v50 }
 0xe92   :  { %v15117_v39 = vadd.f32 %v17131_v55, %v15076_v24 }
 0xeaa   :  { %v17148_v1 = vpop.f32.mrb[12].mxu0 }
 0xeab   :  { %v15195_v45 = vpop.f32.mrb[12].mxu1  ;;  %v17149_v25 = vpop.f32.mrb[13].mxu0 }
 0xeac   :  { %v17437_v44 = vpop.f32.mrb[13].mxu1  ;;  %v17150_v17 = vadd.f32 %v17149_v25, %v17148_v1  ;;  %v17151_v21 = vpop.f32.mrb[14].mxu0 }
 0xead   :  { %v15198_v57 = vpop.f32.mrb[14].mxu1  ;;  %v17152_v46 = vpop.f32.mrb[15].mxu0 }
 0xeae   :  { %v17438_v38 = vpop.f32.mrb[15].mxu1  ;;  %v15155_v18 = vadd.f32 %v17150_v17, %v15114_v56  ;;  %v17153_v26 = vadd.f32 %v17152_v46, %v17151_v21 }
 0xeb0   :  { %v15196_v52 = vadd.f32 %v15195_v45, %v15155_v18  ;;  %v15158_v8 = vadd.f32 %v17153_v26, %v15117_v39 }
 0xeb2   :  { %15202 = vst [vmem:[#allocation24] sm:$0xff] %v15196_v52  ;;  %v15199_v2 = vadd.f32 %v15198_v57, %v15158_v8 }
 0xeb4   :  { %15203 = vst [vmem:[#allocation24 + $0x8] sm:$0xff] %v15199_v2 }
 0xeb5   :  { %20335 = shalt.err (!%p20332_p3)
}
 0xeb6   :  { %s20336_s29 = scalar_lea.hbm %s22074_s12, 256 }
 0xeb7   :  { %p20337_p4 = scmp.ne.s32.totalorder %s22074_s12, %s20336_s29  ;;  %p20340_p5 = scmp.lt.u32.totalorder %s20336_s29, %s22074_s12 }
 0xeb9   :  { %p20342_p6 = pnand %p20340_p5, %p20337_p4 }
 0xebb   :  { %20345 = shalt.err (!%p20342_p6)
}
 0xebc   :  { %s20401_s19 = smov 128   ;;  %s20402_s9 = smov 8  }
 0xebd   :  { %15215 = dma.vmem_to_hbm [thread:$0]  %s15210_s22, 256, %s22074_s12, [#allocation6], %s20401_s19, %s20401_s19, %s20402_s9  }
 0xebe   :  { %20364 = dma.done.wait [#allocation6], 256  }
 0xebf   :  { %20365 = vsyncadd [#allocation6], 4294967040 }
 0xec0   :  { %15219 = vsyncpa [#allocation5], 1 }
 0xec1   :  { %15220 = vsyncpa [#allocation8], 1 }
 0xec2   :  { %15221 = vsyncpa [#allocation11], 1 }
 0xec3   :  { %15222 = vsyncpa [#allocation14], 1 }
 0xec4   :  { %15223 = vsyncpa [#allocation17], 1 }
 0xec5   :  { %15224 = vsyncpa [#allocation20], 1 }
 0xec6   :  { %15225 = vsyncpa [#allocation23], 1 }
 0xec7   :  { %15226 = vsyncpa [#allocation6], 1 }

</bundles_post_ra>
